<compile_context>
chip_gen: v6e
topology: v6e:2x2x1
jax: 0.10.0
libtpu: 0.0.40
codegen_flags: <defaults>
</compile_context>

<pallas_src>
import functools

import jax
import jax.numpy as jnp
import numpy as np
from jax import lax
from jax.experimental import pallas as pl
from jax.experimental.pallas import tpu as pltpu

NUM_LAYERS = 24   # Network.num_layers
INPLANES = 64     # Network.inplanes
OUT_CH = 3
PAD_L = 8         # left spatial pad in W so interior stores are tile-aligned
PAD_R = 8


# ----------------------------------------------------------------------------
# Fused network kernel
# ----------------------------------------------------------------------------
@functools.lru_cache(maxsize=None)
def _build_fused(N, H, W, C, L, Cout):
    HP = H + 2                 # padded height (untiled leading dim)
    WP = PAD_L + W + PAD_R     # padded width; conv window needs cols [PAD_L-1, PAD_L+W]
    K = 9 * C                  # im2col contraction depth

    def conv3x3(pad_ref, w, b):
        """3x3 'same' conv from a zero-padded scratch via one K=9*C matmul."""
        xp = pad_ref[...]                                          # (HP, WP, C) f32
        cols = []
        for dy in range(3):
            for dx in range(3):
                piece = xp[dy:dy + H, PAD_L - 1 + dx:PAD_L - 1 + dx + W, :]
                cols.append(piece.astype(jnp.bfloat16))            # (H, W, C)
        patch = jnp.concatenate(cols, axis=-1)                     # (H, W, 9C)
        patch = patch.reshape(H * W, K)                            # (H*W, 9C) bf16
        acc = jnp.dot(patch, w, preferred_element_type=jnp.float32)
        return acc + b                                             # (H*W, C) f32

    def store_interior(pad_ref, y3):                               # y3: (H, W, C) f32
        pad_ref[pl.ds(1, H), pl.ds(PAD_L, W), :] = y3

    def load_interior(pad_ref):
        return pad_ref[pl.ds(1, H), pl.ds(PAD_L, W), :].reshape(H * W, C)

    def kernel(x_ref, winc_ref, binc_ref, w1_ref, b1_ref, w2_ref, b2_ref,
               wout_ref, bout_ref, o_ref, xpad, hpad, ident):
        # Zero the padded scratches once per image; borders stay zero afterwards.
        xpad[...] = jnp.zeros_like(xpad)
        hpad[...] = jnp.zeros_like(hpad)

        # inc: Conv2d(3->64, 3x3, pad=1) + ReLU (input channels pre-padded to C).
        store_interior(xpad, x_ref[0].astype(jnp.float32))
        y = jnp.maximum(conv3x3(xpad, winc_ref[...], binc_ref[...]), 0.0)
        ident[...] = y
        store_interior(xpad, y.reshape(H, W, C))

        # 24 BasicBlocks: x = relu(conv2(relu(conv1(x))) + x), weights in VMEM.
        def body(i, carry):
            h = jnp.maximum(conv3x3(xpad, w1_ref[i], b1_ref[i]), 0.0)
            store_interior(hpad, h.reshape(H, W, C))
            res = load_interior(xpad)                              # residual (f32)
            y2 = jnp.maximum(conv3x3(hpad, w2_ref[i], b2_ref[i]) + res, 0.0)
            store_interior(xpad, y2.reshape(H, W, C))
            return carry

        lax.fori_loop(0, L, body, 0)

        # x = x + identity ; outc: Conv2d(64 -> 3, 1x1)
        xf = load_interior(xpad) + ident[...]
        out = jnp.dot(xf.astype(jnp.bfloat16), wout_ref[...],
                      preferred_element_type=jnp.float32) + bout_ref[...]
        o_ref[...] = out.reshape(1, H, W, Cout).astype(o_ref.dtype)

    in_specs = [
        pl.BlockSpec((1, H, W, C), lambda n: (n, 0, 0, 0)),        # x (Cin padded to C)
        pl.BlockSpec((K, C), lambda n: (0, 0)),                    # w_inc  (bf16)
        pl.BlockSpec((1, C), lambda n: (0, 0)),                    # b_inc  (f32)
        pl.BlockSpec((L, K, C), lambda n: (0, 0, 0)),              # w1 stack (bf16)
        pl.BlockSpec((L, 1, C), lambda n: (0, 0, 0)),              # b1 stack (f32)
        pl.BlockSpec((L, K, C), lambda n: (0, 0, 0)),              # w2 stack (bf16)
        pl.BlockSpec((L, 1, C), lambda n: (0, 0, 0)),              # b2 stack (f32)
        pl.BlockSpec((C, Cout), lambda n: (0, 0)),                 # w_out  (bf16)
        pl.BlockSpec((1, Cout), lambda n: (0, 0)),                 # b_out  (f32)
    ]
    return pl.pallas_call(
        kernel,
        out_shape=jax.ShapeDtypeStruct((N, H, W, Cout), jnp.float32),
        grid=(N,),
        in_specs=in_specs,
        out_specs=pl.BlockSpec((1, H, W, Cout), lambda n: (n, 0, 0, 0)),
        scratch_shapes=[
            pltpu.VMEM((HP, WP, C), jnp.float32),   # padded x
            pltpu.VMEM((HP, WP, C), jnp.float32),   # padded h
            pltpu.VMEM((H * W, C), jnp.float32),    # identity (skip over all blocks)
        ],
        compiler_params=pltpu.CompilerParams(
            dimension_semantics=("parallel",),
            vmem_limit_bytes=32 * 1024 * 1024,
        ),
    )


# ----------------------------------------------------------------------------
# Parameter init (matches the PyTorch module's init) and forward
# ----------------------------------------------------------------------------
def init_params(key):
    """normal(0, sqrt(2/(Cout*kh*kw)) * num_layers**-0.5), bias = 0."""
    def conv_init(k, kh, kw, cin, cout):
        std = np.sqrt(2.0 / (cout * kh * kw)) * NUM_LAYERS ** (-0.5)
        w = jax.random.normal(k, (kh, kw, cin, cout), jnp.float32) * std
        b = jnp.zeros((cout,), jnp.float32)
        return w, b

    keys = jax.random.split(key, 2 * NUM_LAYERS + 2)
    inc_w, inc_b = conv_init(keys[0], 3, 3, 3, INPLANES)
    layers = []
    for i in range(NUM_LAYERS):
        w1, b1 = conv_init(keys[1 + 2 * i], 3, 3, INPLANES, INPLANES)
        w2, b2 = conv_init(keys[2 + 2 * i], 3, 3, INPLANES, INPLANES)
        layers.append((w1, b1, w2, b2))
    out_w, out_b = conv_init(keys[-1], 1, 1, INPLANES, OUT_CH)
    return {"inc": (inc_w, inc_b), "layers": layers,
            "outc": (out_w.reshape(INPLANES, OUT_CH), out_b)}


def _prep_inputs(x_nchw, params):
    """NCHW->NHWC, pad Cin to 64, stack/reshape weights to (L, 9C, C) bf16."""
    N, Cin, H, W = x_nchw.shape
    C = INPLANES
    x = jnp.transpose(x_nchw, (0, 2, 3, 1)).astype(jnp.float32)
    x = jnp.pad(x, ((0, 0), (0, 0), (0, 0), (0, C - Cin)))

    winc, binc = params["inc"]
    winc = jnp.pad(winc, ((0, 0), (0, 0), (0, C - Cin), (0, 0)))       # (3,3,C,C)
    winc = winc.reshape(9 * C, C).astype(jnp.bfloat16)

    w1 = jnp.stack([l[0] for l in params["layers"]])
    w1 = w1.reshape(NUM_LAYERS, 9 * C, C).astype(jnp.bfloat16)
    b1 = jnp.stack([l[1] for l in params["layers"]]).reshape(NUM_LAYERS, 1, C)
    w2 = jnp.stack([l[2] for l in params["layers"]])
    w2 = w2.reshape(NUM_LAYERS, 9 * C, C).astype(jnp.bfloat16)
    b2 = jnp.stack([l[3] for l in params["layers"]]).reshape(NUM_LAYERS, 1, C)

    wout = params["outc"][0].astype(jnp.bfloat16)                      # (C, 3)
    bout = params["outc"][1].reshape(1, OUT_CH)
    return x, winc, binc.reshape(1, C), w1, b1, w2, b2, wout, bout


@jax.jit
def forward_pallas(x_nchw, params):
    N, _, H, W = x_nchw.shape
    args = _prep_inputs(x_nchw, params)
    fn = _build_fused(N, H, W, INPLANES, NUM_LAYERS, OUT_CH)
    out_nhwc = fn(*args)
    return jnp.transpose(out_nhwc, (0, 3, 1, 2))                       # NHWC -> NCHW


# ----------------------------------------------------------------------------
# Pure-JAX reference mirroring the kernel's precision policy
# (bf16 conv operands, f32 accumulation, f32 residual stream).
# ----------------------------------------------------------------------------
def _conv_ref(x, w, b):
    out = lax.conv_general_dilated(
        x.astype(jnp.bfloat16), w.astype(jnp.bfloat16),
        window_strides=(1, 1), padding="SAME",
        dimension_numbers=("NHWC", "HWIO", "NHWC"),
        preferred_element_type=jnp.float32)
    return out + b


@jax.jit
def forward_ref(x_nchw, params):
    x = jnp.transpose(x_nchw, (0, 2, 3, 1)).astype(jnp.float32)
    x = jax.nn.relu(_conv_ref(x, params["inc"][0], params["inc"][1]))
    identity = x
    for (w1, b1, w2, b2) in params["layers"]:
        h = jax.nn.relu(_conv_ref(x, w1, b1))
        x = jax.nn.relu(_conv_ref(h, w2, b2) + x)
    x = x + identity
    x = _conv_ref(x, params["outc"][0].reshape(1, 1, INPLANES, OUT_CH),
                  params["outc"][1])
    return jnp.transpose(x, (0, 3, 1, 2))


if __name__ == "__main__":
    key = jax.random.PRNGKey(0)
    pkey, xkey = jax.random.split(key)
    params = init_params(pkey)
    # PyTorch-style input: N=2, C=3, H=W=16 (NCHW, like the nn.Module).
    x = jax.random.normal(xkey, (2, 3, 16, 16), jnp.float32)

    out = jax.block_until_ready(forward_pallas(x, params))
    assert out.shape == (2, 3, 16, 16) and out.dtype == jnp.float32

    ref = jax.block_until_ready(forward_ref(x, params))
    err = float(jnp.max(jnp.abs(out - ref)))
    assert err < 2e-3, f"Pallas/reference mismatch: max abs err = {err}"

    print("KERNEL_OK")
</pallas_src>

<mosaic_0001>
module attributes {stable_mosaic.version = 11 : i64} {
  func.func @kernel(%arg0: i32, %arg1: memref<1x16x16x64xf32, #tpu.memory_space<vmem>>, %arg2: memref<576x64xbf16, #tpu.memory_space<vmem>>, %arg3: memref<1x64xf32, #tpu.memory_space<vmem>>, %arg4: memref<24x576x64xbf16, #tpu.memory_space<vmem>>, %arg5: memref<24x1x64xf32, #tpu.memory_space<vmem>>, %arg6: memref<24x576x64xbf16, #tpu.memory_space<vmem>>, %arg7: memref<24x1x64xf32, #tpu.memory_space<vmem>>, %arg8: memref<64x3xbf16, #tpu.memory_space<vmem>>, %arg9: memref<1x3xf32, #tpu.memory_space<vmem>>, %arg10: memref<1x16x16x3xf32, #tpu.memory_space<vmem>>, %arg11: memref<18x32x64xf32, #tpu.memory_space<vmem>>, %arg12: memref<18x32x64xf32, #tpu.memory_space<vmem>>, %arg13: memref<256x64xf32, #tpu.memory_space<vmem>>) attributes {dimension_semantics = [#tpu.dimension_semantics<parallel>], iteration_bounds = array<i64: 2>, scalar_prefetch = 0 : i64, scratch_operands = 3 : i64, tpu.core_type = #tpu.core_type<tc>, window_params = [{transform_indices = @transform_0, window_bounds = array<i64: 1, 16, 16, 64>}, {pipeline_mode = #tpu.pipeline_mode<synchronous>, transform_indices = @transform_1, window_bounds = array<i64: 576, 64>}, {pipeline_mode = #tpu.pipeline_mode<synchronous>, transform_indices = @transform_2, window_bounds = array<i64: 1, 64>}, {pipeline_mode = #tpu.pipeline_mode<synchronous>, transform_indices = @transform_3, window_bounds = array<i64: 24, 576, 64>}, {pipeline_mode = #tpu.pipeline_mode<synchronous>, transform_indices = @transform_4, window_bounds = array<i64: 24, 1, 64>}, {pipeline_mode = #tpu.pipeline_mode<synchronous>, transform_indices = @transform_5, window_bounds = array<i64: 24, 576, 64>}, {pipeline_mode = #tpu.pipeline_mode<synchronous>, transform_indices = @transform_6, window_bounds = array<i64: 24, 1, 64>}, {pipeline_mode = #tpu.pipeline_mode<synchronous>, transform_indices = @transform_7, window_bounds = array<i64: 64, 3>}, {pipeline_mode = #tpu.pipeline_mode<synchronous>, transform_indices = @transform_8, window_bounds = array<i64: 1, 3>}, {transform_indices = @transform_9, window_bounds = array<i64: 1, 16, 16, 3>}]} {
    %cst = arith.constant 0.000000e+00 : f32
    %0 = vector.broadcast %cst : f32 to vector<18x32x64xf32>
    %c0 = arith.constant 0 : index
    %c0_0 = arith.constant 0 : index
    %c0_1 = arith.constant 0 : index
    %1 = vector.load %arg11[%c0, %c0_0, %c0_1] : memref<18x32x64xf32, #tpu.memory_space<vmem>>, vector<18x32x64xf32>
    tpu.vector_store %arg11[%c0, %c0_0, %c0_1], %0 {strides = array<i32>} : memref<18x32x64xf32, #tpu.memory_space<vmem>>, vector<18x32x64xf32>,
    %cst_2 = arith.constant 0.000000e+00 : f32
    %2 = vector.broadcast %cst_2 : f32 to vector<18x32x64xf32>
    %c0_3 = arith.constant 0 : index
    %c0_4 = arith.constant 0 : index
    %c0_5 = arith.constant 0 : index
    %3 = vector.load %arg12[%c0_3, %c0_4, %c0_5] : memref<18x32x64xf32, #tpu.memory_space<vmem>>, vector<18x32x64xf32>
    tpu.vector_store %arg12[%c0_3, %c0_4, %c0_5], %2 {strides = array<i32>} : memref<18x32x64xf32, #tpu.memory_space<vmem>>, vector<18x32x64xf32>,
    %c0_6 = arith.constant 0 : index
    %c0_7 = arith.constant 0 : index
    %c0_8 = arith.constant 0 : index
    %c0_9 = arith.constant 0 : index
    %4 = vector.load %arg1[%c0_6, %c0_7, %c0_8, %c0_9] : memref<1x16x16x64xf32, #tpu.memory_space<vmem>>, vector<1x16x16x64xf32>
    %5 = vector.shape_cast %4 : vector<1x16x16x64xf32> to vector<16x16x64xf32>
    %c1 = arith.constant 1 : index
    %c8 = arith.constant 8 : index
    %c0_10 = arith.constant 0 : index
    %6 = vector.load %arg11[%c1, %c8, %c0_10] : memref<18x32x64xf32, #tpu.memory_space<vmem>>, vector<16x16x64xf32>
    tpu.vector_store %arg11[%c1, %c8, %c0_10], %5 {strides = array<i32>} : memref<18x32x64xf32, #tpu.memory_space<vmem>>, vector<16x16x64xf32>,
    %c0_11 = arith.constant 0 : index
    %c0_12 = arith.constant 0 : index
    %7 = vector.load %arg2[%c0_11, %c0_12] : memref<576x64xbf16, #tpu.memory_space<vmem>>, vector<576x64xbf16>
    %c0_13 = arith.constant 0 : index
    %c0_14 = arith.constant 0 : index
    %8 = vector.load %arg3[%c0_13, %c0_14] : memref<1x64xf32, #tpu.memory_space<vmem>>, vector<1x64xf32>
    %c0_15 = arith.constant 0 : index
    %c0_16 = arith.constant 0 : index
    %c0_17 = arith.constant 0 : index
    %9 = vector.load %arg11[%c0_15, %c0_16, %c0_17] : memref<18x32x64xf32, #tpu.memory_space<vmem>>, vector<18x32x64xf32>
    %10 = vector.extract_strided_slice %9 {offsets = [0, 7, 0], sizes = [16, 16, 64], strides = [1, 1, 1]} : vector<18x32x64xf32> to vector<16x16x64xf32>
    %11 = arith.truncf %10 : vector<16x16x64xf32> to vector<16x16x64xbf16>
    %12 = vector.extract_strided_slice %9 {offsets = [0, 8, 0], sizes = [16, 16, 64], strides = [1, 1, 1]} : vector<18x32x64xf32> to vector<16x16x64xf32>
    %13 = arith.truncf %12 : vector<16x16x64xf32> to vector<16x16x64xbf16>
    %14 = vector.extract_strided_slice %9 {offsets = [0, 9, 0], sizes = [16, 16, 64], strides = [1, 1, 1]} : vector<18x32x64xf32> to vector<16x16x64xf32>
    %15 = arith.truncf %14 : vector<16x16x64xf32> to vector<16x16x64xbf16>
    %16 = vector.extract_strided_slice %9 {offsets = [1, 7, 0], sizes = [16, 16, 64], strides = [1, 1, 1]} : vector<18x32x64xf32> to vector<16x16x64xf32>
    %17 = arith.truncf %16 : vector<16x16x64xf32> to vector<16x16x64xbf16>
    %18 = vector.extract_strided_slice %9 {offsets = [1, 8, 0], sizes = [16, 16, 64], strides = [1, 1, 1]} : vector<18x32x64xf32> to vector<16x16x64xf32>
    %19 = arith.truncf %18 : vector<16x16x64xf32> to vector<16x16x64xbf16>
    %20 = vector.extract_strided_slice %9 {offsets = [1, 9, 0], sizes = [16, 16, 64], strides = [1, 1, 1]} : vector<18x32x64xf32> to vector<16x16x64xf32>
    %21 = arith.truncf %20 : vector<16x16x64xf32> to vector<16x16x64xbf16>
    %22 = vector.extract_strided_slice %9 {offsets = [2, 7, 0], sizes = [16, 16, 64], strides = [1, 1, 1]} : vector<18x32x64xf32> to vector<16x16x64xf32>
    %23 = arith.truncf %22 : vector<16x16x64xf32> to vector<16x16x64xbf16>
    %24 = vector.extract_strided_slice %9 {offsets = [2, 8, 0], sizes = [16, 16, 64], strides = [1, 1, 1]} : vector<18x32x64xf32> to vector<16x16x64xf32>
    %25 = arith.truncf %24 : vector<16x16x64xf32> to vector<16x16x64xbf16>
    %26 = vector.extract_strided_slice %9 {offsets = [2, 9, 0], sizes = [16, 16, 64], strides = [1, 1, 1]} : vector<18x32x64xf32> to vector<16x16x64xf32>
    %27 = arith.truncf %26 : vector<16x16x64xf32> to vector<16x16x64xbf16>
    %28 = tpu.concatenate %11, %13, %15, %17, %19, %21, %23, %25, %27 in 2 : vector<16x16x64xbf16>, vector<16x16x64xbf16>, vector<16x16x64xbf16>, vector<16x16x64xbf16>, vector<16x16x64xbf16>, vector<16x16x64xbf16>, vector<16x16x64xbf16>, vector<16x16x64xbf16>, vector<16x16x64xbf16> -> vector<16x16x576xbf16>
    %29 = vector.shape_cast %28 : vector<16x16x576xbf16> to vector<256x576xbf16>
    %cst_18 = arith.constant dense<0.000000e+00> : vector<256x64xf32>
    %30 = tpu.matmul %29, %7, %cst_18 {dimension_numbers = #tpu.dot_dimension_numbers<[1], [0], [0], [1], [0, 0, 1, 1], [], []>} : vector<256x576xbf16>, vector<576x64xbf16>, vector<256x64xf32> -> vector<256x64xf32>
    %31 = vector.broadcast %8 : vector<1x64xf32> to vector<256x64xf32>
    %32 = arith.addf %30, %31 : vector<256x64xf32>
    %cst_19 = arith.constant 0.000000e+00 : f32
    %33 = vector.broadcast %cst_19 : f32 to vector<256x64xf32>
    %34 = arith.maximumf %32, %33 : vector<256x64xf32>
    %c0_20 = arith.constant 0 : index
    %c0_21 = arith.constant 0 : index
    %35 = vector.load %arg13[%c0_20, %c0_21] : memref<256x64xf32, #tpu.memory_space<vmem>>, vector<256x64xf32>
    tpu.vector_store %arg13[%c0_20, %c0_21], %34 {strides = array<i32>} : memref<256x64xf32, #tpu.memory_space<vmem>>, vector<256x64xf32>,
    %36 = vector.shape_cast %34 : vector<256x64xf32> to vector<16x16x64xf32>
    %c1_22 = arith.constant 1 : index
    %c8_23 = arith.constant 8 : index
    %c0_24 = arith.constant 0 : index
    %37 = vector.load %arg11[%c1_22, %c8_23, %c0_24] : memref<18x32x64xf32, #tpu.memory_space<vmem>>, vector<16x16x64xf32>
    tpu.vector_store %arg11[%c1_22, %c8_23, %c0_24], %36 {strides = array<i32>} : memref<18x32x64xf32, #tpu.memory_space<vmem>>, vector<16x16x64xf32>,
    %c0_i32 = arith.constant 0 : i32
    %c24_i32 = arith.constant 24 : i32
    %38 = arith.addi %c0_i32, %c24_i32 : i32
    %c1_i32 = arith.constant 1 : i32
    scf.for %arg14 = %c0_i32 to %38 step %c1_i32  : i32 {
      %51 = arith.index_cast %arg14 : i32 to index
      %c0_40 = arith.constant 0 : index
      %c0_41 = arith.constant 0 : index
      %52 = vector.load %arg4[%51, %c0_40, %c0_41] : memref<24x576x64xbf16, #tpu.memory_space<vmem>>, vector<1x576x64xbf16>
      %53 = vector.shape_cast %52 : vector<1x576x64xbf16> to vector<576x64xbf16>
      %54 = arith.index_cast %arg14 : i32 to index
      %c0_42 = arith.constant 0 : index
      %c0_43 = arith.constant 0 : index
      %55 = vector.load %arg5[%54, %c0_42, %c0_43] : memref<24x1x64xf32, #tpu.memory_space<vmem>>, vector<1x1x64xf32>
      %56 = vector.shape_cast %55 : vector<1x1x64xf32> to vector<1x64xf32>
      %c0_44 = arith.constant 0 : index
      %c0_45 = arith.constant 0 : index
      %c0_46 = arith.constant 0 : index
      %57 = vector.load %arg11[%c0_44, %c0_45, %c0_46] : memref<18x32x64xf32, #tpu.memory_space<vmem>>, vector<18x32x64xf32>
      %58 = vector.extract_strided_slice %57 {offsets = [0, 7, 0], sizes = [16, 16, 64], strides = [1, 1, 1]} : vector<18x32x64xf32> to vector<16x16x64xf32>
      %59 = arith.truncf %58 : vector<16x16x64xf32> to vector<16x16x64xbf16>
      %60 = vector.extract_strided_slice %57 {offsets = [0, 8, 0], sizes = [16, 16, 64], strides = [1, 1, 1]} : vector<18x32x64xf32> to vector<16x16x64xf32>
      %61 = arith.truncf %60 : vector<16x16x64xf32> to vector<16x16x64xbf16>
      %62 = vector.extract_strided_slice %57 {offsets = [0, 9, 0], sizes = [16, 16, 64], strides = [1, 1, 1]} : vector<18x32x64xf32> to vector<16x16x64xf32>
      %63 = arith.truncf %62 : vector<16x16x64xf32> to vector<16x16x64xbf16>
      %64 = vector.extract_strided_slice %57 {offsets = [1, 7, 0], sizes = [16, 16, 64], strides = [1, 1, 1]} : vector<18x32x64xf32> to vector<16x16x64xf32>
      %65 = arith.truncf %64 : vector<16x16x64xf32> to vector<16x16x64xbf16>
      %66 = vector.extract_strided_slice %57 {offsets = [1, 8, 0], sizes = [16, 16, 64], strides = [1, 1, 1]} : vector<18x32x64xf32> to vector<16x16x64xf32>
      %67 = arith.truncf %66 : vector<16x16x64xf32> to vector<16x16x64xbf16>
      %68 = vector.extract_strided_slice %57 {offsets = [1, 9, 0], sizes = [16, 16, 64], strides = [1, 1, 1]} : vector<18x32x64xf32> to vector<16x16x64xf32>
      %69 = arith.truncf %68 : vector<16x16x64xf32> to vector<16x16x64xbf16>
      %70 = vector.extract_strided_slice %57 {offsets = [2, 7, 0], sizes = [16, 16, 64], strides = [1, 1, 1]} : vector<18x32x64xf32> to vector<16x16x64xf32>
      %71 = arith.truncf %70 : vector<16x16x64xf32> to vector<16x16x64xbf16>
      %72 = vector.extract_strided_slice %57 {offsets = [2, 8, 0], sizes = [16, 16, 64], strides = [1, 1, 1]} : vector<18x32x64xf32> to vector<16x16x64xf32>
      %73 = arith.truncf %72 : vector<16x16x64xf32> to vector<16x16x64xbf16>
      %74 = vector.extract_strided_slice %57 {offsets = [2, 9, 0], sizes = [16, 16, 64], strides = [1, 1, 1]} : vector<18x32x64xf32> to vector<16x16x64xf32>
      %75 = arith.truncf %74 : vector<16x16x64xf32> to vector<16x16x64xbf16>
      %76 = tpu.concatenate %59, %61, %63, %65, %67, %69, %71, %73, %75 in 2 : vector<16x16x64xbf16>, vector<16x16x64xbf16>, vector<16x16x64xbf16>, vector<16x16x64xbf16>, vector<16x16x64xbf16>, vector<16x16x64xbf16>, vector<16x16x64xbf16>, vector<16x16x64xbf16>, vector<16x16x64xbf16> -> vector<16x16x576xbf16>
      %77 = vector.shape_cast %76 : vector<16x16x576xbf16> to vector<256x576xbf16>
      %cst_47 = arith.constant dense<0.000000e+00> : vector<256x64xf32>
      %78 = tpu.matmul %77, %53, %cst_47 {dimension_numbers = #tpu.dot_dimension_numbers<[1], [0], [0], [1], [0, 0, 1, 1], [], []>} : vector<256x576xbf16>, vector<576x64xbf16>, vector<256x64xf32> -> vector<256x64xf32>
      %79 = vector.broadcast %56 : vector<1x64xf32> to vector<256x64xf32>
      %80 = arith.addf %78, %79 : vector<256x64xf32>
      %cst_48 = arith.constant 0.000000e+00 : f32
      %81 = vector.broadcast %cst_48 : f32 to vector<256x64xf32>
      %82 = arith.maximumf %80, %81 : vector<256x64xf32>
      %83 = vector.shape_cast %82 : vector<256x64xf32> to vector<16x16x64xf32>
      %c1_49 = arith.constant 1 : index
      %c8_50 = arith.constant 8 : index
      %c0_51 = arith.constant 0 : index
      %84 = vector.load %arg12[%c1_49, %c8_50, %c0_51] : memref<18x32x64xf32, #tpu.memory_space<vmem>>, vector<16x16x64xf32>
      tpu.vector_store %arg12[%c1_49, %c8_50, %c0_51], %83 {strides = array<i32>} : memref<18x32x64xf32, #tpu.memory_space<vmem>>, vector<16x16x64xf32>,
      %c1_52 = arith.constant 1 : index
      %c8_53 = arith.constant 8 : index
      %c0_54 = arith.constant 0 : index
      %85 = vector.load %arg11[%c1_52, %c8_53, %c0_54] : memref<18x32x64xf32, #tpu.memory_space<vmem>>, vector<16x16x64xf32>
      %86 = vector.shape_cast %85 : vector<16x16x64xf32> to vector<256x64xf32>
      %87 = arith.index_cast %arg14 : i32 to index
      %c0_55 = arith.constant 0 : index
      %c0_56 = arith.constant 0 : index
      %88 = vector.load %arg6[%87, %c0_55, %c0_56] : memref<24x576x64xbf16, #tpu.memory_space<vmem>>, vector<1x576x64xbf16>
      %89 = vector.shape_cast %88 : vector<1x576x64xbf16> to vector<576x64xbf16>
      %90 = arith.index_cast %arg14 : i32 to index
      %c0_57 = arith.constant 0 : index
      %c0_58 = arith.constant 0 : index
      %91 = vector.load %arg7[%90, %c0_57, %c0_58] : memref<24x1x64xf32, #tpu.memory_space<vmem>>, vector<1x1x64xf32>
      %92 = vector.shape_cast %91 : vector<1x1x64xf32> to vector<1x64xf32>
      %c0_59 = arith.constant 0 : index
      %c0_60 = arith.constant 0 : index
      %c0_61 = arith.constant 0 : index
      %93 = vector.load %arg12[%c0_59, %c0_60, %c0_61] : memref<18x32x64xf32, #tpu.memory_space<vmem>>, vector<18x32x64xf32>
      %94 = vector.extract_strided_slice %93 {offsets = [0, 7, 0], sizes = [16, 16, 64], strides = [1, 1, 1]} : vector<18x32x64xf32> to vector<16x16x64xf32>
      %95 = arith.truncf %94 : vector<16x16x64xf32> to vector<16x16x64xbf16>
      %96 = vector.extract_strided_slice %93 {offsets = [0, 8, 0], sizes = [16, 16, 64], strides = [1, 1, 1]} : vector<18x32x64xf32> to vector<16x16x64xf32>
      %97 = arith.truncf %96 : vector<16x16x64xf32> to vector<16x16x64xbf16>
      %98 = vector.extract_strided_slice %93 {offsets = [0, 9, 0], sizes = [16, 16, 64], strides = [1, 1, 1]} : vector<18x32x64xf32> to vector<16x16x64xf32>
      %99 = arith.truncf %98 : vector<16x16x64xf32> to vector<16x16x64xbf16>
      %100 = vector.extract_strided_slice %93 {offsets = [1, 7, 0], sizes = [16, 16, 64], strides = [1, 1, 1]} : vector<18x32x64xf32> to vector<16x16x64xf32>
      %101 = arith.truncf %100 : vector<16x16x64xf32> to vector<16x16x64xbf16>
      %102 = vector.extract_strided_slice %93 {offsets = [1, 8, 0], sizes = [16, 16, 64], strides = [1, 1, 1]} : vector<18x32x64xf32> to vector<16x16x64xf32>
      %103 = arith.truncf %102 : vector<16x16x64xf32> to vector<16x16x64xbf16>
      %104 = vector.extract_strided_slice %93 {offsets = [1, 9, 0], sizes = [16, 16, 64], strides = [1, 1, 1]} : vector<18x32x64xf32> to vector<16x16x64xf32>
      %105 = arith.truncf %104 : vector<16x16x64xf32> to vector<16x16x64xbf16>
      %106 = vector.extract_strided_slice %93 {offsets = [2, 7, 0], sizes = [16, 16, 64], strides = [1, 1, 1]} : vector<18x32x64xf32> to vector<16x16x64xf32>
      %107 = arith.truncf %106 : vector<16x16x64xf32> to vector<16x16x64xbf16>
      %108 = vector.extract_strided_slice %93 {offsets = [2, 8, 0], sizes = [16, 16, 64], strides = [1, 1, 1]} : vector<18x32x64xf32> to vector<16x16x64xf32>
      %109 = arith.truncf %108 : vector<16x16x64xf32> to vector<16x16x64xbf16>
      %110 = vector.extract_strided_slice %93 {offsets = [2, 9, 0], sizes = [16, 16, 64], strides = [1, 1, 1]} : vector<18x32x64xf32> to vector<16x16x64xf32>
      %111 = arith.truncf %110 : vector<16x16x64xf32> to vector<16x16x64xbf16>
      %112 = tpu.concatenate %95, %97, %99, %101, %103, %105, %107, %109, %111 in 2 : vector<16x16x64xbf16>, vector<16x16x64xbf16>, vector<16x16x64xbf16>, vector<16x16x64xbf16>, vector<16x16x64xbf16>, vector<16x16x64xbf16>, vector<16x16x64xbf16>, vector<16x16x64xbf16>, vector<16x16x64xbf16> -> vector<16x16x576xbf16>
      %113 = vector.shape_cast %112 : vector<16x16x576xbf16> to vector<256x576xbf16>
      %cst_62 = arith.constant dense<0.000000e+00> : vector<256x64xf32>
      %114 = tpu.matmul %113, %89, %cst_62 {dimension_numbers = #tpu.dot_dimension_numbers<[1], [0], [0], [1], [0, 0, 1, 1], [], []>} : vector<256x576xbf16>, vector<576x64xbf16>, vector<256x64xf32> -> vector<256x64xf32>
      %115 = vector.broadcast %92 : vector<1x64xf32> to vector<256x64xf32>
      %116 = arith.addf %114, %115 : vector<256x64xf32>
      %117 = arith.addf %116, %86 : vector<256x64xf32>
      %cst_63 = arith.constant 0.000000e+00 : f32
      %118 = vector.broadcast %cst_63 : f32 to vector<256x64xf32>
      %119 = arith.maximumf %117, %118 : vector<256x64xf32>
      %120 = vector.shape_cast %119 : vector<256x64xf32> to vector<16x16x64xf32>
      %c1_64 = arith.constant 1 : index
      %c8_65 = arith.constant 8 : index
      %c0_66 = arith.constant 0 : index
      %121 = vector.load %arg11[%c1_64, %c8_65, %c0_66] : memref<18x32x64xf32, #tpu.memory_space<vmem>>, vector<16x16x64xf32>
      tpu.vector_store %arg11[%c1_64, %c8_65, %c0_66], %120 {strides = array<i32>} : memref<18x32x64xf32, #tpu.memory_space<vmem>>, vector<16x16x64xf32>,
    }
    %c24_i32_25 = arith.constant 24 : i32
    %c1_26 = arith.constant 1 : index
    %c8_27 = arith.constant 8 : index
    %c0_28 = arith.constant 0 : index
    %39 = vector.load %arg11[%c1_26, %c8_27, %c0_28] : memref<18x32x64xf32, #tpu.memory_space<vmem>>, vector<16x16x64xf32>
    %40 = vector.shape_cast %39 : vector<16x16x64xf32> to vector<256x64xf32>
    %c0_29 = arith.constant 0 : index
    %c0_30 = arith.constant 0 : index
    %41 = vector.load %arg13[%c0_29, %c0_30] : memref<256x64xf32, #tpu.memory_space<vmem>>, vector<256x64xf32>
    %42 = arith.addf %40, %41 : vector<256x64xf32>
    %43 = arith.truncf %42 : vector<256x64xf32> to vector<256x64xbf16>
    %c0_31 = arith.constant 0 : index
    %c0_32 = arith.constant 0 : index
    %44 = vector.load %arg8[%c0_31, %c0_32] : memref<64x3xbf16, #tpu.memory_space<vmem>>, vector<64x3xbf16>
    %cst_33 = arith.constant dense<0.000000e+00> : vector<256x3xf32>
    %45 = tpu.matmul %43, %44, %cst_33 {dimension_numbers = #tpu.dot_dimension_numbers<[1], [0], [0], [1], [0, 0, 1, 1], [], []>} : vector<256x64xbf16>, vector<64x3xbf16>, vector<256x3xf32> -> vector<256x3xf32>
    %c0_34 = arith.constant 0 : index
    %c0_35 = arith.constant 0 : index
    %46 = vector.load %arg9[%c0_34, %c0_35] : memref<1x3xf32, #tpu.memory_space<vmem>>, vector<1x3xf32>
    %47 = vector.broadcast %46 : vector<1x3xf32> to vector<256x3xf32>
    %48 = arith.addf %45, %47 : vector<256x3xf32>
    %49 = vector.shape_cast %48 : vector<256x3xf32> to vector<1x16x16x3xf32>
    %c0_36 = arith.constant 0 : index
    %c0_37 = arith.constant 0 : index
    %c0_38 = arith.constant 0 : index
    %c0_39 = arith.constant 0 : index
    %50 = vector.load %arg10[%c0_36, %c0_37, %c0_38, %c0_39] : memref<1x16x16x3xf32, #tpu.memory_space<vmem>>, vector<1x16x16x3xf32>
    tpu.vector_store %arg10[%c0_36, %c0_37, %c0_38, %c0_39], %49 {strides = array<i32>} : memref<1x16x16x3xf32, #tpu.memory_space<vmem>>, vector<1x16x16x3xf32>,
    return
  }
  func.func @transform_0(%arg0: i32) -> (i32, i32, i32, i32) {
    %c0_i32 = arith.constant 0 : i32
    %c0_i32_0 = arith.constant 0 : i32
    %c0_i32_1 = arith.constant 0 : i32
    %c0_i32_2 = arith.constant 0 : i32
    return %arg0, %c0_i32, %c0_i32_0, %c0_i32_1 : i32, i32, i32, i32
  }
  func.func @transform_1(%arg0: i32) -> (i32, i32) {
    %c0_i32 = arith.constant 0 : i32
    %c0_i32_0 = arith.constant 0 : i32
    %c0_i32_1 = arith.constant 0 : i32
    return %c0_i32, %c0_i32_0 : i32, i32
  }
  func.func @transform_2(%arg0: i32) -> (i32, i32) {
    %c0_i32 = arith.constant 0 : i32
    %c0_i32_0 = arith.constant 0 : i32
    %c0_i32_1 = arith.constant 0 : i32
    return %c0_i32, %c0_i32_0 : i32, i32
  }
  func.func @transform_3(%arg0: i32) -> (i32, i32, i32) {
    %c0_i32 = arith.constant 0 : i32
    %c0_i32_0 = arith.constant 0 : i32
    %c0_i32_1 = arith.constant 0 : i32
    %c0_i32_2 = arith.constant 0 : i32
    return %c0_i32, %c0_i32_0, %c0_i32_1 : i32, i32, i32
  }
  func.func @transform_4(%arg0: i32) -> (i32, i32, i32) {
    %c0_i32 = arith.constant 0 : i32
    %c0_i32_0 = arith.constant 0 : i32
    %c0_i32_1 = arith.constant 0 : i32
    %c0_i32_2 = arith.constant 0 : i32
    return %c0_i32, %c0_i32_0, %c0_i32_1 : i32, i32, i32
  }
  func.func @transform_5(%arg0: i32) -> (i32, i32, i32) {
    %c0_i32 = arith.constant 0 : i32
    %c0_i32_0 = arith.constant 0 : i32
    %c0_i32_1 = arith.constant 0 : i32
    %c0_i32_2 = arith.constant 0 : i32
    return %c0_i32, %c0_i32_0, %c0_i32_1 : i32, i32, i32
  }
  func.func @transform_6(%arg0: i32) -> (i32, i32, i32) {
    %c0_i32 = arith.constant 0 : i32
    %c0_i32_0 = arith.constant 0 : i32
    %c0_i32_1 = arith.constant 0 : i32
    %c0_i32_2 = arith.constant 0 : i32
    return %c0_i32, %c0_i32_0, %c0_i32_1 : i32, i32, i32
  }
  func.func @transform_7(%arg0: i32) -> (i32, i32) {
    %c0_i32 = arith.constant 0 : i32
    %c0_i32_0 = arith.constant 0 : i32
    %c0_i32_1 = arith.constant 0 : i32
    return %c0_i32, %c0_i32_0 : i32, i32
  }
  func.func @transform_8(%arg0: i32) -> (i32, i32) {
    %c0_i32 = arith.constant 0 : i32
    %c0_i32_0 = arith.constant 0 : i32
    %c0_i32_1 = arith.constant 0 : i32
    return %c0_i32, %c0_i32_0 : i32, i32
  }
  func.func @transform_9(%arg0: i32) -> (i32, i32, i32, i32) {
    %c0_i32 = arith.constant 0 : i32
    %c0_i32_0 = arith.constant 0 : i32
    %c0_i32_1 = arith.constant 0 : i32
    %c0_i32_2 = arith.constant 0 : i32
    return %arg0, %c0_i32, %c0_i32_0, %c0_i32_1 : i32, i32, i32, i32
  }
}

</mosaic_0001>

<bundles_post_ra>
// kernel: forward_pallas.1
= control target key start
LH: loop header
LB: loop body
LE: loop exit
PB: predicated region body
PF: predicated region fallthrough
CT: control target
= control target key end

     0   :  { %s10779_s30 = smov 0   ;;  %s15711_s0 = inlined_call_operand.vmem [shape: f32[2,16,16,64], index: 0, kind: input, shape index: {}]   ;;  %s15712_s1 = inlined_call_operand.vmem [shape: bf16[576,64], index: 1, kind: input, shape index: {}]   ;;  %s15713_s2 = inlined_call_operand.vmem [shape: f32[1,64], index: 2, kind: input, shape index: {}]   ;;  %s15714_s3 = inlined_call_operand.vmem [shape: bf16[24,576,64], index: 3, kind: input, shape index: {}]   ;;  %s15715_s4 = inlined_call_operand.vmem [shape: f32[24,1,64], index: 4, kind: input, shape index: {}]   ;;  %s15716_s5 = inlined_call_operand.vmem [shape: bf16[24,576,64], index: 5, kind: input, shape index: {}]   ;;  %s15717_s6 = inlined_call_operand.vmem [shape: f32[24,1,64], index: 6, kind: input, shape index: {}]   ;;  %s15718_s7 = inlined_call_operand.vmem [shape: bf16[64,3], index: 7, kind: input, shape index: {}]   ;;  %s15719_s8 = inlined_call_operand.vmem [shape: f32[1,3], index: 8, kind: input, shape index: {}]   ;;  %s15720_s9 = inlined_call_operand.vmem [shape: f32[2,16,16,3], index: 9, kind: output, shape index: {}]  }
   0x1 LB: > { %s9437_s10 = sadd.s32 4294967295, %s10720_s30   ;;  %p9441_p0 = scmp.ge.s32.totalorder %s10720_s30, 1  ;;  %s10720_s30 = sphi %s10779_s30, %s19_s30  }
   0x2   : > { %p287_p1 = scmp.lt.s32.totalorder %s10720_s30, 3 }
   0x4   : > { %p288_p2 = pnand %p9441_p0, %p287_p1 }
   0x6   : > { %291 = sbr.rel (%p288_p2) target bundleno = 1844 (0x734), region = 56 }
   0xb   : > { %p10789_p3 = scmp.lt.s32.totalorder %s9437_s10, 1  ;;  %vm334_vm0 = vcmask 523264   ;;  %v10796_v0 = vld [vmem:[%s15712_s1 + $0x78] sm:$0xff]   ;;  %v10726_v1 = vmov 0.0   ;;  %v10591_v3 = vld [vmem:[%s15712_s1 + $0x70] sm:$0xff]   ;;  %v10593_v5 = vld [vmem:[%s15712_s1 + $0x68] sm:$0xff]  }
   0xc   : > { %387 = vst.msk [vmem:[#allocation2 + $0x1a0] sm:$0xff] %vm334_vm0, %v10726_v1  ;;  %388 = vst.msk [vmem:[#allocation2 + $0x1a8] sm:$0xff] %vm334_vm0, %v10726_v1  ;;  %9634 = vmatprep.subr.bf16.mxu0 %v10796_v0  ;;  %v10590_v2 = vld [vmem:[%s15712_s1 + $0x38] sm:$0xff]   ;;  %10546 = vmatprep.subr.bf16.mxu1 %v10796_v0  ;;  %v10592_v4 = vld [vmem:[%s15712_s1 + $0x30] sm:$0xff]   ;;  %s10727_s29 = smov 64   ;;  %vm953_vm1 = vcmask 1042432  }
   0xd   : > { %389 = vst.msk [vmem:[#allocation2 + $0x1b0] sm:$0xff] %vm334_vm0, %v10726_v1  ;;  %335 = vst.msk [vmem:[#allocation2] sm:$0xff] %vm334_vm0, %v10726_v1  ;;  %s16487_s10 = smov (!%p10789_p3, %s9437_s10), 1  ;;  %9635 = vmatpush3.bf16.msra.mxu0 %v10590_v2  ;;  %10554 = vmatpush3.bf16.msra.mxu1 %v10590_v2  ;;  %vm1458_vm2 = vsmask.f32 4352  ;;  %s12632_s19 = smov 0  }
   0xe   : > { %336 = vst.msk [vmem:[#allocation2 + $0x8] sm:$0xff] %vm334_vm0, %v10726_v1  ;;  %337 = vst.msk [vmem:[#allocation2 + $0x10] sm:$0xff] %vm334_vm0, %v10726_v1  ;;  %s9630_s18 = sshll.u32 %s16487_s10, 8  ;;  %9636 = vmatprep.subr.bf16.mxu0 %v10591_v3  ;;  %10547 = vmatprep.subr.bf16.mxu1 %v10591_v3 }
   0xf   : > { %338 = vst.msk [vmem:[#allocation2 + $0x18] sm:$0xff] %vm334_vm0, %v10726_v1  ;;  %339 = vst.msk [vmem:[#allocation2 + $0x20] sm:$0xff] %vm334_vm0, %v10726_v1  ;;  %s11104_s23 = scalar_lea.vmem %s15711_s0, %s9630_s18  ;;  %s11109_s26 = scalar_lea.vmem %s15720_s9, %s9630_s18 }
  0x10   : > { %340 = vst.msk [vmem:[#allocation2 + $0x28] sm:$0xff] %vm334_vm0, %v10726_v1  ;;  %341 = vst.msk [vmem:[#allocation2 + $0x30] sm:$0xff] %vm334_vm0, %v10726_v1  ;;  %v503_v6 = vld [vmem:[%s11104_s23 + $0xc0] sm:$0xff]  ;;  %v504_v7 = vld [vmem:[%s11104_s23 + $0xc8] sm:$0xff] }
  0x11   : > { %342 = vst.msk [vmem:[#allocation2 + $0x38] sm:$0xff] %vm334_vm0, %v10726_v1  ;;  %343 = vst.msk [vmem:[#allocation2 + $0x40] sm:$0xff] %vm334_vm0, %v10726_v1  ;;  %v479_v8 = vld [vmem:[%s11104_s23] sm:$0xff]  ;;  %v480_v9 = vld [vmem:[%s11104_s23 + $0x8] sm:$0xff]  ;;  %9637 = vmatpush3.bf16.msra.mxu0 %v10592_v4  ;;  %10555 = vmatpush3.bf16.msra.mxu1 %v10592_v4 }
  0x12   : > { %344 = vst.msk [vmem:[#allocation2 + $0x48] sm:$0xff] %vm334_vm0, %v10726_v1  ;;  %345 = vst.msk [vmem:[#allocation2 + $0x50] sm:$0xff] %vm334_vm0, %v10726_v1  ;;  %v506_v10 = vld [vmem:[%s11104_s23 + $0xd8] sm:$0xff]  ;;  %v505_v11 = vld [vmem:[%s11104_s23 + $0xd0] sm:$0xff]  ;;  %9638 = vmatprep.subr.bf16.mxu0 %v10593_v5  ;;  %10548 = vmatprep.subr.bf16.mxu1 %v10593_v5 }
  0x13   : > { %346 = vst.msk [vmem:[#allocation2 + $0x58] sm:$0xff] %vm334_vm0, %v10726_v1  ;;  %347 = vst.msk [vmem:[#allocation2 + $0x60] sm:$0xff] %vm334_vm0, %v10726_v1  ;;  %v481_v14 = vld [vmem:[%s11104_s23 + $0x10] sm:$0xff]  ;;  %v482_v16 = vld [vmem:[%s11104_s23 + $0x18] sm:$0xff] }
  0x14   : > { %348 = vst.msk [vmem:[#allocation2 + $0x68] sm:$0xff] %vm334_vm0, %v10726_v1  ;;  %349 = vst.msk [vmem:[#allocation2 + $0x70] sm:$0xff] %vm334_vm0, %v10726_v1  ;;  %v501_v17 = vld [vmem:[%s11104_s23 + $0xb0] sm:$0xff]  ;;  %v669_v18 = vld [vmem:[#allocation2 + $0x1a0] sm:$0xff] }
  0x15   : > { %350 = vst.msk [vmem:[#allocation2 + $0x78] sm:$0xff] %vm334_vm0, %v10726_v1  ;;  %351 = vst.msk [vmem:[#allocation2 + $0x80] sm:$0xff] %vm334_vm0, %v10726_v1  ;;  %v11124_v12 = vld [vmem:[#allocation2 + $0x8] sm:$0xff]  ;;  %v11128_v13 = vld [vmem:[#allocation2 + $0x10] sm:$0xff] }
  0x16   : > { %352 = vst.msk [vmem:[#allocation2 + $0x88] sm:$0xff] %vm334_vm0, %v10726_v1  ;;  %353 = vst.msk [vmem:[#allocation2 + $0x90] sm:$0xff] %vm334_vm0, %v10726_v1  ;;  %v11133_v15 = vpack.c.bf16 %v11128_v13, %v11124_v12  ;;  %v502_v19 = vld [vmem:[%s11104_s23 + $0xb8] sm:$0xff]  ;;  %v507_v20 = vld [vmem:[%s11104_s23 + $0xe0] sm:$0xff] }
  0x17   : > { %354 = vst.msk [vmem:[#allocation2 + $0x98] sm:$0xff] %vm334_vm0, %v10726_v1  ;;  %355 = vst.msk [vmem:[#allocation2 + $0xa0] sm:$0xff] %vm334_vm0, %v10726_v1  ;;  %v621_v21 = vld [vmem:[#allocation2 + $0x20] sm:$0xff]  ;;  %v508_v24 = vld [vmem:[%s11104_s23 + $0xe8] sm:$0xff] }
  0x18   : > { %356 = vst.msk [vmem:[#allocation2 + $0xa8] sm:$0xff] %vm334_vm0, %v10726_v1  ;;  %357 = vst.msk [vmem:[#allocation2 + $0xb0] sm:$0xff] %vm334_vm0, %v10726_v1  ;;  %v762_v22 = vshrl.u32 %v11133_v15, 16  ;;  %v765_v23 = vshll.u32 %v11133_v15, 16  ;;  %v483_v25 = vld [vmem:[%s11104_s23 + $0x20] sm:$0xff]  ;;  %v484_v26 = vld [vmem:[%s11104_s23 + $0x28] sm:$0xff] }
  0x19   : > { %358 = vst.msk [vmem:[#allocation2 + $0xb8] sm:$0xff] %vm334_vm0, %v10726_v1  ;;  %359 = vst.msk [vmem:[#allocation2 + $0xc0] sm:$0xff] %vm334_vm0, %v10726_v1  ;;  %v509_v27 = vld [vmem:[%s11104_s23 + $0xf0] sm:$0xff]  ;;  %v510_v35 = vld [vmem:[%s11104_s23 + $0xf8] sm:$0xff] }
  0x1a   : > { %360 = vst.msk [vmem:[#allocation2 + $0xc8] sm:$0xff] %vm334_vm0, %v10726_v1  ;;  %361 = vst.msk [vmem:[#allocation2 + $0xd0] sm:$0xff] %vm334_vm0, %v10726_v1  ;;  %v764_v31 = vrot.slane %v762_v22, 4  ;;  %v767_v32 = vrot.slane %v765_v23, 5  ;;  %v485_v36 = vld [vmem:[%s11104_s23 + $0x30] sm:$0xff]  ;;  %v486_v40 = vld [vmem:[%s11104_s23 + $0x38] sm:$0xff] }
  0x1b   : > { %362 = vst.msk [vmem:[#allocation2 + $0xd8] sm:$0xff] %vm334_vm0, %v10726_v1  ;;  %363 = vst.msk [vmem:[#allocation2 + $0xe0] sm:$0xff] %vm334_vm0, %v10726_v1  ;;  %v487_v43 = vld [vmem:[%s11104_s23 + $0x40] sm:$0xff]  ;;  %v488_v48 = vld [vmem:[%s11104_s23 + $0x48] sm:$0xff] }
  0x1c   : > { %364 = vst.msk [vmem:[#allocation2 + $0xe8] sm:$0xff] %vm334_vm0, %v10726_v1  ;;  %365 = vst.msk [vmem:[#allocation2 + $0xf0] sm:$0xff] %vm334_vm0, %v10726_v1  ;;  %v768_v39 = vor.u32 %v767_v32, %v764_v31  ;;  %v625_v53 = vld [vmem:[#allocation2 + $0x40] sm:$0xff]  ;;  %v489_v57 = vld [vmem:[%s11104_s23 + $0x50] sm:$0xff] }
  0x1d   : > { %366 = vst.msk [vmem:[#allocation2 + $0xf8] sm:$0xff] %vm334_vm0, %v10726_v1  ;;  %367 = vst.msk [vmem:[#allocation2 + $0x100] sm:$0xff] %vm334_vm0, %v10726_v1  ;;  %v490_v58 = vld [vmem:[%s11104_s23 + $0x58] sm:$0xff]  ;;  %v491_v59 = vld [vmem:[%s11104_s23 + $0x60] sm:$0xff] }
  0x1e   : > { %368 = vst.msk [vmem:[#allocation2 + $0x108] sm:$0xff] %vm334_vm0, %v10726_v1  ;;  %369 = vst.msk [vmem:[#allocation2 + $0x110] sm:$0xff] %vm334_vm0, %v10726_v1  ;;  %v492_v0 = vld [vmem:[%s11104_s23 + $0x68] sm:$0xff]  ;;  %v499_v32 = vld [vmem:[%s11104_s23 + $0xa0] sm:$0xff] }
  0x1f   : > { %370 = vst.msk [vmem:[#allocation2 + $0x118] sm:$0xff] %vm334_vm0, %v10726_v1  ;;  %371 = vst.msk [vmem:[#allocation2 + $0x120] sm:$0xff] %vm334_vm0, %v10726_v1  ;;  %v10594_v23 = vld [vmem:[%s15712_s1 + $0x28] sm:$0xff]  }
  0x20   : > { %372 = vst.msk [vmem:[#allocation2 + $0x128] sm:$0xff] %vm334_vm0, %v10726_v1  ;;  %373 = vst.msk [vmem:[#allocation2 + $0x130] sm:$0xff] %vm334_vm0, %v10726_v1  ;;  %9639 = vmatpush3.bf16.msra.mxu0 %v10594_v23  ;;  %10556 = vmatpush3.bf16.msra.mxu1 %v10594_v23  ;;  %v633_v23 = vld [vmem:[#allocation2 + $0x80] sm:$0xff] }
  0x21   : > { %374 = vst.msk [vmem:[#allocation2 + $0x138] sm:$0xff] %vm334_vm0, %v10726_v1  ;;  %375 = vst.msk [vmem:[#allocation2 + $0x140] sm:$0xff] %vm334_vm0, %v10726_v1 }
  0x22   : > { %376 = vst.msk [vmem:[#allocation2 + $0x148] sm:$0xff] %vm334_vm0, %v10726_v1  ;;  %377 = vst.msk [vmem:[#allocation2 + $0x150] sm:$0xff] %vm334_vm0, %v10726_v1 }
  0x23   : > { %378 = vst.msk [vmem:[#allocation2 + $0x158] sm:$0xff] %vm334_vm0, %v10726_v1  ;;  %379 = vst.msk [vmem:[#allocation2 + $0x160] sm:$0xff] %vm334_vm0, %v10726_v1 }
  0x24   : > { %380 = vst.msk [vmem:[#allocation2 + $0x168] sm:$0xff] %vm334_vm0, %v10726_v1  ;;  %381 = vst.msk [vmem:[#allocation2 + $0x170] sm:$0xff] %vm334_vm0, %v10726_v1 }
  0x25   : > { %382 = vst.msk [vmem:[#allocation2 + $0x178] sm:$0xff] %vm334_vm0, %v10726_v1  ;;  %383 = vst.msk [vmem:[#allocation2 + $0x180] sm:$0xff] %vm334_vm0, %v10726_v1 }
  0x26   : > { %384 = vst.msk [vmem:[#allocation2 + $0x188] sm:$0xff] %vm334_vm0, %v10726_v1  ;;  %385 = vst.msk [vmem:[#allocation2 + $0x190] sm:$0xff] %vm334_vm0, %v10726_v1 }
  0x27   : > { %386 = vst.msk [vmem:[#allocation2 + $0x198] sm:$0xff] %vm334_vm0, %v10726_v1  ;;  %390 = vst.msk [vmem:[#allocation2 + $0x1b8] sm:$0xff] %vm334_vm0, %v10726_v1 }
  0x28   : > { %391 = vst.msk [vmem:[#allocation2 + $0x1c0] sm:$0xff] %vm334_vm0, %v10726_v1  ;;  %392 = vst.msk [vmem:[#allocation2 + $0x1c8] sm:$0xff] %vm334_vm0, %v10726_v1 }
  0x29   : > { %393 = vst.msk [vmem:[#allocation2 + $0x1d0] sm:$0xff] %vm334_vm0, %v10726_v1  ;;  %394 = vst.msk [vmem:[#allocation2 + $0x1d8] sm:$0xff] %vm334_vm0, %v10726_v1 }
  0x2a   : > { %395 = vst.msk [vmem:[#allocation2 + $0x1e0] sm:$0xff] %vm334_vm0, %v10726_v1  ;;  %396 = vst.msk [vmem:[#allocation2 + $0x1e8] sm:$0xff] %vm334_vm0, %v10726_v1 }
  0x2b   : > { %397 = vst.msk [vmem:[#allocation2 + $0x1f0] sm:$0xff] %vm334_vm0, %v10726_v1  ;;  %398 = vst.msk [vmem:[#allocation2 + $0x1f8] sm:$0xff] %vm334_vm0, %v10726_v1 }
  0x2c   : > { %399 = vst.msk [vmem:[#allocation2 + $0x200] sm:$0xff] %vm334_vm0, %v10726_v1  ;;  %400 = vst.msk [vmem:[#allocation2 + $0x208] sm:$0xff] %vm334_vm0, %v10726_v1 }
  0x2d   : > { %401 = vst.msk [vmem:[#allocation2 + $0x210] sm:$0xff] %vm334_vm0, %v10726_v1  ;;  %402 = vst.msk [vmem:[#allocation2 + $0x218] sm:$0xff] %vm334_vm0, %v10726_v1 }
  0x2e   : > { %403 = vst.msk [vmem:[#allocation2 + $0x220] sm:$0xff] %vm334_vm0, %v10726_v1  ;;  %404 = vst.msk [vmem:[#allocation2 + $0x228] sm:$0xff] %vm334_vm0, %v10726_v1 }
  0x2f   : > { %405 = vst.msk [vmem:[#allocation2 + $0x230] sm:$0xff] %vm334_vm0, %v10726_v1  ;;  %406 = vst.msk [vmem:[#allocation2 + $0x238] sm:$0xff] %vm334_vm0, %v10726_v1  ;;  %v673_v46 = vld [vmem:[#allocation2 + $0x1c0] sm:$0xff] }
  0x30   : > { %407 = vst.msk [vmem:[#allocation3] sm:$0xff] %vm334_vm0, %v10726_v1  ;;  %408 = vst.msk [vmem:[#allocation3 + $0x8] sm:$0xff] %vm334_vm0, %v10726_v1 }
  0x31   : > { %409 = vst.msk [vmem:[#allocation3 + $0x10] sm:$0xff] %vm334_vm0, %v10726_v1  ;;  %410 = vst.msk [vmem:[#allocation3 + $0x18] sm:$0xff] %vm334_vm0, %v10726_v1  ;;  %v677_v22 = vld [vmem:[#allocation2 + $0x1e0] sm:$0xff] }
  0x32   : > { %411 = vst.msk [vmem:[#allocation3 + $0x20] sm:$0xff] %vm334_vm0, %v10726_v1  ;;  %412 = vst.msk [vmem:[#allocation3 + $0x28] sm:$0xff] %vm334_vm0, %v10726_v1 }
  0x33   : > { %413 = vst.msk [vmem:[#allocation3 + $0x30] sm:$0xff] %vm334_vm0, %v10726_v1  ;;  %414 = vst.msk [vmem:[#allocation3 + $0x38] sm:$0xff] %vm334_vm0, %v10726_v1 }
  0x34   : > { %415 = vst.msk [vmem:[#allocation3 + $0x40] sm:$0xff] %vm334_vm0, %v10726_v1  ;;  %416 = vst.msk [vmem:[#allocation3 + $0x48] sm:$0xff] %vm334_vm0, %v10726_v1 }
  0x35   : > { %417 = vst.msk [vmem:[#allocation3 + $0x50] sm:$0xff] %vm334_vm0, %v10726_v1  ;;  %418 = vst.msk [vmem:[#allocation3 + $0x58] sm:$0xff] %vm334_vm0, %v10726_v1 }
  0x36   : > { %419 = vst.msk [vmem:[#allocation3 + $0x60] sm:$0xff] %vm334_vm0, %v10726_v1  ;;  %420 = vst.msk [vmem:[#allocation3 + $0x68] sm:$0xff] %vm334_vm0, %v10726_v1 }
  0x37   : > { %421 = vst.msk [vmem:[#allocation3 + $0x70] sm:$0xff] %vm334_vm0, %v10726_v1  ;;  %422 = vst.msk [vmem:[#allocation3 + $0x78] sm:$0xff] %vm334_vm0, %v10726_v1 }
  0x38   : > { %423 = vst.msk [vmem:[#allocation3 + $0x80] sm:$0xff] %vm334_vm0, %v10726_v1  ;;  %424 = vst.msk [vmem:[#allocation3 + $0x88] sm:$0xff] %vm334_vm0, %v10726_v1 }
  0x39   : > { %425 = vst.msk [vmem:[#allocation3 + $0x90] sm:$0xff] %vm334_vm0, %v10726_v1  ;;  %426 = vst.msk [vmem:[#allocation3 + $0x98] sm:$0xff] %vm334_vm0, %v10726_v1 }
  0x3a   : > { %427 = vst.msk [vmem:[#allocation3 + $0xa0] sm:$0xff] %vm334_vm0, %v10726_v1  ;;  %428 = vst.msk [vmem:[#allocation3 + $0xa8] sm:$0xff] %vm334_vm0, %v10726_v1 }
  0x3b   : > { %429 = vst.msk [vmem:[#allocation3 + $0xb0] sm:$0xff] %vm334_vm0, %v10726_v1  ;;  %430 = vst.msk [vmem:[#allocation3 + $0xb8] sm:$0xff] %vm334_vm0, %v10726_v1 }
  0x3c   : > { %431 = vst.msk [vmem:[#allocation3 + $0xc0] sm:$0xff] %vm334_vm0, %v10726_v1  ;;  %432 = vst.msk [vmem:[#allocation3 + $0xc8] sm:$0xff] %vm334_vm0, %v10726_v1 }
  0x3d   : > { %433 = vst.msk [vmem:[#allocation3 + $0xd0] sm:$0xff] %vm334_vm0, %v10726_v1  ;;  %434 = vst.msk [vmem:[#allocation3 + $0xd8] sm:$0xff] %vm334_vm0, %v10726_v1 }
  0x3e   : > { %435 = vst.msk [vmem:[#allocation3 + $0xe0] sm:$0xff] %vm334_vm0, %v10726_v1  ;;  %436 = vst.msk [vmem:[#allocation3 + $0xe8] sm:$0xff] %vm334_vm0, %v10726_v1 }
  0x3f   : > { %437 = vst.msk [vmem:[#allocation3 + $0xf0] sm:$0xff] %vm334_vm0, %v10726_v1  ;;  %438 = vst.msk [vmem:[#allocation3 + $0xf8] sm:$0xff] %vm334_vm0, %v10726_v1 }
  0x40   : > { %439 = vst.msk [vmem:[#allocation3 + $0x100] sm:$0xff] %vm334_vm0, %v10726_v1  ;;  %440 = vst.msk [vmem:[#allocation3 + $0x108] sm:$0xff] %vm334_vm0, %v10726_v1 }
  0x41   : > { %441 = vst.msk [vmem:[#allocation3 + $0x110] sm:$0xff] %vm334_vm0, %v10726_v1  ;;  %442 = vst.msk [vmem:[#allocation3 + $0x118] sm:$0xff] %vm334_vm0, %v10726_v1 }
  0x42   : > { %443 = vst.msk [vmem:[#allocation3 + $0x120] sm:$0xff] %vm334_vm0, %v10726_v1  ;;  %444 = vst.msk [vmem:[#allocation3 + $0x128] sm:$0xff] %vm334_vm0, %v10726_v1 }
  0x43   : > { %445 = vst.msk [vmem:[#allocation3 + $0x130] sm:$0xff] %vm334_vm0, %v10726_v1  ;;  %446 = vst.msk [vmem:[#allocation3 + $0x138] sm:$0xff] %vm334_vm0, %v10726_v1 }
  0x44   : > { %447 = vst.msk [vmem:[#allocation3 + $0x140] sm:$0xff] %vm334_vm0, %v10726_v1  ;;  %448 = vst.msk [vmem:[#allocation3 + $0x148] sm:$0xff] %vm334_vm0, %v10726_v1 }
  0x45   : > { %449 = vst.msk [vmem:[#allocation3 + $0x150] sm:$0xff] %vm334_vm0, %v10726_v1  ;;  %450 = vst.msk [vmem:[#allocation3 + $0x158] sm:$0xff] %vm334_vm0, %v10726_v1 }
  0x46   : > { %451 = vst.msk [vmem:[#allocation3 + $0x160] sm:$0xff] %vm334_vm0, %v10726_v1  ;;  %452 = vst.msk [vmem:[#allocation3 + $0x168] sm:$0xff] %vm334_vm0, %v10726_v1 }
  0x47   : > { %453 = vst.msk [vmem:[#allocation3 + $0x170] sm:$0xff] %vm334_vm0, %v10726_v1  ;;  %454 = vst.msk [vmem:[#allocation3 + $0x178] sm:$0xff] %vm334_vm0, %v10726_v1 }
  0x48   : > { %455 = vst.msk [vmem:[#allocation3 + $0x180] sm:$0xff] %vm334_vm0, %v10726_v1  ;;  %456 = vst.msk [vmem:[#allocation3 + $0x188] sm:$0xff] %vm334_vm0, %v10726_v1 }
  0x49   : > { %457 = vst.msk [vmem:[#allocation3 + $0x190] sm:$0xff] %vm334_vm0, %v10726_v1  ;;  %458 = vst.msk [vmem:[#allocation3 + $0x198] sm:$0xff] %vm334_vm0, %v10726_v1 }
  0x4a   : > { %459 = vst.msk [vmem:[#allocation3 + $0x1a0] sm:$0xff] %vm334_vm0, %v10726_v1  ;;  %460 = vst.msk [vmem:[#allocation3 + $0x1a8] sm:$0xff] %vm334_vm0, %v10726_v1 }
  0x4b   : > { %461 = vst.msk [vmem:[#allocation3 + $0x1b0] sm:$0xff] %vm334_vm0, %v10726_v1  ;;  %462 = vst.msk [vmem:[#allocation3 + $0x1b8] sm:$0xff] %vm334_vm0, %v10726_v1 }
  0x4c   : > { %463 = vst.msk [vmem:[#allocation3 + $0x1c0] sm:$0xff] %vm334_vm0, %v10726_v1  ;;  %464 = vst.msk [vmem:[#allocation3 + $0x1c8] sm:$0xff] %vm334_vm0, %v10726_v1 }
  0x4d   : > { %465 = vst.msk [vmem:[#allocation3 + $0x1d0] sm:$0xff] %vm334_vm0, %v10726_v1  ;;  %466 = vst.msk [vmem:[#allocation3 + $0x1d8] sm:$0xff] %vm334_vm0, %v10726_v1 }
  0x4e   : > { %467 = vst.msk [vmem:[#allocation3 + $0x1e0] sm:$0xff] %vm334_vm0, %v10726_v1  ;;  %468 = vst.msk [vmem:[#allocation3 + $0x1e8] sm:$0xff] %vm334_vm0, %v10726_v1 }
  0x4f   : > { %469 = vst.msk [vmem:[#allocation3 + $0x1f0] sm:$0xff] %vm334_vm0, %v10726_v1  ;;  %470 = vst.msk [vmem:[#allocation3 + $0x1f8] sm:$0xff] %vm334_vm0, %v10726_v1 }
  0x50   : > { %471 = vst.msk [vmem:[#allocation3 + $0x200] sm:$0xff] %vm334_vm0, %v10726_v1  ;;  %472 = vst.msk [vmem:[#allocation3 + $0x208] sm:$0xff] %vm334_vm0, %v10726_v1 }
  0x51   : > { %473 = vst.msk [vmem:[#allocation3 + $0x210] sm:$0xff] %vm334_vm0, %v10726_v1  ;;  %474 = vst.msk [vmem:[#allocation3 + $0x218] sm:$0xff] %vm334_vm0, %v10726_v1 }
  0x52   : > { %475 = vst.msk [vmem:[#allocation3 + $0x220] sm:$0xff] %vm334_vm0, %v10726_v1  ;;  %476 = vst.msk [vmem:[#allocation3 + $0x228] sm:$0xff] %vm334_vm0, %v10726_v1 }
  0x53   : > { %477 = vst.msk [vmem:[#allocation3 + $0x230] sm:$0xff] %vm334_vm0, %v10726_v1  ;;  %478 = vst.msk [vmem:[#allocation3 + $0x238] sm:$0xff] %vm334_vm0, %v10726_v1 }
  0x54   : > { %536 = vst.msk [vmem:[#allocation2 + $0x1a8] sm:$0xff] %vm334_vm0, %v503_v6  ;;  %537 = vst.msk [vmem:[#allocation2 + $0x1b0] sm:$0xff] %vm334_vm0, %v504_v7  ;;  %v493_v6 = vld [vmem:[%s11104_s23 + $0x70] sm:$0xff]  ;;  %v494_v7 = vld [vmem:[%s11104_s23 + $0x78] sm:$0xff] }
  0x55   : > { %512 = vst.msk [vmem:[#allocation2 + $0x28] sm:$0xff] %vm334_vm0, %v479_v8  ;;  %513 = vst.msk [vmem:[#allocation2 + $0x30] sm:$0xff] %vm334_vm0, %v480_v9  ;;  %v495_v8 = vld [vmem:[%s11104_s23 + $0x80] sm:$0xff] }
  0x56   : > { %539 = vst.msk [vmem:[#allocation2 + $0x1d0] sm:$0xff] %vm334_vm0, %v506_v10  ;;  %538 = vst.msk [vmem:[#allocation2 + $0x1c8] sm:$0xff] %vm334_vm0, %v505_v11 }
  0x57   : > { %514 = vst.msk [vmem:[#allocation2 + $0x48] sm:$0xff] %vm334_vm0, %v481_v14  ;;  %515 = vst.msk [vmem:[#allocation2 + $0x50] sm:$0xff] %vm334_vm0, %v482_v16  ;;  %v496_v14 = vld [vmem:[%s11104_s23 + $0x88] sm:$0xff] }
  0x58   : > { %534 = vst.msk [vmem:[#allocation2 + $0x188] sm:$0xff] %vm334_vm0, %v501_v17  ;;  %535 = vst.msk [vmem:[#allocation2 + $0x190] sm:$0xff] %vm334_vm0, %v502_v19 }
  0x59   : > { %540 = vst.msk [vmem:[#allocation2 + $0x1e8] sm:$0xff] %vm334_vm0, %v507_v20  ;;  %541 = vst.msk [vmem:[#allocation2 + $0x1f0] sm:$0xff] %vm334_vm0, %v508_v24  ;;  %v497_v20 = vld [vmem:[%s11104_s23 + $0x90] sm:$0xff] }
  0x5a   : > { %516 = vst.msk [vmem:[#allocation2 + $0x68] sm:$0xff] %vm334_vm0, %v483_v25  ;;  %517 = vst.msk [vmem:[#allocation2 + $0x70] sm:$0xff] %vm334_vm0, %v484_v26 }
  0x5b   : > { %v670_v28 = vld [vmem:[#allocation2 + $0x1a8] sm:$0xff]  ;;  %v671_v29 = vld [vmem:[#allocation2 + $0x1b0] sm:$0xff]  ;;  %542 = vst.msk [vmem:[#allocation2 + $0x208] sm:$0xff] %vm334_vm0, %v509_v27  ;;  %543 = vst.msk [vmem:[#allocation2 + $0x210] sm:$0xff] %vm334_vm0, %v510_v35 }
  0x5c   : > { %v622_v30 = vld [vmem:[#allocation2 + $0x28] sm:$0xff]  ;;  %v11154_v33 = vpack.c.bf16 %v670_v28, %v669_v18  ;;  %v623_v37 = vld [vmem:[#allocation2 + $0x30] sm:$0xff]  ;;  %v11164_v38 = vpack.c.bf16 %v671_v29, %v671_v29  ;;  %518 = vst.msk [vmem:[#allocation2 + $0x88] sm:$0xff] %vm334_vm0, %v485_v36  ;;  %519 = vst.msk [vmem:[#allocation2 + $0x90] sm:$0xff] %vm334_vm0, %v486_v40  ;;  %v11176_v45 = vpack.c.bf16 %v671_v29, %v670_v28 }
  0x5d   : > { %v11156_v34 = vpack.c.bf16 %v622_v30, %v621_v21  ;;  %v675_v41 = vld [vmem:[#allocation2 + $0x1d0] sm:$0xff]  ;;  %520 = vst.msk [vmem:[#allocation2 + $0xa8] sm:$0xff] %vm334_vm0, %v487_v43  ;;  %v11183_v49 = vpack.c.bf16 %v623_v37, %v622_v30  ;;  %v11188_v50 = vpack.c.bf16 %v623_v37, %v623_v37  ;;  %v674_v52 = vld [vmem:[#allocation2 + $0x1c8] sm:$0xff]  ;;  %521 = vst.msk [vmem:[#allocation2 + $0xb0] sm:$0xff] %vm334_vm0, %v488_v48 }
  0x5e   : > { %1082 = vrot.lane.b32.xlu0 %v11154_v33, %s10727_s29  ;;  %v11190_v51 = vpack.c.bf16 %v675_v41, %v675_v41  ;;  %v626_v54 = vld [vmem:[#allocation2 + $0x48] sm:$0xff]  ;;  %522 = vst.msk [vmem:[#allocation2 + $0xc8] sm:$0xff] %vm334_vm0, %v489_v57  ;;  %523 = vst.msk [vmem:[#allocation2 + $0xd0] sm:$0xff] %vm334_vm0, %v490_v58  ;;  %v11200_v60 = vpack.c.bf16 %v674_v52, %v673_v46  ;;  %v866_v62 = vshrl.u32 %v11176_v45, 16  ;;  %v869_v63 = vshll.u32 %v11176_v45, 16  ;;  %v627_v1 = vld [vmem:[#allocation2 + $0x50] sm:$0xff] }
  0x5f   : > { %1034 = vrot.lane.b32.xlu1 %v11156_v34, %s10727_s29  ;;  %v11169_v42 = vld [vmem:[#allocation2 + $0x188] sm:$0xff]  ;;  %v11173_v44 = vld [vmem:[#allocation2 + $0x190] sm:$0xff]  ;;  %v11202_v61 = vpack.c.bf16 %v626_v54, %v625_v53  ;;  %524 = vst.msk [vmem:[#allocation2 + $0xe8] sm:$0xff] %vm334_vm0, %v491_v59  ;;  %v770_v4 = vshrl.u32 %v11183_v49, 16  ;;  %v773_v5 = vshll.u32 %v11183_v49, 16  ;;  %525 = vst.msk [vmem:[#allocation2 + $0xf0] sm:$0xff] %vm334_vm0, %v492_v0  ;;  %v11220_v9 = vpack.c.bf16 %v675_v41, %v674_v52 }
  0x60   : > { %v11180_v47 = vpack.c.bf16 %v11173_v44, %v11169_v42  ;;  %526 = vst.msk [vmem:[#allocation2 + $0x108] sm:$0xff] %vm334_vm0, %v493_v6  ;;  %527 = vst.msk [vmem:[#allocation2 + $0x110] sm:$0xff] %vm334_vm0, %v494_v7  ;;  %v11222_v10 = vpack.c.bf16 %v627_v1, %v627_v1  ;;  %v868_v11 = vrot.slane %v866_v62, 4  ;;  %v871_v17 = vrot.slane %v869_v63, 5  ;;  %v498_v21 = vld [vmem:[%s11104_s23 + $0x98] sm:$0xff]  ;;  %v678_v25 = vld [vmem:[#allocation2 + $0x1e8] sm:$0xff] }
  0x61   : > { %528 = vst.msk [vmem:[#allocation2 + $0x128] sm:$0xff] %vm334_vm0, %v495_v8  ;;  %v772_v18 = vrot.slane %v770_v4, 4  ;;  %v775_v19 = vrot.slane %v773_v5, 5  ;;  %529 = vst.msk [vmem:[#allocation2 + $0x130] sm:$0xff] %vm334_vm0, %v496_v14  ;;  %v11240_v24 = vpack.c.bf16 %v627_v1, %v626_v54  ;;  %v679_v26 = vld [vmem:[#allocation2 + $0x1f0] sm:$0xff]  ;;  %v10595_v27 = vld [vmem:[%s15712_s1 + $0x60] sm:$0xff]   ;;  %v11261_v37 = vpack.c.bf16 %v678_v25, %v677_v22 }
  0x62   : > { %1084 = vrot.lane.b32.xlu0 %v11164_v38, %s10727_s29  ;;  %v858_v55 = vshrl.u32 %v11180_v47, 16  ;;  %v861_v56 = vshll.u32 %v11180_v47, 16  ;;  %530 = vst.msk [vmem:[#allocation2 + $0x148] sm:$0xff] %vm334_vm0, %v497_v20  ;;  %531 = vst.msk [vmem:[#allocation2 + $0x150] sm:$0xff] %vm334_vm0, %v498_v21  ;;  %v11249_v28 = vor.u32 %v871_v17, %v868_v11  ;;  %v874_v30 = vshrl.u32 %v11220_v9, 16  ;;  %9640 = vmatprep.subr.bf16.mxu0 %v10595_v27  ;;  %v500_v35 = vld [vmem:[%s11104_s23 + $0xa8] sm:$0xff] }
  0x63   : > { %889 = vrot.lane.b32.xlu1 %v768_v39, %s10727_s29  ;;  %v11251_v29 = vor.u32 %v775_v19, %v772_v18  ;;  %v877_v31 = vshll.u32 %v11220_v9, 16  ;;  %532 = vst.msk [vmem:[#allocation2 + $0x168] sm:$0xff] %vm334_vm0, %v499_v32  ;;  %v10596_v36 = vld [vmem:[%s15712_s1 + $0x20] sm:$0xff]   ;;  %10549 = vmatprep.subr.bf16.mxu1 %v10595_v27  ;;  %v11263_v39 = vpack.c.bf16 %v679_v26, %v679_v26  ;;  %533 = vst.msk [vmem:[#allocation2 + $0x170] sm:$0xff] %vm334_vm0, %v500_v35  ;;  %v630_v52 = vld [vmem:[#allocation2 + $0x68] sm:$0xff] }
  0x64   : > { %v860_v2 = vrot.slane %v858_v55, 4  ;;  %v863_v3 = vrot.slane %v861_v56, 5  ;;  %15965 = vst [vmem:[#allocation6_spill] sm:$0xff] %v11249_v28  ;;  %v876_v40 = vrot.slane %v874_v30, 4  ;;  %v778_v43 = vshrl.u32 %v11240_v24, 16  ;;  %v629_v48 = vld [vmem:[#allocation2 + $0x60] sm:$0xff]  ;;  %9641 = vmatpush3.bf16.msra.mxu0 %v10596_v36  ;;  %10557 = vmatpush3.bf16.msra.mxu1 %v10596_v36 }
  0x65   : > { %15966 = vst [vmem:[#allocation7_spill] sm:$0xff] %v11251_v29  ;;  %v879_v41 = vrot.slane %v877_v31, 5  ;;  %v781_v46 = vshll.u32 %v11240_v24, 16  ;;  %v11272_v53 = vpack.c.bf16 %v679_v26, %v678_v25  ;;  %v10597_v54 = vld [vmem:[%s15712_s1 + $0x58] sm:$0xff]   ;;  %v11286_v57 = vpack.c.bf16 %v630_v52, %v629_v48  ;;  %v10599_v62 = vld [vmem:[%s15712_s1 + $0x50] sm:$0xff]   ;;  %v681_v5 = vld [vmem:[#allocation2 + $0x200] sm:$0xff] }
  0x66   : > { %1036 = vrot.lane.b32.xlu0 %v11188_v50, %s10727_s29  ;;  %v11230_v16 = vor.u32 %v863_v3, %v860_v2  ;;  %v10598_v55 = vld [vmem:[%s15712_s1 + $0x18] sm:$0xff]   ;;  %v780_v58 = vrot.slane %v778_v43, 4  ;;  %v631_v63 = vld [vmem:[#allocation2 + $0x70] sm:$0xff]  ;;  %9642 = vmatprep.subr.bf16.mxu0 %v10597_v54  ;;  %v11306_v7 = vld [vmem:[#allocation2 + $0x208] sm:$0xff] }
  0x67   : > { %1088 = vrot.lane.b32.xlu1 %v11190_v51, %s10727_s29  ;;  %v11284_v56 = vor.u32 %v879_v41, %v876_v40  ;;  %15968 = vst [vmem:[#allocation9_spill] sm:$0xff] %v11286_v57  ;;  %v783_v59 = vrot.slane %v781_v46, 5  ;;  %10550 = vmatprep.subr.bf16.mxu1 %v10597_v54  ;;  %v882_v0 = vshrl.u32 %v11272_v53, 16  ;;  %v885_v1 = vshll.u32 %v11272_v53, 16  ;;  %v10600_v6 = vld [vmem:[%s15712_s1 + $0x10] sm:$0xff]   ;;  %v10601_v14 = vld [vmem:[%s15712_s1 + $0x48] sm:$0xff]  }
  0x68   : > { %15964 = vst [vmem:[#allocation5_spill] sm:$0xff] %v11230_v16  ;;  %9643 = vmatpush3.bf16.msra.mxu0 %v10598_v55  ;;  %10558 = vmatpush3.bf16.msra.mxu1 %v10598_v55  ;;  %v11297_v2 = vpack.c.bf16 %v631_v63, %v631_v63  ;;  %v11299_v3 = vpack.c.bf16 %v631_v63, %v630_v52  ;;  %v11308_v8 = vld [vmem:[#allocation2 + $0x210] sm:$0xff]  ;;  %v10602_v18 = vld [vmem:[%s15712_s1 + $0x8] sm:$0xff]   ;;  %v10603_v26 = vld [vmem:[%s15712_s1 + $0x40] sm:$0xff]   ;;  %v11357_v54 = vrot.slane %v11183_v49, 5 }
  0x69   : > { %15967 = vst [vmem:[#allocation8_spill] sm:$0xff] %v11284_v56  ;;  %9644 = vmatprep.subr.bf16.mxu0 %v10599_v62  ;;  %10551 = vmatprep.subr.bf16.mxu1 %v10599_v62  ;;  %v11301_v4 = vor.u32 %v783_v59, %v780_v58  ;;  %v884_v11 = vrot.slane %v882_v0, 4  ;;  %v887_v17 = vrot.slane %v885_v1, 5  ;;  %v11321_v19 = vpack.c.bf16 %v11306_v7, %v681_v5  ;;  %v634_v25 = vld [vmem:[#allocation2 + $0x88] sm:$0xff]  ;;  %v624_v27 = vld [vmem:[#allocation2 + $0x38] sm:$0xff]  ;;  %v10604_v30 = vld [vmem:[%s15712_s1] sm:$0xff]  }
  0x6a   : > { %1086 = vrot.lane.b32.xlu0 %v11200_v60, %s10727_s29  ;;  %15969 = vst [vmem:[#allocation10_spill] sm:$0xff] %v11297_v2  ;;  %v11325_v20 = vpack.c.bf16 %v11308_v8, %v11308_v8  ;;  %v786_v21 = vshrl.u32 %v11299_v3, 16  ;;  %v789_v22 = vshll.u32 %v11299_v3, 16  ;;  %v10605_v31 = vld [vmem:[%s15712_s1 + $0xf8] sm:$0xff]   ;;  %v11344_v35 = vpack.c.bf16 %v634_v25, %v633_v23  ;;  %v635_v41 = vld [vmem:[#allocation2 + $0x90] sm:$0xff]  ;;  %v637_v58 = vld [vmem:[#allocation2 + $0xa0] sm:$0xff] }
  0x6b   : > { %1038 = vrot.lane.b32.xlu1 %v11202_v61, %s10727_s29  ;;  %15970 = vst [vmem:[#allocation11_spill] sm:$0xff] %v11301_v4  ;;  %15971 = vst [vmem:[#allocation12_spill] sm:$0xff] %v11321_v19  ;;  %v11342_v32 = vor.u32 %v887_v17, %v884_v11  ;;  %v738_v43 = vpack.c.bf16 %v624_v27, %v624_v27  ;;  %v11350_v46 = vpack.c.bf16 %v635_v41, %v635_v41  ;;  %v638_v59 = vld [vmem:[#allocation2 + $0xa8] sm:$0xff]  ;;  %v639_v62 = vld [vmem:[#allocation2 + $0xb0] sm:$0xff] }
  0x6c   : > { %9645 = vmatpush3.bf16.msra.mxu0 %v10600_v6  ;;  %10559 = vmatpush3.bf16.msra.mxu1 %v10600_v6  ;;  %15972 = vst [vmem:[#allocation13_spill] sm:$0xff] %v11325_v20  ;;  %15974 = vst [vmem:[#allocation15_spill] sm:$0xff] %v11344_v35  ;;  %v788_v36 = vrot.slane %v786_v21, 4  ;;  %v791_v40 = vrot.slane %v789_v22, 5  ;;  %v11352_v48 = vpack.c.bf16 %v635_v41, %v634_v25  ;;  %v628_v49 = vld [vmem:[#allocation2 + $0x58] sm:$0xff]  ;;  %v11380_v21 = vrot.slane %v11240_v24, 5 }
  0x6d   : > { %9646 = vmatprep.subr.bf16.mxu0 %v10601_v14  ;;  %10552 = vmatprep.subr.bf16.mxu1 %v10601_v14  ;;  %15973 = vst [vmem:[#allocation14_spill] sm:$0xff] %v11342_v32  ;;  %15975 = vst [vmem:[#allocation16_spill] sm:$0xff] %v11350_v46  ;;  %v958_v55 = vrot.slane %v738_v43, 5  ;;  %v11369_v5 = vpack.c.bf16 %v638_v59, %v637_v58  ;;  %v11371_v6 = vpack.c.bf16 %v639_v62, %v639_v62  ;;  %v641_v22 = vld [vmem:[#allocation2 + $0xc0] sm:$0xff]  ;;  %v642_v23 = vld [vmem:[#allocation2 + $0xc8] sm:$0xff] }
  0x6e   : > { %1040 = vrot.lane.b32.xlu0 %v11222_v10, %s10727_s29  ;;  %v11354_v52 = vor.u32 %v791_v40, %v788_v36  ;;  %v794_v63 = vshrl.u32 %v11352_v48, 16  ;;  %v797_v0 = vshll.u32 %v11352_v48, 16  ;;  %v11377_v11 = vpack.c.bf16 %v639_v62, %v638_v59  ;;  %v632_v25 = vld [vmem:[#allocation2 + $0x78] sm:$0xff]  ;;  %v643_v40 = vld [vmem:[#allocation2 + $0xd0] sm:$0xff] }
  0x6f   : > { %913 = vrot.lane.b32.xlu1 %v11230_v16, %s10727_s29  ;;  %v11367_v1 = vsel %vm953_vm1, %v11357_v54, %v958_v55  ;;  %15977 = vst [vmem:[#allocation18_spill] sm:$0xff] %v11369_v5  ;;  %15978 = vst [vmem:[#allocation19_spill] sm:$0xff] %v11371_v6  ;;  %v11393_v24 = vld [vmem:[%s15712_s1 + $0x118] sm:$0xff]   ;;  %v11400_v36 = vpack.c.bf16 %v642_v23, %v641_v22  ;;  %v740_v55 = vpack.c.bf16 %v632_v25, %v632_v25  ;;  %v647_v25 = vld [vmem:[#allocation2 + $0xf0] sm:$0xff] }
  0x70   : > { %9647 = vmatpush3.bf16.msra.mxu0 %v10602_v18  ;;  %10560 = vmatpush3.bf16.msra.mxu1 %v10602_v18  ;;  %15976 = vst [vmem:[#allocation17_spill] sm:$0xff] %v11354_v52  ;;  %v796_v14 = vrot.slane %v794_v63, 4  ;;  %v799_v17 = vrot.slane %v797_v0, 5  ;;  %v739_v18 = vpack.c.bf16 %v628_v49, %v628_v49  ;;  %v11406_v59 = vpack.c.bf16 %v643_v40, %v643_v40 }
  0x71   : > { %9648 = vmatprep.subr.bf16.mxu0 %v10603_v26  ;;  %10553 = vmatprep.subr.bf16.mxu1 %v10603_v26  ;;  %15980 = vst [vmem:[#allocation21_spill] sm:$0xff] %v11400_v36  ;;  %v11412_v62 = vpack.c.bf16 %v643_v40, %v642_v23  ;;  %v11417_v0 = vrot.slane %v11299_v3, 5  ;;  %v964_v49 = vrot.slane %v740_v55, 5  ;;  %v636_v3 = vld [vmem:[#allocation2 + $0x98] sm:$0xff] }
  0x72   : > { %915 = vrot.lane.b32.xlu0 %v11249_v28, %s10727_s29  ;;  %v11386_v26 = vor.u32 %v799_v17, %v796_v14  ;;  %v961_v27 = vrot.slane %v739_v18, 5  ;;  %15981 = vst [vmem:[#allocation22_spill] sm:$0xff] %v11406_v59  ;;  %v645_v14 = vld [vmem:[#allocation2 + $0xe0] sm:$0xff]  ;;  %v646_v17 = vld [vmem:[#allocation2 + $0xe8] sm:$0xff] }
  0x73   : > { %891 = vrot.lane.b32.xlu1 %v11251_v29, %s10727_s29  ;;  %v810_v18 = vshrl.u32 %v11412_v62, 16  ;;  %v813_v22 = vshll.u32 %v11412_v62, 16  ;;  %v11427_v23 = vsel %vm953_vm1, %v11417_v0, %v964_v49  ;;  %v11446_v49 = vrot.slane %v11352_v48, 5 }
  0x74   : > { %9649 = vmatpush3.bf16.msra.mxu0 %v10604_v30  ;;  %10561 = vmatpush3.bf16.msra.mxu1 %v10604_v30  ;;  %15979 = vst [vmem:[#allocation20_spill] sm:$0xff] %v11386_v26  ;;  %v802_v30 = vshrl.u32 %v11377_v11, 16  ;;  %v11404_v58 = vsel %vm953_vm1, %v11380_v21, %v961_v27  ;;  %15983 = vst [vmem:[#allocation24_spill] sm:$0xff] %v11427_v23  ;;  %v11429_v27 = vpack.c.bf16 %v646_v17, %v645_v14 }
  0x75   : > { %9746 = vmatprep.subr.bf16.mxu1 %v10605_v31  ;;  %v805_v31 = vshll.u32 %v11377_v11, 16  ;;  %10386 = vmatprep.subr.bf16.mxu0 %v11393_v24  ;;  %v812_v40 = vrot.slane %v810_v18, 4  ;;  %15987 = vst [vmem:[#allocation28_spill] sm:$0xff] %v11446_v49  ;;  %v650_v18 = vld [vmem:[#allocation2 + $0x108] sm:$0xff]  ;;  %v1526_v16 = vshrl.u32 %v11404_v58, 16 }
  0x76   : > { %1090 = vrot.lane.b32.xlu0 %v11261_v37, %s10727_s29  ;;  %v804_v41 = vrot.slane %v802_v30, 4  ;;  %15984 = vst [vmem:[#allocation25_spill] sm:$0xff] %v11429_v27  ;;  %v11435_v30 = vpack.c.bf16 %v647_v25, %v647_v25 }
  0x77   : > { %1092 = vrot.lane.b32.xlu1 %v11263_v39, %s10727_s29  ;;  %v807_v43 = vrot.slane %v805_v31, 5  ;;  %v11437_v31 = vpack.c.bf16 %v647_v25, %v646_v17  ;;  %v649_v25 = vld [vmem:[#allocation2 + $0x100] sm:$0xff] }
  0x78   : > { %15985 = vst [vmem:[#allocation26_spill] sm:$0xff] %v11435_v30 }
  0x79   : > { %v11414_v63 = vor.u32 %v807_v43, %v804_v41  ;;  %v815_v41 = vrot.slane %v813_v22, 5  ;;  %v741_v43 = vpack.c.bf16 %v636_v3, %v636_v3  ;;  %v818_v14 = vshrl.u32 %v11437_v31, 16  ;;  %v640_v22 = vld [vmem:[#allocation2 + $0xb8] sm:$0xff] }
  0x7a   : > { %917 = vrot.lane.b32.xlu0 %v11284_v56, %s10727_s29  ;;  %v11454_v3 = vpack.c.bf16 %v650_v18, %v649_v25  ;;  %v1604_v56 = vshll.u32 %v11427_v23, 16  ;;  %v11490_v25 = vrot.slane %v11220_v9, 5  ;;  %v654_v9 = vld [vmem:[#allocation2 + $0x128] sm:$0xff] }
  0x7b   : > { %1042 = vrot.lane.b32.xlu1 %v11286_v57, %s10727_s29  ;;  %15982 = vst [vmem:[#allocation23_spill] sm:$0xff] %v11414_v63  ;;  %v11443_v55 = vor.u32 %v815_v41, %v812_v40  ;;  %v967_v17 = vrot.slane %v741_v43, 5  ;;  %v820_v40 = vrot.slane %v818_v14, 4  ;;  %v1601_v43 = vshrl.u32 %v11427_v23, 16 }
  0x7c   : > { %15988 = vst [vmem:[#allocation29_spill] sm:$0xff] %v11454_v3 }
  0x7d   : > { %15986 = vst [vmem:[#allocation27_spill] sm:$0xff] %v11443_v55  ;;  %v11458_v48 = vsel %vm953_vm1, %v11446_v49, %v967_v17  ;;  %v644_v17 = vld [vmem:[#allocation2 + $0xd8] sm:$0xff] }
  0x7e   : > { %1044 = vrot.lane.b32.xlu0 %v11297_v2, %s10727_s29  ;;  %15989 = vst [vmem:[#allocation30_spill] sm:$0xff] %v11458_v48  ;;  %v656_v2 = vld [vmem:[#allocation2 + $0x138] sm:$0xff] }
  0x7f   : > { %893 = vrot.lane.b32.xlu1 %v11301_v4, %s10727_s29 }
  0x82   : > { %1094 = vrot.lane.b32.xlu0 %v11321_v19, %s10727_s29  ;;  %v742_v19 = vpack.c.bf16 %v640_v22, %v640_v22  ;;  %v1529_v22 = vshll.u32 %v11404_v58, 16 }
  0x83   : > { %1096 = vrot.lane.b32.xlu1 %v11325_v20, %s10727_s29  ;;  %v651_v20 = vld [vmem:[#allocation2 + $0x110] sm:$0xff] }
  0x84   : > { %v11462_v28 = vpack.c.bf16 %v651_v20, %v650_v18  ;;  %v11477_v18 = vrot.slane %v11377_v11, 5  ;;  %v1661_v11 = vshrl.u32 %v11458_v48, 16 }
  0x86   : > { %919 = vrot.lane.b32.xlu0 %v11342_v32, %s10727_s29  ;;  %v821_v32 = vshll.u32 %v11437_v31, 16  ;;  %15992 = vst [vmem:[#allocation33_spill] sm:$0xff] %v11477_v18 }
  0x87   : > { %1046 = vrot.lane.b32.xlu1 %v11344_v35, %s10727_s29 }
  0x88   : > { %v823_v41 = vrot.slane %v821_v32, 5  ;;  %v11469_v32 = vpack.c.bf16 %v651_v20, %v651_v20  ;;  %v826_v20 = vshrl.u32 %v11462_v28, 16 }
  0x8a   : > { %1048 = vrot.lane.b32.xlu0 %v11350_v46, %s10727_s29  ;;  %15990 = vst [vmem:[#allocation31_spill] sm:$0xff] %v11469_v32  ;;  %v11471_v14 = vor.u32 %v823_v41, %v820_v40  ;;  %v829_v40 = vshll.u32 %v11462_v28, 16  ;;  %v648_v41 = vld [vmem:[#allocation2 + $0xf8] sm:$0xff] }
  0x8b   : > { %895 = vrot.lane.b32.xlu1 %v11354_v52, %s10727_s29  ;;  %v659_v52 = vld [vmem:[#allocation2 + $0x150] sm:$0xff] }
  0x8c   : > { %15991 = vst [vmem:[#allocation32_spill] sm:$0xff] %v11471_v14 }
  0x8e   : > { %1111 = vrot.lane.b32.xlu0 %v11357_v54, %s10727_s29 }
  0x8f   : > { %1113 = vrot.lane.b32.xlu1 %v11367_v1, %s10727_s29 }
  0x92   : > { %1050 = vrot.lane.b32.xlu0 %v11369_v5, %s10727_s29  ;;  %v657_v5 = vld [vmem:[#allocation2 + $0x140] sm:$0xff] }
  0x93   : > { %1052 = vrot.lane.b32.xlu1 %v11371_v6, %s10727_s29  ;;  %v11518_v6 = vrot.slane %v1661_v11, 3  ;;  %v668_v11 = vld [vmem:[#allocation2 + $0x198] sm:$0xff] }
  0x94   : > { %v749_v46 = vpack.c.bf16 %v668_v11, %v668_v11  ;;  %v672_v11 = vld [vmem:[#allocation2 + $0x1b8] sm:$0xff] }
  0x95   : > { %15998 = vst [vmem:[#allocation39_spill] sm:$0xff] %v11518_v6 }
  0x96   : > { %897 = vrot.lane.b32.xlu0 %v11386_v26, %s10727_s29  ;;  %v1664_v26 = vshll.u32 %v11458_v48, 16 }
  0x97   : > { %1115 = vrot.lane.b32.xlu1 %v11380_v21, %s10727_s29 }
  0x98   : > { %v11524_v4 = vrot.slane %v1664_v26, 4  ;;  %v11539_v26 = vrot.slane %v11437_v31, 5 }
  0x9a   : > { %1117 = vrot.lane.b32.xlu0 %v11404_v58, %s10727_s29  ;;  %16000 = vst [vmem:[#allocation41_spill] sm:$0xff] %v11524_v4  ;;  %16003 = vst [vmem:[#allocation44_spill] sm:$0xff] %v11539_v26 }
  0x9b   : > { %1054 = vrot.lane.b32.xlu1 %v11400_v36, %s10727_s29  ;;  %v831_v36 = vrot.slane %v829_v40, 5  ;;  %v11534_v40 = vrot.slane %v11412_v62, 5  ;;  %v661_v62 = vld [vmem:[#allocation2 + $0x160] sm:$0xff] }
  0x9d   : > { %16002 = vst [vmem:[#allocation43_spill] sm:$0xff] %v11534_v40 }
  0x9e   : > { %1056 = vrot.lane.b32.xlu0 %v11406_v59, %s10727_s29  ;;  %v11507_v59 = vrot.slane %v1529_v22, 4 }
  0x9f   : > { %899 = vrot.lane.b32.xlu1 %v11414_v63, %s10727_s29  ;;  %v11494_v63 = vrot.slane %v11272_v53, 5 }
  0xa0   : > { %15996 = vst [vmem:[#allocation37_spill] sm:$0xff] %v11507_v59 }
  0xa2   : > { %1119 = vrot.lane.b32.xlu0 %v11417_v0, %s10727_s29 }
  0xa3   : > { %1121 = vrot.lane.b32.xlu1 %v11427_v23, %s10727_s29 }
  0xa6   : > { %1058 = vrot.lane.b32.xlu0 %v11429_v27, %s10727_s29  ;;  %v11482_v27 = vrot.slane %v1604_v56, 4  ;;  %v11498_v56 = vpack.c.bf16 %v11308_v8, %v11306_v7  ;;  %v652_v8 = vld [vmem:[#allocation2 + $0x118] sm:$0xff] }
  0xa7   : > { %1060 = vrot.lane.b32.xlu1 %v11435_v30, %s10727_s29  ;;  %v11480_v30 = vrot.slane %v1601_v43, 3  ;;  %v11500_v43 = vrot.slane %v1526_v16, 3  ;;  %v744_v16 = vpack.c.bf16 %v648_v41, %v648_v41 }
  0xa8   : > { %15994 = vst [vmem:[#allocation35_spill] sm:$0xff] %v11482_v27  ;;  %v662_v27 = vld [vmem:[#allocation2 + $0x168] sm:$0xff] }
  0xa9   : > { %15993 = vst [vmem:[#allocation34_spill] sm:$0xff] %v11480_v30  ;;  %15995 = vst [vmem:[#allocation36_spill] sm:$0xff] %v11500_v43 }
  0xaa   : > { %901 = vrot.lane.b32.xlu0 %v11443_v55, %s10727_s29  ;;  %v970_v55 = vrot.slane %v742_v19, 5  ;;  %v743_v19 = vpack.c.bf16 %v644_v17, %v644_v17  ;;  %v655_v17 = vld [vmem:[#allocation2 + $0x130] sm:$0xff] }
  0xab   : > { %1123 = vrot.lane.b32.xlu1 %v11446_v49, %s10727_s29  ;;  %v11513_v7 = vpack.c.bf16 %v655_v17, %v654_v9 }
  0xac   : > { %v11511_v53 = vsel %vm953_vm1, %v11477_v18, %v970_v55  ;;  %v973_v59 = vrot.slane %v743_v19, 5 }
  0xad   : > { %15997 = vst [vmem:[#allocation38_spill] sm:$0xff] %v11511_v53  ;;  %v1721_v43 = vshrl.u32 %v11511_v53, 16  ;;  %v1724_v41 = vshll.u32 %v11511_v53, 16  ;;  %v834_v19 = vshrl.u32 %v11513_v7, 16 }
  0xae   : > { %1125 = vrot.lane.b32.xlu0 %v11458_v48, %s10727_s29  ;;  %v11573_v48 = vld [vmem:[#allocation2] sm:$0xff] }
  0xaf   : > { %1062 = vrot.lane.b32.xlu1 %v11454_v3, %s10727_s29  ;;  %v11487_v3 = vrot.slane %v11176_v45, 5  ;;  %v653_v45 = vld [vmem:[#allocation2 + $0x120] sm:$0xff]  ;;  %v11541_v4 = vrot.slane %v1721_v43, 3  ;;  %v11555_v43 = vrot.slane %v1724_v41, 4  ;;  %v11567_v41 = vpack.c.bf16 %v662_v27, %v661_v62 }
  0xb0   : > { %v11520_v22 = vpack.c.bf16 %v654_v9, %v653_v45  ;;  %v837_v45 = vshll.u32 %v11513_v7, 16  ;;  %v976_v9 = vrot.slane %v744_v16, 5 }
  0xb1   : > { %16004 = vst [vmem:[#allocation45_spill] sm:$0xff] %v11541_v4  ;;  %16009 = vst [vmem:[#allocation50_spill] sm:$0xff] %v11555_v43 }
  0xb2   : > { %1064 = vrot.lane.b32.xlu0 %v11469_v32, %s10727_s29  ;;  %v828_v32 = vrot.slane %v826_v20, 4  ;;  %15999 = vst [vmem:[#allocation40_spill] sm:$0xff] %v11520_v22  ;;  %v11531_v20 = vpack.c.bf16 %v655_v17, %v655_v17  ;;  %v11547_v17 = vpack.c.bf16 %v659_v52, %v659_v52  ;;  %v11565_v4 = vsel %vm953_vm1, %v11539_v26, %v976_v9 }
  0xb3   : > { %903 = vrot.lane.b32.xlu1 %v11471_v14, %s10727_s29  ;;  %v658_v14 = vld [vmem:[#allocation2 + $0x148] sm:$0xff]  ;;  %16010 = vst [vmem:[#allocation51_spill] sm:$0xff] %v11565_v4  ;;  %16011 = vst [vmem:[#allocation52_spill] sm:$0xff] %v11567_v41  ;;  %v1841_v43 = vshrl.u32 %v11565_v4, 16 }
  0xb4   : > { %v11522_v55 = vpack.c.bf16 %v659_v52, %v658_v14  ;;  %16001 = vst [vmem:[#allocation42_spill] sm:$0xff] %v11531_v20  ;;  %v11543_v6 = vor.u32 %v831_v36, %v828_v32  ;;  %v11545_v30 = vpack.c.bf16 %v658_v14, %v657_v5  ;;  %16007 = vst [vmem:[#allocation48_spill] sm:$0xff] %v11547_v17  ;;  %v836_v32 = vrot.slane %v834_v19, 4 }
  0xb5   : > { %v745_v36 = vpack.c.bf16 %v652_v8, %v652_v8  ;;  %v839_v14 = vrot.slane %v837_v45, 5  ;;  %v991_v19 = vrot.slane %v749_v46, 5  ;;  %v665_v45 = vld [vmem:[#allocation2 + $0x180] sm:$0xff]  ;;  %v11586_v46 = vrot.slane %v11180_v47, 5 }
  0xb6   : > { %1127 = vrot.lane.b32.xlu0 %v11477_v18, %s10727_s29  ;;  %16005 = vst [vmem:[#allocation46_spill] sm:$0xff] %v11543_v6  ;;  %16006 = vst [vmem:[#allocation47_spill] sm:$0xff] %v11545_v30  ;;  %v663_v18 = vld [vmem:[#allocation2 + $0x170] sm:$0xff]  ;;  %v842_v31 = vshrl.u32 %v11522_v55, 16  ;;  %v845_v16 = vshll.u32 %v11522_v55, 16 }
  0xb7   : > { %1129 = vrot.lane.b32.xlu1 %v11511_v53, %s10727_s29  ;;  %v11551_v53 = vsel %vm953_vm1, %v11534_v40, %v973_v59  ;;  %v620_v59 = vld [vmem:[#allocation2 + $0x18] sm:$0xff]  ;;  %v732_v35 = vpack.c.bf16 %v663_v18, %v662_v27  ;;  %v979_v57 = vrot.slane %v745_v36, 5  ;;  %v750_v27 = vpack.c.bf16 %v672_v11, %v672_v11 }
  0xb8   : > { %16008 = vst [vmem:[#allocation49_spill] sm:$0xff] %v11551_v53  ;;  %v1781_v52 = vshrl.u32 %v11551_v53, 16  ;;  %v1784_v5 = vshll.u32 %v11551_v53, 16  ;;  %v844_v8 = vrot.slane %v842_v31, 4  ;;  %v847_v49 = vrot.slane %v845_v16, 5 }
  0xb9   : > { %v737_v29 = vpack.c.bf16 %v620_v59, %v620_v59  ;;  %v11583_v23 = vor.u32 %v839_v14, %v836_v32  ;;  %v11589_v31 = vrot.slane %v11462_v28, 5  ;;  %v11593_v59 = vrot.slane %v1841_v43, 3  ;;  %v676_v14 = vld [vmem:[#allocation2 + $0x1d8] sm:$0xff] }
  0xba   : > { %1066 = vrot.lane.b32.xlu0 %v11520_v22, %s10727_s29  ;;  %v1844_v22 = vshll.u32 %v11565_v4, 16  ;;  %v11579_v9 = vrot.slane %v1781_v52, 3  ;;  %v11581_v62 = vrot.slane %v1784_v5, 4  ;;  %v11598_v5 = vpack.c.bf16 %v11169_v42, %v665_v45  ;;  %v680_v43 = vld [vmem:[#allocation2 + $0x1f8] sm:$0xff] }
  0xbb   : > { %1068 = vrot.lane.b32.xlu1 %v11531_v20, %s10727_s29  ;;  %v11571_v20 = vpack.c.bf16 %v663_v18, %v663_v18  ;;  %v660_v18 = vld [vmem:[#allocation2 + $0x158] sm:$0xff]  ;;  %16015 = vst [vmem:[#allocation56_spill] sm:$0xff] %v11583_v23  ;;  %16016 = vst [vmem:[#allocation57_spill] sm:$0xff] %v11589_v31  ;;  %v746_v36 = vpack.c.bf16 %v656_v2, %v656_v2  ;;  %v11600_v11 = vor.u32 %v847_v49, %v844_v8 }
  0xbc   : > { %16013 = vst [vmem:[#allocation54_spill] sm:$0xff] %v11579_v9  ;;  %16014 = vst [vmem:[#allocation55_spill] sm:$0xff] %v11581_v62  ;;  %v11595_v52 = vrot.slane %v1844_v22, 4  ;;  %v11604_v47 = vsel %vm953_vm1, %v11586_v46, %v991_v19  ;;  %v955_v32 = vrot.slane %v737_v29, 5  ;;  %v747_v28 = vpack.c.bf16 %v660_v18, %v660_v18  ;;  %v664_v62 = vld [vmem:[#allocation2 + $0x178] sm:$0xff] }
  0xbd   : > { %16012 = vst [vmem:[#allocation53_spill] sm:$0xff] %v11571_v20  ;;  %16017 = vst [vmem:[#allocation58_spill] sm:$0xff] %v11593_v59  ;;  %v11612_v42 = vsel %vm953_vm1, %v11589_v31, %v979_v57  ;;  %v994_v2 = vrot.slane %v750_v27, 5  ;;  %v850_v49 = vshrl.u32 %v732_v35, 16  ;;  %v853_v22 = vshll.u32 %v732_v35, 16  ;;  %v684_v27 = vld [vmem:[#allocation2 + $0x218] sm:$0xff] }
  0xbe   : > { %905 = vrot.lane.b32.xlu0 %v11543_v6, %s10727_s29  ;;  %16018 = vst [vmem:[#allocation59_spill] sm:$0xff] %v11595_v52  ;;  %16019 = vst [vmem:[#allocation60_spill] sm:$0xff] %v11600_v11  ;;  %v1901_v29 = vshrl.u32 %v11612_v42, 16  ;;  %v1904_v19 = vshll.u32 %v11612_v42, 16  ;;  %v11619_v45 = vpack.c.bf16 %v11173_v44, %v11173_v44  ;;  %v11622_v18 = vrot.slane %v11513_v7, 5 }
  0xbf   : > { %1131 = vrot.lane.b32.xlu1 %v11534_v40, %s10727_s29  ;;  %16020 = vst [vmem:[#allocation61_spill] sm:$0xff] %v11612_v42  ;;  %v982_v16 = vrot.slane %v746_v36, 5  ;;  %v751_v57 = vpack.c.bf16 %v676_v14, %v676_v14  ;;  %v748_v52 = vpack.c.bf16 %v664_v62, %v664_v62  ;;  %v11626_v9 = vrot.slane %v11522_v55, 5 }
  0xc0   : > { %v985_v8 = vrot.slane %v747_v28, 5  ;;  %v752_v6 = vpack.c.bf16 %v680_v43, %v680_v43  ;;  %v16021_v44 = vrot.slane %v11133_v15, 5  ;;  %v11639_v62 = vsel %vm953_vm1, %v11487_v3, %v994_v2 }
  0xc1   : > { %v852_v55 = vrot.slane %v850_v49, 4  ;;  %v855_v36 = vrot.slane %v853_v22, 5  ;;  %v11641_v28 = vrot.slane %v1901_v29, 3  ;;  %v11643_v14 = vrot.slane %v1904_v19, 4 }
  0xc2   : > { %1133 = vrot.lane.b32.xlu0 %v11551_v53, %s10727_s29  ;;  %v687_v53 = vld [vmem:[#allocation2 + $0x230] sm:$0xff]  ;;  %v11635_v7 = vsel %vm953_vm1, %v16021_v44, %v955_v32  ;;  %v11645_v43 = vrot.slane %v732_v35, 5  ;;  %v756_v59 = vpack.c.bf16 %v684_v27, %v684_v27  ;;  %v988_v32 = vrot.slane %v748_v52, 5 }
  0xc3   : > { %1070 = vrot.lane.b32.xlu1 %v11545_v30, %s10727_s29  ;;  %v686_v30 = vld [vmem:[#allocation2 + $0x228] sm:$0xff]  ;;  %16022 = vst [vmem:[#allocation62_spill] sm:$0xff] %v11641_v28  ;;  %16023 = vst [vmem:[#allocation63_spill] sm:$0xff] %v11643_v14  ;;  %v11657_v22 = vsel %vm953_vm1, %v11626_v9, %v985_v8  ;;  %v1000_v29 = vrot.slane %v752_v6, 5  ;;  %v1099_v52 = vshrl.u32 %v11498_v56, 16  ;;  %v1102_v8 = vshll.u32 %v11498_v56, 16 }
  0xc4   : > { %v11651_v44 = vpack.c.bf16 %v687_v53, %v686_v30  ;;  %v2021_v53 = vshrl.u32 %v11657_v22, 16  ;;  %v11670_v6 = vrot.slane %v11498_v56, 5  ;;  %v1109_v19 = vrot.slane %v756_v59, 5 }
  0xc5   : > { %v11690_v56 = vsel %vm953_vm1, %v11494_v63, %v1000_v29 }
  0xc6   : > { %1072 = vrot.lane.b32.xlu0 %v11547_v17, %s10727_s29  ;;  %v997_v17 = vrot.slane %v751_v57, 5  ;;  %16024 = vst [vmem:[#allocation64_spill] sm:$0xff] %v11651_v44  ;;  %16025 = vst [vmem:[#allocation65_spill] sm:$0xff] %v11670_v6  ;;  %v11672_v57 = vor.u32 %v855_v36, %v852_v55  ;;  %v1176_v30 = vshrl.u32 %v11651_v44, 16  ;;  %v1179_v35 = vshll.u32 %v11651_v44, 16 }
  0xc7   : > { %907 = vrot.lane.b32.xlu1 %v11583_v23, %s10727_s29  ;;  %v11649_v23 = vsel %vm953_vm1, %v11622_v18, %v982_v16  ;;  %v2024_v16 = vshll.u32 %v11657_v22, 16  ;;  %v11705_v29 = vsel %vm953_vm1, %v11670_v6, %v1109_v19 }
  0xc8   : > { %v1961_v2 = vshrl.u32 %v11649_v23, 16  ;;  %v1964_v49 = vshll.u32 %v11649_v23, 16  ;;  %16026 = vst [vmem:[#allocation66_spill] sm:$0xff] %v11672_v57  ;;  %v11676_v27 = vsel %vm953_vm1, %v11490_v25, %v997_v17  ;;  %v11696_v17 = vrot.slane %v2021_v53, 3  ;;  %16031 = vst [vmem:[#allocation71_spill] sm:$0xff] %v11705_v29 }
  0xc9   : > { %v11698_v59 = vrot.slane %v2024_v16, 4  ;;  %v11709_v53 = vrot.slane %v1179_v35, 5  ;;  %v2383_v16 = vshrl.u32 %v11705_v29, 16  ;;  %v2386_v55 = vshll.u32 %v11705_v29, 16 }
  0xca   : > { %1135 = vrot.lane.b32.xlu0 %v11539_v26, %s10727_s29  ;;  %v11680_v14 = vrot.slane %v1961_v2, 3  ;;  %v11682_v28 = vrot.slane %v1964_v49, 4  ;;  %16029 = vst [vmem:[#allocation69_spill] sm:$0xff] %v11696_v17  ;;  %v1101_v2 = vrot.slane %v1099_v52, 4  ;;  %v1104_v49 = vrot.slane %v1102_v8, 5 }
  0xcb   : > { %1137 = vrot.lane.b32.xlu1 %v11565_v4, %s10727_s29  ;;  %v11686_v4 = vsel %vm953_vm1, %v11645_v43, %v988_v32  ;;  %16030 = vst [vmem:[#allocation70_spill] sm:$0xff] %v11698_v59  ;;  %v16032_v52 = vrot.slane %v11133_v15, 5  ;;  %v11733_v26 = vrot.slane %v2383_v16, 3 }
  0xcc   : > { %16027 = vst [vmem:[#allocation67_spill] sm:$0xff] %v11680_v14  ;;  %16028 = vst [vmem:[#allocation68_spill] sm:$0xff] %v11682_v28  ;;  %v2081_v36 = vshrl.u32 %v11686_v4, 16  ;;  %v2084_v32 = vshll.u32 %v11686_v4, 16  ;;  %v11707_v14 = vrot.slane %v1176_v30, 4 }
  0xcd   : > { %16035 = vst [vmem:[#allocation74_spill] sm:$0xff] %v11733_v26 }
  0xce   : > { %1074 = vrot.lane.b32.xlu0 %v11567_v41, %s10727_s29  ;;  %v11724_v35 = vrot.slane %v2081_v36, 3 }
  0xcf   : > { %1076 = vrot.lane.b32.xlu1 %v11571_v20, %s10727_s29 }
  0xd0   : > { %v1083_v44 = vpop.permute.xlu0 %1082  ;;  %16033 = vst [vmem:[#allocation72_spill] sm:$0xff] %v11724_v35 }
  0xd1   : > { %v1035_v28 = vpop.permute.xlu1 %1034  ;;  %v1346_v59 = vsel %vm334_vm0, %v11586_v46, %v1083_v44 }
  0xd2   : > { %v1274_v8 = vsel %vm334_vm0, %v16032_v52, %v1035_v28  ;;  %v2209_v20 = vshrl.u32 %v1346_v59, 16  ;;  %v2212_v30 = vshll.u32 %v1346_v59, 16  ;;  %909 = vrot.lane.b32.xlu0 %v11600_v11, %s10727_s29  ;;  %v11727_v28 = vrot.slane %v2084_v32, 4 }
  0xd3   : > { %1139 = vrot.lane.b32.xlu1 %v11589_v31, %s10727_s29  ;;  %v1474_v15 = vshrl.u32 %v1274_v8, 16  ;;  %v1477_v41 = vshll.u32 %v1274_v8, 16  ;;  %v11729_v52 = vor.u32 %v1104_v49, %v1101_v2  ;;  %v11735_v31 = vrot.slane %v2386_v55, 4 }
  0xd4   : > { %16034 = vst [vmem:[#allocation73_spill] sm:$0xff] %v11727_v28  ;;  %v2211_v17 = vrot.slane %v2209_v20, 3  ;;  %v1085_v19 = vpop.permute.xlu0 %1084  ;;  %v2214_v36 = vrot.slane %v2212_v30, 4  ;;  %v16037_v32 = vpack.c.bf16 %v11124_v12, %v11573_v48  ;;  %v16038_v20 = vpack.c.bf16 %v11128_v13, %v11128_v13 }
  0xd5   : > { %v890_v59 = vpop.permute.xlu1 %889  ;;  %16036 = vst [vmem:[#allocation75_spill] sm:$0xff] %v11735_v31  ;;  %v1349_v44 = vsel %vm334_vm0, %v11604_v47, %v1085_v19  ;;  %v1476_v55 = vrot.slane %v1474_v15, 3  ;;  %v1479_v19 = vrot.slane %v1477_v41, 4 }
  0xd6   : > { %v1194_v2 = vsel %vm334_vm0, %v16037_v32, %v890_v59  ;;  %v1196_v49 = vsel %vm334_vm0, %v16038_v20, %v890_v59  ;;  %v2216_v8 = vshrl.u32 %v1349_v44, 16  ;;  %v2219_v11 = vshll.u32 %v1349_v44, 16  ;;  %1141 = vrot.lane.b32.xlu0 %v11612_v42, %s10727_s29 }
  0xd7   : > { %v1459_v16 = vshrl.u32 %v1194_v2, 16  ;;  %v1462_v26 = vshll.u32 %v1194_v2, 16  ;;  %1078 = vrot.lane.b32.xlu1 %v11598_v5, %s10727_s29  ;;  %v1466_v12 = vshrl.u32 %v1196_v49, 16  ;;  %v1469_v48 = vshll.u32 %v1196_v49, 16 }
  0xd8   : > { %v2218_v30 = vrot.slane %v2216_v8, 3  ;;  %v2221_v32 = vrot.slane %v2219_v11, 4  ;;  %v1037_v28 = vpop.permute.xlu0 %1036 }
  0xd9   : > { %v1461_v31 = vrot.slane %v1459_v16, 3  ;;  %v1464_v13 = vrot.slane %v1462_v26, 4  ;;  %v1089_v59 = vpop.permute.xlu1 %1088  ;;  %v1468_v20 = vrot.slane %v1466_v12, 3  ;;  %v1471_v44 = vrot.slane %v1469_v48, 4 }
  0xda   : > { %v1277_v2 = vsel %vm334_vm0, %v11635_v7, %v1037_v28  ;;  %v1355_v35 = vsel %vm334_vm0, %v11639_v62, %v1089_v59  ;;  %1080 = vrot.lane.b32.xlu0 %v11619_v45, %s10727_s29  ;;  %v2215_v26 = vor.u32 %v2214_v36, %v2211_v17  ;;  %v2222_v8 = vor.u32 %v2221_v32, %v2218_v30 }
  0xdb   : > { %v1481_v42 = vshrl.u32 %v1277_v2, 16  ;;  %v1484_v40 = vshll.u32 %v1277_v2, 16  ;;  %v2276_v15 = vshrl.u32 %v1355_v35, 16  ;;  %911 = vrot.lane.b32.xlu1 %v11672_v57, %s10727_s29  ;;  %v1465_v41 = vor.u32 %v1464_v13, %v1461_v31 }
  0xdc   : > { %v1472_v11 = vor.u32 %v1471_v44, %v1468_v20  ;;  %v2279_v49 = vshll.u32 %v1355_v35, 16  ;;  %v1087_v28 = vpop.permute.xlu0 %1086  ;;  %v1480_v59 = vor.u32 %v1479_v19, %v1476_v55  ;;  %v2223_v57 = vsel %vm1458_vm2, %v2215_v26, %v2222_v8  ;;  %v10622_v26 = vld [vmem:[%s15712_s1 + $0x110] sm:$0xff]  }
  0xdd   : > { %v1483_v16 = vrot.slane %v1481_v42, 3  ;;  %v1486_v12 = vrot.slane %v1484_v40, 4  ;;  %v2278_v7 = vrot.slane %v2276_v15, 3  ;;  %v1039_v48 = vpop.permute.xlu1 %1038  ;;  %v1352_v2 = vsel %vm334_vm0, %v11487_v3, %v1087_v28  ;;  %2901 = vmatprep.mubr.bf16.mxu1 %v2223_v57 }
  0xde   : > { %v2281_v29 = vrot.slane %v2279_v49, 4  ;;  %v1280_v6 = vsel %vm334_vm0, %v11357_v54, %v1039_v48  ;;  %v2269_v17 = vshrl.u32 %v1352_v2, 16  ;;  %v2272_v31 = vshll.u32 %v1352_v2, 16  ;;  %1143 = vrot.lane.b32.xlu0 %v11622_v18, %s10727_s29 }
  0xdf   : > { %v1549_v36 = vshrl.u32 %v1280_v6, 16  ;;  %v1552_v35 = vshll.u32 %v1280_v6, 16  ;;  %1145 = vrot.lane.b32.xlu1 %v11649_v23, %s10727_s29  ;;  %v1487_v42 = vor.u32 %v1486_v12, %v1483_v16  ;;  %v1473_v55 = vsel %vm1458_vm2, %v1465_v41, %v1472_v11 }
  0xe0   : > { %v2282_v40 = vor.u32 %v2281_v29, %v2278_v7  ;;  %v1519_v19 = vshrl.u32 %v11380_v21, 16  ;;  %v2271_v54 = vrot.slane %v2269_v17, 3  ;;  %v2274_v30 = vrot.slane %v2272_v31, 4  ;;  %v1041_v6 = vpop.permute.xlu0 %1040 }
  0xe1   : > { %v11770_v32 = vrot.slane %v1549_v36, 3  ;;  %v11772_v13 = vrot.slane %v1552_v35, 4  ;;  %v914_v57 = vpop.permute.xlu1 %913  ;;  %v1283_v20 = vsel %vm334_vm0, %v11367_v1, %v1041_v6  ;;  %v1488_v15 = vsel %vm1458_vm2, %v1480_v59, %v1487_v42  ;;  %v10623_v42 = vld [vmem:[%s15712_s1 + $0x108] sm:$0xff]  }
  0xe2   : > { %v1254_v29 = vsel %vm334_vm0, %v11598_v5, %v914_v57  ;;  %v1256_v44 = vsel %vm334_vm0, %v11619_v45, %v914_v57  ;;  %v2275_v41 = vor.u32 %v2274_v30, %v2271_v54  ;;  %v1556_v49 = vshrl.u32 %v1283_v20, 16  ;;  %2805 = vmatprep.mubr.bf16.mxu0 %v1488_v15  ;;  %1147 = vrot.lane.b32.xlu0 %v11626_v9, %s10727_s29 }
  0xe3   : > { %v1555_v11 = vor.u32 %v11772_v13, %v11770_v32  ;;  %v1559_v8 = vshll.u32 %v1283_v20, 16  ;;  %v2119_v1 = vshrl.u32 %v1254_v29, 16  ;;  %v2122_v5 = vshll.u32 %v1254_v29, 16  ;;  %2806 = vmatmul.mubr.bf16.vlgmr.msra.gmra.mxu0 %v1473_v55  ;;  %1149 = vrot.lane.b32.xlu1 %v11657_v22, %s10727_s29 }
  0xe4   : > { %v2126_v16 = vshrl.u32 %v1256_v44, 16  ;;  %v2129_v45 = vshll.u32 %v1256_v44, 16  ;;  %v1558_v12 = vrot.slane %v1556_v49, 3  ;;  %v916_v28 = vpop.permute.xlu0 %915  ;;  %v2283_v59 = vsel %vm1458_vm2, %v2275_v41, %v2282_v40  ;;  %10387 = vmatpush3.bf16.msra.mxu0 %v11393_v24 }
  0xe5   : > { %v1561_v7 = vrot.slane %v1559_v8, 4  ;;  %v892_v48 = vpop.permute.xlu1 %891  ;;  %v11792_v2 = vrot.slane %v1519_v19, 3  ;;  %v2121_v17 = vrot.slane %v2119_v1, 3  ;;  %v2124_v31 = vrot.slane %v2122_v5, 4  ;;  %10388 = vmatprep.subr.bf16.mxu0 %v10622_v26  ;;  %v10624_v1 = vld [vmem:[%s15712_s1 + $0x100] sm:$0xff]  }
  0xe6   : > { %v2128_v36 = vrot.slane %v2126_v16, 3  ;;  %v2131_v35 = vrot.slane %v2129_v45, 4  ;;  %v1259_v54 = vsel %vm334_vm0, %v11154_v33, %v916_v28  ;;  %v1261_v40 = vsel %vm334_vm0, %v11164_v38, %v916_v28  ;;  %1151 = vrot.lane.b32.xlu0 %v11645_v43, %s10727_s29 }
  0xe7   : > { %v1562_v55 = vor.u32 %v1561_v7, %v1558_v12  ;;  %v1199_v24 = vsel %vm334_vm0, %v11156_v34, %v892_v48  ;;  %v2125_v19 = vor.u32 %v2124_v31, %v2121_v17  ;;  %v2179_v6 = vshrl.u32 %v1259_v54, 16  ;;  %1153 = vrot.lane.b32.xlu1 %v11686_v4, %s10727_s29 }
  0xe8   : > { %v2132_v30 = vor.u32 %v2131_v35, %v2128_v36  ;;  %v2182_v57 = vshll.u32 %v1259_v54, 16  ;;  %v2186_v20 = vshrl.u32 %v1261_v40, 16  ;;  %v2189_v29 = vshll.u32 %v1261_v40, 16  ;;  %v1091_v38 = vpop.permute.xlu0 %1090  ;;  %10389 = vmatpush3.bf16.msra.mxu0 %v10622_v26 }
  0xe9   : > { %v1201_v33 = vsel %vm334_vm0, %v11188_v50, %v892_v48  ;;  %v1534_v44 = vshrl.u32 %v1199_v24, 16  ;;  %v1093_v15 = vpop.permute.xlu1 %1092  ;;  %v11809_v34 = vrot.slane %v2179_v6, 3  ;;  %v1537_v49 = vshll.u32 %v1199_v24, 16  ;;  %10390 = vmatprep.subr.bf16.mxu0 %v10623_v42  ;;  %v10606_v48 = vld [vmem:[%s15712_s1 + $0xb8] sm:$0xff]   ;;  %v10607_v24 = vld [vmem:[%s15712_s1 + $0xf0] sm:$0xff]  }
  0xea   : > { %v11811_v41 = vrot.slane %v2182_v57, 4  ;;  %v1541_v8 = vshrl.u32 %v1201_v33, 16  ;;  %v11816_v5 = vrot.slane %v2186_v20, 3  ;;  %v11818_v16 = vrot.slane %v2189_v29, 4  ;;  %1155 = vrot.lane.b32.xlu0 %v11586_v46, %s10727_s29 }
  0xeb   : > { %v1536_v50 = vrot.slane %v1534_v44, 3  ;;  %v1544_v45 = vshll.u32 %v1201_v33, 16  ;;  %v1539_v12 = vrot.slane %v1537_v49, 4  ;;  %v1358_v28 = vsel %vm334_vm0, %v11490_v25, %v1091_v38  ;;  %1157 = vrot.lane.b32.xlu1 %v11604_v47, %s10727_s29 }
  0xec   : > { %v2185_v26 = vor.u32 %v11811_v41, %v11809_v34  ;;  %v1543_v7 = vrot.slane %v1541_v8, 3  ;;  %v2192_v17 = vor.u32 %v11818_v16, %v11816_v5  ;;  %v2329_v36 = vshrl.u32 %v1358_v28, 16  ;;  %v918_v54 = vpop.permute.xlu0 %917  ;;  %10391 = vmatpush3.bf16.msra.mxu0 %v10623_v42  ;;  %v10613_v34 = vld [vmem:[%s15712_s1 + $0xd8] sm:$0xff]  }
  0xed   : > { %v1546_v31 = vrot.slane %v1544_v45, 4  ;;  %v2332_v35 = vshll.u32 %v1358_v28, 16  ;;  %v1043_v40 = vpop.permute.xlu1 %1042  ;;  %v1540_v6 = vor.u32 %v1539_v12, %v1536_v50  ;;  %v1361_v57 = vsel %vm334_vm0, %v11676_v27, %v1093_v15  ;;  %10392 = vmatprep.subr.bf16.mxu0 %v10624_v1 }
  0xee   : > { %v1563_v20 = vsel %vm1458_vm2, %v1555_v11, %v1562_v55  ;;  %v11843_v29 = vsel %vm1458_vm2, %v2125_v19, %v2132_v30  ;;  %v11845_v44 = vrot.slane %v2329_v36, 3  ;;  %v2336_v49 = vshrl.u32 %v1361_v57, 16  ;;  %v10608_v55 = vld [vmem:[%s15712_s1 + $0xb0] sm:$0xff]   ;;  %1159 = vrot.lane.b32.xlu0 %v11487_v3, %s10727_s29 }
  0xef   : > { %v1547_v33 = vor.u32 %v1546_v31, %v1543_v7  ;;  %v11847_v38 = vrot.slane %v2332_v35, 4  ;;  %2813 = vmatprep.mubr.bf16.mxu0 %v1563_v20  ;;  %2902 = vmatmul.mubr.bf16.vlgmr.msra.gmra.mxu1 %v11843_v29  ;;  %v2339_v42 = vshll.u32 %v1361_v57, 16  ;;  %v1264_v32 = vsel %vm334_vm0, %v11200_v60, %v918_v54 }
  0xf0   : > { %2909 = vmatprep.mubr.bf16.mxu1 %v2283_v59  ;;  %9747 = vmatpush3.bf16.msra.mxu1 %v10606_v48  ;;  %v1266_v13 = vsel %vm334_vm0, %v11190_v51, %v918_v54  ;;  %v1286_v11 = vsel %vm334_vm0, %v11380_v21, %v1043_v40  ;;  %v2338_v30 = vrot.slane %v2336_v49, 3  ;;  %v2239_v15 = vshrl.u32 %v1264_v32, 16  ;;  %v1045_v8 = vpop.permute.xlu0 %1044  ;;  %v10609_v51 = vld [vmem:[%s15712_s1 + $0xe8] sm:$0xff]   ;;  %v10611_v49 = vld [vmem:[%s15712_s1 + $0xe0] sm:$0xff]  }
  0xf1   : > { %v2335_v19 = vor.u32 %v11847_v38, %v11845_v44  ;;  %v2242_v59 = vshll.u32 %v1264_v32, 16  ;;  %9748 = vmatprep.subr.bf16.mxu1 %v10607_v24  ;;  %v894_v50 = vpop.permute.xlu1 %893  ;;  %v2341_v60 = vrot.slane %v2339_v42, 4  ;;  %v2246_v45 = vshrl.u32 %v1266_v13, 16  ;;  %1161 = vrot.lane.b32.xlu1 %v11639_v62, %s10727_s29 }
  0xf2   : > { %v2249_v12 = vshll.u32 %v1266_v13, 16  ;;  %v1609_v7 = vshrl.u32 %v1286_v11, 16  ;;  %10393 = vmatpush3.bf16.msra.mxu0 %v10624_v1  ;;  %v11868_v28 = vrot.slane %v2239_v15, 3  ;;  %v1612_v31 = vshll.u32 %v1286_v11, 16  ;;  %v10610_v1 = vld [vmem:[%s15712_s1 + $0xa8] sm:$0xff]   ;;  %1163 = vrot.lane.b32.xlu0 %v11490_v25, %s10727_s29 }
  0xf3   : > { %v11870_v48 = vrot.slane %v2242_v59, 4  ;;  %v1548_v36 = vsel %vm1458_vm2, %v1540_v6, %v1547_v33  ;;  %v2342_v35 = vor.u32 %v2341_v60, %v2338_v30  ;;  %v11873_v54 = vrot.slane %v2246_v45, 3 }
  0xf4   : > { %v11875_v40 = vrot.slane %v2249_v12, 4  ;;  %v11877_v24 = vrot.slane %v1609_v7, 3  ;;  %2814 = vmatmul.mubr.bf16.gmra.mxu0 %v1548_v36  ;;  %9749 = vmatpush3.bf16.msra.mxu1 %v10608_v55  ;;  %v11884_v20 = vrot.slane %v1612_v31, 4  ;;  %v1289_v6 = vsel %vm334_vm0, %v11404_v58, %v1045_v8  ;;  %v1095_v44 = vpop.permute.xlu0 %1094 }
  0xf5   : > { %v2245_v57 = vor.u32 %v11870_v48, %v11868_v28  ;;  %v1204_v33 = vsel %vm334_vm0, %v11202_v61, %v894_v50  ;;  %9750 = vmatprep.subr.bf16.mxu1 %v10609_v51  ;;  %v1097_v38 = vpop.permute.xlu1 %1096  ;;  %v1616_v32 = vshrl.u32 %v1289_v6, 16  ;;  %v1619_v13 = vshll.u32 %v1289_v6, 16  ;;  %1165 = vrot.lane.b32.xlu1 %v11676_v27, %s10727_s29 }
  0xf6   : > { %v2252_v42 = vor.u32 %v11875_v40, %v11873_v54  ;;  %v1206_v58 = vsel %vm334_vm0, %v11222_v10, %v894_v50  ;;  %v1615_v61 = vor.u32 %v11884_v20, %v11877_v24  ;;  %v1504_v11 = vshrl.u32 %v1204_v33, 16  ;;  %v10612_v50 = vld [vmem:[%s15712_s1 + $0xa0] sm:$0xff]   ;;  %1183 = vrot.lane.b32.xlu0 %v11729_v52, %s10727_s29  ;;  %v16040_v54 = vld [vmem:[#allocation24_spill] sm:$0xff] }
  0xf7   : > { %v1507_v55 = vshll.u32 %v1204_v33, 16  ;;  %v1511_v30 = vshrl.u32 %v1206_v58, 16  ;;  %v1618_v15 = vrot.slane %v1616_v32, 3  ;;  %v1621_v59 = vrot.slane %v1619_v13, 4  ;;  %v10614_v33 = vld [vmem:[%s15712_s1 + $0x98] sm:$0xff]  }
  0xf8   : > { %v1514_v8 = vshll.u32 %v1206_v58, 16  ;;  %v11910_v10 = vsel %vm1458_vm2, %v2185_v26, %v2192_v17  ;;  %9751 = vmatpush3.bf16.msra.mxu1 %v10610_v1  ;;  %v1506_v51 = vrot.slane %v1504_v11, 3  ;;  %v2343_v12 = vsel %vm1458_vm2, %v2335_v19, %v2342_v35  ;;  %v920_v5 = vpop.permute.xlu0 %919  ;;  %v10615_v11 = vld [vmem:[%s15712_s1 + $0xd0] sm:$0xff]  }
  0xf9   : > { %v1509_v60 = vrot.slane %v1507_v55, 4  ;;  %v1513_v45 = vrot.slane %v1511_v30, 3  ;;  %2910 = vmatmul.mubr.bf16.gmra.mxu1 %v11910_v10  ;;  %9752 = vmatprep.subr.bf16.mxu1 %v10611_v49  ;;  %v1047_v16 = vpop.permute.xlu1 %1046  ;;  %v1622_v41 = vor.u32 %v1621_v59, %v1618_v15  ;;  %v1364_v17 = vsel %vm334_vm0, %v11494_v63, %v1095_v44 }
  0xfa   : > { %v1516_v26 = vrot.slane %v1514_v8, 4  ;;  %2917 = vmatprep.mubr.bf16.mxu1 %v2343_v12  ;;  %v1367_v7 = vsel %vm334_vm0, %v11690_v56, %v1097_v38  ;;  %v2391_v31 = vshrl.u32 %v1364_v17, 16  ;;  %v2394_v36 = vshll.u32 %v1364_v17, 16  ;;  %1167 = vrot.lane.b32.xlu1 %v11494_v63, %s10727_s29 }
  0xfb   : > { %v1510_v19 = vor.u32 %v1509_v60, %v1506_v51  ;;  %v2398_v35 = vshrl.u32 %v1367_v7, 16  ;;  %v2401_v1 = vshll.u32 %v1367_v7, 16  ;;  %v1269_v20 = vsel %vm334_vm0, %v11261_v37, %v920_v5  ;;  %1169 = vrot.lane.b32.xlu0 %v11690_v56, %s10727_s29 }
  0xfc   : > { %v1517_v24 = vor.u32 %v1516_v26, %v1513_v45  ;;  %9753 = vmatpush3.bf16.msra.mxu1 %v10612_v50  ;;  %v1271_v6 = vsel %vm334_vm0, %v11263_v39, %v920_v5  ;;  %v2393_v44 = vrot.slane %v2391_v31, 3  ;;  %v2396_v38 = vrot.slane %v2394_v36, 4  ;;  %v1049_v13 = vpop.permute.xlu0 %1048  ;;  %v16041_v36 = vld [vmem:[#allocation65_spill] sm:$0xff] }
  0xfd   : > { %v2400_v49 = vrot.slane %v2398_v35, 3  ;;  %v2299_v32 = vshrl.u32 %v1269_v20, 16  ;;  %9754 = vmatprep.subr.bf16.mxu1 %v10613_v34  ;;  %v896_v58 = vpop.permute.xlu1 %895  ;;  %v2403_v55 = vrot.slane %v2401_v1, 4  ;;  %v2302_v37 = vshll.u32 %v1269_v20, 16  ;;  %v10617_v34 = vld [vmem:[%s15712_s1 + $0x90] sm:$0xff]   ;;  %v16044_v20 = vld [vmem:[#allocation10_spill] sm:$0xff] }
  0xfe   : > { %v2306_v30 = vshrl.u32 %v1271_v6, 16  ;;  %v2309_v15 = vshll.u32 %v1271_v6, 16  ;;  %v2397_v39 = vor.u32 %v2396_v38, %v2393_v44  ;;  %v1292_v8 = vsel %vm334_vm0, %v11417_v0, %v1047_v16  ;;  %v16042_v35 = vld [vmem:[#allocation71_spill] sm:$0xff] }
  0xff   : > { %v11940_v59 = vrot.slane %v2299_v32, 3  ;;  %v1623_v50 = vsel %vm1458_vm2, %v1615_v61, %v1622_v41  ;;  %v16039_v51 = vor.u32 %v11709_v53, %v11707_v14  ;;  %v2404_v60 = vor.u32 %v2403_v55, %v2400_v49  ;;  %v10618_v41 = vld [vmem:[%s15712_s1 + $0xc8] sm:$0xff]   ;;  %1171 = vrot.lane.b32.xlu0 %v16041_v36, %s10727_s29  ;;  %v16045_v44 = vld [vmem:[#allocation7_spill] sm:$0xff] }
 0x100   : > { %v2304_v45 = vrot.slane %v2302_v37, 4  ;;  %v2308_v12 = vrot.slane %v2306_v30, 3  ;;  %v2311_v5 = vrot.slane %v2309_v15, 4  ;;  %2821 = vmatprep.mubr.bf16.mxu0 %v1623_v50  ;;  %9755 = vmatpush3.bf16.msra.mxu1 %v10614_v33  ;;  %v1669_v26 = vshrl.u32 %v1292_v8, 16  ;;  %v1112_v61 = vpop.permute.xlu0 %1111  ;;  %v10619_v49 = vld [vmem:[%s15712_s1 + $0x88] sm:$0xff]  }
 0x101   : > { %1185 = vrot.lane.b32.xlu1 %v16039_v51, %s10727_s29  ;;  %v1672_v17 = vshll.u32 %v1292_v8, 16  ;;  %v11959_v14 = vsel %vm1458_vm2, %v2245_v57, %v2252_v42  ;;  %v1518_v53 = vsel %vm1458_vm2, %v1510_v19, %v1517_v24  ;;  %9756 = vmatprep.subr.bf16.mxu1 %v10615_v11  ;;  %v1114_v16 = vpop.permute.xlu1 %1113  ;;  %v1295_v28 = vsel %vm334_vm0, %v16040_v54, %v1049_v13  ;;  %v16043_v24 = vld [vmem:[#allocation9_spill] sm:$0xff] }
 0x102   : > { %v2305_v7 = vor.u32 %v2304_v45, %v11940_v59  ;;  %v2312_v31 = vor.u32 %v2311_v5, %v2308_v12  ;;  %2918 = vmatmul.mubr.bf16.gmra.mxu1 %v11959_v14  ;;  %2822 = vmatmul.mubr.bf16.gmra.mxu0 %v1518_v53  ;;  %v1522_v48 = vshll.u32 %v11380_v21, 16  ;;  %v1671_v40 = vrot.slane %v1669_v26, 3 }
 0x103   : > { %v1674_v57 = vrot.slane %v1672_v17, 4  ;;  %v1676_v42 = vshrl.u32 %v1295_v28, 16  ;;  %v1679_v19 = vshll.u32 %v1295_v28, 16  ;;  %v1209_v1 = vsel %vm334_vm0, %v16043_v24, %v896_v58  ;;  %v10621_v17 = vld [vmem:[%s15712_s1 + $0x80] sm:$0xff]   ;;  %v16047_v24 = vld [vmem:[#allocation30_spill] sm:$0xff] }
 0x104   : > { %v1211_v6 = vsel %vm334_vm0, %v16044_v20, %v896_v58  ;;  %v2405_v33 = vsel %vm1458_vm2, %v2397_v39, %v2404_v60  ;;  %9757 = vmatpush3.bf16.msra.mxu1 %v10617_v34  ;;  %v1370_v38 = vsel %vm334_vm0, %v16045_v44, %v1112_v61  ;;  %v1579_v55 = vshrl.u32 %v1209_v1, 16  ;;  %v1051_v37 = vpop.permute.xlu0 %1050  ;;  %v10620_v58 = vld [vmem:[%s15712_s1 + $0xc0] sm:$0xff]  }
 0x105   : > { %1173 = vrot.lane.b32.xlu1 %v16042_v35, %s10727_s29  ;;  %v1675_v32 = vor.u32 %v1674_v57, %v1671_v40  ;;  %v1678_v13 = vrot.slane %v1676_v42, 3  ;;  %v1681_v11 = vrot.slane %v1679_v19, 4  ;;  %2925 = vmatprep.mubr.bf16.mxu1 %v2405_v33  ;;  %v1053_v30 = vpop.permute.xlu1 %1052  ;;  %v1582_v15 = vshll.u32 %v1209_v1, 16  ;;  %v16046_v19 = vld [vmem:[#allocation28_spill] sm:$0xff] }
 0x106   : > { %9758 = vmatprep.subr.bf16.mxu1 %v10618_v41  ;;  %v1586_v39 = vshrl.u32 %v1211_v6, 16  ;;  %v1589_v59 = vshll.u32 %v1211_v6, 16  ;;  %v1489_v8 = vshrl.u32 %v1370_v38, 16  ;;  %v1581_v51 = vrot.slane %v1579_v55, 3 }
 0x107   : > { %v1682_v50 = vor.u32 %v1681_v11, %v1678_v13  ;;  %v1492_v60 = vshll.u32 %v1370_v38, 16  ;;  %v1372_v45 = vsel %vm334_vm0, %v16045_v44, %v1114_v16  ;;  %v1584_v12 = vrot.slane %v1582_v15, 4 }
 0x108   : > { %v1588_v5 = vrot.slane %v1586_v39, 3  ;;  %v1591_v34 = vrot.slane %v1589_v59, 4  ;;  %v1491_v26 = vrot.slane %v1489_v8, 3  ;;  %9759 = vmatpush3.bf16.msra.mxu1 %v10619_v49  ;;  %v1496_v41 = vshrl.u32 %v1372_v45, 16  ;;  %v898_v40 = vpop.permute.xlu0 %897  ;;  %v16049_v8 = vld [vmem:[#allocation16_spill] sm:$0xff] }
 0x109   : > { %v1494_v61 = vrot.slane %v1492_v60, 4  ;;  %v1499_v54 = vshll.u32 %v1372_v45, 16  ;;  %v11993_v28 = vsel %vm1458_vm2, %v2305_v7, %v2312_v31  ;;  %9760 = vmatprep.subr.bf16.mxu1 %v10620_v58  ;;  %v1116_v57 = vpop.permute.xlu1 %1115  ;;  %v1585_v42 = vor.u32 %v1584_v12, %v1581_v51 }
 0x10a   : > { %v1592_v16 = vor.u32 %v1591_v34, %v1588_v5  ;;  %2926 = vmatmul.mubr.bf16.gmra.mxu1 %v11993_v28  ;;  %v1298_v35 = vsel %vm334_vm0, %v16046_v19, %v1051_v37  ;;  %v1301_v1 = vsel %vm334_vm0, %v16047_v24, %v1053_v30  ;;  %v1498_v6 = vrot.slane %v1496_v41, 3  ;;  %v16048_v37 = vld [vmem:[#allocation15_spill] sm:$0xff] }
 0x10b   : > { %v1495_v20 = vor.u32 %v1494_v61, %v1491_v26  ;;  %v1501_v33 = vrot.slane %v1499_v54, 4  ;;  %2966 = vmatprep.mubr.bf16.mxu1 %v1518_v53  ;;  %v1729_v44 = vshrl.u32 %v1298_v35, 16  ;;  %v1732_v7 = vshll.u32 %v1298_v35, 16  ;;  %v16050_v34 = vld [vmem:[#allocation11_spill] sm:$0xff] }
 0x10c   : > { %v1736_v31 = vshrl.u32 %v1301_v1, 16  ;;  %v1739_v38 = vshll.u32 %v1301_v1, 16  ;;  %v1683_v49 = vsel %vm1458_vm2, %v1675_v32, %v1682_v50  ;;  %9761 = vmatpush3.bf16.msra.mxu1 %v10621_v17  ;;  %v1593_v55 = vsel %vm1458_vm2, %v1585_v42, %v1592_v16  ;;  %v1118_v30 = vpop.permute.xlu0 %1117 }
 0x10d   : > { %v1502_v13 = vor.u32 %v1501_v33, %v1498_v6  ;;  %v1731_v11 = vrot.slane %v1729_v44, 3  ;;  %2829 = vmatprep.mubr.bf16.mxu0 %v1683_v49  ;;  %v1214_v58 = vsel %vm334_vm0, %v16048_v37, %v898_v40  ;;  %v1055_v15 = vpop.permute.xlu1 %1054  ;;  %v1734_v39 = vrot.slane %v1732_v7, 4  ;;  %v16051_v6 = vld [vmem:[#allocation33_spill] sm:$0xff] }
 0x10e   : > { %v1738_v59 = vrot.slane %v1736_v31, 3  ;;  %v1741_v53 = vrot.slane %v1739_v38, 4  ;;  %2830 = vmatmul.mubr.bf16.gmra.mxu0 %v1593_v55  ;;  %v1216_v51 = vsel %vm334_vm0, %v16049_v8, %v898_v40  ;;  %v1639_v60 = vshrl.u32 %v1214_v58, 16 }
 0x10f   : > { %v1642_v32 = vshll.u32 %v1214_v58, 16  ;;  %v1646_v50 = vshrl.u32 %v1216_v51, 16  ;;  %v1649_v45 = vshll.u32 %v1216_v51, 16  ;;  %v1735_v12 = vor.u32 %v1734_v39, %v1731_v11  ;;  %v16052_v39 = vld [vmem:[#allocation38_spill] sm:$0xff] }
 0x110   : > { %v1742_v5 = vor.u32 %v1741_v53, %v1738_v59  ;;  %v1375_v26 = vsel %vm334_vm0, %v16050_v34, %v1116_v57  ;;  %v1503_v17 = vsel %vm1458_vm2, %v1495_v20, %v1502_v13  ;;  %v1641_v61 = vrot.slane %v1639_v60, 3  ;;  %v1057_v16 = vpop.permute.xlu0 %1056 }
 0x111   : > { %v1644_v41 = vrot.slane %v1642_v32, 4  ;;  %v1648_v54 = vrot.slane %v1646_v50, 3  ;;  %v1651_v42 = vrot.slane %v1649_v45, 4  ;;  %v900_v35 = vpop.permute.xlu1 %899  ;;  %v1564_v24 = vshrl.u32 %v1375_v26, 16  ;;  %v16053_v50 = vld [vmem:[#allocation18_spill] sm:$0xff] }
 0x112   : > { %v1567_v1 = vshll.u32 %v1375_v26, 16  ;;  %2967 = vmatmul.mubr.bf16.vlgmr.msra.gmra.mxu1 %v1503_v17  ;;  %v1377_v40 = vsel %vm334_vm0, %v16050_v34, %v1118_v30  ;;  %v1304_v33 = vsel %vm334_vm0, %v16051_v6, %v1055_v15  ;;  %v1743_v58 = vsel %vm1458_vm2, %v1735_v12, %v1742_v5  ;;  %v16054_v34 = vld [vmem:[#allocation19_spill] sm:$0xff] }
 0x113   : > { %v1645_v44 = vor.u32 %v1644_v41, %v1641_v61  ;;  %v1652_v7 = vor.u32 %v1651_v42, %v1648_v54  ;;  %2974 = vmatprep.mubr.bf16.mxu1 %v1593_v55  ;;  %v1571_v57 = vshrl.u32 %v1377_v40, 16  ;;  %v1574_v20 = vshll.u32 %v1377_v40, 16  ;;  %2837 = vmatprep.mubr.bf16.mxu0 %v1743_v58 }
 0x114   : > { %v1566_v31 = vrot.slane %v1564_v24, 3  ;;  %v1569_v38 = vrot.slane %v1567_v1, 4  ;;  %v1789_v49 = vshrl.u32 %v1304_v33, 16  ;;  %v1792_v13 = vshll.u32 %v1304_v33, 16  ;;  %v1120_v30 = vpop.permute.xlu0 %1119 }
 0x115   : > { %v1573_v11 = vrot.slane %v1571_v57, 3  ;;  %v1576_v37 = vrot.slane %v1574_v20, 4  ;;  %v1307_v59 = vsel %vm334_vm0, %v16052_v39, %v1057_v16  ;;  %v1122_v53 = vpop.permute.xlu1 %1121  ;;  %v1219_v45 = vsel %vm334_vm0, %v16053_v50, %v900_v35  ;;  %v16055_v57 = vld [vmem:[#allocation17_spill] sm:$0xff] }
 0x116   : > { %v1570_v8 = vor.u32 %v1569_v38, %v1566_v31  ;;  %v1791_v15 = vrot.slane %v1789_v49, 3  ;;  %v1794_v51 = vrot.slane %v1792_v13, 4  ;;  %v1796_v55 = vshrl.u32 %v1307_v59, 16 }
 0x117   : > { %v1577_v60 = vor.u32 %v1576_v37, %v1573_v11  ;;  %v1799_v32 = vshll.u32 %v1307_v59, 16  ;;  %v1221_v26 = vsel %vm334_vm0, %v16054_v34, %v900_v35  ;;  %v1699_v5 = vshrl.u32 %v1219_v45, 16 }
 0x118   : > { %v1795_v17 = vor.u32 %v1794_v51, %v1791_v15  ;;  %v1798_v12 = vrot.slane %v1796_v55, 3  ;;  %v1702_v61 = vshll.u32 %v1219_v45, 16  ;;  %v1706_v54 = vshrl.u32 %v1221_v26, 16  ;;  %v1059_v24 = vpop.permute.xlu0 %1058  ;;  %v16056_v15 = vld [vmem:[#allocation43_spill] sm:$0xff] }
 0x119   : > { %v1801_v41 = vrot.slane %v1799_v32, 4  ;;  %v1709_v42 = vshll.u32 %v1221_v26, 16  ;;  %v1653_v16 = vsel %vm1458_vm2, %v1645_v44, %v1652_v7  ;;  %v1061_v1 = vpop.permute.xlu1 %1060  ;;  %v1701_v40 = vrot.slane %v1699_v5, 3  ;;  %v16057_v26 = vld [vmem:[#allocation49_spill] sm:$0xff] }
 0x11a   : > { %v1704_v33 = vrot.slane %v1702_v61, 4  ;;  %2838 = vmatmul.mubr.bf16.gmra.mxu0 %v1653_v16  ;;  %v1380_v20 = vsel %vm334_vm0, %v16055_v57, %v1120_v30  ;;  %v1382_v35 = vsel %vm334_vm0, %v16055_v57, %v1122_v53  ;;  %v1708_v38 = vrot.slane %v1706_v54, 3  ;;  %v16059_v57 = vld [vmem:[#allocation22_spill] sm:$0xff] }
 0x11b   : > { %v1802_v31 = vor.u32 %v1801_v41, %v1798_v12  ;;  %v1711_v49 = vrot.slane %v1709_v42, 4  ;;  %v1624_v13 = vshrl.u32 %v1380_v20, 16  ;;  %v1627_v37 = vshll.u32 %v1380_v20, 16 }
 0x11c   : > { %v1705_v11 = vor.u32 %v1704_v33, %v1701_v40  ;;  %v1631_v58 = vshrl.u32 %v1382_v35, 16  ;;  %v1634_v39 = vshll.u32 %v1382_v35, 16  ;;  %v1578_v59 = vsel %vm1458_vm2, %v1570_v8, %v1577_v60  ;;  %v902_v55 = vpop.permute.xlu0 %901  ;;  %v16058_v40 = vld [vmem:[#allocation21_spill] sm:$0xff] }
 0x11d   : > { %v1712_v44 = vor.u32 %v1711_v49, %v1708_v38  ;;  %v1626_v7 = vrot.slane %v1624_v13, 3  ;;  %v1310_v51 = vsel %vm334_vm0, %v16056_v15, %v1059_v24  ;;  %v1124_v30 = vpop.permute.xlu1 %1123  ;;  %v1629_v32 = vrot.slane %v1627_v37, 4  ;;  %2975 = vmatmul.mubr.bf16.gmra.mxu1 %v1578_v59  ;;  %v16060_v37 = vld [vmem:[#allocation20_spill] sm:$0xff] }
 0x11e   : > { %v1633_v50 = vrot.slane %v1631_v58, 3  ;;  %v1636_v53 = vrot.slane %v1634_v39, 4  ;;  %v1849_v45 = vshrl.u32 %v1310_v51, 16  ;;  %2982 = vmatprep.mubr.bf16.mxu1 %v1653_v16  ;;  %v1852_v34 = vshll.u32 %v1310_v51, 16 }
 0x11f   : > { %v1313_v12 = vsel %vm334_vm0, %v16057_v26, %v1061_v1  ;;  %v1803_v5 = vsel %vm1458_vm2, %v1795_v17, %v1802_v31  ;;  %v1713_v61 = vsel %vm1458_vm2, %v1705_v11, %v1712_v44  ;;  %v1630_v8 = vor.u32 %v1629_v32, %v1626_v7 }
 0x120   : > { %v1637_v60 = vor.u32 %v1636_v53, %v1633_v50  ;;  %v1851_v41 = vrot.slane %v1849_v45, 3  ;;  %v1856_v54 = vshrl.u32 %v1313_v12, 16  ;;  %2845 = vmatprep.mubr.bf16.mxu0 %v1803_v5  ;;  %v1854_v42 = vrot.slane %v1852_v34, 4  ;;  %v1126_v20 = vpop.permute.xlu0 %1125  ;;  %v16061_v5 = vld [vmem:[#allocation44_spill] sm:$0xff] }
 0x121   : > { %v1859_v24 = vshll.u32 %v1313_v12, 16  ;;  %v1224_v33 = vsel %vm334_vm0, %v16058_v40, %v902_v55  ;;  %v1226_v16 = vsel %vm334_vm0, %v16059_v57, %v902_v55  ;;  %v1063_v35 = vpop.permute.xlu1 %1062  ;;  %v1385_v58 = vsel %vm334_vm0, %v16060_v37, %v1124_v30 }
 0x122   : > { %v1858_v1 = vrot.slane %v1856_v54, 3  ;;  %2846 = vmatmul.mubr.bf16.gmra.mxu0 %v1713_v61  ;;  %v1759_v17 = vshrl.u32 %v1224_v33, 16  ;;  %v1762_v31 = vshll.u32 %v1224_v33, 16  ;;  %v1766_v38 = vshrl.u32 %v1226_v16, 16 }
 0x123   : > { %v1855_v49 = vor.u32 %v1854_v42, %v1851_v41  ;;  %v1861_v13 = vrot.slane %v1859_v24, 4  ;;  %v1769_v11 = vshll.u32 %v1226_v16, 16  ;;  %v1684_v59 = vshrl.u32 %v1385_v58, 16 }
 0x124   : > { %v1761_v39 = vrot.slane %v1759_v17, 3  ;;  %v1764_v44 = vrot.slane %v1762_v31, 4  ;;  %v1768_v7 = vrot.slane %v1766_v38, 3  ;;  %v1687_v55 = vshll.u32 %v1385_v58, 16  ;;  %v1065_v53 = vpop.permute.xlu0 %1064 }
 0x125   : > { %v1862_v51 = vor.u32 %v1861_v13, %v1858_v1  ;;  %v1771_v32 = vrot.slane %v1769_v11, 4  ;;  %v1638_v50 = vsel %vm1458_vm2, %v1630_v8, %v1637_v60  ;;  %v904_v45 = vpop.permute.xlu1 %903  ;;  %v1686_v26 = vrot.slane %v1684_v59, 3  ;;  %v16062_v60 = vld [vmem:[#allocation51_spill] sm:$0xff] }
 0x126   : > { %v1765_v34 = vor.u32 %v1764_v44, %v1761_v39  ;;  %2983 = vmatmul.mubr.bf16.gmra.mxu1 %v1638_v50  ;;  %v1387_v12 = vsel %vm334_vm0, %v16060_v37, %v1126_v20  ;;  %v1316_v30 = vsel %vm334_vm0, %v16061_v5, %v1063_v35  ;;  %v1689_v54 = vrot.slane %v1687_v55, 4  ;;  %v16064_v44 = vld [vmem:[#allocation26_spill] sm:$0xff] }
 0x127   : > { %v1772_v41 = vor.u32 %v1771_v32, %v1768_v7  ;;  %2990 = vmatprep.mubr.bf16.mxu1 %v1713_v61  ;;  %v1691_v42 = vshrl.u32 %v1387_v12, 16  ;;  %v1694_v24 = vshll.u32 %v1387_v12, 16  ;;  %v1909_v40 = vshrl.u32 %v1316_v30, 16  ;;  %v16063_v61 = vld [vmem:[#allocation25_spill] sm:$0xff]  ;;  %v16065_v12 = vld [vmem:[#allocation23_spill] sm:$0xff] }
 0x128   : > { %v1912_v33 = vshll.u32 %v1316_v30, 16  ;;  %v1863_v8 = vsel %vm1458_vm2, %v1855_v49, %v1862_v51  ;;  %v1319_v57 = vsel %vm334_vm0, %v16062_v60, %v1065_v53  ;;  %v1690_v16 = vor.u32 %v1689_v54, %v1686_v26  ;;  %v1128_v31 = vpop.permute.xlu0 %1127 }
 0x129   : > { %v1693_v1 = vrot.slane %v1691_v42, 3  ;;  %v1696_v17 = vrot.slane %v1694_v24, 4  ;;  %2853 = vmatprep.mubr.bf16.mxu0 %v1863_v8  ;;  %v1916_v20 = vshrl.u32 %v1319_v57, 16  ;;  %v1130_v38 = vpop.permute.xlu1 %1129  ;;  %v1911_v35 = vrot.slane %v1909_v40, 3 }
 0x12a   : > { %v1914_v13 = vrot.slane %v1912_v33, 4  ;;  %v1919_v11 = vshll.u32 %v1319_v57, 16  ;;  %v1229_v37 = vsel %vm334_vm0, %v16063_v61, %v904_v45  ;;  %v1231_v49 = vsel %vm334_vm0, %v16064_v44, %v904_v45  ;;  %v16067_v61 = vld [vmem:[#allocation61_spill] sm:$0xff] }
 0x12b   : > { %v1697_v58 = vor.u32 %v1696_v17, %v1693_v1  ;;  %v1918_v39 = vrot.slane %v1916_v20, 3  ;;  %v1819_v7 = vshrl.u32 %v1229_v37, 16  ;;  %v1822_v32 = vshll.u32 %v1229_v37, 16 }
 0x12c   : > { %v1915_v59 = vor.u32 %v1914_v13, %v1911_v35  ;;  %v1921_v51 = vrot.slane %v1919_v11, 4  ;;  %v1826_v55 = vshrl.u32 %v1231_v49, 16  ;;  %v1829_v53 = vshll.u32 %v1231_v49, 16  ;;  %v1067_v54 = vpop.permute.xlu0 %1066  ;;  %v16066_v13 = vld [vmem:[#allocation57_spill] sm:$0xff] }
 0x12d   : > { %v1821_v50 = vrot.slane %v1819_v7, 3  ;;  %v1773_v26 = vsel %vm1458_vm2, %v1765_v34, %v1772_v41  ;;  %v1390_v30 = vsel %vm334_vm0, %v16065_v12, %v1128_v31  ;;  %v1069_v42 = vpop.permute.xlu1 %1068  ;;  %v1824_v40 = vrot.slane %v1822_v32, 4 }
 0x12e   : > { %v1922_v24 = vor.u32 %v1921_v51, %v1918_v39  ;;  %v1828_v33 = vrot.slane %v1826_v55, 3  ;;  %2854 = vmatmul.mubr.bf16.gmra.mxu0 %v1773_v26  ;;  %v1744_v8 = vshrl.u32 %v1390_v30, 16  ;;  %v1831_v45 = vrot.slane %v1829_v53, 4 }
 0x12f   : > { %v1747_v60 = vshll.u32 %v1390_v30, 16  ;;  %v1392_v57 = vsel %vm334_vm0, %v16065_v12, %v1130_v38  ;;  %v1698_v1 = vsel %vm1458_vm2, %v1690_v16, %v1697_v58  ;;  %v1825_v17 = vor.u32 %v1824_v40, %v1821_v50 }
 0x130   : > { %v1746_v20 = vrot.slane %v1744_v8, 3  ;;  %v1751_v34 = vshrl.u32 %v1392_v57, 16  ;;  %v1754_v41 = vshll.u32 %v1392_v57, 16  ;;  %2991 = vmatmul.mubr.bf16.gmra.mxu1 %v1698_v1  ;;  %v1832_v31 = vor.u32 %v1831_v45, %v1828_v33  ;;  %v906_v39 = vpop.permute.xlu0 %905  ;;  %v16069_v33 = vld [vmem:[#allocation31_spill] sm:$0xff] }
 0x131   : > { %v1749_v35 = vrot.slane %v1747_v60, 4  ;;  %2998 = vmatprep.mubr.bf16.mxu1 %v1773_v26  ;;  %v1322_v11 = vsel %vm334_vm0, %v16066_v13, %v1067_v54  ;;  %v1325_v37 = vsel %vm334_vm0, %v16067_v61, %v1069_v42  ;;  %v1132_v44 = vpop.permute.xlu1 %1131  ;;  %v1923_v55 = vsel %vm1458_vm2, %v1915_v59, %v1922_v24  ;;  %v16068_v42 = vld [vmem:[#allocation29_spill] sm:$0xff] }
 0x132   : > { %v1753_v49 = vrot.slane %v1751_v34, 3  ;;  %v1756_v38 = vrot.slane %v1754_v41, 4  ;;  %v1969_v7 = vshrl.u32 %v1322_v11, 16  ;;  %v1972_v16 = vshll.u32 %v1322_v11, 16  ;;  %2861 = vmatprep.mubr.bf16.mxu0 %v1923_v55  ;;  %v16070_v41 = vld [vmem:[#allocation27_spill] sm:$0xff] }
 0x133   : > { %v1750_v58 = vor.u32 %v1749_v35, %v1746_v20  ;;  %v1976_v51 = vshrl.u32 %v1325_v37, 16  ;;  %v1979_v32 = vshll.u32 %v1325_v37, 16  ;;  %v1833_v12 = vsel %vm1458_vm2, %v1825_v17, %v1832_v31 }
 0x134   : > { %v1757_v50 = vor.u32 %v1756_v38, %v1753_v49  ;;  %v1971_v53 = vrot.slane %v1969_v7, 3  ;;  %v1974_v26 = vrot.slane %v1972_v16, 4  ;;  %v1234_v40 = vsel %vm334_vm0, %v16068_v42, %v906_v39  ;;  %v1134_v45 = vpop.permute.xlu0 %1133 }
 0x135   : > { %v1978_v30 = vrot.slane %v1976_v51, 3  ;;  %v1981_v54 = vrot.slane %v1979_v32, 4  ;;  %v1236_v8 = vsel %vm334_vm0, %v16069_v33, %v906_v39  ;;  %v1071_v60 = vpop.permute.xlu1 %1070  ;;  %v1879_v1 = vshrl.u32 %v1234_v40, 16 }
 0x136   : > { %v1975_v57 = vor.u32 %v1974_v26, %v1971_v53  ;;  %2862 = vmatmul.mubr.bf16.gmra.mxu0 %v1833_v12  ;;  %v1882_v59 = vshll.u32 %v1234_v40, 16  ;;  %v1886_v24 = vshrl.u32 %v1236_v8, 16  ;;  %v1889_v34 = vshll.u32 %v1236_v8, 16 }
 0x137   : > { %v1982_v20 = vor.u32 %v1981_v54, %v1978_v30  ;;  %v1395_v17 = vsel %vm334_vm0, %v16070_v41, %v1132_v44  ;;  %v1758_v31 = vsel %vm1458_vm2, %v1750_v58, %v1757_v50  ;;  %v1881_v35 = vrot.slane %v1879_v1, 3 }
 0x138   : > { %v1884_v11 = vrot.slane %v1882_v59, 4  ;;  %v1888_v61 = vrot.slane %v1886_v24, 3  ;;  %v1804_v37 = vshrl.u32 %v1395_v17, 16  ;;  %2999 = vmatmul.mubr.bf16.gmra.mxu1 %v1758_v31  ;;  %v1891_v39 = vrot.slane %v1889_v34, 4  ;;  %v1073_v16 = vpop.permute.xlu0 %1072  ;;  %v16072_v31 = vld [vmem:[#allocation42_spill] sm:$0xff] }
 0x139   : > { %v1807_v49 = vshll.u32 %v1395_v17, 16  ;;  %3006 = vmatprep.mubr.bf16.mxu1 %v1833_v12  ;;  %v1397_v38 = vsel %vm334_vm0, %v16070_v41, %v1134_v45  ;;  %v1328_v7 = vsel %vm334_vm0, %v11622_v18, %v1071_v60  ;;  %v908_v51 = vpop.permute.xlu1 %907  ;;  %v1983_v12 = vsel %vm1458_vm2, %v1975_v57, %v1982_v20  ;;  %v16071_v41 = vld [vmem:[#allocation40_spill] sm:$0xff] }
 0x13a   : > { %v1885_v32 = vor.u32 %v1884_v11, %v1881_v35  ;;  %v1806_v44 = vrot.slane %v1804_v37, 3  ;;  %v1811_v55 = vshrl.u32 %v1397_v38, 16  ;;  %v1814_v58 = vshll.u32 %v1397_v38, 16  ;;  %2869 = vmatprep.mubr.bf16.mxu0 %v1983_v12 }
 0x13b   : > { %v1892_v50 = vor.u32 %v1891_v39, %v1888_v61  ;;  %v1809_v53 = vrot.slane %v1807_v49, 4  ;;  %v2029_v26 = vshrl.u32 %v1328_v7, 16  ;;  %v2032_v30 = vshll.u32 %v1328_v7, 16 }
 0x13c   : > { %v1813_v54 = vrot.slane %v1811_v55, 3  ;;  %v1816_v42 = vrot.slane %v1814_v58, 4  ;;  %v1331_v40 = vsel %vm334_vm0, %v11649_v23, %v1073_v16  ;;  %v1136_v1 = vpop.permute.xlu0 %1135  ;;  %v1239_v17 = vsel %vm334_vm0, %v16071_v41, %v908_v51  ;;  %v16073_v16 = vld [vmem:[#allocation32_spill] sm:$0xff] }
 0x13d   : > { %v1810_v33 = vor.u32 %v1809_v53, %v1806_v44  ;;  %v2031_v8 = vrot.slane %v2029_v26, 3  ;;  %v2034_v45 = vrot.slane %v2032_v30, 4  ;;  %v2036_v60 = vshrl.u32 %v1331_v40, 16  ;;  %v1138_v59 = vpop.permute.xlu1 %1137 }
 0x13e   : > { %v1817_v24 = vor.u32 %v1816_v42, %v1813_v54  ;;  %v2039_v34 = vshll.u32 %v1331_v40, 16  ;;  %v1241_v35 = vsel %vm334_vm0, %v16072_v31, %v908_v51  ;;  %v1939_v20 = vshrl.u32 %v1239_v17, 16 }
 0x13f   : > { %v2035_v11 = vor.u32 %v2034_v45, %v2031_v8  ;;  %v2038_v57 = vrot.slane %v2036_v60, 3  ;;  %v1942_v61 = vshll.u32 %v1239_v17, 16  ;;  %v1946_v37 = vshrl.u32 %v1241_v35, 16 }
 0x140   : > { %v2041_v23 = vrot.slane %v2039_v34, 4  ;;  %v1949_v39 = vshll.u32 %v1241_v35, 16  ;;  %v1893_v49 = vsel %vm1458_vm2, %v1885_v32, %v1892_v50  ;;  %v1941_v38 = vrot.slane %v1939_v20, 3  ;;  %v1075_v58 = vpop.permute.xlu0 %1074 }
 0x141   : > { %v1944_v7 = vrot.slane %v1942_v61, 4  ;;  %2870 = vmatmul.mubr.bf16.gmra.mxu0 %v1893_v49  ;;  %v1400_v44 = vsel %vm334_vm0, %v16073_v16, %v1136_v1  ;;  %v1402_v55 = vsel %vm334_vm0, %v16073_v16, %v1138_v59  ;;  %v1077_v51 = vpop.permute.xlu1 %1076  ;;  %v1948_v26 = vrot.slane %v1946_v37, 3 }
 0x142   : > { %v2042_v53 = vor.u32 %v2041_v23, %v2038_v57  ;;  %v1951_v30 = vrot.slane %v1949_v39, 4  ;;  %v1864_v54 = vshrl.u32 %v1400_v44, 16  ;;  %v1867_v12 = vshll.u32 %v1400_v44, 16  ;;  %v16075_v44 = vld [vmem:[#allocation48_spill] sm:$0xff] }
 0x143   : > { %v1945_v42 = vor.u32 %v1944_v7, %v1941_v38  ;;  %v1871_v40 = vshrl.u32 %v1402_v55, 16  ;;  %v1874_v8 = vshll.u32 %v1402_v55, 16  ;;  %v1818_v45 = vsel %vm1458_vm2, %v1810_v33, %v1817_v24  ;;  %v16074_v7 = vld [vmem:[#allocation47_spill] sm:$0xff] }
 0x144   : > { %v1952_v32 = vor.u32 %v1951_v30, %v1948_v26  ;;  %v1866_v50 = vrot.slane %v1864_v54, 3  ;;  %v1334_v60 = vsel %vm334_vm0, %v11626_v9, %v1075_v58  ;;  %v1869_v1 = vrot.slane %v1867_v12, 4  ;;  %3007 = vmatmul.mubr.bf16.gmra.mxu1 %v1818_v45  ;;  %v910_v17 = vpop.permute.xlu0 %909 }
 0x145   : > { %v1873_v34 = vrot.slane %v1871_v40, 3  ;;  %v1876_v59 = vrot.slane %v1874_v8, 4  ;;  %v2089_v41 = vshrl.u32 %v1334_v60, 16  ;;  %v1140_v31 = vpop.permute.xlu1 %1139  ;;  %3014 = vmatprep.mubr.bf16.mxu1 %v1893_v49  ;;  %v2092_v35 = vshll.u32 %v1334_v60, 16 }
 0x146   : > { %v1337_v57 = vsel %vm334_vm0, %v11657_v22, %v1077_v51  ;;  %v2043_v20 = vsel %vm1458_vm2, %v2035_v11, %v2042_v53  ;;  %v1953_v61 = vsel %vm1458_vm2, %v1945_v42, %v1952_v32  ;;  %v1870_v33 = vor.u32 %v1869_v1, %v1866_v50  ;;  %v16076_v42 = vld [vmem:[#allocation46_spill] sm:$0xff] }
 0x147   : > { %v1877_v24 = vor.u32 %v1876_v59, %v1873_v34  ;;  %v2091_v23 = vrot.slane %v2089_v41, 3  ;;  %v2096_v37 = vshrl.u32 %v1337_v57, 16  ;;  %2877 = vmatprep.mubr.bf16.mxu0 %v2043_v20  ;;  %v2094_v39 = vrot.slane %v2092_v35, 4 }
 0x148   : > { %v2099_v38 = vshll.u32 %v1337_v57, 16  ;;  %v1244_v16 = vsel %vm334_vm0, %v16074_v7, %v910_v17  ;;  %v1246_v49 = vsel %vm334_vm0, %v16075_v44, %v910_v17  ;;  %v1142_v51 = vpop.permute.xlu0 %1141  ;;  %v1405_v12 = vsel %vm334_vm0, %v16076_v42, %v1140_v31 }
 0x149   : > { %v2098_v55 = vrot.slane %v2096_v37, 3  ;;  %2878 = vmatmul.mubr.bf16.gmra.mxu0 %v1953_v61  ;;  %v1999_v22 = vshrl.u32 %v1244_v16, 16  ;;  %v2002_v58 = vshll.u32 %v1244_v16, 16  ;;  %v2006_v11 = vshrl.u32 %v1246_v49, 16  ;;  %v1079_v53 = vpop.permute.xlu1 %1078 }
 0x14a   : > { %v2095_v26 = vor.u32 %v2094_v39, %v2091_v23  ;;  %v2101_v30 = vrot.slane %v2099_v38, 4  ;;  %v2009_v54 = vshll.u32 %v1246_v49, 16  ;;  %v1924_v50 = vshrl.u32 %v1405_v12, 16 }
 0x14b   : > { %v2001_v40 = vrot.slane %v1999_v22, 3  ;;  %v2004_v8 = vrot.slane %v2002_v58, 4  ;;  %v2008_v32 = vrot.slane %v2006_v11, 3  ;;  %v1927_v1 = vshll.u32 %v1405_v12, 16 }
 0x14c   : > { %v2102_v45 = vor.u32 %v2101_v30, %v2098_v55  ;;  %v2011_v60 = vrot.slane %v2009_v54, 4  ;;  %v1878_v34 = vsel %vm1458_vm2, %v1870_v33, %v1877_v24  ;;  %v1926_v41 = vrot.slane %v1924_v50, 3  ;;  %v1081_v57 = vpop.permute.xlu0 %1080 }
 0x14d   : > { %v2005_v59 = vor.u32 %v2004_v8, %v2001_v40  ;;  %3015 = vmatmul.mubr.bf16.gmra.mxu1 %v1878_v34  ;;  %v1407_v17 = vsel %vm334_vm0, %v16076_v42, %v1142_v51  ;;  %v1340_v35 = vsel %vm334_vm0, %v11645_v43, %v1079_v53  ;;  %v912_v31 = vpop.permute.xlu1 %911  ;;  %v1929_v23 = vrot.slane %v1927_v1, 4  ;;  %v16077_v51 = vld [vmem:[#allocation52_spill] sm:$0xff]  ;;  %v16078_v42 = vld [vmem:[#allocation53_spill] sm:$0xff] }
 0x14e   : > { %v2012_v20 = vor.u32 %v2011_v60, %v2008_v32  ;;  %3022 = vmatprep.mubr.bf16.mxu1 %v1953_v61  ;;  %v1931_v37 = vshrl.u32 %v1407_v17, 16  ;;  %v1934_v39 = vshll.u32 %v1407_v17, 16  ;;  %v2149_v38 = vshrl.u32 %v1340_v35, 16  ;;  %v16079_v34 = vld [vmem:[#allocation56_spill] sm:$0xff] }
 0x14f   : > { %v2152_v7 = vshll.u32 %v1340_v35, 16  ;;  %v2103_v33 = vsel %vm1458_vm2, %v2095_v26, %v2102_v45  ;;  %v1343_v24 = vsel %vm334_vm0, %v11686_v4, %v1081_v57  ;;  %v1930_v16 = vor.u32 %v1929_v23, %v1926_v41 }
 0x150   : > { %v1933_v44 = vrot.slane %v1931_v37, 3  ;;  %v1936_v49 = vrot.slane %v1934_v39, 4  ;;  %2885 = vmatprep.mubr.bf16.mxu0 %v2103_v33  ;;  %v2156_v55 = vshrl.u32 %v1343_v24, 16  ;;  %v2151_v22 = vrot.slane %v2149_v38, 3  ;;  %v1144_v53 = vpop.permute.xlu0 %1143 }
 0x151   : > { %v2154_v58 = vrot.slane %v2152_v7, 4  ;;  %v2159_v11 = vshll.u32 %v1343_v24, 16  ;;  %v1249_v61 = vsel %vm334_vm0, %v16077_v51, %v912_v31  ;;  %v1251_v26 = vsel %vm334_vm0, %v16078_v42, %v912_v31  ;;  %v1146_v50 = vpop.permute.xlu1 %1145 }
 0x152   : > { %v1937_v30 = vor.u32 %v1936_v49, %v1933_v44  ;;  %v2158_v54 = vrot.slane %v2156_v55, 3  ;;  %v2059_v12 = vshrl.u32 %v1249_v61, 16  ;;  %v2062_v8 = vshll.u32 %v1249_v61, 16 }
 0x153   : > { %v2155_v40 = vor.u32 %v2154_v58, %v2151_v22  ;;  %v2161_v4 = vrot.slane %v2159_v11, 4  ;;  %v2066_v32 = vshrl.u32 %v1251_v26, 16  ;;  %v2069_v60 = vshll.u32 %v1251_v26, 16  ;;  %v16080_v58 = vld [vmem:[#allocation60_spill] sm:$0xff] }
 0x154   : > { %v2061_v45 = vrot.slane %v2059_v12, 3  ;;  %v2013_v1 = vsel %vm1458_vm2, %v2005_v59, %v2012_v20  ;;  %v1410_v41 = vsel %vm334_vm0, %v16079_v34, %v1144_v53  ;;  %v2064_v35 = vrot.slane %v2062_v8, 4  ;;  %v1148_v37 = vpop.permute.xlu0 %1147 }
 0x155   : > { %v2162_v17 = vor.u32 %v2161_v4, %v2158_v54  ;;  %v2068_v57 = vrot.slane %v2066_v32, 3  ;;  %2886 = vmatmul.mubr.bf16.gmra.mxu0 %v2013_v1  ;;  %v1984_v23 = vshrl.u32 %v1410_v41, 16  ;;  %v2071_v31 = vrot.slane %v2069_v60, 4  ;;  %v1150_v20 = vpop.permute.xlu1 %1149  ;;  %v16081_v60 = vld [vmem:[#allocation36_spill] sm:$0xff] }
 0x156   : > { %v1987_v39 = vshll.u32 %v1410_v41, 16  ;;  %v1412_v38 = vsel %vm334_vm0, %v16079_v34, %v1146_v50  ;;  %v1938_v7 = vsel %vm1458_vm2, %v1930_v16, %v1937_v30  ;;  %v2065_v33 = vor.u32 %v2064_v35, %v2061_v45 }
 0x157   : > { %v1986_v24 = vrot.slane %v1984_v23, 3  ;;  %v1991_v44 = vshrl.u32 %v1412_v38, 16  ;;  %v1994_v59 = vshll.u32 %v1412_v38, 16  ;;  %3023 = vmatmul.mubr.bf16.gmra.mxu1 %v1938_v7  ;;  %v2072_v49 = vor.u32 %v2071_v31, %v2068_v57 }
 0x158   : > { %v1989_v55 = vrot.slane %v1987_v39, 4  ;;  %3030 = vmatprep.mubr.bf16.mxu1 %v2013_v1  ;;  %v2163_v22 = vsel %vm1458_vm2, %v2155_v40, %v2162_v17  ;;  %v1415_v11 = vsel %vm334_vm0, %v16080_v58, %v1148_v37  ;;  %v1417_v42 = vsel %vm334_vm0, %v16080_v58, %v1150_v20  ;;  %v1152_v32 = vpop.permute.xlu0 %1151  ;;  %v16082_v1 = vld [vmem:[#allocation37_spill] sm:$0xff]  ;;  %v16083_v39 = vld [vmem:[#allocation66_spill] sm:$0xff] }
 0x159   : > { %v1993_v51 = vrot.slane %v1991_v44, 3  ;;  %v1996_v61 = vrot.slane %v1994_v59, 4  ;;  %2893 = vmatprep.mubr.bf16.mxu0 %v2163_v22  ;;  %v2044_v53 = vshrl.u32 %v1415_v11, 16  ;;  %v2047_v54 = vshll.u32 %v1415_v11, 16  ;;  %v1154_v17 = vpop.permute.xlu1 %1153 }
 0x15a   : > { %v1990_v16 = vor.u32 %v1989_v55, %v1986_v24  ;;  %v2073_v30 = vsel %vm1458_vm2, %v2065_v33, %v2072_v49  ;;  %v1524_v26 = vrot.slane %v1522_v48, 4  ;;  %v2051_v8 = vshrl.u32 %v1417_v42, 16 }
 0x15b   : > { %v1997_v12 = vor.u32 %v1996_v61, %v1993_v51  ;;  %v2046_v4 = vrot.slane %v2044_v53, 3  ;;  %v2049_v40 = vrot.slane %v2047_v54, 4  ;;  %v2054_v50 = vshll.u32 %v1417_v42, 16  ;;  %v16084_v42 = vld [vmem:[#allocation35_spill] sm:$0xff] }
 0x15c   : > { %v1525_v45 = vor.u32 %v1524_v26, %v11792_v2  ;;  %v1532_v34 = vor.u32 %v16082_v1, %v16081_v60  ;;  %v1594_v41 = vshrl.u32 %v11417_v0, 16  ;;  %v2053_v57 = vrot.slane %v2051_v8, 3  ;;  %v1156_v11 = vpop.permute.xlu0 %1155  ;;  %v16085_v26 = vld [vmem:[#allocation34_spill] sm:$0xff]  ;;  %v16087_v8 = vld [vmem:[#allocation39_spill] sm:$0xff]  ;;  %v16089_v1 = vld [vmem:[#allocation45_spill] sm:$0xff] }
 0x15d   : > { %2894 = vmatmul.mubr.bf16.gmra.mxu0 %v2073_v30  ;;  %v2050_v35 = vor.u32 %v2049_v40, %v2046_v4  ;;  %v1998_v21 = vsel %vm1458_vm2, %v1990_v16, %v1997_v12  ;;  %v1597_v48 = vshll.u32 %v11417_v0, 16  ;;  %v2056_v23 = vrot.slane %v2054_v50, 4  ;;  %v1158_v16 = vpop.permute.xlu1 %1157 }
 0x15e   : > { %v1533_v37 = vsel %vm1458_vm2, %v1525_v45, %v1532_v34  ;;  %v1596_v31 = vrot.slane %v1594_v41, 3  ;;  %v1420_v2 = vsel %vm334_vm0, %v16083_v39, %v1152_v32  ;;  %v1422_v24 = vsel %vm334_vm0, %v16083_v39, %v1154_v17  ;;  %v16088_v32 = vld [vmem:[#allocation41_spill] sm:$0xff]  ;;  %v16090_v34 = vld [vmem:[#allocation50_spill] sm:$0xff] }
 0x15f   : > { %3031 = vmatmul.mubr.bf16.gmra.mxu1 %v1998_v21  ;;  %10394 = vmatprep.mubr.msk.bf16.mxu0 %vm334_vm0, %v1533_v37  ;;  %v1599_v38 = vrot.slane %v1597_v48, 4  ;;  %v2104_v7 = vshrl.u32 %v1420_v2, 16  ;;  %v2107_v33 = vshll.u32 %v1420_v2, 16  ;;  %v2057_v44 = vor.u32 %v2056_v23, %v2053_v57 }
 0x160   : > { %3038 = vmatprep.mubr.bf16.mxu1 %v2073_v30  ;;  %v2111_v59 = vshrl.u32 %v1422_v24, 16  ;;  %v2114_v0 = vshll.u32 %v1422_v24, 16  ;;  %v1654_v20 = vshrl.u32 %v16046_v19, 16  ;;  %v1657_v58 = vshll.u32 %v16046_v19, 16  ;;  %v1160_v23 = vpop.permute.xlu0 %1159 }
 0x161   : > { %v1600_v49 = vor.u32 %v1599_v38, %v1596_v31  ;;  %v2106_v55 = vrot.slane %v2104_v7, 3  ;;  %v2109_v22 = vrot.slane %v2107_v33, 4  ;;  %v2058_v53 = vsel %vm1458_vm2, %v2050_v35, %v2057_v44  ;;  %v16091_v35 = vld [vmem:[#allocation5_spill] sm:$0xff] }
 0x162   : > { %v2113_v51 = vrot.slane %v2111_v59, 3  ;;  %v2116_v61 = vrot.slane %v2114_v0, 4  ;;  %v1656_v54 = vrot.slane %v1654_v20, 3  ;;  %v16086_v12 = vor.u32 %v16084_v42, %v16085_v26 }
 0x163   : > { %v2110_v4 = vor.u32 %v2109_v22, %v2106_v55  ;;  %v1659_v40 = vrot.slane %v1657_v58, 4  ;;  %v1667_v50 = vor.u32 %v16088_v32, %v16087_v8  ;;  %v1714_v19 = vshrl.u32 %v16051_v6, 16  ;;  %v16092_v22 = vld [vmem:[#allocation54_spill] sm:$0xff]  ;;  %v16093_v58 = vld [vmem:[#allocation55_spill] sm:$0xff] }
 0x164   : > { %v1608_v30 = vsel %vm1458_vm2, %v1600_v49, %v16086_v12  ;;  %v2117_v45 = vor.u32 %v2116_v61, %v2113_v51  ;;  %v1717_v60 = vshll.u32 %v16051_v6, 16  ;;  %v1727_v41 = vor.u32 %v16090_v34, %v16089_v1  ;;  %v1164_v51 = vpop.permute.xlu0 %1163  ;;  %v16094_v12 = vld [vmem:[#allocation58_spill] sm:$0xff] }
 0x165   : > { %10395 = vmatmul.mubr.msk.bf16.vlgmr.msra.gmra.mxu0 %vm334_vm0, %v1608_v30  ;;  %v1660_v17 = vor.u32 %v1659_v40, %v1656_v54  ;;  %v1425_v57 = vsel %vm334_vm0, %v16091_v35, %v1156_v11  ;;  %v1427_v21 = vsel %vm334_vm0, %v16091_v35, %v1158_v16  ;;  %v1774_v48 = vshrl.u32 %v16056_v15, 16  ;;  %v1162_v16 = vpop.permute.xlu1 %1161  ;;  %v16095_v30 = vld [vmem:[#allocation59_spill] sm:$0xff]  ;;  %v16096_v40 = vld [vmem:[#allocation6_spill] sm:$0xff] }
 0x166   : > { %v1716_v37 = vrot.slane %v1714_v19, 3  ;;  %v1719_v31 = vrot.slane %v1717_v60, 4  ;;  %v2164_v39 = vshrl.u32 %v1425_v57, 16  ;;  %v2167_v2 = vshll.u32 %v1425_v57, 16 }
 0x167   : > { %3039 = vmatmul.mubr.bf16.gmra.mxu1 %v2058_v53  ;;  %v1668_v6 = vsel %vm1458_vm2, %v1660_v17, %v1667_v50  ;;  %v2171_v38 = vshrl.u32 %v1427_v21, 16  ;;  %v2174_v7 = vshll.u32 %v1427_v21, 16  ;;  %v2118_v33 = vsel %vm1458_vm2, %v2110_v4, %v2117_v45 }
 0x168   : > { %3046 = vmatprep.mubr.bf16.mxu1 %v11843_v29  ;;  %10398 = vmatprep.mubr.msk.bf16.mxu0 %vm334_vm0, %v1668_v6  ;;  %v1720_v24 = vor.u32 %v1719_v31, %v1716_v37  ;;  %v2166_v44 = vrot.slane %v2164_v39, 3  ;;  %v2169_v59 = vrot.slane %v2167_v2, 4  ;;  %v1776_v0 = vrot.slane %v1774_v48, 3  ;;  %v1184_v31 = vpop.permute.xlu0 %1183 }
 0x169   : > { %v2173_v20 = vrot.slane %v2171_v38, 3  ;;  %v2176_v49 = vrot.slane %v2174_v7, 4  ;;  %v1777_v55 = vshll.u32 %v16056_v15, 16  ;;  %v1787_v11 = vor.u32 %v16093_v58, %v16092_v22  ;;  %v1166_v37 = vpop.permute.xlu1 %1165  ;;  %v16097_v38 = vld [vmem:[#allocation62_spill] sm:$0xff]  ;;  %v16098_v7 = vld [vmem:[#allocation63_spill] sm:$0xff]  ;;  %v16102_v58 = vld [vmem:[#allocation12_spill] sm:$0xff] }
 0x16a   : > { %v1728_v61 = vsel %vm1458_vm2, %v1720_v24, %v1727_v41  ;;  %v2170_v53 = vor.u32 %v2169_v59, %v2166_v44  ;;  %v1834_v54 = vshrl.u32 %v16061_v5, 16  ;;  %v1837_v29 = vshll.u32 %v16061_v5, 16 }
 0x16b   : > { %v2177_v42 = vor.u32 %v2176_v49, %v2173_v20  ;;  %v1779_v26 = vrot.slane %v1777_v55, 4  ;;  %v1847_v4 = vor.u32 %v16095_v30, %v16094_v12  ;;  %v1430_v15 = vsel %vm334_vm0, %v16096_v40, %v1160_v23  ;;  %v16100_v20 = vld [vmem:[#allocation68_spill] sm:$0xff] }
 0x16c   : > { %v1836_v8 = vrot.slane %v1834_v54, 3  ;;  %v1839_v32 = vrot.slane %v1837_v29, 4  ;;  %v2224_v50 = vshrl.u32 %v1430_v15, 16  ;;  %v2227_v45 = vshll.u32 %v1430_v15, 16  ;;  %v16101_v55 = vld [vmem:[#allocation8_spill] sm:$0xff] }
 0x16d   : > { %10399 = vmatmul.mubr.msk.bf16.gmra.mxu0 %vm334_vm0, %v1728_v61  ;;  %v1780_v19 = vor.u32 %v1779_v26, %v1776_v0  ;;  %v1432_v60 = vsel %vm334_vm0, %v16096_v40, %v1162_v16  ;;  %v2178_v5 = vsel %vm1458_vm2, %v2170_v53, %v2177_v42  ;;  %v1894_v1 = vshrl.u32 %v16066_v13, 16 }
 0x16e   : > { %v1840_v34 = vor.u32 %v1839_v32, %v1836_v8  ;;  %v2226_v41 = vrot.slane %v2224_v50, 3  ;;  %v2229_v17 = vrot.slane %v2227_v45, 4  ;;  %v2231_v35 = vshrl.u32 %v1432_v60, 16 }
 0x16f   : > { %3047 = vmatmul.mubr.bf16.gmra.mxu1 %v2118_v33  ;;  %v1788_v57 = vsel %vm1458_vm2, %v1780_v19, %v1787_v11  ;;  %v2234_v21 = vshll.u32 %v1432_v60, 16  ;;  %v1896_v48 = vrot.slane %v1894_v1, 3  ;;  %v1897_v23 = vshll.u32 %v16066_v13, 16  ;;  %v16099_v13 = vld [vmem:[#allocation67_spill] sm:$0xff] }
 0x170   : > { %3054 = vmatprep.mubr.bf16.mxu1 %v11910_v10  ;;  %10402 = vmatprep.mubr.msk.bf16.mxu0 %vm334_vm0, %v1788_v57  ;;  %v1848_v39 = vsel %vm1458_vm2, %v1840_v34, %v1847_v4  ;;  %v2230_v2 = vor.u32 %v2229_v17, %v2226_v41  ;;  %v2233_v6 = vrot.slane %v2231_v35, 3  ;;  %v1907_v24 = vor.u32 %v16098_v7, %v16097_v38  ;;  %v16103_v4 = vld [vmem:[#allocation13_spill] sm:$0xff]  ;;  %v1168_v34 = vpop.permute.xlu1 %1167 }
 0x171   : > { %v2236_v33 = vrot.slane %v2234_v21, 4  ;;  %v1899_v44 = vrot.slane %v1897_v23, 4  ;;  %v1954_v59 = vshrl.u32 %v11622_v18, 16  ;;  %v1957_v0 = vshll.u32 %v11622_v18, 16 }
 0x172   : > { %v1967_v49 = vor.u32 %v16100_v20, %v16099_v13  ;;  %v1435_v10 = vsel %vm334_vm0, %v16101_v55, %v1164_v51  ;;  %v1437_v22 = vsel %vm334_vm0, %v16101_v55, %v1166_v37  ;;  %v1450_v11 = vsel %vm334_vm0, %v16102_v58, %v1184_v31  ;;  %v1170_v37 = vpop.permute.xlu0 %1169  ;;  %v685_v13 = vld [vmem:[#allocation2 + $0x220] sm:$0xff] }
 0x173   : > { %v2237_v61 = vor.u32 %v2236_v33, %v2233_v6  ;;  %v1900_v53 = vor.u32 %v1899_v44, %v1896_v48  ;;  %v1956_v54 = vrot.slane %v1954_v59, 3  ;;  %v1959_v29 = vrot.slane %v1957_v0, 4  ;;  %v16105_v6 = vld [vmem:[#allocation70_spill] sm:$0xff]  ;;  %v16106_v44 = vld [vmem:[#allocation72_spill] sm:$0xff]  ;;  %v16107_v59 = vld [vmem:[#allocation73_spill] sm:$0xff] }
 0x174   : > { %v2284_v16 = vshrl.u32 %v1435_v10, 16  ;;  %v2287_v42 = vshll.u32 %v1435_v10, 16  ;;  %v2291_v26 = vshrl.u32 %v1437_v22, 16  ;;  %v2294_v18 = vshll.u32 %v1437_v22, 16 }
 0x175   : > { %10403 = vmatmul.mubr.msk.bf16.gmra.mxu0 %vm334_vm0, %v1848_v39  ;;  %v1908_v12 = vsel %vm1458_vm2, %v1900_v53, %v1907_v24  ;;  %v1960_v30 = vor.u32 %v1959_v29, %v1956_v54  ;;  %v2238_v51 = vsel %vm1458_vm2, %v2230_v2, %v2237_v61  ;;  %v1452_v40 = vsel %vm334_vm0, %v16103_v4, %v1184_v31  ;;  %v16104_v2 = vld [vmem:[#allocation69_spill] sm:$0xff]  ;;  %v1186_v53 = vpop.permute.xlu1 %1185 }
 0x176   : > { %10406 = vmatprep.mubr.msk.bf16.mxu0 %vm334_vm0, %v1908_v12  ;;  %v2286_v15 = vrot.slane %v2284_v16, 3  ;;  %v2289_v8 = vrot.slane %v2287_v42, 4  ;;  %v2293_v32 = vrot.slane %v2291_v26, 3  ;;  %v2296_v50 = vrot.slane %v2294_v18, 4  ;;  %v10625_v16 = vld [vmem:[#allocation2 + $0x228] sm:$0xff] }
 0x177   : > { %3055 = vmatmul.mubr.bf16.gmra.mxu1 %v2178_v5  ;;  %v1968_v45 = vsel %vm1458_vm2, %v1960_v30, %v1967_v49  ;;  %v2359_v19 = vshrl.u32 %v1450_v11, 16  ;;  %v2362_v60 = vshll.u32 %v1450_v11, 16  ;;  %v2366_v1 = vshrl.u32 %v1452_v40, 16  ;;  %v16108_v49 = vld [vmem:[#allocation14_spill] sm:$0xff] }
 0x178   : > { %3062 = vmatprep.mubr.bf16.mxu1 %v11959_v14  ;;  %v2290_v41 = vor.u32 %v2289_v8, %v2286_v15  ;;  %v2297_v17 = vor.u32 %v2296_v50, %v2293_v32  ;;  %v2369_v35 = vshll.u32 %v1452_v40, 16  ;;  %v2014_v57 = vshrl.u32 %v11626_v9, 16  ;;  %v10626_v15 = vld [vmem:[#allocation2 + $0x230] sm:$0xff] }
 0x179   : > { %v12200_v21 = vrot.slane %v2359_v19, 3  ;;  %v12202_v48 = vrot.slane %v2362_v60, 4  ;;  %v2368_v23 = vrot.slane %v2366_v1, 3  ;;  %v2017_v5 = vshll.u32 %v11626_v9, 16 }
 0x17a   : > { %v2371_v31 = vrot.slane %v2369_v35, 4  ;;  %v2016_v39 = vrot.slane %v2014_v57, 3  ;;  %v2027_v38 = vor.u32 %v16105_v6, %v16104_v2  ;;  %v2074_v14 = vshrl.u32 %v11645_v43, 16 }
 0x17b   : > { %v2365_v7 = vor.u32 %v12202_v48, %v12200_v21  ;;  %v2019_v24 = vrot.slane %v2017_v5, 4  ;;  %v2077_v33 = vshll.u32 %v11645_v43, 16  ;;  %v2087_v0 = vor.u32 %v16107_v59, %v16106_v44  ;;  %v1174_v59 = vpop.permute.xlu1 %1173 }
 0x17c   : > { %v2372_v20 = vor.u32 %v2371_v31, %v2368_v23  ;;  %v2076_v9 = vrot.slane %v2074_v14, 3  ;;  %v1442_v55 = vsel %vm334_vm0, %v16108_v49, %v1170_v37  ;;  %v1440_v10 = vsel %vm334_vm0, %v16108_v49, %v1168_v34 }
 0x17d   : > { %10407 = vmatmul.mubr.msk.bf16.gmra.mxu0 %vm334_vm0, %v1968_v45  ;;  %v2020_v22 = vor.u32 %v2019_v24, %v2016_v39  ;;  %v2079_v58 = vrot.slane %v2077_v33, 4  ;;  %v2351_v11 = vshrl.u32 %v1442_v55, 16  ;;  %v2354_v61 = vshll.u32 %v1442_v55, 16  ;;  %v1172_v39 = vpop.permute.xlu0 %1171 }
 0x17e   : > { %v2344_v43 = vshrl.u32 %v1440_v10, 16  ;;  %v2347_v54 = vshll.u32 %v1440_v10, 16  ;;  %v2298_v29 = vsel %vm1458_vm2, %v2290_v41, %v2297_v17  ;;  %v757_v42 = vpack.c.bf16 %v10625_v16, %v685_v13 }
 0x17f   : > { %3063 = vmatmul.mubr.bf16.gmra.mxu1 %v2238_v51  ;;  %v2028_v26 = vsel %vm1458_vm2, %v2020_v22, %v2027_v38  ;;  %v2080_v18 = vor.u32 %v2079_v58, %v2076_v9  ;;  %v2353_v12 = vrot.slane %v2351_v11, 3  ;;  %v2356_v30 = vrot.slane %v2354_v61, 4 }
 0x180   : > { %3070 = vmatprep.mubr.bf16.mxu1 %v11993_v28  ;;  %10410 = vmatprep.mubr.msk.bf16.mxu0 %vm334_vm0, %v2028_v26  ;;  %v2346_v4 = vrot.slane %v2344_v43, 3  ;;  %v2349_v40 = vrot.slane %v2347_v54, 4  ;;  %v758_v8 = vpack.c.bf16 %v10626_v15, %v10626_v15  ;;  %v1455_v32 = vsel %vm334_vm0, %v757_v42, %v1186_v53 }
 0x181   : > { %v2088_v50 = vsel %vm1458_vm2, %v2080_v18, %v2087_v0  ;;  %v2357_v45 = vor.u32 %v2356_v30, %v2353_v12  ;;  %v2421_v19 = vshrl.u32 %v1455_v32, 16  ;;  %v2424_v51 = vshll.u32 %v1455_v32, 16 }
 0x182   : > { %v2350_v60 = vor.u32 %v2349_v40, %v2346_v4  ;;  %v1457_v1 = vsel %vm334_vm0, %v758_v8, %v1186_v53  ;;  %v2134_v34 = vshrl.u32 %v11586_v46, 16  ;;  %v2137_v28 = vshll.u32 %v11586_v46, 16 }
 0x183   : > { %v2423_v41 = vrot.slane %v2421_v19, 3  ;;  %v2426_v17 = vrot.slane %v2424_v51, 4  ;;  %v2428_v35 = vshrl.u32 %v1457_v1, 16  ;;  %v2431_v57 = vshll.u32 %v1457_v1, 16 }
 0x184   : > { %v2136_v21 = vrot.slane %v2134_v34, 3  ;;  %v2139_v48 = vrot.slane %v2137_v28, 4  ;;  %v16109_v23 = vshrl.u32 %v11604_v47, 16  ;;  %v16110_v37 = vshll.u32 %v11604_v47, 16 }
 0x185   : > { %10411 = vmatmul.mubr.msk.bf16.gmra.mxu0 %vm334_vm0, %v2088_v50  ;;  %v2427_v2 = vor.u32 %v2426_v17, %v2423_v41  ;;  %v2430_v6 = vrot.slane %v2428_v35, 3  ;;  %v2433_v38 = vrot.slane %v2431_v57, 4  ;;  %v2373_v46 = vsel %vm1458_vm2, %v2365_v7, %v2372_v20 }
 0x186   : > { %v2143_v5 = vrot.slane %v16109_v23, 3  ;;  %v2146_v31 = vrot.slane %v16110_v37, 4  ;;  %v2140_v14 = vor.u32 %v2139_v48, %v2136_v21  ;;  %v2194_v33 = vshrl.u32 %v11487_v3, 16  ;;  %v16117_v37 = vld [vmem:[#allocation74_spill] sm:$0xff] }
 0x187   : > { %v2197_v44 = vshll.u32 %v11487_v3, 16  ;;  %3071 = vmatmul.mubr.bf16.gmra.mxu1 %v2298_v29  ;;  %v2434_v0 = vor.u32 %v2433_v38, %v2430_v6  ;;  %v16111_v47 = vshrl.u32 %v11639_v62, 16  ;;  %v16112_v9 = vshll.u32 %v11639_v62, 16  ;;  %v16119_v6 = vld [vmem:[#allocation64_spill] sm:$0xff] }
 0x188   : > { %v2147_v24 = vor.u32 %v2146_v31, %v2143_v5  ;;  %v1445_v55 = vsel %vm334_vm0, %v11729_v52, %v1172_v39  ;;  %3078 = vmatprep.mubr.bf16.mxu1 %v2373_v46  ;;  %v2196_v20 = vrot.slane %v2194_v33, 3  ;;  %v1447_v11 = vsel %vm334_vm0, %v11729_v52, %v1174_v59  ;;  %v16118_v31 = vld [vmem:[#allocation75_spill] sm:$0xff] }
 0x189   : > { %v2203_v13 = vrot.slane %v16111_v47, 3  ;;  %v2206_v49 = vrot.slane %v16112_v9, 4  ;;  %v2199_v10 = vrot.slane %v2197_v44, 4  ;;  %v2406_v22 = vshrl.u32 %v1445_v55, 16 }
 0x18a   : > { %v2148_v7 = vsel %vm1458_vm2, %v2140_v14, %v2147_v24  ;;  %v2409_v58 = vshll.u32 %v1445_v55, 16  ;;  %v2358_v61 = vsel %vm1458_vm2, %v2350_v60, %v2357_v45  ;;  %v2413_v43 = vshrl.u32 %v1447_v11, 16  ;;  %v688_v60 = vld [vmem:[#allocation2 + $0x238] sm:$0xff] }
 0x18b   : > { %10414 = vmatprep.mubr.msk.bf16.mxu0 %vm334_vm0, %v2148_v7  ;;  %v2207_v3 = vor.u32 %v2206_v49, %v2203_v13  ;;  %v2200_v62 = vor.u32 %v2199_v10, %v2196_v20  ;;  %v2408_v53 = vrot.slane %v2406_v22, 3  ;;  %v2416_v54 = vshll.u32 %v1447_v11, 16 }
 0x18c   : > { %v2411_v29 = vrot.slane %v2409_v58, 4  ;;  %v2254_v16 = vshrl.u32 %v11490_v25, 16  ;;  %v2257_v42 = vshll.u32 %v11490_v25, 16  ;;  %v16113_v26 = vshrl.u32 %v11676_v27, 16 }
 0x18d   : > { %v2208_v12 = vsel %vm1458_vm2, %v2200_v62, %v2207_v3  ;;  %v2415_v30 = vrot.slane %v2413_v43, 3  ;;  %v2418_v4 = vrot.slane %v2416_v54, 4  ;;  %v16114_v52 = vshll.u32 %v11676_v27, 16 }
 0x18e   : > { %v2263_v18 = vrot.slane %v16113_v26, 3  ;;  %10415 = vmatmul.mubr.msk.bf16.gmra.mxu0 %vm334_vm0, %v2208_v12  ;;  %v2412_v15 = vor.u32 %v2411_v29, %v2408_v53  ;;  %v2256_v8 = vrot.slane %v2254_v16, 3  ;;  %v2259_v32 = vrot.slane %v2257_v42, 4 }
 0x18f   : > { %v2266_v40 = vrot.slane %v16114_v52, 4  ;;  %v2435_v50 = vsel %vm1458_vm2, %v2427_v2, %v2434_v0  ;;  %v2419_v45 = vor.u32 %v2418_v4, %v2415_v30  ;;  %v2314_v25 = vshrl.u32 %v11494_v63, 16  ;;  %3079 = vmatmul.mubr.bf16.gmra.mxu1 %v2358_v61 }
 0x190   : > { %v2317_v51 = vshll.u32 %v11494_v63, 16  ;;  %v2260_v1 = vor.u32 %v2259_v32, %v2256_v8  ;;  %v16115_v34 = vshrl.u32 %v11690_v56, 16  ;;  %v16116_v28 = vshll.u32 %v11690_v56, 16  ;;  %3086 = vmatprep.mubr.bf16.mxu1 %v2435_v50 }
 0x191   : > { %v2267_v19 = vor.u32 %v2266_v40, %v2263_v18  ;;  %v2375_v17 = vshrl.u32 %v16041_v36, 16  ;;  %v2316_v35 = vrot.slane %v2314_v25, 3  ;;  %v2378_v21 = vshll.u32 %v16041_v36, 16 }
 0x192   : > { %v2323_v27 = vrot.slane %v16115_v34, 3  ;;  %v2326_v41 = vrot.slane %v16116_v28, 4  ;;  %v2319_v57 = vrot.slane %v2317_v51, 4  ;;  %v760_v5 = vpack.c.bf16 %v688_v60, %v688_v60 }
 0x193   : > { %v2268_v48 = vsel %vm1458_vm2, %v2260_v1, %v2267_v19  ;;  %v2377_v63 = vrot.slane %v2375_v17, 3  ;;  %v2389_v39 = vor.u32 %v16118_v31, %v16117_v37  ;;  %v2380_v56 = vrot.slane %v2378_v21, 4 }
 0x194   : > { %v2327_v23 = vor.u32 %v2326_v41, %v2323_v27  ;;  %10418 = vmatprep.mubr.msk.bf16.mxu0 %vm334_vm0, %v2268_v48  ;;  %v2320_v2 = vor.u32 %v2319_v57, %v2316_v35  ;;  %v1189_v38 = vrot.slane %v16119_v6, 5  ;;  %v2420_v46 = vsel %vm1458_vm2, %v2412_v15, %v2419_v45  ;;  %v12305_v6 = vld [vmem:[%s15713_s2] ss:$0 sm:$0xff] }
 0x195   : > { %v1190_v14 = vrot.slane %v760_v5, 5  ;;  %v2381_v36 = vor.u32 %v2380_v56, %v2377_v63 }
 0x196   : > { %v2328_v24 = vsel %vm1458_vm2, %v2320_v2, %v2327_v23  ;;  %v2437_v33 = vshrl.u32 %v1189_v38, 16  ;;  %v2440_v44 = vshll.u32 %v1189_v38, 16 }
 0x197   : > { %10419 = vmatmul.mubr.msk.bf16.gmra.mxu0 %vm334_vm0, %v2328_v24  ;;  %v1191_v59 = vsel %vm953_vm1, %v1189_v38, %v1190_v14  ;;  %v2390_v0 = vsel %vm1458_vm2, %v2381_v36, %v2389_v39  ;;  %3087 = vmatmul.mubr.bf16.gmra.mxu1 %v2420_v46 }
 0x198   : > { %v2439_v47 = vrot.slane %v2437_v33, 3  ;;  %v2442_v13 = vrot.slane %v2440_v44, 4  ;;  %v2445_v9 = vshrl.u32 %v1191_v59, 16  ;;  %10422 = vmatprep.mubr.msk.bf16.mxu0 %vm334_vm0, %v2390_v0  ;;  %v2448_v49 = vshll.u32 %v1191_v59, 16 }
 0x19a   : > { %v2447_v55 = vrot.slane %v2445_v9, 3  ;;  %v2443_v7 = vor.u32 %v2442_v13, %v2439_v47  ;;  %v2450_v20 = vrot.slane %v2448_v49, 4 }
 0x19c   : > { %v2451_v10 = vor.u32 %v2450_v20, %v2447_v55 }
 0x19e   : > { %v2452_v22 = vsel %vm1458_vm2, %v2443_v7, %v2451_v10 }
 0x19f   : > { %10423 = vmatmul.mubr.msk.bf16.gmra.mxu0 %vm334_vm0, %v2452_v22 }
 0x1a3   : > { %v9650_v3 = vpop.f32.mrf.mxu0 }
 0x1a5   : > { %v9651_v58 = vpop.f32.mrf.mxu0 }
 0x1a6   : > { %v9652_v11 = vadd.f32 %v9651_v58, %v9650_v3 }
 0x1a7   : > { %v9653_v61 = vpop.f32.mrf.mxu0 }
 0x1a8   : > { %v2808_v36 = vadd.f32 %v9652_v11, %v12305_v6 }
 0x1a9   : > { %v9654_v62 = vpop.f32.mrf.mxu0 }
 0x1aa   : > { %v9655_v53 = vadd.f32 %v9654_v62, %v9653_v61 }
 0x1ac   : > { %v2811_v13 = vadd.f32 %v9655_v53, %v12305_v6 }
 0x1af   : > { %v9722_v43 = vpop.f32.mrf.mxu1 }
 0x1b1   : > { %v9723_v54 = vpop.f32.mrf.mxu1 }
 0x1b2   : > { %v12276_v29 = vadd.f32 %v9723_v54, %v9722_v43 }
 0x1b3   : > { %v9725_v16 = vpop.f32.mrf.mxu1 }
 0x1b4   : > { %16120 = vst [vmem:[#allocation24_spill] sm:$0xff] %v12276_v29  ;;  %v9656_v42 = vpop.f32.mrf.mxu0 }
 0x1b5   : > { %v9726_v26 = vpop.f32.mrf.mxu1 }
 0x1b6   : > { %v9657_v18 = vpop.f32.mrf.mxu0  ;;  %v12278_v12 = vadd.f32 %v9726_v26, %v9725_v16 }
 0x1b7   : > { %v12280_v30 = vadd.f32 %v9657_v18, %v9656_v42 }
 0x1b8   : > { %16121 = vst [vmem:[#allocation65_spill] sm:$0xff] %v12278_v12  ;;  %v9659_v4 = vpop.f32.mrf.mxu0 }
 0x1b9   : > { %v9728_v52 = vpop.f32.mrf.mxu1 }
 0x1ba   : > { %v9660_v40 = vpop.f32.mrf.mxu0 }
 0x1bb   : > { %v12282_v15 = vadd.f32 %v9660_v40, %v9659_v4  ;;  %v9729_v8 = vpop.f32.mrf.mxu1 }
 0x1bc   : > { %v12284_v32 = vadd.f32 %v9729_v8, %v9728_v52 }
 0x1bd   : > { %v9731_v50 = vpop.f32.mrf.mxu1 }
 0x1be   : > { %16122 = vst [vmem:[#allocation71_spill] sm:$0xff] %v12284_v32 }
 0x1bf   : > { %v9732_v45 = vpop.f32.mrf.mxu1 }
 0x1c0   : > { %v12286_v19 = vadd.f32 %v9732_v45, %v9731_v50 }
 0x1c2   : > { %16123 = vst [vmem:[#allocation9_spill] sm:$0xff] %v12286_v19  ;;  %v9734_v25 = vpop.f32.mrf.mxu1  ;;  %v9662_v51 = vpop.f32.mrf.mxu0 }
 0x1c4   : > { %v9735_v60 = vpop.f32.mrf.mxu1  ;;  %v9663_v1 = vpop.f32.mrf.mxu0 }
 0x1c5   : > { %v12288_v34 = vadd.f32 %v9735_v60, %v9734_v25  ;;  %v12290_v27 = vadd.f32 %v9663_v1, %v9662_v51 }
 0x1c6   : > { %v9737_v28 = vpop.f32.mrf.mxu1  ;;  %v9665_v41 = vpop.f32.mrf.mxu0 }
 0x1c7   : > { %16124 = vst [vmem:[#allocation10_spill] sm:$0xff] %v12288_v34 }
 0x1c8   : > { %v9738_v17 = vpop.f32.mrf.mxu1  ;;  %v9666_v35 = vpop.f32.mrf.mxu0 }
 0x1c9   : > { %v12292_v57 = vadd.f32 %v9738_v17, %v9737_v28  ;;  %v12294_v21 = vadd.f32 %v9666_v35, %v9665_v41 }
 0x1ca   : > { %v9740_v48 = vpop.f32.mrf.mxu1 }
 0x1cb   : > { %16125 = vst [vmem:[#allocation7_spill] sm:$0xff] %v12292_v57 }
 0x1cc   : > { %v9741_v23 = vpop.f32.mrf.mxu1 }
 0x1cd   : > { %v12296_v63 = vadd.f32 %v9741_v23, %v9740_v48 }
 0x1ce   : > { %v9743_v5 = vpop.f32.mrf.mxu1  ;;  %v9668_v37 = vpop.f32.mrf.mxu0 }
 0x1cf   : > { %16126 = vst [vmem:[#allocation28_spill] sm:$0xff] %v12296_v63 }
 0x1d0   : > { %v9744_v31 = vpop.f32.mrf.mxu1  ;;  %v9669_v39 = vpop.f32.mrf.mxu0 }
 0x1d1   : > { %v12298_v2 = vadd.f32 %v9744_v31, %v9743_v5  ;;  %v12300_v56 = vadd.f32 %v9669_v39, %v9668_v37 }
 0x1d2   : > { %v9762_v38 = vpop.f32.mrf.mxu1  ;;  %v9671_v46 = vpop.f32.mrf.mxu0 }
 0x1d3   : > { %16127 = vst [vmem:[#allocation30_spill] sm:$0xff] %v12298_v2 }
 0x1d4   : > { %v9763_v14 = vpop.f32.mrf.mxu1  ;;  %v9672_v24 = vpop.f32.mrf.mxu0 }
 0x1d5   : > { %v9764_v33 = vadd.f32 %v9763_v14, %v9762_v38  ;;  %v12308_v44 = vadd.f32 %v9672_v24, %v9671_v46 }
 0x1d6   : > { %v9765_v59 = vpop.f32.mrf.mxu1 }
 0x1d7   : > { %v12310_v0 = vadd.f32 %v9764_v33, %v2808_v36 }
 0x1d8   : > { %v9766_v47 = vpop.f32.mrf.mxu1 }
 0x1d9   : > { %v9767_v9 = vadd.f32 %v9766_v47, %v9765_v59 }
 0x1da   : > { %v9674_v49 = vpop.f32.mrf.mxu0 }
 0x1db   : > { %v12313_v55 = vadd.f32 %v9767_v9, %v2811_v13 }
 0x1dc   : > { %v9675_v7 = vpop.f32.mrf.mxu0 }
 0x1dd   : > { %v12315_v20 = vadd.f32 %v9675_v7, %v9674_v49  ;;  %v9768_v22 = vpop.f32.mrf.mxu1 }
 0x1de   : > { %v9677_v10 = vpop.f32.mrf.mxu0 }
 0x1df   : > { %v9769_v58 = vpop.f32.mrf.mxu1 }
 0x1e0   : > { %v9678_v3 = vpop.f32.mrf.mxu0  ;;  %v9770_v29 = vadd.f32 %v9769_v58, %v9768_v22  ;;  %v2819_v22 = vadd.f32 %v12282_v15, %v12305_v6 }
 0x1e1   : > { %v12317_v11 = vadd.f32 %v9678_v3, %v9677_v10  ;;  %v12319_v61 = vpop.f32.mrf.mxu1 }
 0x1e2   : > { %v9680_v62 = vpop.f32.mrf.mxu0 }
 0x1e3   : > { %v9772_v43 = vpop.f32.mrf.mxu1 }
 0x1e4   : > { %v9681_v54 = vpop.f32.mrf.mxu0 }
 0x1e5   : > { %v12321_v16 = vadd.f32 %v9681_v54, %v9680_v62 }
 0x1e6   : > { %v12323_v53 = vpop.f32.mrf.mxu1  ;;  %v9683_v42 = vpop.f32.mrf.mxu0 }
 0x1e8   : > { %v12325_v26 = vpop.f32.mrf.mxu1  ;;  %v9684_v18 = vpop.f32.mrf.mxu0 }
 0x1e9   : > { %v12327_v4 = vadd.f32 %v9684_v18, %v9683_v42 }
 0x1ea   : > { %v12329_v52 = vpop.f32.mrf.mxu1 }
 0x1ec   : > { %v12331_v40 = vpop.f32.mrf.mxu1 }
 0x1ee   : > { %v9686_v8 = vpop.f32.mrf.mxu0 }
 0x1f0   : > { %v9687_v50 = vpop.f32.mrf.mxu0  ;;  %v9780_v45 = vpop.f32.mrf.mxu1 }
 0x1f1   : > { %v12333_v25 = vadd.f32 %v9687_v50, %v9686_v8 }
 0x1f2   : > { %v9689_v51 = vpop.f32.mrf.mxu0  ;;  %v9781_v60 = vpop.f32.mrf.mxu1 }
 0x1f4   : > { %v9690_v1 = vpop.f32.mrf.mxu0  ;;  %v12335_v28 = vpop.f32.mrf.mxu1 }
 0x1f5   : > { %v12337_v41 = vadd.f32 %v9690_v1, %v9689_v51 }
 0x1f6   : > { %v12339_v17 = vpop.f32.mrf.mxu0  ;;  %v12341_v35 = vpop.f32.mrf.mxu1 }
 0x1f8   : > { %v12343_v48 = vpop.f32.mrf.mxu0  ;;  %v12345_v23 = vpop.f32.mrf.mxu1 }
 0x1fa   : > { %v12347_v5 = vpop.f32.mrf.mxu0  ;;  %v12349_v37 = vpop.f32.mrf.mxu1 }
 0x1fc   : > { %v12351_v31 = vpop.f32.mrf.mxu0  ;;  %v12353_v39 = vpop.f32.mrf.mxu1 }
 0x1fe   : > { %v12357_v46 = vpop.f32.mrf.mxu1 }
 0x201   : > { %v12355_v38 = vpop.f32.mrf.mxu0 }
 0x203   : > { %v12359_v14 = vpop.f32.mrf.mxu0 }
 0x204   : > { %v12363_v36 = vpop.f32.mrf.mxu1 }
 0x205   : > { %v12361_v24 = vpop.f32.mrf.mxu0 }
 0x206   : > { %16128 = vst [vmem:[#allocation15_spill] sm:$0xff] %v12361_v24  ;;  %v12367_v59 = vpop.f32.mrf.mxu1 }
 0x207   : > { %v12365_v33 = vpop.f32.mrf.mxu0 }
 0x208   : > { %16129 = vst [vmem:[#allocation16_spill] sm:$0xff] %v12365_v33  ;;  %v12369_v47 = vpop.f32.mrf.mxu1 }
 0x209   : > { %v12371_v13 = vpop.f32.mrf.mxu0 }
 0x20a   : > { %v12373_v9 = vpop.f32.mrf.mxu1 }
 0x20b   : > { %v12375_v49 = vpop.f32.mrf.mxu0 }
 0x20d   : > { %v12377_v7 = vpop.f32.mrf.mxu1  ;;  %v12379_v10 = vpop.f32.mrf.mxu0 }
 0x20e   : > { %16130 = vst [vmem:[#allocation11_spill] sm:$0xff] %v12379_v10 }
 0x20f   : > { %v12381_v3 = vpop.f32.mrf.mxu1  ;;  %v12385_v54 = vpop.f32.mrf.mxu0 }
 0x210   : > { %16131 = vst [vmem:[#allocation33_spill] sm:$0xff] %v12385_v54 }
 0x211   : > { %v12383_v62 = vpop.f32.mrf.mxu1 }
 0x213   : > { %v12387_v42 = vpop.f32.mrf.mxu1 }
 0x215   : > { %v12389_v18 = vpop.f32.mrf.mxu0 }
 0x216   : > { %16132 = vst [vmem:[#allocation38_spill] sm:$0xff] %v12389_v18 }
 0x217   : > { %v12391_v8 = vpop.f32.mrf.mxu0  ;;  %v12393_v50 = vpop.f32.mrf.mxu1 }
 0x218   : > { %16133 = vst [vmem:[#allocation18_spill] sm:$0xff] %v12391_v8 }
 0x219   : > { %v12395_v51 = vpop.f32.mrf.mxu0  ;;  %v12397_v1 = vpop.f32.mrf.mxu1 }
 0x21a   : > { %16134 = vst [vmem:[#allocation19_spill] sm:$0xff] %v12395_v51  ;;  %v2816_v51 = vadd.f32 %v12280_v30, %v12305_v6 }
 0x21b   : > { %v12399_v57 = vpop.f32.mrf.mxu0  ;;  %v12401_v2 = vpop.f32.mrf.mxu1 }
 0x21c   : > { %16135 = vst [vmem:[#allocation17_spill] sm:$0xff] %v12399_v57  ;;  %v2977_v33 = vadd.f32 %v9770_v29, %v2816_v51  ;;  %v2832_v29 = vadd.f32 %v12300_v56, %v12305_v6  ;;  %v2848_v51 = vadd.f32 %v12321_v16, %v12305_v6  ;;  %v9797_v16 = vadd.f32 %v12373_v9, %v12369_v47 }
 0x21d   : > { %v12403_v34 = vpop.f32.mrf.mxu0  ;;  %v12405_v63 = vpop.f32.mrf.mxu1 }
 0x21e   : > { %16136 = vst [vmem:[#allocation43_spill] sm:$0xff] %v12403_v34  ;;  %v9773_v34 = vadd.f32 %v9772_v43, %v12319_v61  ;;  %v9776_v61 = vadd.f32 %v12325_v26, %v12323_v53 }
 0x21f   : > { %v12407_v12 = vpop.f32.mrf.mxu0  ;;  %v12409_v19 = vpop.f32.mrf.mxu1 }
 0x220   : > { %16137 = vst [vmem:[#allocation49_spill] sm:$0xff] %v12407_v12  ;;  %16138 = vst [vmem:[#allocation21_spill] sm:$0xff] %v12409_v19 }
 0x221   : > { %v12411_v32 = vpop.f32.mrf.mxu0  ;;  %v12413_v8 = vpop.f32.mrf.mxu1 }
 0x222   : > { %16139 = vst [vmem:[#allocation22_spill] sm:$0xff] %v12411_v32  ;;  %16140 = vst [vmem:[#allocation20_spill] sm:$0xff] %v12413_v8  ;;  %v9782_v8 = vadd.f32 %v9781_v60, %v9780_v45  ;;  %v2824_v45 = vadd.f32 %v12290_v27, %v12305_v6  ;;  %v9779_v27 = vadd.f32 %v12331_v40, %v12329_v52 }
 0x223   : > { %v12417_v18 = vpop.f32.mrf.mxu0  ;;  %v12419_v57 = vpop.f32.mrf.mxu1 }
 0x224   : > { %16141 = vst [vmem:[#allocation44_spill] sm:$0xff] %v12417_v18  ;;  %16142 = vst [vmem:[#allocation51_spill] sm:$0xff] %v12419_v57  ;;  %v2980_v18 = vadd.f32 %v9773_v34, %v2819_v22  ;;  %v2993_v26 = vadd.f32 %v9782_v8, %v2832_v29  ;;  %v2840_v29 = vadd.f32 %v12315_v20, %v12305_v6 }
 0x225   : > { %v10396_v24 = vpop.f32.mrf.mxu0  ;;  %v12422_v54 = vpop.f32.mrf.mxu1 }
 0x226   : > { %v3138_v58 = vadd.f32 %v10396_v24, %v2977_v33  ;;  %v2985_v33 = vadd.f32 %v9776_v61, %v2824_v45  ;;  %v2851_v45 = vadd.f32 %v12327_v4, %v12305_v6 }
 0x227   : > { %v3129_v32 = vpop.f32.mrf.mxu0  ;;  %v12426_v12 = vpop.f32.mrf.mxu1 }
 0x228   : > { %v3258_v19 = vmax.f32 %v3138_v58, 0.0  ;;  %v3130_v30 = vadd.f32 %v3129_v32, %v12310_v0  ;;  %v9785_v0 = vadd.f32 %v12341_v35, %v12335_v28 }
 0x229   : > { %v10397_v10 = vpop.f32.mrf.mxu0  ;;  %v12429_v57 = vpop.f32.mrf.mxu1 }
 0x22a   : > { %3290 = vst.msk [vmem:[#allocation4 + $0x10] sm:$0xff] %vm334_vm0, %v3258_v19  ;;  %3322 = vst.msk [vmem:[#allocation2 + $0x48] sm:$0xff] %vm334_vm0, %v3258_v19  ;;  %v3256_v15 = vmax.f32 %v3130_v30, 0.0  ;;  %v3141_v43 = vadd.f32 %v10397_v10, %v2980_v18  ;;  %v2835_v19 = vadd.f32 %v12308_v44, %v12305_v6  ;;  %v9794_v44 = vadd.f32 %v12367_v59, %v12363_v36 }
 0x22b   : > { %v3132_v32 = vpop.f32.mrf.mxu0  ;;  %v12439_v34 = vpop.f32.mrf.mxu1 }
 0x22c   : > { %3288 = vst.msk [vmem:[#allocation4] sm:$0xff] %vm334_vm0, %v3256_v15  ;;  %3320 = vst.msk [vmem:[#allocation2 + $0x28] sm:$0xff] %vm334_vm0, %v3256_v15  ;;  %v3259_v56 = vmax.f32 %v3141_v43, 0.0  ;;  %v3133_v53 = vadd.f32 %v3132_v32, %v12313_v55  ;;  %v2827_v55 = vadd.f32 %v12294_v21, %v12305_v6  ;;  %v2996_v8 = vadd.f32 %v9785_v0, %v2835_v19 }
 0x22d   : > { %v10400_v60 = vpop.f32.mrf.mxu0  ;;  %v12448_v24 = vpop.f32.mrf.mxu1  ;;  %v9788_v21 = vadd.f32 %v12349_v37, %v12345_v23  ;;  %v3009_v43 = vadd.f32 %v9794_v44, %v2848_v51  ;;  %v9694_v32 = vadd.f32 %v12343_v48, %v12339_v17  ;;  %v9806_v17 = vadd.f32 %v12397_v1, %v12393_v50 }
 0x22e   : > { %3291 = vst.msk [vmem:[#allocation4 + $0x18] sm:$0xff] %vm334_vm0, %v3259_v56  ;;  %3323 = vst.msk [vmem:[#allocation2 + $0x50] sm:$0xff] %vm334_vm0, %v3259_v56  ;;  %v3257_v28 = vmax.f32 %v3133_v53, 0.0  ;;  %v3154_v35 = vadd.f32 %v10400_v60, %v2993_v26  ;;  %v2988_v30 = vadd.f32 %v9779_v27, %v2827_v55  ;;  %v9791_v56 = vadd.f32 %v12357_v46, %v12353_v39 }
 0x22f   : > { %v3145_v10 = vpop.f32.mrf.mxu0  ;;  %v12456_v18 = vpop.f32.mrf.mxu1  ;;  %v3001_v53 = vadd.f32 %v9788_v21, %v2840_v29  ;;  %v2843_v26 = vadd.f32 %v12317_v11, %v12305_v6  ;;  %v3012_v46 = vadd.f32 %v9797_v16, %v2851_v45  ;;  %v2864_v60 = vadd.f32 %v9694_v32, %v12305_v6 }
 0x230   : > { %3289 = vst.msk [vmem:[#allocation4 + $0x8] sm:$0xff] %vm334_vm0, %v3257_v28  ;;  %3321 = vst.msk [vmem:[#allocation2 + $0x30] sm:$0xff] %vm334_vm0, %v3257_v28  ;;  %v3262_v52 = vmax.f32 %v3154_v35, 0.0  ;;  %v3146_v40 = vadd.f32 %v3145_v10, %v2985_v33  ;;  %v9697_v27 = vadd.f32 %v12351_v31, %v12347_v5  ;;  %v9800_v35 = vadd.f32 %v12381_v3, %v12377_v7 }
 0x231   : > { %v10401_v22 = vpop.f32.mrf.mxu0  ;;  %v12464_v58 = vpop.f32.mrf.mxu1  ;;  %v3004_v33 = vadd.f32 %v9791_v56, %v2843_v26  ;;  %v2856_v55 = vadd.f32 %v12333_v25, %v12305_v6  ;;  %v9809_v5 = vadd.f32 %v12405_v63, %v12401_v2  ;;  %v3025_v3 = vadd.f32 %v9806_v17, %v2864_v60  ;;  %v16148_v56 = vld [vmem:[#allocation16_spill] sm:$0xff]  ;;  %v16150_v60 = vld [vmem:[#allocation49_spill] sm:$0xff] }
 0x232   : > { %3294 = vst.msk [vmem:[#allocation4 + $0x30] sm:$0xff] %vm334_vm0, %v3262_v52  ;;  %3326 = vst.msk [vmem:[#allocation2 + $0x88] sm:$0xff] %vm334_vm0, %v3262_v52  ;;  %v3260_v36 = vmax.f32 %v3146_v40, 0.0  ;;  %v3157_v59 = vadd.f32 %v10401_v22, %v2996_v8  ;;  %v2867_v52 = vadd.f32 %v9697_v27, %v12305_v6  ;;  %v9706_v40 = vadd.f32 %v12375_v49, %v12371_v13 }
 0x233   : > { %v3148_v61 = vpop.f32.mrf.mxu0  ;;  %v12472_v15 = vpop.f32.mrf.mxu1  ;;  %v9803_v51 = vadd.f32 %v12387_v42, %v12383_v62  ;;  %v3017_v22 = vadd.f32 %v9800_v35, %v2856_v55  ;;  %v2859_v21 = vadd.f32 %v12337_v41, %v12305_v6  ;;  %v16144_v41 = vld [vmem:[#allocation33_spill] sm:$0xff]  ;;  %v9821_v26 = vadd.f32 %v12448_v24, %v12439_v34 }
 0x234   : > { %3292 = vst.msk [vmem:[#allocation4 + $0x20] sm:$0xff] %vm334_vm0, %v3260_v36  ;;  %3324 = vst.msk [vmem:[#allocation2 + $0x68] sm:$0xff] %vm334_vm0, %v3260_v36  ;;  %v3263_v23 = vmax.f32 %v3157_v59, 0.0  ;;  %v3149_v37 = vadd.f32 %v3148_v61, %v2988_v30  ;;  %v9700_v36 = vadd.f32 %v12359_v14, %v12355_v38  ;;  %v9818_v59 = vadd.f32 %v12429_v57, %v12426_v12  ;;  %v16143_v61 = vld [vmem:[#allocation11_spill] sm:$0xff]  ;;  %v16145_v14 = vld [vmem:[#allocation21_spill] sm:$0xff] }
 0x235   : > { %v10404_v20 = vpop.f32.mrf.mxu0  ;;  %v12482_v0 = vpop.f32.mrf.mxu1  ;;  %v3028_v30 = vadd.f32 %v9809_v5, %v2867_v52  ;;  %v2880_v29 = vadd.f32 %v9706_v40, %v12305_v6  ;;  %v9709_v16 = vadd.f32 %v16144_v41, %v16143_v61  ;;  %v3020_v45 = vadd.f32 %v9803_v51, %v2859_v21  ;;  %v16153_v5 = vld [vmem:[#allocation18_spill] sm:$0xff] }
 0x236   : > { %3295 = vst.msk [vmem:[#allocation4 + $0x38] sm:$0xff] %vm334_vm0, %v3263_v23  ;;  %3327 = vst.msk [vmem:[#allocation2 + $0x90] sm:$0xff] %vm334_vm0, %v3263_v23  ;;  %v3261_v47 = vmax.f32 %v3149_v37, 0.0  ;;  %v3170_v9 = vadd.f32 %v10404_v20, %v3009_v43  ;;  %v16146_v37 = vld [vmem:[#allocation20_spill] sm:$0xff]  ;;  %v2872_v32 = vadd.f32 %v9700_v36, %v12305_v6  ;;  %v16147_v20 = vld [vmem:[#allocation15_spill] sm:$0xff] }
 0x237   : > { %v3161_v4 = vpop.f32.mrf.mxu0  ;;  %v12490_v19 = vpop.f32.mrf.mxu1  ;;  %v9812_v43 = vadd.f32 %v16146_v37, %v16145_v14 }
 0x238   : > { %3293 = vst.msk [vmem:[#allocation4 + $0x28] sm:$0xff] %vm334_vm0, %v3261_v47  ;;  %3325 = vst.msk [vmem:[#allocation2 + $0x70] sm:$0xff] %vm334_vm0, %v3261_v47  ;;  %v3266_v48 = vmax.f32 %v3170_v9, 0.0  ;;  %v3162_v39 = vadd.f32 %v3161_v4, %v3001_v53  ;;  %v9703_v47 = vadd.f32 %v16148_v56, %v16147_v20 }
 0x239   : > { %v10405_v28 = vpop.f32.mrf.mxu0  ;;  %v12499_v11 = vpop.f32.mrf.mxu1 }
 0x23a   : > { %3298 = vst.msk [vmem:[#allocation4 + $0x50] sm:$0xff] %vm334_vm0, %v3266_v48  ;;  %3330 = vst.msk [vmem:[#allocation2 + $0xc8] sm:$0xff] %vm334_vm0, %v3266_v48  ;;  %v3264_v50 = vmax.f32 %v3162_v39, 0.0  ;;  %v3173_v1 = vadd.f32 %v10405_v28, %v3012_v46  ;;  %v3041_v48 = vadd.f32 %v9818_v59, %v2880_v29  ;;  %v2883_v39 = vadd.f32 %v9709_v16, %v12305_v6  ;;  %v16149_v46 = vld [vmem:[#allocation43_spill] sm:$0xff] }
 0x23b   : > { %v3164_v10 = vpop.f32.mrf.mxu0  ;;  %v12507_v44 = vpop.f32.mrf.mxu1  ;;  %v9718_v27 = vadd.f32 %v16150_v60, %v16149_v46  ;;  %v2875_v55 = vadd.f32 %v9703_v47, %v12305_v6  ;;  %v9830_v52 = vadd.f32 %v12499_v11, %v12490_v19 }
 0x23c   : > { %3296 = vst.msk [vmem:[#allocation4 + $0x40] sm:$0xff] %vm334_vm0, %v3264_v50  ;;  %3328 = vst.msk [vmem:[#allocation2 + $0xa8] sm:$0xff] %vm334_vm0, %v3264_v50  ;;  %v3267_v31 = vmax.f32 %v3173_v1, 0.0  ;;  %v3165_v7 = vadd.f32 %v3164_v10, %v3004_v33  ;;  %v16151_v50 = vld [vmem:[#allocation51_spill] sm:$0xff]  ;;  %v3033_v33 = vadd.f32 %v9812_v43, %v2872_v32  ;;  %v16152_v10 = vld [vmem:[#allocation38_spill] sm:$0xff] }
 0x23d   : > { %v10408_v8 = vpop.f32.mrf.mxu0  ;;  %v12516_v25 = vpop.f32.mrf.mxu1  ;;  %v9815_v1 = vadd.f32 %v12422_v54, %v16151_v50  ;;  %v2896_v51 = vadd.f32 %v9718_v27, %v12305_v6  ;;  %v16159_v27 = vld [vmem:[#allocation24_spill] sm:$0xff] }
 0x23e   : > { %3299 = vst.msk [vmem:[#allocation4 + $0x58] sm:$0xff] %vm334_vm0, %v3267_v31  ;;  %3331 = vst.msk [vmem:[#allocation2 + $0xd0] sm:$0xff] %vm334_vm0, %v3267_v31  ;;  %v3265_v63 = vmax.f32 %v3165_v7, 0.0  ;;  %v3186_v2 = vadd.f32 %v10408_v8, %v3025_v3  ;;  %v9712_v31 = vadd.f32 %v16153_v5, %v16152_v10  ;;  %v3044_v8 = vadd.f32 %v9821_v26, %v2883_v39 }
 0x23f   : > { %v3177_v13 = vpop.f32.mrf.mxu0  ;;  %v12526_v49 = vpop.f32.mrf.mxu1  ;;  %v3036_v59 = vadd.f32 %v9815_v1, %v2875_v55  ;;  %v9833_v16 = vadd.f32 %v12516_v25, %v12507_v44 }
 0x240   : > { %3297 = vst.msk [vmem:[#allocation4 + $0x48] sm:$0xff] %vm334_vm0, %v3265_v63  ;;  %3329 = vst.msk [vmem:[#allocation2 + $0xb0] sm:$0xff] %vm334_vm0, %v3265_v63  ;;  %v3270_v62 = vmax.f32 %v3186_v2, 0.0  ;;  %v3178_v42 = vadd.f32 %v3177_v13, %v3017_v22  ;;  %v16154_v63 = vld [vmem:[#allocation22_spill] sm:$0xff]  ;;  %v16155_v2 = vld [vmem:[#allocation44_spill] sm:$0xff]  ;;  %v9824_v13 = vadd.f32 %v12464_v58, %v12456_v18 }
 0x241   : > { %v10409_v23 = vpop.f32.mrf.mxu0  ;;  %v12535_v38 = vpop.f32.mrf.mxu1  ;;  %v9721_v22 = vadd.f32 %v16155_v2, %v16154_v63 }
 0x242   : > { %3302 = vst.msk [vmem:[#allocation4 + $0x70] sm:$0xff] %vm334_vm0, %v3270_v62  ;;  %3334 = vst.msk [vmem:[#allocation2 + $0x108] sm:$0xff] %vm334_vm0, %v3270_v62  ;;  %v3268_v12 = vmax.f32 %v3178_v42, 0.0  ;;  %v3189_v57 = vadd.f32 %v10409_v23, %v3028_v30  ;;  %v2888_v62 = vadd.f32 %v9712_v31, %v12305_v6  ;;  %v16156_v42 = vld [vmem:[#allocation19_spill] sm:$0xff]  ;;  %v16157_v30 = vld [vmem:[#allocation17_spill] sm:$0xff]  ;;  %v3057_v23 = vadd.f32 %v9830_v52, %v2896_v51 }
 0x243   : > { %v3180_v9 = vpop.f32.mrf.mxu0  ;;  %v12544_v53 = vpop.f32.mrf.mxu1  ;;  %v9715_v29 = vadd.f32 %v16157_v30, %v16156_v42  ;;  %v2899_v14 = vadd.f32 %v9721_v22, %v12305_v6 }
 0x244   : > { %3300 = vst.msk [vmem:[#allocation4 + $0x60] sm:$0xff] %vm334_vm0, %v3268_v12  ;;  %3332 = vst.msk [vmem:[#allocation2 + $0xe8] sm:$0xff] %vm334_vm0, %v3268_v12  ;;  %v3271_v4 = vmax.f32 %v3189_v57, 0.0  ;;  %v3181_v17 = vadd.f32 %v3180_v9, %v3020_v45  ;;  %v9827_v12 = vadd.f32 %v12482_v0, %v12472_v15  ;;  %v3049_v25 = vadd.f32 %v9824_v13, %v2888_v62  ;;  %v16158_v15 = vld [vmem:[#allocation71_spill] sm:$0xff] }
 0x245   : > { %v10412_v28 = vpop.f32.mrf.mxu0  ;;  %v12553_v35 = vpop.f32.mrf.mxu1  ;;  %v2891_v45 = vadd.f32 %v9715_v29, %v12305_v6  ;;  %v3060_v26 = vadd.f32 %v9833_v16, %v2899_v14  ;;  %v2912_v0 = vadd.f32 %v16158_v15, %v12305_v6  ;;  %v16163_v16 = vld [vmem:[#allocation10_spill] sm:$0xff] }
 0x246   : > { %3303 = vst.msk [vmem:[#allocation4 + $0x78] sm:$0xff] %vm334_vm0, %v3271_v4  ;;  %3335 = vst.msk [vmem:[#allocation2 + $0x110] sm:$0xff] %vm334_vm0, %v3271_v4  ;;  %v3269_v34 = vmax.f32 %v3181_v17, 0.0  ;;  %v3202_v24 = vadd.f32 %v10412_v28, %v3041_v48  ;;  %v9836_v48 = vadd.f32 %v12535_v38, %v12526_v49  ;;  %v2904_v28 = vadd.f32 %v16159_v27, %v12305_v6  ;;  %v16160_v38 = vld [vmem:[#allocation9_spill] sm:$0xff] }
 0x247   : > { %v3193_v7 = vpop.f32.mrf.mxu0  ;;  %v9840_v3 = vpop.f32.mrf.mxu1  ;;  %v3052_v60 = vadd.f32 %v9827_v12, %v2891_v45  ;;  %v2915_v55 = vadd.f32 %v16160_v38, %v12305_v6  ;;  %v9839_v31 = vadd.f32 %v12553_v35, %v12544_v53  ;;  %v16162_v53 = vld [vmem:[#allocation28_spill] sm:$0xff] }
 0x248   : > { %3301 = vst.msk [vmem:[#allocation4 + $0x68] sm:$0xff] %vm334_vm0, %v3269_v34  ;;  %3333 = vst.msk [vmem:[#allocation2 + $0xf0] sm:$0xff] %vm334_vm0, %v3269_v34  ;;  %v3274_v54 = vmax.f32 %v3202_v24, 0.0  ;;  %v3194_v40 = vadd.f32 %v3193_v7, %v3033_v33  ;;  %v3065_v52 = vadd.f32 %v9836_v48, %v2904_v28  ;;  %v2928_v35 = vadd.f32 %v16162_v53, %v12305_v6 }
 0x249   : > { %v10413_v21 = vpop.f32.mrf.mxu0  ;;  %v9841_v36 = vpop.f32.mrf.mxu1 }
 0x24a   : > { %3306 = vst.msk [vmem:[#allocation4 + $0x90] sm:$0xff] %vm334_vm0, %v3274_v54  ;;  %3338 = vst.msk [vmem:[#allocation2 + $0x148] sm:$0xff] %vm334_vm0, %v3274_v54  ;;  %v3272_v19 = vmax.f32 %v3194_v40, 0.0  ;;  %v3205_v11 = vadd.f32 %v10413_v21, %v3044_v8  ;;  %v9842_v56 = vadd.f32 %v9841_v36, %v9840_v3  ;;  %v16161_v8 = vld [vmem:[#allocation65_spill] sm:$0xff] }
 0x24b   : > { %v3196_v61 = vpop.f32.mrf.mxu0  ;;  %v9843_v41 = vpop.f32.mrf.mxu1  ;;  %v2907_v51 = vadd.f32 %v16161_v8, %v12305_v6 }
 0x24c   : > { %3304 = vst.msk [vmem:[#allocation4 + $0x80] sm:$0xff] %vm334_vm0, %v3272_v19  ;;  %3336 = vst.msk [vmem:[#allocation2 + $0x128] sm:$0xff] %vm334_vm0, %v3272_v19  ;;  %v3275_v18 = vmax.f32 %v3205_v11, 0.0  ;;  %v3197_v58 = vadd.f32 %v3196_v61, %v3036_v59  ;;  %v3073_v49 = vadd.f32 %v9842_v56, %v2912_v0 }
 0x24d   : > { %v9844_v43 = vpop.f32.mrf.mxu1  ;;  %v3068_v59 = vadd.f32 %v9839_v31, %v2907_v51 }
 0x24e   : > { %v10416_v37 = vpop.f32.mrf.mxu0  ;;  %3307 = vst.msk [vmem:[#allocation4 + $0x98] sm:$0xff] %vm334_vm0, %v3275_v18  ;;  %3339 = vst.msk [vmem:[#allocation2 + $0x150] sm:$0xff] %vm334_vm0, %v3275_v18  ;;  %v3273_v57 = vmax.f32 %v3197_v58, 0.0  ;;  %v9845_v34 = vadd.f32 %v9844_v43, %v9843_v41  ;;  %v2920_v18 = vadd.f32 %v16163_v16, %v12305_v6 }
 0x24f   : > { %v3218_v44 = vadd.f32 %v10416_v37, %v3057_v23  ;;  %v9846_v20 = vpop.f32.mrf.mxu1  ;;  %v16164_v23 = vld [vmem:[#allocation30_spill] sm:$0xff] }
 0x250   : > { %v3209_v32 = vpop.f32.mrf.mxu0  ;;  %3305 = vst.msk [vmem:[#allocation4 + $0x88] sm:$0xff] %vm334_vm0, %v3273_v57  ;;  %3337 = vst.msk [vmem:[#allocation2 + $0x130] sm:$0xff] %vm334_vm0, %v3273_v57  ;;  %v3076_v22 = vadd.f32 %v9845_v34, %v2915_v55  ;;  %v2931_v14 = vadd.f32 %v16164_v23, %v12305_v6 }
 0x251   : > { %v3278_v47 = vmax.f32 %v3218_v44, 0.0  ;;  %v3210_v9 = vadd.f32 %v3209_v32, %v3049_v25  ;;  %v9847_v17 = vpop.f32.mrf.mxu1 }
 0x252   : > { %v10417_v4 = vpop.f32.mrf.mxu0  ;;  %v9848_v62 = vadd.f32 %v9847_v17, %v9846_v20  ;;  %v16165_v20 = vld [vmem:[#allocation7_spill] sm:$0xff] }
 0x253   : > { %3310 = vst.msk [vmem:[#allocation4 + $0xb0] sm:$0xff] %vm334_vm0, %v3278_v47  ;;  %3342 = vst.msk [vmem:[#allocation2 + $0x188] sm:$0xff] %vm334_vm0, %v3278_v47  ;;  %v3276_v39 = vmax.f32 %v3210_v9, 0.0  ;;  %v3221_v46 = vadd.f32 %v10417_v4, %v3060_v26  ;;  %v9849_v1 = vpop.f32.mrf.mxu1  ;;  %v2923_v56 = vadd.f32 %v16165_v20, %v12305_v6 }
 0x254   : > { %v3212_v50 = vpop.f32.mrf.mxu0  ;;  %v3081_v25 = vadd.f32 %v9848_v62, %v2920_v18 }
 0x255   : > { %3308 = vst.msk [vmem:[#allocation4 + $0xa0] sm:$0xff] %vm334_vm0, %v3276_v39  ;;  %3340 = vst.msk [vmem:[#allocation2 + $0x168] sm:$0xff] %vm334_vm0, %v3276_v39  ;;  %v3279_v24 = vmax.f32 %v3221_v46, 0.0  ;;  %v3213_v33 = vadd.f32 %v3212_v50, %v3052_v60  ;;  %v9850_v5 = vpop.f32.mrf.mxu1 }
 0x256   : > { %v9851_v57 = vadd.f32 %v9850_v5, %v9849_v1 }
 0x257   : > { %v10420_v10 = vpop.f32.mrf.mxu0  ;;  %3311 = vst.msk [vmem:[#allocation4 + $0xb8] sm:$0xff] %vm334_vm0, %v3279_v24  ;;  %3343 = vst.msk [vmem:[#allocation2 + $0x190] sm:$0xff] %vm334_vm0, %v3279_v24  ;;  %v3277_v7 = vmax.f32 %v3213_v33, 0.0  ;;  %v9852_v40 = vpop.f32.mrf.mxu1 }
 0x258   : > { %v3234_v3 = vadd.f32 %v10420_v10, %v3073_v49  ;;  %v3084_v4 = vadd.f32 %v9851_v57, %v2923_v56 }
 0x259   : > { %v3225_v54 = vpop.f32.mrf.mxu0  ;;  %3309 = vst.msk [vmem:[#allocation4 + $0xa8] sm:$0xff] %vm334_vm0, %v3277_v7  ;;  %3341 = vst.msk [vmem:[#allocation2 + $0x170] sm:$0xff] %vm334_vm0, %v3277_v7  ;;  %v9853_v36 = vpop.f32.mrf.mxu1 }
 0x25a   : > { %v3282_v63 = vmax.f32 %v3234_v3, 0.0  ;;  %v3226_v2 = vadd.f32 %v3225_v54, %v3065_v52  ;;  %v9854_v11 = vadd.f32 %v9853_v36, %v9852_v40 }
 0x25b   : > { %v10421_v21 = vpop.f32.mrf.mxu0  ;;  %v9855_v30 = vpop.f32.mrf.mxu1 }
 0x25c   : > { %3314 = vst.msk [vmem:[#allocation4 + $0xd0] sm:$0xff] %vm334_vm0, %v3282_v63  ;;  %3346 = vst.msk [vmem:[#allocation2 + $0x1c8] sm:$0xff] %vm334_vm0, %v3282_v63  ;;  %v3280_v13 = vmax.f32 %v3226_v2, 0.0  ;;  %v3237_v19 = vadd.f32 %v10421_v21, %v3076_v22  ;;  %v3089_v41 = vadd.f32 %v9854_v11, %v2928_v35 }
 0x25d   : > { %v3228_v42 = vpop.f32.mrf.mxu0  ;;  %v9856_v58 = vpop.f32.mrf.mxu1 }
 0x25e   : > { %3312 = vst.msk [vmem:[#allocation4 + $0xc0] sm:$0xff] %vm334_vm0, %v3280_v13  ;;  %3344 = vst.msk [vmem:[#allocation2 + $0x1a8] sm:$0xff] %vm334_vm0, %v3280_v13  ;;  %v3283_v29 = vmax.f32 %v3237_v19, 0.0  ;;  %v3229_v61 = vadd.f32 %v3228_v42, %v3068_v59  ;;  %v9857_v12 = vadd.f32 %v9856_v58, %v9855_v30 }
 0x25f   : > { %v10424_v43 = vpop.f32.mrf.mxu0 }
 0x260   : > { %3315 = vst.msk [vmem:[#allocation4 + $0xd8] sm:$0xff] %vm334_vm0, %v3283_v29  ;;  %3347 = vst.msk [vmem:[#allocation2 + $0x1d0] sm:$0xff] %vm334_vm0, %v3283_v29  ;;  %v3281_v37 = vmax.f32 %v3229_v61, 0.0  ;;  %v3250_v44 = vadd.f32 %v10424_v43, %v3089_v41  ;;  %v3092_v32 = vadd.f32 %v9857_v12, %v2931_v14 }
 0x261   : > { %v3241_v45 = vpop.f32.mrf.mxu0 }
 0x262   : > { %3313 = vst.msk [vmem:[#allocation4 + $0xc8] sm:$0xff] %vm334_vm0, %v3281_v37  ;;  %3345 = vst.msk [vmem:[#allocation2 + $0x1b0] sm:$0xff] %vm334_vm0, %v3281_v37  ;;  %v3286_v47 = vmax.f32 %v3250_v44, 0.0  ;;  %v3242_v9 = vadd.f32 %v3241_v45, %v3081_v25 }
 0x263   : > { %v10425_v26 = vpop.f32.mrf.mxu0 }
 0x264   : > { %3318 = vst.msk [vmem:[#allocation4 + $0xf0] sm:$0xff] %vm334_vm0, %v3286_v47  ;;  %3350 = vst.msk [vmem:[#allocation2 + $0x208] sm:$0xff] %vm334_vm0, %v3286_v47  ;;  %v3284_v15 = vmax.f32 %v3242_v9, 0.0  ;;  %v3253_v0 = vadd.f32 %v10425_v26, %v3092_v32 }
 0x265   : > { %v3244_v17 = vpop.f32.mrf.mxu0 }
 0x266   : > { %3316 = vst.msk [vmem:[#allocation4 + $0xe0] sm:$0xff] %vm334_vm0, %v3284_v15  ;;  %3348 = vst.msk [vmem:[#allocation2 + $0x1e8] sm:$0xff] %vm334_vm0, %v3284_v15  ;;  %v3287_v48 = vmax.f32 %v3253_v0, 0.0  ;;  %v3245_v39 = vadd.f32 %v3244_v17, %v3084_v4 }
 0x268   : > { %3319 = vst.msk [vmem:[#allocation4 + $0xf8] sm:$0xff] %vm334_vm0, %v3287_v48  ;;  %3351 = vst.msk [vmem:[#allocation2 + $0x210] sm:$0xff] %vm334_vm0, %v3287_v48  ;;  %v3285_v6 = vmax.f32 %v3245_v39, 0.0 }
 0x26a   : > { %3317 = vst.msk [vmem:[#allocation4 + $0xe8] sm:$0xff] %vm334_vm0, %v3285_v6  ;;  %3349 = vst.msk [vmem:[#allocation2 + $0x1f0] sm:$0xff] %vm334_vm0, %v3285_v6 }
 0x26b LB: >> { %v3439_v46 = vld [vmem:[#allocation2 + $0x20] sm:$0xff]  ;;  %v3440_v60 = vld [vmem:[#allocation2 + $0x28] sm:$0xff]  ;;  %v3441_v27 = vld [vmem:[#allocation2 + $0x30] sm:$0xff]  ;;  %s10728_s20 = smov 64   ;;  %s9632_s21 = smul.u32 288, %s10724_s19  ;;  %s10724_s19 = sphi %s12632_s19, %s3357_s19  }
 0x26c   : >> { %v12637_v28 = vpack.c.bf16 %v3440_v60, %v3439_v46  ;;  %v12639_v50 = vld [vmem:[#allocation2 + $0x8] sm:$0xff]  ;;  %v12641_v1 = vld [vmem:[#allocation2 + $0x10] sm:$0xff]  ;;  %v12643_v34 = vpack.c.bf16 %v3441_v27, %v3440_v60  ;;  %v12651_v38 = vpack.c.bf16 %v3441_v27, %v3441_v27  ;;  %v3443_v40 = vld [vmem:[#allocation2 + $0x40] sm:$0xff]  ;;  %s3433_s12 = scalar_lea.vmem %s15715_s4, %s10724_s19  ;;  %s6243_s14 = scalar_lea.vmem %s15717_s6, %s10724_s19 }
 0x26d   : >> { %v12647_v24 = vpack.c.bf16 %v12641_v1, %v12639_v50  ;;  %v3445_v33 = vld [vmem:[#allocation2 + $0x50] sm:$0xff]  ;;  %v3444_v49 = vld [vmem:[#allocation2 + $0x48] sm:$0xff]  ;;  %v3447_v2 = vld [vmem:[#allocation2 + $0x60] sm:$0xff]  ;;  %s12684_s24 = scalar_lea.vmem %s15714_s3, %s9632_s21  ;;  %s13849_s28 = scalar_lea.vmem %s15716_s5, %s9632_s21 }
 0x26e   : >> { %3851 = vrot.lane.b32.xlu0 %v12637_v28, %s10728_s20  ;;  %v12653_v55 = vpack.c.bf16 %v3445_v33, %v3444_v49  ;;  %v3588_v3 = vshrl.u32 %v12643_v34, 16  ;;  %v3591_v52 = vshll.u32 %v12643_v34, 16  ;;  %v12661_v54 = vpack.c.bf16 %v3445_v33, %v3445_v33  ;;  %v3448_v22 = vld [vmem:[#allocation2 + $0x68] sm:$0xff]  ;;  %v3449_v11 = vld [vmem:[#allocation2 + $0x70] sm:$0xff]  ;;  %v3451_v41 = vld [vmem:[#allocation2 + $0x80] sm:$0xff]  ;;  %s3357_s19 = sadd.s32 1, %s10724_s19  }
 0x26f   : >> { %v3580_v10 = vshrl.u32 %v12647_v24, 16  ;;  %v3583_v5 = vshll.u32 %v12647_v24, 16  ;;  %v12666_v53 = vpack.c.bf16 %v3444_v49, %v3443_v40  ;;  %v12671_v36 = vpack.c.bf16 %v3448_v22, %v3447_v2  ;;  %v3452_v42 = vld [vmem:[#allocation2 + $0x88] sm:$0xff]  ;;  %v3453_v30 = vld [vmem:[#allocation2 + $0x90] sm:$0xff]  ;;  %v10627_v16 = vld [vmem:[%s12684_s24 + $0x78] sm:$0xff]   ;;  %p3354_p4 = scmp.ge.s32.totalorder %s3357_s19, 24  }
 0x270   : >> { %v3596_v8 = vshrl.u32 %v12653_v55, 16  ;;  %v3599_v51 = vshll.u32 %v12653_v55, 16  ;;  %v3590_v35 = vrot.slane %v3588_v3, 4  ;;  %v3593_v21 = vrot.slane %v3591_v52, 5  ;;  %v3455_v14 = vld [vmem:[#allocation2 + $0xa0] sm:$0xff]  ;;  %v10628_v37 = vld [vmem:[%s12684_s24 + $0x38] sm:$0xff]   ;;  %9878 = vmatprep.subr.bf16.mxu0 %v10627_v16 }
 0x271   : >> { %v3582_v31 = vrot.slane %v3580_v10, 4  ;;  %v3585_v7 = vrot.slane %v3583_v5, 5  ;;  %v12677_v62 = vpack.c.bf16 %v3449_v11, %v3448_v22  ;;  %v12690_v61 = vpack.c.bf16 %v3453_v30, %v3452_v42  ;;  %v3456_v44 = vld [vmem:[#allocation2 + $0xa8] sm:$0xff]  ;;  %9879 = vmatpush3.bf16.msra.mxu0 %v10628_v37  ;;  %v10629_v25 = vld [vmem:[%s12684_s24 + $0x70] sm:$0xff]   ;;  %v10633_v17 = vld [vmem:[%s12684_s24 + $0x60] sm:$0xff]  }
 0x272   : >> { %3853 = vrot.lane.b32.xlu0 %v12651_v38, %s10728_s20  ;;  %v3598_v13 = vrot.slane %v3596_v8, 4  ;;  %v3601_v19 = vrot.slane %v3599_v51, 5  ;;  %v12675_v59 = vor.u32 %v3593_v21, %v3590_v35  ;;  %v12695_v18 = vpack.c.bf16 %v3449_v11, %v3449_v11  ;;  %v10630_v45 = vld [vmem:[%s12684_s24 + $0x30] sm:$0xff]   ;;  %9880 = vmatprep.subr.bf16.mxu0 %v10629_v25  ;;  %v10631_v47 = vld [vmem:[%s12684_s24 + $0x68] sm:$0xff]   ;;  %v10634_v33 = vld [vmem:[%s12684_s24 + $0x20] sm:$0xff]  }
 0x273   : >> { %v3586_v63 = vor.u32 %v3585_v7, %v3582_v31  ;;  %v3604_v58 = vshrl.u32 %v12677_v62, 16  ;;  %v3607_v23 = vshll.u32 %v12677_v62, 16  ;;  %v12702_v43 = vpack.c.bf16 %v3453_v30, %v3453_v30  ;;  %v3457_v0 = vld [vmem:[#allocation2 + $0xb0] sm:$0xff]  ;;  %v10632_v4 = vld [vmem:[%s12684_s24 + $0x28] sm:$0xff]   ;;  %v10635_v49 = vld [vmem:[%s12684_s24 + $0x58] sm:$0xff]  }
 0x274   : >> { %16166 = vst [vmem:[#allocation76_spill] sm:$0xff] %v12675_v59  ;;  %v12688_v29 = vor.u32 %v3601_v19, %v3598_v13  ;;  %v3612_v12 = vshrl.u32 %v12690_v61, 16  ;;  %v3615_v57 = vshll.u32 %v12690_v61, 16  ;;  %v12710_v32 = vpack.c.bf16 %v3452_v42, %v3451_v41  ;;  %v3460_v6 = vld [vmem:[#allocation2 + $0xc8] sm:$0xff]  ;;  %v3461_v46 = vld [vmem:[#allocation2 + $0xd0] sm:$0xff]  ;;  %v3459_v5 = vld [vmem:[#allocation2 + $0xc0] sm:$0xff] }
 0x275   : >> { %3707 = vrot.lane.b32.xlu1 %v3586_v63, %s10728_s20  ;;  %v3606_v20 = vrot.slane %v3604_v58, 4  ;;  %v3609_v56 = vrot.slane %v3607_v23, 5  ;;  %v12715_v9 = vpack.c.bf16 %v3456_v44, %v3455_v14  ;;  %9881 = vmatpush3.bf16.msra.mxu0 %v10630_v45  ;;  %v12723_v39 = vpack.c.bf16 %v3457_v0, %v3456_v44  ;;  %v3463_v52 = vld [vmem:[#allocation2 + $0xe0] sm:$0xff]  ;;  %v3464_v40 = vld [vmem:[#allocation2 + $0xe8] sm:$0xff]  ;;  %v10636_v63 = vld [vmem:[%s12684_s24 + $0x18] sm:$0xff]  }
 0x276   : >> { %3857 = vrot.lane.b32.xlu0 %v12661_v54, %s10728_s20  ;;  %16167 = vst [vmem:[#allocation77_spill] sm:$0xff] %v12688_v29  ;;  %v3614_v26 = vrot.slane %v3612_v12, 4  ;;  %v3617_v15 = vrot.slane %v3615_v57, 5  ;;  %9882 = vmatprep.subr.bf16.mxu0 %v10631_v47  ;;  %v12729_v27 = vpack.c.bf16 %v3461_v46, %v3460_v6  ;;  %v12735_v10 = vpack.c.bf16 %v3457_v0, %v3457_v0  ;;  %v10637_v2 = vld [vmem:[%s12684_s24 + $0x50] sm:$0xff]   ;;  %v10639_v16 = vld [vmem:[%s12684_s24 + $0x48] sm:$0xff]   ;;  %v10641_v45 = vld [vmem:[%s12684_s24 + $0x40] sm:$0xff]  }
 0x277   : >> { %v12721_v48 = vor.u32 %v3609_v56, %v3606_v20  ;;  %v3620_v31 = vshrl.u32 %v12723_v39, 16  ;;  %v3623_v7 = vshll.u32 %v12723_v39, 16  ;;  %v12741_v3 = vpack.c.bf16 %v3461_v46, %v3461_v46  ;;  %v3465_v19 = vld [vmem:[#allocation2 + $0xf0] sm:$0xff]  ;;  %v3468_v23 = vld [vmem:[#allocation2 + $0x108] sm:$0xff]  ;;  %v3467_v56 = vld [vmem:[#allocation2 + $0x100] sm:$0xff] }
 0x278   : >> { %v12727_v60 = vor.u32 %v3617_v15, %v3614_v26  ;;  %v3628_v8 = vshrl.u32 %v12729_v27, 16  ;;  %v3631_v51 = vshll.u32 %v12729_v27, 16  ;;  %v12749_v22 = vpack.c.bf16 %v3460_v6, %v3459_v5  ;;  %v10638_v41 = vld [vmem:[%s12684_s24 + $0x10] sm:$0xff]   ;;  %v10640_v25 = vld [vmem:[%s12684_s24 + $0x8] sm:$0xff]   ;;  %v3471_v47 = vld [vmem:[#allocation2 + $0x120] sm:$0xff] }
 0x279   : >> { %3855 = vrot.lane.b32.xlu1 %v12666_v53, %s10728_s20  ;;  %16168 = vst [vmem:[#allocation78_spill] sm:$0xff] %v12721_v48  ;;  %9883 = vmatpush3.bf16.msra.mxu0 %v10632_v4  ;;  %16170 = vst [vmem:[#allocation80_spill] sm:$0xff] %v12741_v3  ;;  %v3622_v35 = vrot.slane %v3620_v31, 4  ;;  %v3625_v21 = vrot.slane %v3623_v7, 5  ;;  %v12753_v13 = vpack.c.bf16 %v3464_v40, %v3463_v52  ;;  %v3469_v14 = vld [vmem:[#allocation2 + $0x110] sm:$0xff]  ;;  %v3472_v15 = vld [vmem:[#allocation2 + $0x128] sm:$0xff] }
 0x27a   : >> { %3859 = vrot.lane.b32.xlu0 %v12671_v36, %s10728_s20  ;;  %16169 = vst [vmem:[#allocation79_spill] sm:$0xff] %v12727_v60  ;;  %9884 = vmatprep.subr.bf16.mxu0 %v10633_v17  ;;  %16171 = vst [vmem:[#allocation81_spill] sm:$0xff] %v12749_v22  ;;  %v3630_v11 = vrot.slane %v3628_v8, 4  ;;  %v3633_v42 = vrot.slane %v3631_v51, 5  ;;  %v12755_v30 = vpack.c.bf16 %v3465_v19, %v3464_v40  ;;  %v3473_v0 = vld [vmem:[#allocation2 + $0x130] sm:$0xff]  ;;  %v3476_v8 = vld [vmem:[#allocation2 + $0x148] sm:$0xff] }
 0x27b   : >> { %16172 = vst [vmem:[#allocation82_spill] sm:$0xff] %v12753_v13  ;;  %v12761_v58 = vor.u32 %v3625_v21, %v3622_v35  ;;  %v12767_v12 = vpack.c.bf16 %v3469_v14, %v3468_v23  ;;  %v12775_v20 = vpack.c.bf16 %v3465_v19, %v3465_v19  ;;  %v12779_v26 = vpack.c.bf16 %v3469_v14, %v3469_v14  ;;  %v3477_v51 = vld [vmem:[#allocation2 + $0x150] sm:$0xff] }
 0x27c   : >> { %v12765_v37 = vor.u32 %v3633_v42, %v3630_v11  ;;  %v3636_v57 = vshrl.u32 %v12755_v30, 16  ;;  %v3639_v44 = vshll.u32 %v12755_v30, 16  ;;  %v12789_v5 = vpack.c.bf16 %v3468_v23, %v3467_v56  ;;  %v3475_v11 = vld [vmem:[#allocation2 + $0x140] sm:$0xff] }
 0x27d   : >> { %3709 = vrot.lane.b32.xlu1 %v12675_v59, %s10728_s20  ;;  %9885 = vmatpush3.bf16.msra.mxu0 %v10634_v33  ;;  %16173 = vst [vmem:[#allocation83_spill] sm:$0xff] %v12761_v58  ;;  %16175 = vst [vmem:[#allocation85_spill] sm:$0xff] %v12775_v20  ;;  %v3644_v4 = vshrl.u32 %v12767_v12, 16  ;;  %v3647_v17 = vshll.u32 %v12767_v12, 16  ;;  %v10642_v33 = vld [vmem:[%s12684_s24] sm:$0xff]   ;;  %v12791_v31 = vpack.c.bf16 %v3473_v0, %v3472_v15  ;;  %v3450_v59 = vld [vmem:[#allocation2 + $0x78] sm:$0xff] }
 0x27e   : >> { %3711 = vrot.lane.b32.xlu0 %v12688_v29, %s10728_s20  ;;  %9886 = vmatprep.subr.bf16.mxu0 %v10635_v49  ;;  %16174 = vst [vmem:[#allocation84_spill] sm:$0xff] %v12765_v37  ;;  %16176 = vst [vmem:[#allocation86_spill] sm:$0xff] %v12779_v26  ;;  %v3638_v6 = vrot.slane %v3636_v57, 4  ;;  %v3641_v46 = vrot.slane %v3639_v44, 5  ;;  %v12785_v49 = vld [vmem:[%s12684_s24 + $0x118] sm:$0xff]   ;;  %v12795_v7 = vpack.c.bf16 %v3472_v15, %v3471_v47  ;;  %v10653_v29 = vld [vmem:[%s12684_s24 + $0xa0] sm:$0xff]  }
 0x27f   : >> { %16177 = vst [vmem:[#allocation87_spill] sm:$0xff] %v12789_v5  ;;  %v3646_v52 = vrot.slane %v3644_v4, 4  ;;  %v3649_v40 = vrot.slane %v3647_v17, 5  ;;  %v3655_v35 = vshll.u32 %v12791_v31, 16  ;;  %v12808_v19 = vpack.c.bf16 %v3477_v51, %v3476_v8 }
 0x280   : >> { %16178 = vst [vmem:[#allocation88_spill] sm:$0xff] %v12795_v7  ;;  %v12812_v42 = vpack.c.bf16 %v3473_v0, %v3473_v0  ;;  %v12816_v23 = vpack.c.bf16 %v3477_v51, %v3477_v51  ;;  %v12822_v44 = vpack.c.bf16 %v3476_v8, %v3475_v11  ;;  %v3481_v0 = vld [vmem:[#allocation2 + $0x170] sm:$0xff]  ;;  %vm9338_vm3 = vcmask (%p3354_p4), 23552  }
 0x281   : >> { %3861 = vrot.lane.b32.xlu1 %v12695_v18, %s10728_s20  ;;  %9887 = vmatpush3.bf16.msra.mxu0 %v10636_v63  ;;  %v12800_v63 = vor.u32 %v3641_v46, %v3638_v6  ;;  %v12806_v21 = vor.u32 %v3649_v40, %v3646_v52  ;;  %v3660_v14 = vshrl.u32 %v12808_v19, 16  ;;  %v3663_v57 = vshll.u32 %v12808_v19, 16  ;;  %v3484_v6 = vld [vmem:[#allocation2 + $0x188] sm:$0xff]  ;;  %v3485_v46 = vld [vmem:[#allocation2 + $0x190] sm:$0xff] }
 0x282   : >> { %3865 = vrot.lane.b32.xlu0 %v12702_v43, %s10728_s20  ;;  %9888 = vmatprep.subr.bf16.mxu0 %v10637_v2  ;;  %v3652_v2 = vshrl.u32 %v12791_v31, 16  ;;  %16181 = vst [vmem:[#allocation91_spill] sm:$0xff] %v12812_v42  ;;  %16182 = vst [vmem:[#allocation92_spill] sm:$0xff] %v12816_v23  ;;  %v12838_v52 = vpack.c.bf16 %v3485_v46, %v3484_v6  ;;  %v12842_v40 = vpack.c.bf16 %v3481_v0, %v3481_v0 }
 0x283   : >> { %16179 = vst [vmem:[#allocation89_spill] sm:$0xff] %v12800_v63  ;;  %16180 = vst [vmem:[#allocation90_spill] sm:$0xff] %v12806_v21  ;;  %v3662_v47 = vrot.slane %v3660_v14, 4  ;;  %v3665_v15 = vrot.slane %v3663_v57, 5  ;;  %v3488_v14 = vld [vmem:[#allocation2 + $0x1a8] sm:$0xff] }
 0x284   : >> { %16183 = vst [vmem:[#allocation93_spill] sm:$0xff] %v12822_v44  ;;  %16187 = vst [vmem:[#allocation97_spill] sm:$0xff] %v12842_v40  ;;  %v3676_v11 = vshrl.u32 %v12838_v52, 16 }
 0x285   : >> { %3863 = vrot.lane.b32.xlu1 %v12710_v32, %s10728_s20  ;;  %9889 = vmatpush3.bf16.msra.mxu0 %v10638_v41  ;;  %v3479_v41 = vld [vmem:[#allocation2 + $0x160] sm:$0xff] }
 0x286   : >> { %3867 = vrot.lane.b32.xlu0 %v12715_v9, %s10728_s20  ;;  %9890 = vmatprep.subr.bf16.mxu0 %v10639_v16  ;;  %v3480_v16 = vld [vmem:[#allocation2 + $0x168] sm:$0xff] }
 0x287   : >> { %v12826_v56 = vpack.c.bf16 %v3480_v16, %v3479_v41  ;;  %v12832_v17 = vpack.c.bf16 %v3481_v0, %v3480_v16  ;;  %v3679_v41 = vshll.u32 %v12838_v52, 16  ;;  %v3487_v16 = vld [vmem:[#allocation2 + $0x1a0] sm:$0xff]  ;;  %v3678_v0 = vrot.slane %v3676_v11, 4 }
 0x289   : >> { %3713 = vrot.lane.b32.xlu1 %v12721_v48, %s10728_s20  ;;  %9891 = vmatpush3.bf16.msra.mxu0 %v10640_v25  ;;  %v3654_v25 = vrot.slane %v3652_v2, 4  ;;  %16184 = vst [vmem:[#allocation94_spill] sm:$0xff] %v12826_v56  ;;  %v3668_v8 = vshrl.u32 %v12832_v17, 16  ;;  %v3671_v51 = vshll.u32 %v12832_v17, 16  ;;  %v3483_v2 = vld [vmem:[#allocation2 + $0x180] sm:$0xff] }
 0x28a   : >> { %3715 = vrot.lane.b32.xlu0 %v12727_v60, %s10728_s20  ;;  %9892 = vmatprep.subr.bf16.mxu0 %v10641_v45  ;;  %v3657_v45 = vrot.slane %v3655_v35, 5  ;;  %v12848_v35 = vpack.c.bf16 %v3485_v46, %v3485_v46  ;;  %v12854_v57 = vpack.c.bf16 %v3484_v6, %v3483_v2  ;;  %v3681_v46 = vrot.slane %v3679_v41, 5  ;;  %v3493_v2 = vld [vmem:[#allocation2 + $0x1d0] sm:$0xff]  ;;  %v10652_v48 = vld [vmem:[%s12684_s24 + $0xe0] sm:$0xff]  }
 0x28c   : >> { %v12830_v4 = vor.u32 %v3657_v45, %v3654_v25  ;;  %16188 = vst [vmem:[#allocation98_spill] sm:$0xff] %v12848_v35  ;;  %16189 = vst [vmem:[#allocation99_spill] sm:$0xff] %v12854_v57  ;;  %v3670_v25 = vrot.slane %v3668_v8, 4  ;;  %v3673_v45 = vrot.slane %v3671_v51, 5  ;;  %v3492_v51 = vld [vmem:[#allocation2 + $0x1c8] sm:$0xff]  ;;  %v12871_v11 = vor.u32 %v3681_v46, %v3678_v0 }
 0x28d   : >> { %3869 = vrot.lane.b32.xlu1 %v12735_v10, %s10728_s20  ;;  %9893 = vmatpush3.bf16.msra.mxu0 %v10642_v33  ;;  %v12836_v33 = vor.u32 %v3665_v15, %v3662_v47  ;;  %v10646_v47 = vld [vmem:[%s12684_s24 + $0xf8] sm:$0xff]   ;;  %v12859_v15 = vpack.c.bf16 %v3488_v14, %v3487_v16  ;;  %v12873_v41 = vpack.c.bf16 %v3493_v2, %v3492_v51 }
 0x28e   : >> { %3873 = vrot.lane.b32.xlu0 %v12741_v3, %s10728_s20  ;;  %10426 = vmatprep.subr.bf16.mxu0 %v12785_v49  ;;  %16185 = vst [vmem:[#allocation95_spill] sm:$0xff] %v12830_v4  ;;  %v12864_v6 = vor.u32 %v3673_v45, %v3670_v25  ;;  %16192 = vst [vmem:[#allocation102_spill] sm:$0xff] %v12871_v11  ;;  %v10650_v45 = vld [vmem:[%s12684_s24 + $0xe8] sm:$0xff]   ;;  %v12885_v0 = vpack.c.bf16 %v3493_v2, %v3493_v2 }
 0x28f   : >> { %16186 = vst [vmem:[#allocation96_spill] sm:$0xff] %v12836_v33  ;;  %16190 = vst [vmem:[#allocation100_spill] sm:$0xff] %v12859_v15  ;;  %9990 = vmatprep.subr.bf16.mxu1 %v10646_v47  ;;  %v3491_v47 = vld [vmem:[#allocation2 + $0x1c0] sm:$0xff]  ;;  %v3695_v46 = vshll.u32 %v12873_v41, 16 }
 0x290   : >> { %16191 = vst [vmem:[#allocation101_spill] sm:$0xff] %v12864_v6  ;;  %16194 = vst [vmem:[#allocation104_spill] sm:$0xff] %v12885_v0 }
 0x291   : >> { %3871 = vrot.lane.b32.xlu1 %v12749_v22, %s10728_s20  ;;  %v3697_v60 = vrot.slane %v3695_v46, 5 }
 0x292   : >> { %3875 = vrot.lane.b32.xlu0 %v12753_v13, %s10728_s20 }
 0x295   : >> { %3717 = vrot.lane.b32.xlu1 %v12761_v58, %s10728_s20 }
 0x296   : >> { %3719 = vrot.lane.b32.xlu0 %v12765_v37, %s10728_s20 }
 0x299   : >> { %3877 = vrot.lane.b32.xlu1 %v12775_v20, %s10728_s20 }
 0x29a   : >> { %3881 = vrot.lane.b32.xlu0 %v12779_v26, %s10728_s20 }
 0x29d   : >> { %3879 = vrot.lane.b32.xlu1 %v12789_v5, %s10728_s20 }
 0x29e   : >> { %3883 = vrot.lane.b32.xlu0 %v12795_v7, %s10728_s20 }
 0x2a1   : >> { %3721 = vrot.lane.b32.xlu1 %v12800_v63, %s10728_s20  ;;  %v12892_v63 = vpack.c.bf16 %v3492_v51, %v3491_v47  ;;  %v10654_v47 = vld [vmem:[%s12684_s24 + $0xd8] sm:$0xff]  }
 0x2a2   : >> { %3723 = vrot.lane.b32.xlu0 %v12806_v21, %s10728_s20  ;;  %v10648_v21 = vld [vmem:[%s12684_s24 + $0xf0] sm:$0xff]  }
 0x2a3   : >> { %16195 = vst [vmem:[#allocation105_spill] sm:$0xff] %v12892_v63 }
 0x2a5   : >> { %3885 = vrot.lane.b32.xlu1 %v12812_v42, %s10728_s20 }
 0x2a6   : >> { %3889 = vrot.lane.b32.xlu0 %v12816_v23, %s10728_s20 }
 0x2a9   : >> { %3887 = vrot.lane.b32.xlu1 %v12822_v44, %s10728_s20  ;;  %v3494_v44 = vld [vmem:[#allocation2 + $0x1d8] sm:$0xff] }
 0x2aa   : >> { %3891 = vrot.lane.b32.xlu0 %v12826_v56, %s10728_s20  ;;  %v3486_v56 = vld [vmem:[#allocation2 + $0x198] sm:$0xff]  ;;  %v3569_v42 = vpack.c.bf16 %v3494_v44, %v3494_v44 }
 0x2ad   : >> { %3725 = vrot.lane.b32.xlu1 %v12830_v4, %s10728_s20  ;;  %v3489_v4 = vld [vmem:[#allocation2 + $0x1b0] sm:$0xff] }
 0x2ae   : >> { %3727 = vrot.lane.b32.xlu0 %v12836_v33, %s10728_s20  ;;  %v10647_v33 = vld [vmem:[%s12684_s24 + $0xb8] sm:$0xff]   ;;  %v12866_v8 = vpack.c.bf16 %v3489_v4, %v3488_v14  ;;  %v12878_v16 = vpack.c.bf16 %v3489_v4, %v3489_v4  ;;  %v3495_v4 = vld [vmem:[#allocation2 + $0x1e0] sm:$0xff] }
 0x2af   : >> { %9991 = vmatpush3.bf16.msra.mxu1 %v10647_v33  ;;  %v10649_v33 = vld [vmem:[%s12684_s24 + $0xb0] sm:$0xff]  }
 0x2b0   : >> { %9992 = vmatprep.subr.bf16.mxu1 %v10648_v21  ;;  %16193 = vst [vmem:[#allocation103_spill] sm:$0xff] %v12878_v16  ;;  %v3684_v14 = vshrl.u32 %v12866_v8, 16  ;;  %v3687_v25 = vshll.u32 %v12866_v8, 16  ;;  %v3692_v21 = vshrl.u32 %v12873_v41, 16 }
 0x2b1   : >> { %3893 = vrot.lane.b32.xlu1 %v12842_v40, %s10728_s20  ;;  %v13006_v40 = vrot.slane %v12729_v27, 5 }
 0x2b2   : >> { %3897 = vrot.lane.b32.xlu0 %v12848_v35, %s10728_s20  ;;  %v3689_v2 = vrot.slane %v3687_v25, 5  ;;  %v3694_v58 = vrot.slane %v3692_v21, 4  ;;  %v12911_v21 = vld [vmem:[#allocation2 + $0x210] sm:$0xff] }
 0x2b3   : >> { %9993 = vmatpush3.bf16.msra.mxu1 %v10649_v33  ;;  %v10651_v33 = vld [vmem:[%s12684_s24 + $0xa8] sm:$0xff]   ;;  %v12924_v46 = vpack.c.bf16 %v12911_v21, %v12911_v21 }
 0x2b4   : >> { %9994 = vmatprep.subr.bf16.mxu1 %v10650_v45  ;;  %v3497_v45 = vld [vmem:[#allocation2 + $0x1f0] sm:$0xff]  ;;  %v12908_v25 = vor.u32 %v3697_v60, %v3694_v58  ;;  %v3499_v60 = vld [vmem:[#allocation2 + $0x200] sm:$0xff]  ;;  %v3500_v58 = vld [vmem:[#allocation2 + $0x208] sm:$0xff] }
 0x2b5   : >> { %3895 = vrot.lane.b32.xlu1 %v12854_v57, %s10728_s20  ;;  %16200 = vst [vmem:[#allocation110_spill] sm:$0xff] %v12924_v46 }
 0x2b6   : >> { %3899 = vrot.lane.b32.xlu0 %v12859_v15, %s10728_s20  ;;  %16198 = vst [vmem:[#allocation108_spill] sm:$0xff] %v12908_v25 }
 0x2b7   : >> { %9995 = vmatpush3.bf16.msra.mxu1 %v10651_v33  ;;  %v3442_v33 = vld [vmem:[#allocation2 + $0x38] sm:$0xff] }
 0x2b8   : >> { %9996 = vmatprep.subr.bf16.mxu1 %v10652_v48  ;;  %v12915_v48 = vpack.c.bf16 %v3497_v45, %v3497_v45 }
 0x2b9   : >> { %3729 = vrot.lane.b32.xlu1 %v12864_v6, %s10728_s20  ;;  %v3496_v6 = vld [vmem:[#allocation2 + $0x1e8] sm:$0xff] }
 0x2ba   : >> { %3731 = vrot.lane.b32.xlu0 %v12871_v11, %s10728_s20  ;;  %v3686_v11 = vrot.slane %v3684_v14, 4  ;;  %v12896_v37 = vpack.c.bf16 %v3496_v6, %v3495_v4  ;;  %v12904_v14 = vpack.c.bf16 %v3497_v45, %v3496_v6  ;;  %16199 = vst [vmem:[#allocation109_spill] sm:$0xff] %v12915_v48  ;;  %v10656_v4 = vld [vmem:[%s12684_s24 + $0xd0] sm:$0xff]   ;;  %v12930_v45 = vpack.c.bf16 %v3500_v58, %v3499_v60 }
 0x2bb   : >> { %9997 = vmatpush3.bf16.msra.mxu1 %v10653_v29 }
 0x2bc   : >> { %16196 = vst [vmem:[#allocation106_spill] sm:$0xff] %v12896_v37  ;;  %v12902_v51 = vor.u32 %v3689_v2, %v3686_v11  ;;  %9998 = vmatprep.subr.bf16.mxu1 %v10654_v47  ;;  %v3700_v6 = vshrl.u32 %v12904_v14, 16  ;;  %v3703_v29 = vshll.u32 %v12904_v14, 16  ;;  %v10655_v11 = vld [vmem:[%s12684_s24 + $0x98] sm:$0xff]   ;;  %v10657_v2 = vld [vmem:[%s12684_s24 + $0x90] sm:$0xff]   ;;  %16201 = vst [vmem:[#allocation111_spill] sm:$0xff] %v12930_v45 }
 0x2bd   : >> { %3901 = vrot.lane.b32.xlu1 %v12878_v16, %s10728_s20  ;;  %v3474_v16 = vld [vmem:[#allocation2 + $0x138] sm:$0xff] }
 0x2be   : >> { %3905 = vrot.lane.b32.xlu0 %v12885_v0, %s10728_s20  ;;  %16197 = vst [vmem:[#allocation107_spill] sm:$0xff] %v12902_v51  ;;  %v3702_v47 = vrot.slane %v3700_v6, 4  ;;  %v10658_v0 = vld [vmem:[%s12684_s24 + $0xc8] sm:$0xff]  }
 0x2bf   : >> { %9999 = vmatpush3.bf16.msra.mxu1 %v10655_v11  ;;  %v3446_v11 = vld [vmem:[#allocation2 + $0x58] sm:$0xff]  ;;  %v10659_v6 = vld [vmem:[%s12684_s24 + $0x88] sm:$0xff]  }
 0x2c0   : >> { %10000 = vmatprep.subr.bf16.mxu1 %v10656_v4  ;;  %v3558_v4 = vpack.c.bf16 %v3450_v59, %v3450_v59 }
 0x2c1   : >> { %3903 = vrot.lane.b32.xlu1 %v12892_v63, %s10728_s20 }
 0x2c2   : >> { %3907 = vrot.lane.b32.xlu0 %v12896_v37, %s10728_s20  ;;  %v3556_v37 = vpack.c.bf16 %v3442_v33, %v3442_v33  ;;  %v3557_v33 = vpack.c.bf16 %v3446_v11, %v3446_v11 }
 0x2c3   : >> { %10001 = vmatpush3.bf16.msra.mxu1 %v10657_v2  ;;  %v10661_v2 = vld [vmem:[%s12684_s24 + $0x80] sm:$0xff]  }
 0x2c4   : >> { %10002 = vmatprep.subr.bf16.mxu1 %v10658_v0  ;;  %v3454_v0 = vld [vmem:[#allocation2 + $0x98] sm:$0xff] }
 0x2c5   : >> { %3733 = vrot.lane.b32.xlu1 %v12902_v51, %s10728_s20  ;;  %v12935_v51 = vrot.slane %v12643_v34, 5  ;;  %v12947_v34 = vrot.slane %v12653_v55, 5  ;;  %v12959_v55 = vrot.slane %v12677_v62, 5  ;;  %v3559_v11 = vpack.c.bf16 %v3454_v0, %v3454_v0  ;;  %v3470_v0 = vld [vmem:[#allocation2 + $0x118] sm:$0xff] }
 0x2c6   : >> { %3735 = vrot.lane.b32.xlu0 %v12908_v25, %s10728_s20  ;;  %v3705_v25 = vrot.slane %v3703_v29, 5  ;;  %v10660_v29 = vld [vmem:[%s12684_s24 + $0xc0] sm:$0xff]   ;;  %v12973_v62 = vrot.slane %v12866_v8, 5  ;;  %v3563_v35 = vpack.c.bf16 %v3470_v0, %v3470_v0  ;;  %v3490_v0 = vld [vmem:[#allocation2 + $0x1b8] sm:$0xff] }
 0x2c7   : >> { %10003 = vmatpush3.bf16.msra.mxu1 %v10659_v6  ;;  %v3458_v6 = vld [vmem:[#allocation2 + $0xb8] sm:$0xff] }
 0x2c8   : >> { %v12940_v60 = vor.u32 %v3705_v25, %v3702_v47  ;;  %10004 = vmatprep.subr.bf16.mxu1 %v10660_v29  ;;  %v3781_v47 = vrot.slane %v3558_v4, 5  ;;  %v12970_v29 = vrot.slane %v12690_v61, 5  ;;  %16203 = vst [vmem:[#allocation113_spill] sm:$0xff] %v12973_v62  ;;  %v12985_v61 = vrot.slane %v12904_v14, 5 }
 0x2c9   : >> { %3909 = vrot.lane.b32.xlu1 %v12915_v48, %s10728_s20  ;;  %v3438_v48 = vld [vmem:[#allocation2 + $0x18] sm:$0xff]  ;;  %v3771_v4 = vrot.slane %v12647_v24, 5  ;;  %v13000_v14 = vrot.slane %v12723_v39, 5 }
 0x2ca   : >> { %3913 = vrot.lane.b32.xlu0 %v12924_v46, %s10728_s20  ;;  %16202 = vst [vmem:[#allocation112_spill] sm:$0xff] %v12940_v60  ;;  %v3775_v46 = vrot.slane %v3556_v37, 5  ;;  %v3778_v37 = vrot.slane %v3557_v33, 5  ;;  %v3555_v59 = vpack.c.bf16 %v3438_v48, %v3438_v48  ;;  %v12977_v33 = vsel %vm953_vm1, %v12959_v55, %v3781_v47  ;;  %16205 = vst [vmem:[#allocation115_spill] sm:$0xff] %v12985_v61 }
 0x2cb   : >> { %10005 = vmatpush3.bf16.msra.mxu1 %v10661_v2  ;;  %v3462_v2 = vld [vmem:[#allocation2 + $0xd8] sm:$0xff]  ;;  %v4417_v8 = vshrl.u32 %v12977_v33, 16  ;;  %v12991_v47 = vpack.c.bf16 %v12911_v21, %v3500_v58  ;;  %v4420_v63 = vshll.u32 %v12977_v33, 16 }
 0x2cc   : >> { %v12954_v25 = vsel %vm953_vm1, %v12935_v51, %v3775_v46  ;;  %v12965_v46 = vsel %vm953_vm1, %v12947_v34, %v3778_v37  ;;  %v3772_v48 = vrot.slane %v3555_v59, 5  ;;  %v3466_v37 = vld [vmem:[#allocation2 + $0xf8] sm:$0xff]  ;;  %v3560_v59 = vpack.c.bf16 %v3458_v6, %v3458_v6 }
 0x2cd   : >> { %3911 = vrot.lane.b32.xlu1 %v12930_v45, %s10728_s20  ;;  %v12988_v45 = vld [vmem:[#allocation2] sm:$0xff]  ;;  %v3561_v15 = vpack.c.bf16 %v3462_v2, %v3462_v2  ;;  %v3562_v6 = vpack.c.bf16 %v3466_v37, %v3466_v37  ;;  %v3478_v21 = vld [vmem:[#allocation2 + $0x158] sm:$0xff]  ;;  %v13011_v23 = vrot.slane %v4417_v8, 3  ;;  %v13014_v2 = vrot.slane %v12767_v12, 5 }
 0x2ce   : >> { %3928 = vrot.lane.b32.xlu0 %v12935_v51, %s10728_s20  ;;  %v3482_v58 = vld [vmem:[#allocation2 + $0x178] sm:$0xff]  ;;  %v3773_v57 = vsel %vm953_vm1, %v3771_v4, %v3772_v48  ;;  %v3787_v39 = vrot.slane %v3560_v59, 5  ;;  %v3564_v37 = vpack.c.bf16 %v3474_v16, %v3474_v16  ;;  %v13016_v48 = vrot.slane %v4420_v63, 4 }
 0x2cf   : >> { %16207 = vst [vmem:[#allocation117_spill] sm:$0xff] %v13011_v23  ;;  %16208 = vst [vmem:[#allocation118_spill] sm:$0xff] %v13014_v2  ;;  %v3566_v24 = vpack.c.bf16 %v3482_v58, %v3482_v58  ;;  %v3790_v8 = vrot.slane %v3561_v15, 5  ;;  %v3793_v12 = vrot.slane %v3562_v6, 5  ;;  %v3796_v59 = vrot.slane %v3563_v35, 5 }
 0x2d0   : >> { %16209 = vst [vmem:[#allocation119_spill] sm:$0xff] %v13016_v48  ;;  %v3567_v16 = vpack.c.bf16 %v3486_v56, %v3486_v56  ;;  %v3568_v23 = vpack.c.bf16 %v3490_v0, %v3490_v0  ;;  %v3916_v63 = vshrl.u32 %v12991_v47, 16  ;;  %v3919_v48 = vshll.u32 %v12991_v47, 16 }
 0x2d1   : >> { %3737 = vrot.lane.b32.xlu1 %v12940_v60, %s10728_s20  ;;  %v12982_v60 = vrot.slane %v12873_v41, 5  ;;  %v3784_v41 = vrot.slane %v3559_v11, 5  ;;  %v13009_v11 = vrot.slane %v12755_v30, 5  ;;  %v3565_v30 = vpack.c.bf16 %v3478_v21, %v3478_v21 }
 0x2d2   : >> { %3932 = vrot.lane.b32.xlu0 %v12947_v34, %s10728_s20  ;;  %v13033_v21 = vrot.slane %v12791_v31, 5  ;;  %v3799_v58 = vrot.slane %v3564_v37, 5  ;;  %v13036_v15 = vrot.slane %v12808_v19, 5  ;;  %v13042_v35 = vrot.slane %v12832_v17, 5  ;;  %v3498_v37 = vld [vmem:[#allocation2 + $0x1f8] sm:$0xff] }
 0x2d3   : >> { %16204 = vst [vmem:[#allocation114_spill] sm:$0xff] %v12982_v60  ;;  %16206 = vst [vmem:[#allocation116_spill] sm:$0xff] %v13009_v11  ;;  %v13022_v27 = vsel %vm953_vm1, %v12970_v29, %v3784_v41  ;;  %v13030_v41 = vsel %vm953_vm1, %v13000_v14, %v3787_v39  ;;  %v3802_v44 = vrot.slane %v3565_v30, 5  ;;  %v3805_v6 = vrot.slane %v3566_v24, 5 }
 0x2d4   : >> { %16210 = vst [vmem:[#allocation120_spill] sm:$0xff] %v13033_v21  ;;  %16211 = vst [vmem:[#allocation121_spill] sm:$0xff] %v13036_v15  ;;  %v13047_v31 = vrot.slane %v12838_v52, 5  ;;  %v3808_v19 = vrot.slane %v3567_v16, 5  ;;  %v3811_v26 = vrot.slane %v3568_v23, 5  ;;  %v3921_v5 = vrot.slane %v3919_v48, 5 }
 0x2d5   : >> { %3930 = vrot.lane.b32.xlu1 %v12954_v25, %s10728_s20  ;;  %16212 = vst [vmem:[#allocation122_spill] sm:$0xff] %v13042_v35  ;;  %v13051_v17 = vsel %vm953_vm1, %v13006_v40, %v3790_v8  ;;  %v13055_v24 = vsel %vm953_vm1, %v13009_v11, %v3793_v12  ;;  %v13059_v30 = vsel %vm953_vm1, %v13014_v2, %v3796_v59 }
 0x2d6   : >> { %3936 = vrot.lane.b32.xlu0 %v12959_v55, %s10728_s20  ;;  %16213 = vst [vmem:[#allocation123_spill] sm:$0xff] %v13047_v31  ;;  %16214 = vst [vmem:[#allocation124_spill] sm:$0xff] %v13055_v24  ;;  %v13063_v52 = vsel %vm953_vm1, %v13033_v21, %v3799_v58  ;;  %v13070_v23 = vsel %vm953_vm1, %v13036_v15, %v3802_v44  ;;  %v13074_v48 = vsel %vm953_vm1, %v13042_v35, %v3805_v6 }
 0x2d7   : >> { %16215 = vst [vmem:[#allocation125_spill] sm:$0xff] %v13059_v30  ;;  %16216 = vst [vmem:[#allocation126_spill] sm:$0xff] %v13063_v52  ;;  %v3570_v8 = vpack.c.bf16 %v3498_v37, %v3498_v37  ;;  %v13084_v58 = vsel %vm953_vm1, %v12973_v62, %v3811_v26 }
 0x2d8   : >> { %16217 = vst [vmem:[#allocation127_spill] sm:$0xff] %v13070_v23  ;;  %16218 = vst [vmem:[#allocation128_spill] sm:$0xff] %v13074_v48 }
 0x2d9   : >> { %3934 = vrot.lane.b32.xlu1 %v12965_v46, %s10728_s20  ;;  %16220 = vst [vmem:[#allocation130_spill] sm:$0xff] %v13084_v58 }
 0x2da   : >> { %3940 = vrot.lane.b32.xlu0 %v12970_v29, %s10728_s20 }
 0x2dd   : >> { %3938 = vrot.lane.b32.xlu1 %v12977_v33, %s10728_s20 }
 0x2de   : >> { %3944 = vrot.lane.b32.xlu0 %v13000_v14, %s10728_s20 }
 0x2e0   : >> { %v3852_v7 = vpop.permute.xlu0 %3851 }
 0x2e1   : >> { %v4091_v56 = vsel %vm334_vm0, %v3771_v4, %v3852_v7  ;;  %3942 = vrot.lane.b32.xlu1 %v13022_v27, %s10728_s20  ;;  %v3814_v7 = vrot.slane %v3569_v42, 5  ;;  %v3918_v4 = vrot.slane %v3916_v63, 4 }
 0x2e2   : >> { %v4290_v0 = vshrl.u32 %v4091_v56, 16  ;;  %v4293_v39 = vshll.u32 %v4091_v56, 16  ;;  %3948 = vrot.lane.b32.xlu0 %v13006_v40, %s10728_s20 }
 0x2e3   : >> { %v13088_v56 = vsel %vm953_vm1, %v12982_v60, %v3814_v7  ;;  %v13090_v44 = vor.u32 %v3921_v5, %v3918_v4 }
 0x2e4   : >> { %v3854_v20 = vpop.permute.xlu0 %3853  ;;  %v4292_v12 = vrot.slane %v4290_v0, 3  ;;  %v4295_v59 = vrot.slane %v4293_v39, 4  ;;  %16221 = vst [vmem:[#allocation131_spill] sm:$0xff] %v13088_v56  ;;  %v16223_v39 = vpack.c.bf16 %v12639_v50, %v12988_v45  ;;  %v3817_v45 = vrot.slane %v3570_v8, 5 }
 0x2e5   : >> { %v4094_v42 = vsel %vm334_vm0, %v3773_v57, %v3854_v20  ;;  %3946 = vrot.lane.b32.xlu1 %v13030_v41, %s10728_s20  ;;  %v13080_v57 = vsel %vm953_vm1, %v13047_v31, %v3808_v19  ;;  %16222 = vst [vmem:[#allocation132_spill] sm:$0xff] %v13090_v44  ;;  %v16224_v19 = vpack.c.bf16 %v12641_v1, %v12641_v1 }
 0x2e6   : >> { %v4297_v16 = vshrl.u32 %v4094_v42, 16  ;;  %v4300_v63 = vshll.u32 %v4094_v42, 16  ;;  %3952 = vrot.lane.b32.xlu0 %v13009_v11, %s10728_s20  ;;  %16219 = vst [vmem:[#allocation129_spill] sm:$0xff] %v13080_v57  ;;  %v4296_v4 = vor.u32 %v4295_v59, %v4292_v12 }
 0x2e7   : >> { %v3708_v20 = vpop.permute.xlu1 %3707 }
 0x2e8   : >> { %v4299_v6 = vrot.slane %v4297_v16, 3  ;;  %v4302_v0 = vrot.slane %v4300_v63, 4  ;;  %v4011_v37 = vsel %vm334_vm0, %v16223_v39, %v3708_v20  ;;  %v4013_v42 = vsel %vm334_vm0, %v16224_v19, %v3708_v20  ;;  %v3858_v26 = vpop.permute.xlu0 %3857 }
 0x2e9   : >> { %v4275_v13 = vshrl.u32 %v4011_v37, 16  ;;  %v4278_v11 = vshll.u32 %v4011_v37, 16  ;;  %v4282_v3 = vshrl.u32 %v4013_v42, 16  ;;  %v4285_v7 = vshll.u32 %v4013_v42, 16  ;;  %3950 = vrot.lane.b32.xlu1 %v13051_v17, %s10728_s20 }
 0x2ea   : >> { %v4100_v5 = vsel %vm334_vm0, %v12954_v25, %v3858_v26  ;;  %v4303_v50 = vor.u32 %v4302_v0, %v4299_v6  ;;  %3956 = vrot.lane.b32.xlu0 %v13014_v2, %s10728_s20 }
 0x2eb   : >> { %v4277_v1 = vrot.slane %v4275_v13, 3  ;;  %v4280_v16 = vrot.slane %v4278_v11, 4  ;;  %v4284_v63 = vrot.slane %v4282_v3, 3  ;;  %v4287_v20 = vrot.slane %v4285_v7, 4  ;;  %v3856_v39 = vpop.permute.xlu1 %3855  ;;  %v3504_v3 = vld [vmem:[#allocation2 + $0x228] sm:$0xff]  ;;  %v3505_v13 = vld [vmem:[#allocation2 + $0x230] sm:$0xff] }
 0x2ec   : >> { %v4372_v37 = vshrl.u32 %v4100_v5, 16  ;;  %v4375_v19 = vshll.u32 %v4100_v5, 16  ;;  %v4097_v42 = vsel %vm334_vm0, %v12935_v51, %v3856_v39  ;;  %v4304_v22 = vsel %vm1458_vm2, %v4296_v4, %v4303_v50  ;;  %v3860_v25 = vpop.permute.xlu0 %3859  ;;  %v10644_v7 = vld [vmem:[%s12684_s24 + $0x110] sm:$0xff]  }
 0x2ed   : >> { %v4365_v12 = vshrl.u32 %v4097_v42, 16  ;;  %v4368_v59 = vshll.u32 %v4097_v42, 16  ;;  %5621 = vmatprep.mubr.bf16.mxu0 %v4304_v22  ;;  %v4281_v6 = vor.u32 %v4280_v16, %v4277_v1  ;;  %v4288_v0 = vor.u32 %v4287_v20, %v4284_v63  ;;  %3954 = vrot.lane.b32.xlu1 %v13055_v24, %s10728_s20 }
 0x2ee   : >> { %v4374_v11 = vrot.slane %v4372_v37, 3  ;;  %v4377_v8 = vrot.slane %v4375_v19, 4  ;;  %v4103_v26 = vsel %vm334_vm0, %v12947_v34, %v3860_v25  ;;  %3960 = vrot.lane.b32.xlu0 %v13033_v21, %s10728_s20  ;;  %v13118_v51 = vsel %vm953_vm1, %v12985_v61, %v3817_v45 }
 0x2ef   : >> { %16225 = vst [vmem:[#allocation133_spill] sm:$0xff] %v13118_v51  ;;  %v4367_v22 = vrot.slane %v4365_v12, 3  ;;  %v4370_v5 = vrot.slane %v4368_v59, 4  ;;  %v3710_v4 = vpop.permute.xlu1 %3709  ;;  %v4289_v50 = vsel %vm1458_vm2, %v4281_v6, %v4288_v0  ;;  %v4425_v1 = vshrl.u32 %v4103_v26, 16 }
 0x2f0   : >> { %v4016_v16 = vsel %vm334_vm0, %v12637_v28, %v3710_v4  ;;  %v4018_v63 = vsel %vm334_vm0, %v12651_v38, %v3710_v4  ;;  %5622 = vmatmul.mubr.bf16.vlgmr.msra.gmra.mxu0 %v4289_v50  ;;  %v4378_v20 = vor.u32 %v4377_v8, %v4374_v11  ;;  %v3712_v39 = vpop.permute.xlu0 %3711  ;;  %v13125_v37 = vpack.c.bf16 %v3505_v13, %v3504_v3 }
 0x2f1   : >> { %v4350_v19 = vshrl.u32 %v4016_v16, 16  ;;  %v4353_v45 = vshll.u32 %v4016_v16, 16  ;;  %v4357_v42 = vshrl.u32 %v4018_v63, 16  ;;  %v4360_v25 = vshll.u32 %v4018_v63, 16  ;;  %10427 = vmatpush3.bf16.msra.mxu0 %v12785_v49  ;;  %3958 = vrot.lane.b32.xlu1 %v13059_v30, %s10728_s20  ;;  %v10645_v49 = vld [vmem:[%s12684_s24 + $0x108] sm:$0xff]  }
 0x2f2   : >> { %16226 = vst [vmem:[#allocation134_spill] sm:$0xff] %v13125_v37  ;;  %v13130_v12 = vrot.slane %v4425_v1, 3  ;;  %v4428_v28 = vshll.u32 %v4103_v26, 16  ;;  %v4371_v59 = vor.u32 %v4370_v5, %v4367_v22  ;;  %v4021_v38 = vsel %vm334_vm0, %v12666_v53, %v3712_v39  ;;  %10428 = vmatprep.subr.bf16.mxu0 %v10644_v7  ;;  %3964 = vrot.lane.b32.xlu0 %v13036_v15, %s10728_s20 }
 0x2f3   : >> { %v4352_v6 = vrot.slane %v4350_v19, 3  ;;  %v4355_v0 = vrot.slane %v4353_v45, 4  ;;  %v4359_v3 = vrot.slane %v4357_v42, 3  ;;  %v4362_v13 = vrot.slane %v4360_v25, 4  ;;  %v3862_v11 = vpop.permute.xlu1 %3861 }
 0x2f4   : >> { %v4106_v8 = vsel %vm334_vm0, %v12965_v46, %v3862_v11  ;;  %v4379_v4 = vsel %vm1458_vm2, %v4371_v59, %v4378_v20  ;;  %v4023_v26 = vsel %vm334_vm0, %v12661_v54, %v3712_v39  ;;  %v4320_v22 = vshrl.u32 %v4021_v38, 16  ;;  %v3866_v53 = vpop.permute.xlu0 %3865 }
 0x2f5   : >> { %v4432_v5 = vshrl.u32 %v4106_v8, 16  ;;  %v4435_v50 = vshll.u32 %v4106_v8, 16  ;;  %5629 = vmatprep.mubr.bf16.mxu0 %v4379_v4  ;;  %v4323_v1 = vshll.u32 %v4021_v38, 16  ;;  %v4327_v16 = vshrl.u32 %v4023_v26, 16  ;;  %10429 = vmatpush3.bf16.msra.mxu0 %v10644_v7 }
 0x2f6   : >> { %v4430_v63 = vrot.slane %v4428_v28, 4  ;;  %v4330_v19 = vshll.u32 %v4023_v26, 16  ;;  %v4356_v45 = vor.u32 %v4355_v0, %v4352_v6  ;;  %v4363_v42 = vor.u32 %v4362_v13, %v4359_v3  ;;  %3962 = vrot.lane.b32.xlu1 %v13063_v52, %s10728_s20  ;;  %3968 = vrot.lane.b32.xlu0 %v13042_v35, %s10728_s20  ;;  %v3502_v3 = vld [vmem:[#allocation2 + $0x218] sm:$0xff]  ;;  %v10662_v13 = vld [vmem:[%s12684_s24 + $0x100] sm:$0xff]  }
 0x2f7   : >> { %v4434_v54 = vrot.slane %v4432_v5, 3  ;;  %v4437_v20 = vrot.slane %v4435_v50, 4  ;;  %v4322_v39 = vrot.slane %v4320_v22, 3  ;;  %v4325_v25 = vrot.slane %v4323_v1, 4  ;;  %v3864_v59 = vpop.permute.xlu1 %3863  ;;  %10430 = vmatprep.subr.bf16.mxu0 %v10645_v49 }
 0x2f8   : >> { %v4109_v7 = vsel %vm334_vm0, %v12959_v55, %v3864_v59  ;;  %v4364_v28 = vsel %vm1458_vm2, %v4356_v45, %v4363_v42  ;;  %v4112_v38 = vsel %vm334_vm0, %v12977_v33, %v3866_v53  ;;  %v3868_v6 = vpop.permute.xlu0 %3867  ;;  %v3993_v0 = vshrl.u32 %v13125_v37, 16 }
 0x2f9   : >> { %v4329_v11 = vrot.slane %v4327_v16, 3  ;;  %v4332_v8 = vrot.slane %v4330_v19, 4  ;;  %v4485_v4 = vshrl.u32 %v4109_v7, 16  ;;  %v4488_v26 = vshll.u32 %v4109_v7, 16  ;;  %5630 = vmatmul.mubr.bf16.gmra.mxu0 %v4364_v28 }
 0x2fa   : >> { %v4492_v22 = vshrl.u32 %v4112_v38, 16  ;;  %v4495_v5 = vshll.u32 %v4112_v38, 16  ;;  %v4431_v50 = vor.u32 %v4430_v63, %v13130_v12  ;;  %v4438_v1 = vor.u32 %v4437_v20, %v4434_v54  ;;  %3966 = vrot.lane.b32.xlu1 %v13070_v23, %s10728_s20  ;;  %3972 = vrot.lane.b32.xlu0 %v13047_v31, %s10728_s20 }
 0x2fb   : >> { %v3714_v45 = vpop.permute.xlu1 %3713  ;;  %v4115_v33 = vsel %vm334_vm0, %v12970_v29, %v3868_v6  ;;  %v4326_v53 = vor.u32 %v4325_v25, %v4322_v39  ;;  %10431 = vmatpush3.bf16.msra.mxu0 %v10645_v49  ;;  %v3996_v16 = vshll.u32 %v13125_v37, 16  ;;  %v3574_v19 = vpack.c.bf16 %v3502_v3, %v3502_v3 }
 0x2fc   : >> { %v4487_v42 = vrot.slane %v4485_v4, 3  ;;  %v4026_v12 = vsel %vm334_vm0, %v12671_v36, %v3714_v45  ;;  %v4028_v63 = vsel %vm334_vm0, %v12695_v18, %v3714_v45  ;;  %v4439_v54 = vsel %vm1458_vm2, %v4431_v50, %v4438_v1  ;;  %v3716_v20 = vpop.permute.xlu0 %3715  ;;  %10432 = vmatprep.subr.bf16.mxu0 %v10662_v13 }
 0x2fd   : >> { %v4490_v59 = vrot.slane %v4488_v26, 4  ;;  %v4395_v39 = vshrl.u32 %v4026_v12, 16  ;;  %v4398_v25 = vshll.u32 %v4026_v12, 16  ;;  %v4402_v7 = vshrl.u32 %v4028_v63, 16  ;;  %5637 = vmatprep.mubr.bf16.mxu0 %v4439_v54  ;;  %v16230_v54 = vld [vmem:[#allocation80_spill] sm:$0xff] }
 0x2fe   : >> { %v4494_v49 = vrot.slane %v4492_v22, 3  ;;  %v4497_v28 = vrot.slane %v4495_v5, 4  ;;  %v4405_v38 = vshll.u32 %v4028_v63, 16  ;;  %v4333_v6 = vor.u32 %v4332_v8, %v4329_v11  ;;  %3970 = vrot.lane.b32.xlu1 %v13074_v48, %s10728_s20  ;;  %3976 = vrot.lane.b32.xlu0 %v12973_v62, %s10728_s20 }
 0x2ff   : >> { %v3870_v36 = vpop.permute.xlu1 %3869  ;;  %v13170_v18 = vrot.slane %v3993_v0, 4  ;;  %v13172_v3 = vrot.slane %v3996_v16, 5  ;;  %v13175_v4 = vrot.slane %v12991_v47, 5  ;;  %v3926_v26 = vrot.slane %v3574_v19, 5  ;;  %10433 = vmatpush3.bf16.msra.mxu0 %v10662_v13 }
 0x300   : >> { %v4545_v22 = vshrl.u32 %v4115_v33, 16  ;;  %v4548_v5 = vshll.u32 %v4115_v33, 16  ;;  %v4118_v11 = vsel %vm334_vm0, %v13022_v27, %v3870_v36  ;;  %v4334_v8 = vsel %vm1458_vm2, %v4326_v53, %v4333_v6  ;;  %v3874_v50 = vpop.permute.xlu0 %3873 }
 0x301   : >> { %16227 = vst [vmem:[#allocation135_spill] sm:$0xff] %v13175_v4  ;;  %v4397_v1 = vrot.slane %v4395_v39, 3  ;;  %v4400_v45 = vrot.slane %v4398_v25, 4  ;;  %v4404_v12 = vrot.slane %v4402_v7, 3  ;;  %5638 = vmatmul.mubr.bf16.gmra.mxu0 %v4334_v8  ;;  %5782 = vmatprep.mubr.bf16.mxu1 %v4334_v8  ;;  %v4031_v0 = vsel %vm334_vm0, %v12710_v32, %v3716_v20 }
 0x302   : >> { %v4407_v47 = vrot.slane %v4405_v38, 4  ;;  %v4033_v13 = vsel %vm334_vm0, %v12702_v43, %v3716_v20  ;;  %v4491_v16 = vor.u32 %v4490_v59, %v4487_v42  ;;  %v4498_v33 = vor.u32 %v4497_v28, %v4494_v49  ;;  %3974 = vrot.lane.b32.xlu1 %v13080_v57, %s10728_s20  ;;  %3980 = vrot.lane.b32.xlu0 %v12982_v60, %s10728_s20 }
 0x303   : >> { %v4552_v19 = vshrl.u32 %v4118_v11, 16  ;;  %v4555_v53 = vshll.u32 %v4118_v11, 16  ;;  %v3872_v63 = vpop.permute.xlu1 %3871  ;;  %v13192_v32 = vsel %vm953_vm1, %v13175_v4, %v3926_v26  ;;  %v4455_v39 = vshrl.u32 %v4031_v0, 16 }
 0x304   : >> { %16228 = vst [vmem:[#allocation136_spill] sm:$0xff] %v13192_v32  ;;  %v4458_v43 = vshll.u32 %v4031_v0, 16  ;;  %v4121_v42 = vsel %vm334_vm0, %v13000_v14, %v3872_v63  ;;  %v4499_v20 = vsel %vm1458_vm2, %v4491_v16, %v4498_v33  ;;  %v3876_v59 = vpop.permute.xlu0 %3875  ;;  %v4547_v25 = vrot.slane %v4545_v22, 3  ;;  %v16229_v22 = vld [vmem:[#allocation81_spill] sm:$0xff] }
 0x305   : >> { %v4550_v7 = vrot.slane %v4548_v5, 4  ;;  %v4462_v49 = vshrl.u32 %v4033_v13, 16  ;;  %v4465_v28 = vshll.u32 %v4033_v13, 16  ;;  %5645 = vmatprep.mubr.bf16.mxu0 %v4499_v20  ;;  %v4124_v38 = vsel %vm334_vm0, %v13030_v41, %v3874_v50 }
 0x306   : >> { %v4401_v6 = vor.u32 %v4400_v45, %v4397_v1  ;;  %v4408_v36 = vor.u32 %v4407_v47, %v4404_v12  ;;  %v4127_v26 = vsel %vm334_vm0, %v13006_v40, %v3876_v59  ;;  %3978 = vrot.lane.b32.xlu1 %v13084_v58, %s10728_s20  ;;  %v4554_v11 = vrot.slane %v4552_v19, 3  ;;  %4000 = vrot.lane.b32.xlu0 %v13090_v44, %s10728_s20 }
 0x307   : >> { %v4605_v8 = vshrl.u32 %v4121_v42, 16  ;;  %v4608_v0 = vshll.u32 %v4121_v42, 16  ;;  %v3718_v16 = vpop.permute.xlu1 %3717  ;;  %v4557_v5 = vrot.slane %v4555_v53, 4  ;;  %v4457_v13 = vrot.slane %v4455_v39, 3 }
 0x308   : >> { %v4460_v50 = vrot.slane %v4458_v43, 4  ;;  %v4036_v1 = vsel %vm334_vm0, %v12715_v9, %v3718_v16  ;;  %v3720_v45 = vpop.permute.xlu0 %3719  ;;  %v4612_v12 = vshrl.u32 %v4124_v38, 16  ;;  %v4615_v47 = vshll.u32 %v4124_v38, 16 }
 0x309   : >> { %v4038_v33 = vsel %vm334_vm0, %v12735_v10, %v3718_v16  ;;  %v4665_v19 = vshrl.u32 %v4127_v26, 16  ;;  %v4464_v63 = vrot.slane %v4462_v49, 3  ;;  %v4467_v42 = vrot.slane %v4465_v28, 4 }
 0x30a   : >> { %v13211_v20 = vsel %vm1458_vm2, %v4401_v6, %v4408_v36  ;;  %v4551_v59 = vor.u32 %v4550_v7, %v4547_v25  ;;  %3982 = vrot.lane.b32.xlu1 %v13088_v56, %s10728_s20  ;;  %v4607_v53 = vrot.slane %v4605_v8, 3  ;;  %v4610_v39 = vrot.slane %v4608_v0, 4  ;;  %3986 = vrot.lane.b32.xlu0 %v13118_v51, %s10728_s20 }
 0x30b   : >> { %v4515_v43 = vshrl.u32 %v4036_v1, 16  ;;  %5646 = vmatmul.mubr.bf16.gmra.mxu0 %v13211_v20  ;;  %v4668_v9 = vshll.u32 %v4127_v26, 16  ;;  %v3878_v38 = vpop.permute.xlu1 %3877  ;;  %v4518_v10 = vshll.u32 %v4036_v1, 16  ;;  %v4522_v49 = vshrl.u32 %v4038_v33, 16 }
 0x30c   : >> { %v4130_v28 = vsel %vm334_vm0, %v13051_v17, %v3878_v38  ;;  %v4558_v6 = vor.u32 %v4557_v5, %v4554_v11  ;;  %v3882_v25 = vpop.permute.xlu0 %3881  ;;  %v4614_v7 = vrot.slane %v4612_v12, 3  ;;  %v4617_v36 = vrot.slane %v4615_v47, 4 }
 0x30d   : >> { %v4525_v16 = vshll.u32 %v4038_v33, 16  ;;  %v13220_v8 = vrot.slane %v4665_v19, 3  ;;  %v4041_v26 = vsel %vm334_vm0, %v16229_v22, %v3720_v45  ;;  %v4043_v44 = vsel %vm334_vm0, %v16230_v54, %v3720_v45  ;;  %v16231_v22 = vld [vmem:[#allocation116_spill] sm:$0xff] }
 0x30e   : >> { %v4559_v0 = vsel %vm1458_vm2, %v4551_v59, %v4558_v6  ;;  %v4461_v1 = vor.u32 %v4460_v50, %v4457_v13  ;;  %3984 = vrot.lane.b32.xlu1 %v12985_v61, %s10728_s20  ;;  %v4517_v38 = vrot.slane %v4515_v43, 3  ;;  %v13229_v11 = vrot.slane %v4668_v9, 4  ;;  %3988 = vrot.lane.b32.xlu0 %v13175_v4, %s10728_s20  ;;  %v16234_v4 = vld [vmem:[#allocation85_spill] sm:$0xff] }
 0x30f   : >> { %v4672_v5 = vshrl.u32 %v4130_v28, 16  ;;  %v4675_v12 = vshll.u32 %v4130_v28, 16  ;;  %5653 = vmatprep.mubr.bf16.mxu0 %v4559_v0  ;;  %v3880_v47 = vpop.permute.xlu1 %3879  ;;  %v4520_v33 = vrot.slane %v4518_v10, 4  ;;  %v4524_v19 = vrot.slane %v4522_v49, 3 }
 0x310   : >> { %v4133_v59 = vsel %vm334_vm0, %v16231_v22, %v3880_v47  ;;  %v4468_v54 = vor.u32 %v4467_v42, %v4464_v63  ;;  %v3884_v13 = vpop.permute.xlu0 %3883  ;;  %v4527_v50 = vrot.slane %v4525_v16, 4  ;;  %v4575_v45 = vshrl.u32 %v4041_v26, 16 }
 0x311   : >> { %v4578_v6 = vshll.u32 %v4041_v26, 16  ;;  %v4582_v43 = vshrl.u32 %v4043_v44, 16  ;;  %v4136_v28 = vsel %vm334_vm0, %v13055_v24, %v3882_v25  ;;  %v4611_v0 = vor.u32 %v4610_v39, %v4607_v53 }
 0x312   : >> { %v13236_v9 = vsel %vm1458_vm2, %v4461_v1, %v4468_v54  ;;  %v4618_v37 = vor.u32 %v4617_v36, %v4614_v7  ;;  %v16232_v10 = vor.u32 %v13172_v3, %v13170_v18  ;;  %v4674_v49 = vrot.slane %v4672_v5, 3  ;;  %v16233_v1 = vld [vmem:[#allocation82_spill] sm:$0xff] }
 0x313   : >> { %v4677_v63 = vrot.slane %v4675_v12, 4  ;;  %v4585_v42 = vshll.u32 %v4043_v44, 16  ;;  %v4725_v16 = vshrl.u32 %v4133_v59, 16  ;;  %5654 = vmatmul.mubr.bf16.gmra.mxu0 %v13236_v9  ;;  %v3722_v26 = vpop.permute.xlu1 %3721  ;;  %v4728_v47 = vshll.u32 %v4133_v59, 16 }
 0x314   : >> { %4002 = vrot.lane.b32.xlu1 %v16232_v10, %s10728_s20  ;;  %v4046_v54 = vsel %vm334_vm0, %v16233_v1, %v3722_v26  ;;  %v4048_v53 = vsel %vm334_vm0, %v16234_v4, %v3722_v26  ;;  %v4521_v39 = vor.u32 %v4520_v33, %v4517_v38  ;;  %v3724_v25 = vpop.permute.xlu0 %3723  ;;  %v4732_v7 = vshrl.u32 %v4136_v28, 16 }
 0x315   : >> { %v4735_v36 = vshll.u32 %v4136_v28, 16  ;;  %v4635_v18 = vshrl.u32 %v4046_v54, 16  ;;  %v4139_v3 = vsel %vm334_vm0, %v13014_v2, %v3884_v13  ;;  %v4638_v44 = vshll.u32 %v4046_v54, 16 }
 0x316   : >> { %v4642_v5 = vshrl.u32 %v4048_v53, 16  ;;  %v4619_v12 = vsel %vm1458_vm2, %v4611_v0, %v4618_v37  ;;  %v4528_v10 = vor.u32 %v4527_v50, %v4524_v19  ;;  %v4577_v59 = vrot.slane %v4575_v45, 3  ;;  %v16235_v0 = vld [vmem:[#allocation87_spill] sm:$0xff] }
 0x317   : >> { %v4580_v1 = vrot.slane %v4578_v6, 4  ;;  %v4584_v24 = vrot.slane %v4582_v43, 3  ;;  %v4587_v4 = vrot.slane %v4585_v42, 4  ;;  %5661 = vmatprep.mubr.bf16.mxu0 %v4619_v12  ;;  %v3886_v38 = vpop.permute.xlu1 %3885  ;;  %v4727_v33 = vrot.slane %v4725_v16, 3  ;;  %v16236_v16 = vld [vmem:[#allocation86_spill] sm:$0xff] }
 0x318   : >> { %3990 = vrot.lane.b32.xlu1 %v13192_v32, %s10728_s20  ;;  %v4645_v28 = vshll.u32 %v4048_v53, 16  ;;  %v4785_v26 = vshrl.u32 %v4139_v3, 16  ;;  %v13255_v22 = vsel %vm1458_vm2, %v4521_v39, %v4528_v10  ;;  %v3890_v13 = vpop.permute.xlu0 %3889  ;;  %v4730_v54 = vrot.slane %v4728_v47, 4 }
 0x319   : >> { %v4734_v2 = vrot.slane %v4732_v7, 3  ;;  %v4788_v37 = vshll.u32 %v4139_v3, 16  ;;  %v4142_v19 = vsel %vm334_vm0, %v13059_v30, %v3886_v38  ;;  %v4737_v50 = vrot.slane %v4735_v36, 4 }
 0x31a   : >> { %v13259_v45 = vrot.slane %v4635_v18, 3  ;;  %v13261_v6 = vrot.slane %v4638_v44, 4  ;;  %v13263_v43 = vrot.slane %v4642_v5, 3  ;;  %v4051_v42 = vsel %vm334_vm0, %v16235_v0, %v3724_v25 }
 0x31b   : >> { %5662 = vmatmul.mubr.bf16.gmra.mxu0 %v13255_v22  ;;  %v4053_v47 = vsel %vm334_vm0, %v16236_v16, %v3724_v25  ;;  %v3888_v53 = vpop.permute.xlu1 %3887  ;;  %v4671_v39 = vor.u32 %v13229_v11, %v13220_v8  ;;  %v4678_v7 = vor.u32 %v4677_v63, %v4674_v49  ;;  %v13272_v36 = vrot.slane %v4645_v28, 4 }
 0x31c   : >> { %v13274_v18 = vrot.slane %v4785_v26, 3  ;;  %v4792_v3 = vshrl.u32 %v4142_v19, 16  ;;  %v4795_v44 = vshll.u32 %v4142_v19, 16  ;;  %v3892_v5 = vpop.permute.xlu0 %3891  ;;  %v13276_v12 = vrot.slane %v4788_v37, 4 }
 0x31d   : >> { %v4145_v10 = vsel %vm334_vm0, %v13033_v21, %v3888_v53  ;;  %v4679_v38 = vsel %vm1458_vm2, %v4671_v39, %v4678_v7  ;;  %v4581_v25 = vor.u32 %v4580_v1, %v4577_v59  ;;  %v4695_v0 = vshrl.u32 %v4051_v42, 16  ;;  %v16237_v39 = vld [vmem:[#allocation88_spill] sm:$0xff] }
 0x31e   : >> { %v4698_v16 = vshll.u32 %v4051_v42, 16  ;;  %v4702_v32 = vshrl.u32 %v4053_v47, 16  ;;  %5669 = vmatprep.mubr.bf16.mxu0 %v4679_v38  ;;  %v4148_v8 = vsel %vm334_vm0, %v13063_v52, %v3890_v13  ;;  %v4588_v49 = vor.u32 %v4587_v4, %v4584_v24  ;;  %v16238_v38 = vld [vmem:[#allocation91_spill] sm:$0xff] }
 0x31f   : >> { %v3726_v11 = vpop.permute.xlu1 %3725  ;;  %v4151_v63 = vsel %vm334_vm0, %v13036_v15, %v3892_v5  ;;  %v4731_v28 = vor.u32 %v4730_v54, %v4727_v33  ;;  %v4738_v26 = vor.u32 %v4737_v50, %v4734_v2  ;;  %v13285_v37 = vrot.slane %v4792_v3, 3 }
 0x320   : >> { %v13287_v19 = vrot.slane %v4795_v44, 4  ;;  %v4705_v53 = vshll.u32 %v4053_v47, 16  ;;  %v4845_v59 = vshrl.u32 %v4145_v10, 16  ;;  %v3728_v1 = vpop.permute.xlu0 %3727  ;;  %v4848_v42 = vshll.u32 %v4145_v10, 16 }
 0x321   : >> { %v4056_v7 = vsel %vm334_vm0, %v16237_v39, %v3726_v11  ;;  %v4058_v13 = vsel %vm334_vm0, %v16238_v38, %v3726_v11  ;;  %v13294_v24 = vsel %vm1458_vm2, %v4581_v25, %v4588_v49  ;;  %v4852_v4 = vshrl.u32 %v4148_v8, 16  ;;  %v16239_v38 = vld [vmem:[#allocation93_spill] sm:$0xff] }
 0x322   : >> { %v4855_v33 = vshll.u32 %v4148_v8, 16  ;;  %v4755_v2 = vshrl.u32 %v4056_v7, 16  ;;  %v4905_v54 = vshrl.u32 %v4151_v63, 16  ;;  %v13296_v50 = vrot.slane %v4695_v0, 3 }
 0x323   : >> { %v13298_v3 = vrot.slane %v4698_v16, 4  ;;  %v13300_v47 = vrot.slane %v4702_v32, 3  ;;  %5670 = vmatmul.mubr.bf16.gmra.mxu0 %v13294_v24  ;;  %v3894_v44 = vpop.permute.xlu1 %3893  ;;  %v4739_v5 = vsel %vm1458_vm2, %v4731_v28, %v4738_v26  ;;  %v13304_v10 = vrot.slane %v4705_v53, 4 }
 0x324   : >> { %v4758_v11 = vshll.u32 %v4056_v7, 16  ;;  %v4762_v25 = vshrl.u32 %v4058_v13, 16  ;;  %v4765_v49 = vshll.u32 %v4058_v13, 16  ;;  %5677 = vmatprep.mubr.bf16.mxu0 %v4739_v5  ;;  %v3898_v8 = vpop.permute.xlu0 %3897  ;;  %v13306_v39 = vrot.slane %v4845_v59, 3  ;;  %v16240_v7 = vld [vmem:[#allocation92_spill] sm:$0xff] }
 0x325   : >> { %v13308_v0 = vrot.slane %v4848_v42, 4  ;;  %v4908_v16 = vshll.u32 %v4151_v63, 16  ;;  %v4061_v32 = vsel %vm334_vm0, %v16239_v38, %v3728_v1  ;;  %v13312_v15 = vrot.slane %v4852_v4, 3 }
 0x326   : >> { %v13314_v52 = vrot.slane %v4855_v33, 4  ;;  %v13316_v28 = vrot.slane %v4755_v2, 3  ;;  %v13318_v26 = vrot.slane %v4905_v54, 3  ;;  %v4154_v53 = vsel %vm334_vm0, %v13070_v23, %v3894_v44 }
 0x327   : >> { %v4063_v59 = vsel %vm334_vm0, %v16240_v7, %v3728_v1  ;;  %v3896_v42 = vpop.permute.xlu1 %3895  ;;  %v4641_v63 = vor.u32 %v13261_v6, %v13259_v45  ;;  %v4648_v13 = vor.u32 %v13272_v36, %v13263_v43  ;;  %v13328_v4 = vrot.slane %v4758_v11, 4 }
 0x328   : >> { %v13330_v33 = vrot.slane %v4762_v25, 3  ;;  %v13332_v2 = vrot.slane %v4765_v49, 4  ;;  %v4815_v54 = vshrl.u32 %v4061_v32, 16  ;;  %v3900_v5 = vpop.permute.xlu0 %3899  ;;  %v13334_v38 = vrot.slane %v4908_v16, 4 }
 0x329   : >> { %v4157_v1 = vsel %vm334_vm0, %v13042_v35, %v3896_v42  ;;  %v13339_v44 = vsel %vm1458_vm2, %v4641_v63, %v4648_v13  ;;  %v4160_v45 = vsel %vm334_vm0, %v13074_v48, %v3898_v8  ;;  %v4912_v6 = vshrl.u32 %v4154_v53, 16  ;;  %v16241_v48 = vld [vmem:[#allocation94_spill] sm:$0xff]  ;;  %v16242_v35 = vld [vmem:[#allocation97_spill] sm:$0xff] }
 0x32a   : >> { %v4915_v43 = vshll.u32 %v4154_v53, 16  ;;  %v4818_v36 = vshll.u32 %v4061_v32, 16  ;;  %v4822_v11 = vshrl.u32 %v4063_v59, 16  ;;  %v4825_v25 = vshll.u32 %v4063_v59, 16 }
 0x32b   : >> { %5678 = vmatmul.mubr.bf16.gmra.mxu0 %v13339_v44  ;;  %v3730_v49 = vpop.permute.xlu1 %3729  ;;  %v4791_v16 = vor.u32 %v13276_v12, %v13274_v18  ;;  %v4798_v7 = vor.u32 %v13287_v19, %v13285_v37  ;;  %v4163_v42 = vsel %vm334_vm0, %v13047_v31, %v3900_v5  ;;  %v13350_v63 = vrot.slane %v4815_v54, 3 }
 0x32c   : >> { %v4965_v8 = vshrl.u32 %v4157_v1, 16  ;;  %v4968_v13 = vshll.u32 %v4157_v1, 16  ;;  %v4972_v53 = vshrl.u32 %v4160_v45, 16  ;;  %v3732_v32 = vpop.permute.xlu0 %3731  ;;  %v4066_v59 = vsel %vm334_vm0, %v16241_v48, %v3730_v49 }
 0x32d   : >> { %v4068_v23 = vsel %vm334_vm0, %v16242_v35, %v3730_v49  ;;  %v4799_v18 = vsel %vm1458_vm2, %v4791_v16, %v4798_v7  ;;  %v4701_v12 = vor.u32 %v13298_v3, %v13296_v50  ;;  %v13359_v37 = vrot.slane %v4912_v6, 3 }
 0x32e   : >> { %v13361_v19 = vrot.slane %v4915_v43, 4  ;;  %v4975_v54 = vshll.u32 %v4160_v45, 16  ;;  %5685 = vmatprep.mubr.bf16.mxu0 %v4799_v18  ;;  %v5025_v5 = vshrl.u32 %v4163_v42, 16  ;;  %v13363_v1 = vrot.slane %v4818_v36, 4 }
 0x32f   : >> { %v13365_v31 = vrot.slane %v4822_v11, 3  ;;  %v13367_v48 = vrot.slane %v4825_v25, 4  ;;  %v3902_v21 = vpop.permute.xlu1 %3901  ;;  %v4708_v35 = vor.u32 %v13304_v10, %v13300_v47  ;;  %v13371_v49 = vrot.slane %v4965_v8, 3  ;;  %v16244_v10 = vld [vmem:[#allocation99_spill] sm:$0xff] }
 0x330   : >> { %v4875_v50 = vshrl.u32 %v4066_v59, 16  ;;  %v4878_v3 = vshll.u32 %v4066_v59, 16  ;;  %v4882_v6 = vshrl.u32 %v4068_v23, 16  ;;  %v3906_v43 = vpop.permute.xlu0 %3905  ;;  %v13373_v16 = vrot.slane %v4968_v13, 4  ;;  %v16245_v13 = vld [vmem:[#allocation98_spill] sm:$0xff] }
 0x331   : >> { %v13375_v45 = vrot.slane %v4972_v53, 3  ;;  %v4166_v36 = vsel %vm334_vm0, %v13080_v57, %v3902_v21  ;;  %v13380_v11 = vsel %vm1458_vm2, %v4701_v12, %v4708_v35  ;;  %v13382_v25 = vrot.slane %v4975_v54, 4 }
 0x332   : >> { %16243 = vst [vmem:[#allocation81_spill] sm:$0xff] %v13380_v11  ;;  %v4885_v7 = vshll.u32 %v4068_v23, 16  ;;  %v13384_v47 = vrot.slane %v5025_v5, 3  ;;  %v4071_v8 = vsel %vm334_vm0, %v16244_v10, %v3732_v32  ;;  %v5028_v59 = vshll.u32 %v4163_v42, 16 }
 0x333   : >> { %5686 = vmatmul.mubr.bf16.gmra.mxu0 %v13380_v11  ;;  %v4073_v53 = vsel %vm334_vm0, %v16245_v13, %v3732_v32  ;;  %v3904_v18 = vpop.permute.xlu1 %3903  ;;  %v4851_v21 = vor.u32 %v13308_v0, %v13306_v39  ;;  %v4858_v12 = vor.u32 %v13314_v52, %v13312_v15  ;;  %v13395_v54 = vrot.slane %v4875_v50, 3 }
 0x334   : >> { %v13397_v23 = vrot.slane %v4878_v3, 4  ;;  %v13399_v5 = vrot.slane %v4882_v6, 3  ;;  %v5032_v35 = vshrl.u32 %v4166_v36, 16  ;;  %v3908_v42 = vpop.permute.xlu0 %3907  ;;  %v5035_v10 = vshll.u32 %v4166_v36, 16 }
 0x335   : >> { %v4935_v57 = vshrl.u32 %v4071_v8, 16  ;;  %v4169_v32 = vsel %vm334_vm0, %v12973_v62, %v3904_v18  ;;  %v4859_v13 = vsel %vm1458_vm2, %v4851_v21, %v4858_v12  ;;  %v4938_v11 = vshll.u32 %v4071_v8, 16  ;;  %v16246_v12 = vld [vmem:[#allocation100_spill] sm:$0xff] }
 0x336   : >> { %v4942_v39 = vshrl.u32 %v4073_v53, 16  ;;  %5693 = vmatprep.mubr.bf16.mxu0 %v4859_v13  ;;  %v4172_v15 = vsel %vm334_vm0, %v13084_v58, %v3906_v43  ;;  %v4761_v52 = vor.u32 %v13328_v4, %v13316_v28  ;;  %v13408_v0 = vrot.slane %v4885_v7, 4 }
 0x337   : >> { %v13410_v50 = vrot.slane %v5028_v59, 4  ;;  %v4945_v3 = vshll.u32 %v4073_v53, 16  ;;  %v3734_v6 = vpop.permute.xlu1 %3733  ;;  %v4768_v36 = vor.u32 %v13332_v2, %v13330_v33  ;;  %v5085_v18 = vshrl.u32 %v4169_v32, 16  ;;  %v16247_v53 = vld [vmem:[#allocation103_spill] sm:$0xff] }
 0x338   : >> { %v5088_v21 = vshll.u32 %v4169_v32, 16  ;;  %v5092_v8 = vshrl.u32 %v4172_v15, 16  ;;  %v4076_v13 = vsel %vm334_vm0, %v16246_v12, %v3734_v6  ;;  %v3736_v62 = vpop.permute.xlu0 %3735  ;;  %v13416_v43 = vrot.slane %v5032_v35, 3 }
 0x339   : >> { %v13418_v58 = vrot.slane %v5035_v10, 4  ;;  %v13420_v28 = vrot.slane %v4935_v57, 3  ;;  %v5095_v4 = vshll.u32 %v4172_v15, 16  ;;  %v13422_v7 = vrot.slane %v4938_v11, 4 }
 0x33a   : >> { %v13424_v59 = vrot.slane %v4942_v39, 3  ;;  %v4078_v33 = vsel %vm334_vm0, %v16247_v53, %v3734_v6  ;;  %v13429_v2 = vsel %vm1458_vm2, %v4761_v52, %v4768_v36  ;;  %v13431_v32 = vrot.slane %v4945_v3, 4 }
 0x33b   : >> { %16248 = vst [vmem:[#allocation80_spill] sm:$0xff] %v13429_v2  ;;  %v4995_v12 = vshrl.u32 %v4076_v13, 16  ;;  %5694 = vmatmul.mubr.bf16.gmra.mxu0 %v13429_v2  ;;  %v4175_v57 = vsel %vm334_vm0, %v12982_v60, %v3908_v42  ;;  %v3910_v35 = vpop.permute.xlu1 %3909  ;;  %v4911_v11 = vor.u32 %v13334_v38, %v13318_v26  ;;  %v13438_v10 = vrot.slane %v5085_v18, 3  ;;  %v16249_v2 = vld [vmem:[#allocation105_spill] sm:$0xff] }
 0x33c   : >> { %v13440_v39 = vrot.slane %v5088_v21, 4  ;;  %v13442_v15 = vrot.slane %v5092_v8, 3  ;;  %v4998_v52 = vshll.u32 %v4076_v13, 16  ;;  %v13444_v6 = vrot.slane %v5095_v4, 4  ;;  %v3914_v53 = vpop.permute.xlu0 %3913  ;;  %v16250_v4 = vld [vmem:[#allocation104_spill] sm:$0xff] }
 0x33d   : >> { %v5002_v3 = vshrl.u32 %v4078_v33, 16  ;;  %v4178_v36 = vsel %vm334_vm0, %v13088_v56, %v3910_v35  ;;  %v4918_v42 = vor.u32 %v13361_v19, %v13359_v37  ;;  %v5005_v60 = vshll.u32 %v4078_v33, 16 }
 0x33e   : >> { %v4081_v26 = vsel %vm334_vm0, %v16249_v2, %v3736_v62  ;;  %v4821_v38 = vor.u32 %v13363_v1, %v13350_v63  ;;  %v4828_v18 = vor.u32 %v13367_v48, %v13365_v31  ;;  %v13456_v21 = vrot.slane %v4995_v12, 3 }
 0x33f   : >> { %v5145_v8 = vshrl.u32 %v4175_v57, 16  ;;  %v4919_v13 = vsel %vm1458_vm2, %v4911_v11, %v4918_v42  ;;  %v4083_v35 = vsel %vm334_vm0, %v16250_v4, %v3736_v62  ;;  %v3912_v37 = vpop.permute.xlu1 %3911  ;;  %v13461_v19 = vrot.slane %v4998_v52, 4 }
 0x340   : >> { %v5148_v33 = vshll.u32 %v4175_v57, 16  ;;  %v5152_v56 = vshrl.u32 %v4178_v36, 16  ;;  %5701 = vmatprep.mubr.bf16.mxu0 %v4919_v13  ;;  %v4181_v63 = vsel %vm334_vm0, %v12985_v61, %v3912_v37  ;;  %v5155_v1 = vshll.u32 %v4178_v36, 16  ;;  %v3929_v4 = vpop.permute.xlu0 %3928 }
 0x341   : >> { %v5055_v2 = vshrl.u32 %v4081_v26, 16  ;;  %v5058_v31 = vshll.u32 %v4081_v26, 16  ;;  %v13466_v48 = vsel %vm1458_vm2, %v4821_v38, %v4828_v18  ;;  %v5062_v12 = vshrl.u32 %v4083_v35, 16 }
 0x342   : >> { %16251 = vst [vmem:[#allocation82_spill] sm:$0xff] %v13466_v48  ;;  %v5065_v11 = vshll.u32 %v4083_v35, 16  ;;  %v5207_v42 = vshrl.u32 %v4181_v63, 16  ;;  %v4971_v62 = vor.u32 %v13373_v16, %v13371_v49  ;;  %v13470_v52 = vrot.slane %v5002_v3, 3 }
 0x343   : >> { %v13472_v57 = vrot.slane %v5005_v60, 4  ;;  %v5210_v13 = vshll.u32 %v4181_v63, 16  ;;  %5702 = vmatmul.mubr.bf16.gmra.mxu0 %v13466_v48  ;;  %v4978_v36 = vor.u32 %v13382_v25, %v13375_v45  ;;  %v3738_v26 = vpop.permute.xlu1 %3737  ;;  %v13477_v38 = vrot.slane %v5145_v8, 3 }
 0x344   : >> { %v13479_v18 = vrot.slane %v5148_v33, 4  ;;  %v13481_v35 = vrot.slane %v5152_v56, 3  ;;  %v13485_v49 = vsel %vm334_vm0, %v13118_v51, %v3914_v53  ;;  %v13487_v60 = vrot.slane %v5155_v1, 4  ;;  %v16252_v56 = vld [vmem:[#allocation76_spill] sm:$0xff]  ;;  %v3933_v51 = vpop.permute.xlu0 %3932 }
 0x345   : >> { %v13489_v16 = vrot.slane %v5055_v2, 3  ;;  %v13491_v3 = vrot.slane %v5058_v31, 4  ;;  %v4979_v45 = vsel %vm1458_vm2, %v4971_v62, %v4978_v36  ;;  %v13494_v25 = vrot.slane %v5062_v12, 3  ;;  %v16253_v62 = vld [vmem:[#allocation106_spill] sm:$0xff] }
 0x346   : >> { %v13496_v8 = vrot.slane %v5065_v11, 4  ;;  %v13498_v37 = vrot.slane %v5207_v42, 3  ;;  %5709 = vmatprep.mubr.bf16.mxu0 %v4979_v45  ;;  %v4187_v33 = vsel %vm334_vm0, %v16252_v56, %v3929_v4  ;;  %v13502_v53 = vrot.slane %v5210_v13, 4 }
 0x347   : >> { %v5214_v63 = vshrl.u32 %v13485_v49, 16  ;;  %v5217_v1 = vshll.u32 %v13485_v49, 16  ;;  %v4305_v2 = vshrl.u32 %v4187_v33, 16  ;;  %v3931_v31 = vpop.permute.xlu1 %3930  ;;  %v13508_v12 = vsel %vm334_vm0, %v16253_v62, %v3738_v26 }
 0x348   : >> { %v4308_v11 = vshll.u32 %v4187_v33, 16  ;;  %v4189_v42 = vsel %vm334_vm0, %v16252_v56, %v3931_v31  ;;  %v4881_v36 = vor.u32 %v13397_v23, %v13395_v54  ;;  %v4888_v49 = vor.u32 %v13408_v0, %v13399_v5  ;;  %v16254_v33 = vld [vmem:[#allocation77_spill] sm:$0xff] }
 0x349   : >> { %v4307_v13 = vrot.slane %v4305_v2, 3  ;;  %v4312_v4 = vshrl.u32 %v4189_v42, 16  ;;  %v4315_v45 = vshll.u32 %v4189_v42, 16  ;;  %v5031_v48 = vor.u32 %v13410_v50, %v13384_v47  ;;  %v16255_v42 = vld [vmem:[#allocation109_spill] sm:$0xff] }
 0x34a   : >> { %v4310_v61 = vrot.slane %v4308_v11, 4  ;;  %v5038_v62 = vor.u32 %v13418_v58, %v13416_v43  ;;  %v4192_v30 = vsel %vm334_vm0, %v16254_v33, %v3933_v51  ;;  %v13523_v54 = vsel %vm1458_vm2, %v4881_v36, %v4888_v49  ;;  %v3937_v36 = vpop.permute.xlu0 %3936 }
 0x34b   : >> { %v4314_v56 = vrot.slane %v4312_v4, 3  ;;  %v4317_v31 = vrot.slane %v4315_v45, 4  ;;  %v4380_v23 = vshrl.u32 %v4192_v30, 16  ;;  %v3935_v2 = vpop.permute.xlu1 %3934  ;;  %v13527_v5 = vsel %vm334_vm0, %v16255_v42, %v3738_v26  ;;  %5710 = vmatmul.mubr.bf16.gmra.mxu0 %v13523_v54 }
 0x34c   : >> { %v5039_v47 = vsel %vm1458_vm2, %v5031_v48, %v5038_v62  ;;  %v4383_v0 = vshll.u32 %v4192_v30, 16  ;;  %v4194_v58 = vsel %vm334_vm0, %v16254_v33, %v3935_v2  ;;  %v4941_v11 = vor.u32 %v13422_v7, %v13420_v28  ;;  %v16256_v7 = vld [vmem:[#allocation78_spill] sm:$0xff] }
 0x34d   : >> { %5717 = vmatprep.mubr.bf16.mxu0 %v5039_v47  ;;  %v4382_v51 = vrot.slane %v4380_v23, 3  ;;  %v4387_v50 = vshrl.u32 %v4194_v58, 16  ;;  %v4390_v43 = vshll.u32 %v4194_v58, 16  ;;  %v4948_v26 = vor.u32 %v13431_v32, %v13424_v59 }
 0x34e   : >> { %v4385_v4 = vrot.slane %v4383_v0, 4  ;;  %v4311_v45 = vor.u32 %v4310_v61, %v4307_v13  ;;  %v4318_v49 = vor.u32 %v4317_v31, %v4314_v56  ;;  %v5091_v30 = vor.u32 %v13440_v39, %v13438_v10  ;;  %v3941_v31 = vpop.permute.xlu0 %3940 }
 0x34f   : >> { %v4389_v42 = vrot.slane %v4387_v50, 3  ;;  %v4392_v48 = vrot.slane %v4390_v43, 4  ;;  %v5098_v62 = vor.u32 %v13444_v6, %v13442_v15  ;;  %v3939_v33 = vpop.permute.xlu1 %3938  ;;  %v5115_v23 = vshrl.u32 %v13508_v12, 16 }
 0x350   : >> { %v4319_v28 = vsel %vm1458_vm2, %v4311_v45, %v4318_v49  ;;  %v4197_v2 = vsel %vm334_vm0, %v16256_v7, %v3937_v36  ;;  %v4199_v61 = vsel %vm334_vm0, %v16256_v7, %v3939_v33  ;;  %v5118_v59 = vshll.u32 %v13508_v12, 16 }
 0x351   : >> { %5783 = vmatmul.mubr.bf16.vlgmr.msra.gmra.mxu1 %v4319_v28  ;;  %v4440_v32 = vshrl.u32 %v4197_v2, 16  ;;  %v4443_v13 = vshll.u32 %v4197_v2, 16  ;;  %v4447_v10 = vshrl.u32 %v4199_v61, 16  ;;  %v5122_v39 = vshrl.u32 %v13527_v5, 16 }
 0x352   : >> { %5790 = vmatprep.mubr.bf16.mxu1 %v13211_v20  ;;  %v4450_v15 = vshll.u32 %v4199_v61, 16  ;;  %v4386_v6 = vor.u32 %v4385_v4, %v4382_v51  ;;  %v4393_v56 = vor.u32 %v4392_v48, %v4389_v42  ;;  %v13550_v47 = vrot.slane %v5214_v63, 3  ;;  %v3945_v48 = vpop.permute.xlu0 %3944 }
 0x353   : >> { %v13552_v0 = vrot.slane %v5217_v1, 4  ;;  %v13555_v58 = vsel %vm1458_vm2, %v4941_v11, %v4948_v26  ;;  %v5099_v12 = vsel %vm1458_vm2, %v5091_v30, %v5098_v62  ;;  %v3943_v50 = vpop.permute.xlu1 %3942  ;;  %v4442_v43 = vrot.slane %v4440_v32, 3  ;;  %v16257_v1 = vld [vmem:[#allocation79_spill] sm:$0xff] }
 0x354   : >> { %5718 = vmatmul.mubr.bf16.gmra.mxu0 %v13555_v58  ;;  %v4445_v36 = vrot.slane %v4443_v13, 4  ;;  %v4449_v45 = vrot.slane %v4447_v10, 3  ;;  %v4452_v20 = vrot.slane %v4450_v15, 4  ;;  %v5125_v51 = vshll.u32 %v13527_v5, 16 }
 0x355   : >> { %5725 = vmatprep.mubr.bf16.mxu0 %v5099_v12  ;;  %v5001_v63 = vor.u32 %v13461_v19, %v13456_v21  ;;  %v4202_v4 = vsel %vm334_vm0, %v16257_v1, %v3941_v31  ;;  %v4204_v11 = vsel %vm334_vm0, %v16257_v1, %v3943_v50  ;;  %v5008_v26 = vor.u32 %v13472_v57, %v13470_v52  ;;  %v16259_v50 = vld [vmem:[#allocation84_spill] sm:$0xff] }
 0x356   : >> { %v4394_v49 = vsel %vm1458_vm2, %v4386_v6, %v4393_v56  ;;  %v5151_v42 = vor.u32 %v13479_v18, %v13477_v38  ;;  %v5158_v5 = vor.u32 %v13487_v60, %v13481_v35  ;;  %v4500_v30 = vshrl.u32 %v4202_v4, 16  ;;  %v16258_v18 = vld [vmem:[#allocation83_spill] sm:$0xff] }
 0x357   : >> { %v4503_v21 = vshll.u32 %v4202_v4, 16  ;;  %v4507_v19 = vshrl.u32 %v4204_v11, 16  ;;  %v4510_v62 = vshll.u32 %v4204_v11, 16  ;;  %v3947_v33 = vpop.permute.xlu1 %3946  ;;  %v5061_v28 = vor.u32 %v13491_v3, %v13489_v16  ;;  %v3949_v3 = vpop.permute.xlu0 %3948 }
 0x358   : >> { %v5068_v52 = vor.u32 %v13496_v8, %v13494_v25  ;;  %v4446_v57 = vor.u32 %v4445_v36, %v4442_v43  ;;  %v4453_v7 = vor.u32 %v4452_v20, %v4449_v45  ;;  %v5117_v2 = vrot.slane %v5115_v23, 3 }
 0x359   : >> { %v5120_v61 = vrot.slane %v5118_v59, 4  ;;  %v5124_v38 = vrot.slane %v5122_v39, 3  ;;  %5791 = vmatmul.mubr.bf16.gmra.mxu1 %v4394_v49  ;;  %v4207_v35 = vsel %vm334_vm0, %v16258_v18, %v3945_v48  ;;  %v5127_v60 = vrot.slane %v5125_v51, 4 }
 0x35a   : >> { %v13580_v32 = vsel %vm1458_vm2, %v5001_v63, %v5008_v26  ;;  %5798 = vmatprep.mubr.bf16.mxu1 %v13236_v9  ;;  %v4560_v13 = vshrl.u32 %v4207_v35, 16  ;;  %v4209_v16 = vsel %vm334_vm0, %v16258_v18, %v3947_v33  ;;  %v4502_v25 = vrot.slane %v4500_v30, 3 }
 0x35b   : >> { %v4505_v8 = vrot.slane %v4503_v21, 4  ;;  %v4509_v23 = vrot.slane %v4507_v19, 3  ;;  %v4512_v59 = vrot.slane %v4510_v62, 4  ;;  %v5159_v10 = vsel %vm1458_vm2, %v5151_v42, %v5158_v5  ;;  %v3951_v6 = vpop.permute.xlu1 %3950  ;;  %v3953_v33 = vpop.permute.xlu0 %3952 }
 0x35c   : >> { %5726 = vmatmul.mubr.bf16.gmra.mxu0 %v13580_v32  ;;  %v13588_v39 = vsel %vm1458_vm2, %v5061_v28, %v5068_v52  ;;  %v4454_v15 = vsel %vm1458_vm2, %v4446_v57, %v4453_v7  ;;  %v5213_v9 = vor.u32 %v13502_v53, %v13498_v37  ;;  %v5220_v56 = vor.u32 %v13552_v0, %v13550_v47 }
 0x35d   : >> { %5733 = vmatprep.mubr.bf16.mxu0 %v5159_v10  ;;  %v4563_v31 = vshll.u32 %v4207_v35, 16  ;;  %v4567_v12 = vshrl.u32 %v4209_v16, 16  ;;  %v4212_v43 = vsel %vm334_vm0, %v16259_v50, %v3949_v3  ;;  %v13597_v36 = vrot.slane %v4560_v13, 3  ;;  %v16261_v35 = vld [vmem:[#allocation89_spill] sm:$0xff]  ;;  %v16263_v10 = vld [vmem:[#allocation119_spill] sm:$0xff] }
 0x35e   : >> { %v4570_v45 = vshll.u32 %v4209_v16, 16  ;;  %v5121_v20 = vor.u32 %v5120_v61, %v5117_v2  ;;  %v5128_v51 = vor.u32 %v5127_v60, %v5124_v38  ;;  %v4506_v63 = vor.u32 %v4505_v8, %v4502_v25 }
 0x35f   : >> { %v4513_v1 = vor.u32 %v4512_v59, %v4509_v23  ;;  %v4214_v37 = vsel %vm334_vm0, %v16259_v50, %v3951_v6  ;;  %v4338_v53 = vshll.u32 %v12947_v34, 16  ;;  %v4620_v4 = vshrl.u32 %v4212_v43, 16  ;;  %v3955_v7 = vpop.permute.xlu1 %3954  ;;  %v16262_v59 = vld [vmem:[#allocation117_spill] sm:$0xff] }
 0x360   : >> { %v4623_v11 = vshll.u32 %v4212_v43, 16  ;;  %v4342_v47 = vshrl.u32 %v12965_v46, 16  ;;  %v4345_v0 = vshll.u32 %v12965_v46, 16  ;;  %v4565_v26 = vrot.slane %v4563_v31, 4 }
 0x361   : >> { %5799 = vmatmul.mubr.bf16.gmra.mxu1 %v4454_v15  ;;  %v4569_v49 = vrot.slane %v4567_v12, 3  ;;  %v16260_v42 = vshrl.u32 %v12947_v34, 16  ;;  %v4340_v48 = vrot.slane %v4338_v53, 4  ;;  %v4572_v30 = vrot.slane %v4570_v45, 4 }
 0x362   : >> { %5806 = vmatprep.mubr.bf16.mxu1 %v13255_v22  ;;  %v4627_v21 = vshrl.u32 %v4214_v37, 16  ;;  %v4344_v19 = vrot.slane %v4342_v47, 3  ;;  %v4347_v62 = vrot.slane %v4345_v0, 4  ;;  %v5221_v28 = vsel %vm1458_vm2, %v5213_v9, %v5220_v56 }
 0x363   : >> { %v4337_v5 = vrot.slane %v16260_v42, 3  ;;  %v13609_v52 = vsel %vm1458_vm2, %v5121_v20, %v5128_v51  ;;  %v4410_v46 = vshrl.u32 %v12959_v55, 16  ;;  %v4413_v57 = vshll.u32 %v12959_v55, 16 }
 0x364   : >> { %5734 = vmatmul.mubr.bf16.gmra.mxu0 %v13588_v39  ;;  %v4514_v34 = vsel %vm1458_vm2, %v4506_v63, %v4513_v1  ;;  %v13615_v22 = vrot.slane %v4620_v4, 3  ;;  %v13617_v2 = vrot.slane %v4623_v11, 4  ;;  %v4630_v61 = vshll.u32 %v4214_v37, 16  ;;  %v3957_v4 = vpop.permute.xlu0 %3956 }
 0x365   : >> { %5741 = vmatprep.mubr.bf16.mxu0 %v5221_v28  ;;  %v4341_v38 = vor.u32 %v4340_v48, %v4337_v5  ;;  %v4348_v18 = vor.u32 %v4347_v62, %v4344_v19  ;;  %v4217_v60 = vsel %vm334_vm0, %v16261_v35, %v3953_v33  ;;  %v4470_v13 = vshrl.u32 %v12970_v29, 16 }
 0x366   : >> { %v13622_v16 = vrot.slane %v4627_v21, 3  ;;  %v4566_v55 = vor.u32 %v4565_v26, %v13597_v36  ;;  %v4573_v3 = vor.u32 %v4572_v30, %v4569_v49  ;;  %v4219_v25 = vsel %vm334_vm0, %v16261_v35, %v3955_v7  ;;  %v16264_v30 = vld [vmem:[#allocation90_spill] sm:$0xff] }
 0x367   : >> { %v4412_v8 = vrot.slane %v4410_v46, 3  ;;  %v4415_v23 = vrot.slane %v4413_v57, 4  ;;  %v4423_v15 = vor.u32 %v16263_v10, %v16262_v59  ;;  %v4473_v9 = vshll.u32 %v12970_v29, 16  ;;  %v3959_v46 = vpop.permute.xlu1 %3958 }
 0x368   : >> { %v4680_v6 = vshrl.u32 %v4217_v60, 16  ;;  %v4683_v56 = vshll.u32 %v4217_v60, 16  ;;  %v4477_v31 = vshrl.u32 %v13022_v27, 16  ;;  %v4480_v12 = vshll.u32 %v13022_v27, 16 }
 0x369   : >> { %5807 = vmatmul.mubr.bf16.gmra.mxu1 %v4514_v34  ;;  %v4349_v50 = vsel %vm1458_vm2, %v4341_v38, %v4348_v18  ;;  %v4687_v43 = vshrl.u32 %v4219_v25, 16  ;;  %v4472_v36 = vrot.slane %v4470_v13, 3  ;;  %v4475_v45 = vrot.slane %v4473_v9, 4 }
 0x36a   : >> { %5814 = vmatprep.mubr.bf16.mxu1 %v13294_v24  ;;  %v4479_v20 = vrot.slane %v4477_v31, 3  ;;  %v4482_v51 = vrot.slane %v4480_v12, 4  ;;  %v4530_v63 = vshrl.u32 %v13000_v14, 16  ;;  %v4533_v29 = vshll.u32 %v13000_v14, 16  ;;  %v16267_v12 = vld [vmem:[#allocation95_spill] sm:$0xff] }
 0x36b   : >> { %v4416_v1 = vor.u32 %v4415_v23, %v4412_v8  ;;  %v4690_v37 = vshll.u32 %v4219_v25, 16  ;;  %v4537_v53 = vshrl.u32 %v13030_v41, 16  ;;  %v4540_v27 = vshll.u32 %v13030_v41, 16  ;;  %v16266_v23 = vld [vmem:[#allocation124_spill] sm:$0xff]  ;;  %v3963_v9 = vpop.permute.xlu1 %3962 }
 0x36c   : >> { %5742 = vmatmul.mubr.bf16.gmra.mxu0 %v13609_v52  ;;  %v4632_v11 = vrot.slane %v4630_v61, 4  ;;  %v4574_v47 = vsel %vm1458_vm2, %v4566_v55, %v4573_v3  ;;  %v13640_v0 = vrot.slane %v4680_v6, 3  ;;  %v13642_v24 = vrot.slane %v4683_v56, 4  ;;  %v3961_v55 = vpop.permute.xlu0 %3960  ;;  %v16265_v3 = vld [vmem:[#allocation116_spill] sm:$0xff] }
 0x36d   : >> { %10434 = vmatprep.mubr.msk.bf16.mxu0 %vm334_vm0, %v4349_v50  ;;  %v4476_v26 = vor.u32 %v4475_v45, %v4472_v36  ;;  %v4483_v14 = vor.u32 %v4482_v51, %v4479_v20  ;;  %v4532_v49 = vrot.slane %v4530_v63, 3  ;;  %v4535_v42 = vrot.slane %v4533_v29, 4 }
 0x36e   : >> { %v4539_v5 = vrot.slane %v4537_v53, 3  ;;  %v4542_v48 = vrot.slane %v4540_v27, 4  ;;  %v13647_v41 = vsel %vm334_vm0, %v16264_v30, %v3957_v4  ;;  %v4590_v21 = vshrl.u32 %v13006_v40, 16  ;;  %v16268_v4 = vld [vmem:[#allocation118_spill] sm:$0xff] }
 0x36f   : >> { %v4424_v19 = vsel %vm1458_vm2, %v4416_v1, %v4423_v15  ;;  %v13651_v62 = vrot.slane %v4687_v43, 3  ;;  %v13653_v33 = vrot.slane %v4690_v37, 4  ;;  %v4626_v28 = vor.u32 %v13617_v2, %v13615_v22 }
 0x370   : >> { %v4633_v57 = vor.u32 %v4632_v11, %v13622_v16  ;;  %v4592_v7 = vrot.slane %v4590_v21, 3  ;;  %v4593_v34 = vshll.u32 %v13006_v40, 16  ;;  %v4597_v61 = vshrl.u32 %v13051_v17, 16 }
 0x371   : >> { %5815 = vmatmul.mubr.bf16.gmra.mxu1 %v4574_v47  ;;  %v4484_v38 = vsel %vm1458_vm2, %v4476_v26, %v4483_v14  ;;  %v4536_v18 = vor.u32 %v4535_v42, %v4532_v49  ;;  %v4740_v35 = vshrl.u32 %v13647_v41, 16  ;;  %v4600_v60 = vshll.u32 %v13051_v17, 16  ;;  %v16269_v49 = vld [vmem:[#allocation125_spill] sm:$0xff] }
 0x372   : >> { %5822 = vmatprep.mubr.bf16.mxu1 %v13339_v44  ;;  %v4543_v13 = vor.u32 %v4542_v48, %v4539_v5  ;;  %v4224_v22 = vsel %vm334_vm0, %v16264_v30, %v3959_v46  ;;  %v4595_v2 = vrot.slane %v4593_v34, 4  ;;  %v4599_v16 = vrot.slane %v4597_v61, 3 }
 0x373   : >> { %v4602_v40 = vrot.slane %v4600_v60, 4  ;;  %v4650_v25 = vshrl.u32 %v16265_v3, 16  ;;  %v4653_v8 = vshll.u32 %v16265_v3, 16  ;;  %v4657_v59 = vshrl.u32 %v16266_v23, 16 }
 0x374   : >> { %10435 = vmatmul.mubr.msk.bf16.vlgmr.msra.gmra.mxu0 %vm334_vm0, %v4424_v19  ;;  %v4634_v17 = vsel %vm1458_vm2, %v4626_v28, %v4633_v57  ;;  %v4743_v44 = vshll.u32 %v13647_v41, 16  ;;  %v4596_v10 = vor.u32 %v4595_v2, %v4592_v7  ;;  %v4660_v15 = vshll.u32 %v16266_v23, 16  ;;  %v3965_v28 = vpop.permute.xlu0 %3964  ;;  %v16272_v7 = vld [vmem:[#allocation126_spill] sm:$0xff]  ;;  %v3967_v23 = vpop.permute.xlu1 %3966 }
 0x375   : >> { %10438 = vmatprep.mubr.msk.bf16.mxu0 %vm334_vm0, %v4484_v38  ;;  %v4603_v6 = vor.u32 %v4602_v40, %v4599_v16  ;;  %v4652_v56 = vrot.slane %v4650_v25, 3  ;;  %v4655_v31 = vrot.slane %v4653_v8, 4  ;;  %v4227_v50 = vsel %vm334_vm0, %v16267_v12, %v3961_v55  ;;  %v16273_v16 = vld [vmem:[#allocation96_spill] sm:$0xff] }
 0x376   : >> { %v4544_v43 = vsel %vm1458_vm2, %v4536_v18, %v4543_v13  ;;  %v13677_v36 = vrot.slane %v4740_v35, 3  ;;  %v4747_v45 = vshrl.u32 %v4224_v22, 16  ;;  %v4750_v20 = vshll.u32 %v4224_v22, 16 }
 0x377   : >> { %v4686_v51 = vor.u32 %v13642_v24, %v13640_v0  ;;  %v4659_v63 = vrot.slane %v4657_v59, 3  ;;  %v4662_v29 = vrot.slane %v4660_v15, 4  ;;  %v4229_v1 = vsel %vm334_vm0, %v16267_v12, %v3963_v9  ;;  %v16270_v24 = vld [vmem:[#allocation81_spill] sm:$0xff] }
 0x378   : >> { %v4693_v37 = vor.u32 %v13653_v33, %v13651_v62  ;;  %v4800_v53 = vshrl.u32 %v4227_v50, 16  ;;  %v4803_v27 = vshll.u32 %v4227_v50, 16  ;;  %v4710_v11 = vshrl.u32 %v16268_v4, 16  ;;  %v16271_v62 = vld [vmem:[#allocation120_spill] sm:$0xff] }
 0x379   : >> { %5823 = vmatmul.mubr.bf16.gmra.mxu1 %v4634_v17  ;;  %v4604_v47 = vsel %vm1458_vm2, %v4596_v10, %v4603_v6  ;;  %v4656_v26 = vor.u32 %v4655_v31, %v4652_v56  ;;  %v4713_v14 = vshll.u32 %v16268_v4, 16  ;;  %v4717_v0 = vshrl.u32 %v16269_v49, 16  ;;  %v16274_v31 = vld [vmem:[#allocation80_spill] sm:$0xff] }
 0x37a   : >> { %5830 = vmatprep.mubr.bf16.mxu1 %v16270_v24  ;;  %v4807_v42 = vshrl.u32 %v4229_v1, 16  ;;  %v4810_v5 = vshll.u32 %v4229_v1, 16  ;;  %v4712_v48 = vrot.slane %v4710_v11, 3  ;;  %v4720_v30 = vshll.u32 %v16269_v49, 16  ;;  %v16278_v49 = vld [vmem:[#allocation128_spill] sm:$0xff] }
 0x37b   : >> { %v4663_v41 = vor.u32 %v4662_v29, %v4659_v63  ;;  %v4715_v21 = vrot.slane %v4713_v14, 4  ;;  %v4719_v19 = vrot.slane %v4717_v0, 3  ;;  %v4770_v33 = vshrl.u32 %v16271_v62, 16  ;;  %v16276_v29 = vld [vmem:[#allocation127_spill] sm:$0xff] }
 0x37c   : >> { %10439 = vmatmul.mubr.msk.bf16.gmra.mxu0 %vm334_vm0, %v4544_v43  ;;  %v4722_v46 = vrot.slane %v4720_v30, 4  ;;  %v4773_v57 = vshll.u32 %v16271_v62, 16  ;;  %v4777_v34 = vshrl.u32 %v16272_v7, 16  ;;  %v4780_v61 = vshll.u32 %v16272_v7, 16  ;;  %v16275_v43 = vld [vmem:[#allocation121_spill] sm:$0xff] }
 0x37d   : >> { %v4745_v38 = vrot.slane %v4743_v44, 4  ;;  %v4749_v18 = vrot.slane %v4747_v45, 3  ;;  %v4752_v35 = vrot.slane %v4750_v20, 4  ;;  %10442 = vmatprep.mubr.msk.bf16.mxu0 %vm334_vm0, %v4604_v47  ;;  %v4694_v60 = vsel %vm1458_vm2, %v4686_v51, %v4693_v37  ;;  %v3969_v47 = vpop.permute.xlu0 %3968 }
 0x37e   : >> { %v13698_v13 = vrot.slane %v4800_v53, 3  ;;  %v4716_v22 = vor.u32 %v4715_v21, %v4712_v48  ;;  %v4723_v2 = vor.u32 %v4722_v46, %v4719_v19  ;;  %v4232_v55 = vsel %vm334_vm0, %v16273_v16, %v3965_v28  ;;  %v16279_v19 = vld [vmem:[#allocation101_spill] sm:$0xff] }
 0x37f   : >> { %v4772_v40 = vrot.slane %v4770_v33, 3  ;;  %v4775_v3 = vrot.slane %v4773_v57, 4  ;;  %v4779_v25 = vrot.slane %v4777_v34, 3  ;;  %v4782_v8 = vrot.slane %v4780_v61, 4 }
 0x380   : >> { %v4664_v59 = vsel %vm1458_vm2, %v4656_v26, %v4663_v41  ;;  %v4805_v17 = vrot.slane %v4803_v27, 4  ;;  %v4809_v44 = vrot.slane %v4807_v42, 3  ;;  %v4812_v10 = vrot.slane %v4810_v5, 4  ;;  %v16277_v27 = vld [vmem:[#allocation122_spill] sm:$0xff] }
 0x381   : >> { %5831 = vmatmul.mubr.bf16.gmra.mxu1 %v4694_v60  ;;  %v4746_v15 = vor.u32 %v4745_v38, %v13677_v36  ;;  %v4753_v9 = vor.u32 %v4752_v35, %v4749_v18  ;;  %v4860_v6 = vshrl.u32 %v4232_v55, 16  ;;  %v4863_v56 = vshll.u32 %v4232_v55, 16  ;;  %v3971_v18 = vpop.permute.xlu1 %3970  ;;  %v16280_v35 = vld [vmem:[#allocation82_spill] sm:$0xff] }
 0x382   : >> { %5838 = vmatprep.mubr.bf16.mxu1 %v16274_v31  ;;  %v4724_v12 = vsel %vm1458_vm2, %v4716_v22, %v4723_v2  ;;  %v4234_v50 = vsel %vm334_vm0, %v16273_v16, %v3967_v23  ;;  %v4830_v45 = vshrl.u32 %v16275_v43, 16  ;;  %v4833_v20 = vshll.u32 %v16275_v43, 16 }
 0x383   : >> { %v4776_v51 = vor.u32 %v4775_v3, %v4772_v40  ;;  %v4783_v63 = vor.u32 %v4782_v8, %v4779_v25  ;;  %v4837_v1 = vshrl.u32 %v16276_v29, 16  ;;  %v4840_v36 = vshll.u32 %v16276_v29, 16 }
 0x384   : >> { %10443 = vmatmul.mubr.msk.bf16.gmra.mxu0 %vm334_vm0, %v4664_v59  ;;  %v4832_v37 = vrot.slane %v4830_v45, 3  ;;  %v4835_v53 = vrot.slane %v4833_v20, 4  ;;  %v4890_v4 = vshrl.u32 %v16277_v27, 16  ;;  %v4893_v11 = vshll.u32 %v16277_v27, 16  ;;  %v16281_v59 = vld [vmem:[#allocation123_spill] sm:$0xff] }
 0x385   : >> { %10446 = vmatprep.mubr.msk.bf16.mxu0 %vm334_vm0, %v4724_v12  ;;  %v4839_v26 = vrot.slane %v4837_v1, 3  ;;  %v4842_v14 = vrot.slane %v4840_v36, 4  ;;  %v4897_v0 = vshrl.u32 %v16278_v49, 16  ;;  %v4900_v24 = vshll.u32 %v16278_v49, 16  ;;  %v16283_v12 = vld [vmem:[#allocation113_spill] sm:$0xff]  ;;  %v3975_v45 = vpop.permute.xlu1 %3974 }
 0x386   : >> { %v4754_v42 = vsel %vm1458_vm2, %v4746_v15, %v4753_v9  ;;  %v4806_v5 = vor.u32 %v4805_v17, %v13698_v13  ;;  %v4836_v48 = vor.u32 %v4835_v53, %v4832_v37  ;;  %v13720_v30 = vrot.slane %v4860_v6, 3  ;;  %v16284_v37 = vld [vmem:[#allocation130_spill] sm:$0xff] }
 0x387   : >> { %v4867_v41 = vshrl.u32 %v4234_v50, 16  ;;  %v4843_v21 = vor.u32 %v4842_v14, %v4839_v26  ;;  %v4237_v62 = vsel %vm334_vm0, %v16279_v19, %v3969_v47  ;;  %v4892_v33 = vrot.slane %v4890_v4, 3  ;;  %v16285_v4 = vld [vmem:[#allocation102_spill] sm:$0xff] }
 0x388   : >> { %v4895_v28 = vrot.slane %v4893_v11, 4  ;;  %v4899_v46 = vrot.slane %v4897_v0, 3  ;;  %v4902_v57 = vrot.slane %v4900_v24, 4  ;;  %v4784_v7 = vsel %vm1458_vm2, %v4776_v51, %v4783_v63 }
 0x389   : >> { %5839 = vmatmul.mubr.bf16.gmra.mxu1 %v4754_v42  ;;  %v4865_v34 = vrot.slane %v4863_v56, 4  ;;  %v4870_v61 = vshll.u32 %v4234_v50, 16  ;;  %v4813_v38 = vor.u32 %v4812_v10, %v4809_v44  ;;  %v4844_v60 = vsel %vm1458_vm2, %v4836_v48, %v4843_v21  ;;  %v16282_v10 = vld [vmem:[#allocation129_spill] sm:$0xff]  ;;  %v3973_v56 = vpop.permute.xlu0 %3972 }
 0x38a   : >> { %5846 = vmatprep.mubr.bf16.mxu1 %v16280_v35  ;;  %v4920_v13 = vshrl.u32 %v4237_v62, 16  ;;  %v4869_v22 = vrot.slane %v4867_v41, 3  ;;  %v4896_v2 = vor.u32 %v4895_v28, %v4892_v33  ;;  %v4903_v16 = vor.u32 %v4902_v57, %v4899_v46  ;;  %v3979_v41 = vpop.permute.xlu1 %3978  ;;  %v16286_v57 = vld [vmem:[#allocation107_spill] sm:$0xff] }
 0x38b   : >> { %v4239_v55 = vsel %vm334_vm0, %v16279_v19, %v3971_v18  ;;  %v4872_v40 = vrot.slane %v4870_v61, 4  ;;  %v4814_v3 = vsel %vm1458_vm2, %v4806_v5, %v4813_v38  ;;  %v4923_v25 = vshll.u32 %v4237_v62, 16 }
 0x38c   : >> { %10447 = vmatmul.mubr.msk.bf16.gmra.mxu0 %vm334_vm0, %v4784_v7  ;;  %v4866_v8 = vor.u32 %v4865_v34, %v13720_v30  ;;  %v4922_v23 = vrot.slane %v4920_v13, 3  ;;  %v4950_v17 = vshrl.u32 %v16281_v59, 16  ;;  %v4953_v44 = vshll.u32 %v16281_v59, 16 }
 0x38d   : >> { %10450 = vmatprep.mubr.msk.bf16.mxu0 %vm334_vm0, %v4844_v60  ;;  %v4957_v15 = vshrl.u32 %v16282_v10, 16  ;;  %v4927_v9 = vshrl.u32 %v4239_v55, 16  ;;  %v4930_v6 = vshll.u32 %v4239_v55, 16  ;;  %v4960_v31 = vshll.u32 %v16282_v10, 16  ;;  %v3977_v42 = vpop.permute.xlu0 %3976 }
 0x38e   : >> { %v5010_v50 = vshrl.u32 %v16283_v12, 16  ;;  %v4904_v43 = vsel %vm1458_vm2, %v4896_v2, %v4903_v16  ;;  %v4952_v20 = vrot.slane %v4950_v17, 3  ;;  %v4955_v51 = vrot.slane %v4953_v44, 4 }
 0x38f   : >> { %v4959_v63 = vrot.slane %v4957_v15, 3  ;;  %v4962_v29 = vrot.slane %v4960_v31, 4  ;;  %v5013_v36 = vshll.u32 %v16283_v12, 16  ;;  %v5017_v53 = vshrl.u32 %v16284_v37, 16 }
 0x390   : >> { %v5012_v1 = vrot.slane %v5010_v50, 3  ;;  %v4873_v27 = vor.u32 %v4872_v40, %v4869_v22  ;;  %v4242_v11 = vsel %vm334_vm0, %v16285_v4, %v3973_v56  ;;  %v4956_v47 = vor.u32 %v4955_v51, %v4952_v20  ;;  %v16289_v51 = vld [vmem:[#allocation115_spill] sm:$0xff] }
 0x391   : >> { %5847 = vmatmul.mubr.bf16.gmra.mxu1 %v4814_v3  ;;  %v5020_v26 = vshll.u32 %v16284_v37, 16  ;;  %v4925_v14 = vrot.slane %v4923_v25, 4  ;;  %v4963_v49 = vor.u32 %v4962_v29, %v4959_v63  ;;  %v5015_v0 = vrot.slane %v5013_v36, 4  ;;  %v3981_v40 = vpop.permute.xlu0 %3980 }
 0x392   : >> { %5854 = vmatprep.mubr.bf16.mxu1 %v13523_v54  ;;  %v5019_v24 = vrot.slane %v5017_v53, 3  ;;  %v4929_v5 = vrot.slane %v4927_v9, 3  ;;  %v4932_v48 = vrot.slane %v4930_v6, 4  ;;  %v4244_v30 = vsel %vm334_vm0, %v16285_v4, %v3975_v45  ;;  %v16288_v9 = vld [vmem:[#allocation131_spill] sm:$0xff]  ;;  %v16290_v53 = vld [vmem:[#allocation133_spill] sm:$0xff] }
 0x393   : >> { %v5022_v54 = vrot.slane %v5020_v26, 4  ;;  %v4980_v21 = vshrl.u32 %v4242_v11, 16  ;;  %v4983_v19 = vshll.u32 %v4242_v11, 16  ;;  %v4964_v62 = vsel %vm1458_vm2, %v4956_v47, %v4963_v49  ;;  %v16291_v11 = vld [vmem:[#allocation108_spill] sm:$0xff] }
 0x394   : >> { %10451 = vmatmul.mubr.msk.bf16.gmra.mxu0 %vm334_vm0, %v4904_v43  ;;  %v5016_v33 = vor.u32 %v5015_v0, %v5012_v1  ;;  %v4874_v28 = vsel %vm1458_vm2, %v4866_v8, %v4873_v27  ;;  %v4247_v7 = vsel %vm334_vm0, %v16286_v57, %v3977_v42  ;;  %v4987_v34 = vshrl.u32 %v4244_v30, 16  ;;  %v3983_v43 = vpop.permute.xlu1 %3982 }
 0x395   : >> { %10454 = vmatprep.mubr.msk.bf16.mxu0 %vm334_vm0, %v4964_v62  ;;  %v5023_v46 = vor.u32 %v5022_v54, %v5019_v24  ;;  %v4990_v61 = vshll.u32 %v4244_v30, 16  ;;  %v4249_v38 = vsel %vm334_vm0, %v16286_v57, %v3979_v41  ;;  %v4926_v18 = vor.u32 %v4925_v14, %v4922_v23  ;;  %v16287_v23 = vld [vmem:[#allocation114_spill] sm:$0xff]  ;;  %v4001_v36 = vpop.permute.xlu0 %4000  ;;  %v16293_v62 = vld [vmem:[#allocation111_spill] sm:$0xff] }
 0x396   : >> { %v4933_v35 = vor.u32 %v4932_v48, %v4929_v5  ;;  %v4982_v60 = vrot.slane %v4980_v21, 3  ;;  %v4985_v13 = vrot.slane %v4983_v19, 4  ;;  %v5040_v2 = vshrl.u32 %v4247_v7, 16  ;;  %v16292_v48 = vld [vmem:[#allocation136_spill] sm:$0xff] }
 0x397   : >> { %v5024_v22 = vsel %vm1458_vm2, %v5016_v33, %v5023_v46  ;;  %v5043_v16 = vshll.u32 %v4247_v7, 16  ;;  %v5047_v55 = vshrl.u32 %v4249_v38, 16  ;;  %v4989_v3 = vrot.slane %v4987_v34, 3 }
 0x398   : >> { %v4992_v25 = vrot.slane %v4990_v61, 4  ;;  %v4934_v8 = vsel %vm1458_vm2, %v4926_v18, %v4933_v35  ;;  %v5050_v59 = vshll.u32 %v4249_v38, 16  ;;  %v5070_v17 = vshrl.u32 %v16287_v23, 16 }
 0x399   : >> { %5855 = vmatmul.mubr.bf16.gmra.mxu1 %v4874_v28  ;;  %v5073_v44 = vshll.u32 %v16287_v23, 16  ;;  %v13761_v10 = vrot.slane %v5040_v2, 3  ;;  %v4986_v15 = vor.u32 %v4985_v13, %v4982_v60  ;;  %v5077_v6 = vshrl.u32 %v16288_v9, 16  ;;  %v16294_v28 = vld [vmem:[#allocation110_spill] sm:$0xff]  ;;  %v3987_v60 = vpop.permute.xlu0 %3986  ;;  %v3985_v13 = vpop.permute.xlu1 %3984  ;;  %v16295_v23 = vld [vmem:[#allocation112_spill] sm:$0xff] }
 0x39a   : >> { %5862 = vmatprep.mubr.bf16.mxu1 %v13555_v58  ;;  %v5080_v58 = vshll.u32 %v16288_v9, 16  ;;  %v5045_v56 = vrot.slane %v5043_v16, 4  ;;  %v5049_v31 = vrot.slane %v5047_v55, 3  ;;  %v5072_v12 = vrot.slane %v5070_v17, 3 }
 0x39b   : >> { %v5075_v50 = vrot.slane %v5073_v44, 4  ;;  %v5079_v45 = vrot.slane %v5077_v6, 3  ;;  %v5130_v63 = vshrl.u32 %v16289_v51, 16  ;;  %v5133_v29 = vshll.u32 %v16289_v51, 16 }
 0x39c   : >> { %10455 = vmatmul.mubr.msk.bf16.gmra.mxu0 %vm334_vm0, %v5024_v22  ;;  %v5082_v20 = vrot.slane %v5080_v58, 4  ;;  %v4993_v1 = vor.u32 %v4992_v25, %v4989_v3  ;;  %v5137_v27 = vshrl.u32 %v16290_v53, 16  ;;  %v5140_v4 = vshll.u32 %v16290_v53, 16  ;;  %v3503_v22 = vld [vmem:[#allocation2 + $0x220] sm:$0xff] }
 0x39d   : >> { %v5076_v37 = vor.u32 %v5075_v50, %v5072_v12  ;;  %v4252_v47 = vsel %vm334_vm0, %v16291_v11, %v3981_v40  ;;  %v5132_v14 = vrot.slane %v5130_v63, 3  ;;  %v5135_v49 = vrot.slane %v5133_v29, 4  ;;  %v3506_v12 = vld [vmem:[#allocation2 + $0x238] sm:$0xff] }
 0x39e   : >> { %v5083_v26 = vor.u32 %v5082_v20, %v5079_v45  ;;  %v5052_v0 = vrot.slane %v5050_v59, 4  ;;  %v4254_v24 = vsel %vm334_vm0, %v16291_v11, %v3983_v43  ;;  %v5139_v42 = vrot.slane %v5137_v27, 3 }
 0x39f   : >> { %v5142_v5 = vrot.slane %v5140_v4, 4  ;;  %v5199_v30 = vshrl.u32 %v16292_v48, 16  ;;  %v5202_v54 = vshll.u32 %v16292_v48, 16  ;;  %v5136_v21 = vor.u32 %v5135_v49, %v5132_v14  ;;  %v16297_v4 = vld [vmem:[#allocation134_spill] sm:$0xff] }
 0x3a0   : >> { %v5084_v41 = vsel %vm1458_vm2, %v5076_v37, %v5083_v26  ;;  %v5100_v19 = vshrl.u32 %v4252_v47, 16  ;;  %v4267_v33 = vsel %vm334_vm0, %v16293_v62, %v4001_v36  ;;  %v4994_v57 = vsel %vm1458_vm2, %v4986_v15, %v4993_v1  ;;  %v4003_v1 = vpop.permute.xlu1 %4002 }
 0x3a1   : >> { %5863 = vmatmul.mubr.bf16.gmra.mxu1 %v4934_v8  ;;  %10458 = vmatprep.mubr.msk.bf16.mxu0 %vm334_vm0, %v5084_v41  ;;  %v5143_v46 = vor.u32 %v5142_v5, %v5139_v42  ;;  %v5103_v7 = vshll.u32 %v4252_v47, 16  ;;  %v5107_v34 = vshrl.u32 %v4254_v24, 16  ;;  %v5110_v61 = vshll.u32 %v4254_v24, 16 }
 0x3a2   : >> { %5870 = vmatprep.mubr.bf16.mxu1 %v13580_v32  ;;  %v4269_v32 = vsel %vm334_vm0, %v16294_v28, %v4001_v36  ;;  %v5046_v38 = vor.u32 %v5045_v56, %v13761_v10  ;;  %v5053_v18 = vor.u32 %v5052_v0, %v5049_v31  ;;  %v5175_v2 = vshrl.u32 %v4267_v33, 16  ;;  %v10699_v10 = vld [vmem:[#allocation2 + $0x228] sm:$0xff]  ;;  %v10700_v56 = vld [vmem:[#allocation2 + $0x230] sm:$0xff] }
 0x3a3   : >> { %v5144_v35 = vsel %vm1458_vm2, %v5136_v21, %v5143_v46  ;;  %v5178_v16 = vshll.u32 %v4267_v33, 16  ;;  %v5182_v55 = vshrl.u32 %v4269_v32, 16  ;;  %v5185_v40 = vshll.u32 %v4269_v32, 16  ;;  %v16296_v36 = vld [vmem:[#allocation135_spill] sm:$0xff] }
 0x3a4   : >> { %10459 = vmatmul.mubr.msk.bf16.gmra.mxu0 %vm334_vm0, %v5144_v35  ;;  %v5201_v3 = vrot.slane %v5199_v30, 3  ;;  %v5204_v25 = vrot.slane %v5202_v54, 4  ;;  %v13786_v8 = vrot.slane %v5100_v19, 3  ;;  %v13788_v59 = vrot.slane %v5103_v7, 4  ;;  %v3989_v7 = vpop.permute.xlu0 %3988 }
 0x3a5   : >> { %v4259_v17 = vsel %vm334_vm0, %v16295_v23, %v3987_v60  ;;  %v4257_v44 = vsel %vm334_vm0, %v16295_v23, %v3985_v13  ;;  %v3575_v15 = vpack.c.bf16 %v10699_v10, %v3503_v22  ;;  %v5109_v9 = vrot.slane %v5107_v34, 3 }
 0x3a6   : >> { %v5112_v6 = vrot.slane %v5110_v61, 4  ;;  %v5054_v58 = vsel %vm1458_vm2, %v5046_v38, %v5053_v18  ;;  %v3576_v31 = vpack.c.bf16 %v10700_v56, %v10700_v56  ;;  %v13796_v50 = vrot.slane %v5175_v2, 3  ;;  %v3991_v18 = vpop.permute.xlu1 %3990 }
 0x3a7   : >> { %v5180_v43 = vrot.slane %v5178_v16, 4  ;;  %v5184_v45 = vrot.slane %v5182_v55, 3  ;;  %v5187_v20 = vrot.slane %v5185_v40, 4  ;;  %v5167_v51 = vshrl.u32 %v4259_v17, 16 }
 0x3a8   : >> { %v5170_v63 = vshll.u32 %v4259_v17, 16  ;;  %v5160_v29 = vshrl.u32 %v4257_v44, 16  ;;  %v5191_v37 = vshrl.u32 %v16296_v36, 16  ;;  %v5194_v53 = vshll.u32 %v16296_v36, 16 }
 0x3a9   : >> { %5871 = vmatmul.mubr.bf16.gmra.mxu1 %v4994_v57  ;;  %v3578_v27 = vpack.c.bf16 %v3506_v12, %v3506_v12  ;;  %v4006_v11 = vrot.slane %v16297_v4, 5  ;;  %v5163_v47 = vshll.u32 %v4257_v44, 16  ;;  %v4274_v26 = vsel %vm334_vm0, %v3576_v31, %v4003_v1 }
 0x3aa   : >> { %5878 = vmatprep.mubr.bf16.mxu1 %v13588_v39  ;;  %v4272_v39 = vsel %vm334_vm0, %v3575_v15, %v4003_v1  ;;  %v5193_v14 = vrot.slane %v5191_v37, 3  ;;  %v5205_v49 = vor.u32 %v5204_v25, %v5201_v3  ;;  %v5196_v0 = vrot.slane %v5194_v53, 4  ;;  %v6247_v53 = vld [vmem:[#allocation3 + $0x10] sm:$0xff] }
 0x3ab   : >> { %v4007_v24 = vrot.slane %v3578_v27, 5  ;;  %v5253_v42 = vshrl.u32 %v4006_v11, 16  ;;  %v5256_v5 = vshll.u32 %v4006_v11, 16  ;;  %v5106_v30 = vor.u32 %v13788_v59, %v13786_v8  ;;  %v16298_v8 = vld [vmem:[#allocation132_spill] sm:$0xff] }
 0x3ac   : >> { %v5113_v54 = vor.u32 %v5112_v6, %v5109_v9  ;;  %v5237_v41 = vshrl.u32 %v4272_v39, 16  ;;  %v5240_v21 = vshll.u32 %v4272_v39, 16  ;;  %v5197_v19 = vor.u32 %v5196_v0, %v5193_v14  ;;  %v6246_v39 = vld [vmem:[#allocation3 + $0x8] sm:$0xff] }
 0x3ad   : >> { %v4008_v62 = vsel %vm953_vm1, %v4006_v11, %v4007_v24  ;;  %v5255_v33 = vrot.slane %v5253_v42, 3  ;;  %v5258_v28 = vrot.slane %v5256_v5, 4  ;;  %v5244_v46 = vshrl.u32 %v4274_v26, 16 }
 0x3ae   : >> { %v5247_v57 = vshll.u32 %v4274_v26, 16  ;;  %v5261_v34 = vshrl.u32 %v4008_v62, 16  ;;  %v5264_v61 = vshll.u32 %v4008_v62, 16  ;;  %v5181_v35 = vor.u32 %v5180_v43, %v13796_v50 }
 0x3af   : >> { %v5188_v60 = vor.u32 %v5187_v20, %v5184_v45  ;;  %v5206_v13 = vsel %vm1458_vm2, %v5197_v19, %v5205_v49  ;;  %v5169_v2 = vrot.slane %v5167_v51, 3  ;;  %v5172_v40 = vrot.slane %v5170_v63, 4 }
 0x3b0   : >> { %v9894_v48 = vpop.f32.mrf.mxu0  ;;  %10462 = vmatprep.mubr.msk.bf16.mxu0 %vm334_vm0, %v5206_v13  ;;  %v5263_v16 = vrot.slane %v5261_v34, 3  ;;  %v5266_v55 = vrot.slane %v5264_v61, 4  ;;  %v5162_v3 = vrot.slane %v5160_v29, 3  ;;  %v5165_v25 = vrot.slane %v5163_v47, 4  ;;  %v10664_v61 = vld [vmem:[%s13849_s28 + $0x38] sm:$0xff]  }
 0x3b1   : >> { %5879 = vmatmul.mubr.bf16.gmra.mxu1 %v5054_v58  ;;  %v4262_v59 = vsel %vm334_vm0, %v16298_v8, %v3989_v7  ;;  %v5114_v17 = vsel %vm1458_vm2, %v5106_v30, %v5113_v54  ;;  %v5239_v44 = vrot.slane %v5237_v41, 3  ;;  %v4264_v10 = vsel %vm334_vm0, %v16298_v8, %v3991_v18  ;;  %v10663_v7 = vld [vmem:[%s13849_s28 + $0x78] sm:$0xff]  }
 0x3b2   : >> { %5886 = vmatprep.mubr.bf16.mxu1 %v13609_v52  ;;  %v9895_v32 = vpop.f32.mrf.mxu0  ;;  %v5259_v52 = vor.u32 %v5258_v28, %v5255_v33  ;;  %v5267_v15 = vor.u32 %v5266_v55, %v5263_v16  ;;  %v5242_v9 = vrot.slane %v5240_v21, 4  ;;  %v5246_v6 = vrot.slane %v5244_v46, 3  ;;  %10122 = vmatprep.subr.bf16.mxu1 %v10663_v7  ;;  %v10665_v55 = vld [vmem:[%s13849_s28 + $0x70] sm:$0xff]  }
 0x3b3   : >> { %v13807_v38 = vadd.f32 %v9895_v32, %v9894_v48  ;;  %v5249_v58 = vrot.slane %v5247_v57, 4  ;;  %v5189_v56 = vsel %vm1458_vm2, %v5181_v35, %v5188_v60  ;;  %v5222_v50 = vshrl.u32 %v4262_v59, 16  ;;  %10123 = vmatpush3.bf16.msra.mxu1 %v10664_v61 }
 0x3b4   : >> { %v13811_v22 = vpop.f32.mrf.mxu0  ;;  %v5268_v31 = vsel %vm1458_vm2, %v5259_v52, %v5267_v15  ;;  %v5225_v43 = vshll.u32 %v4262_v59, 16  ;;  %v5229_v45 = vshrl.u32 %v4264_v10, 16  ;;  %v5232_v20 = vshll.u32 %v4264_v10, 16  ;;  %10124 = vmatprep.subr.bf16.mxu1 %v10665_v55 }
 0x3b5   : >> { %10463 = vmatmul.mubr.msk.bf16.gmra.mxu0 %vm334_vm0, %v5268_v31  ;;  %v5166_v51 = vor.u32 %v5165_v25, %v5162_v3  ;;  %v5173_v63 = vor.u32 %v5172_v40, %v5169_v2  ;;  %v5243_v1 = vor.u32 %v5242_v9, %v5239_v44  ;;  %v5250_v36 = vor.u32 %v5249_v58, %v5246_v6  ;;  %v10666_v40 = vld [vmem:[%s13849_s28 + $0x30] sm:$0xff]   ;;  %v10667_v58 = vld [vmem:[%s13849_s28 + $0x68] sm:$0xff]  }
 0x3b6   : >> { %v13816_v23 = vpop.f32.mrf.mxu0  ;;  %v5224_v4 = vrot.slane %v5222_v50, 3  ;;  %v13828_v11 = vpack.c.bf16 %v6247_v53, %v6246_v39  ;;  %v5227_v47 = vrot.slane %v5225_v43, 4  ;;  %v5231_v26 = vrot.slane %v5229_v45, 3  ;;  %v10670_v39 = vld [vmem:[%s13849_s28 + $0x20] sm:$0xff]  }
 0x3b7   : >> { %v5234_v14 = vrot.slane %v5232_v20, 4  ;;  %v5174_v49 = vsel %vm1458_vm2, %v5166_v51, %v5173_v63  ;;  %v5251_v24 = vsel %vm1458_vm2, %v5243_v1, %v5250_v36  ;;  %10125 = vmatpush3.bf16.msra.mxu1 %v10666_v40  ;;  %v10669_v36 = vld [vmem:[%s13849_s28 + $0x60] sm:$0xff]  }
 0x3b8   : >> { %16299 = vst [vmem:[#allocation85_spill] sm:$0xff] %v13828_v11  ;;  %v6390_v42 = vshrl.u32 %v13828_v11, 16  ;;  %v6393_v5 = vshll.u32 %v13828_v11, 16  ;;  %v5228_v41 = vor.u32 %v5227_v47, %v5224_v4  ;;  %10126 = vmatprep.subr.bf16.mxu1 %v10667_v58 }
 0x3b9   : >> { %v9900_v12 = vpop.f32.mrf.mxu0  ;;  %5887 = vmatmul.mubr.bf16.gmra.mxu1 %v5114_v17  ;;  %v5235_v21 = vor.u32 %v5234_v14, %v5231_v26 }
 0x3ba   : >> { %5894 = vmatprep.mubr.bf16.mxu1 %v5189_v56  ;;  %v6392_v30 = vrot.slane %v6390_v42, 4  ;;  %v6395_v54 = vrot.slane %v6393_v5, 5  ;;  %v10668_v56 = vld [vmem:[%s13849_s28 + $0x28] sm:$0xff]  }
 0x3bb   : >> { %v9901_v29 = vpop.f32.mrf.mxu0  ;;  %v5236_v32 = vsel %vm1458_vm2, %v5228_v41, %v5235_v21  ;;  %10127 = vmatpush3.bf16.msra.mxu1 %v10668_v56 }
 0x3bc   : >> { %v13824_v37 = vadd.f32 %v9901_v29, %v9900_v12  ;;  %v6396_v62 = vor.u32 %v6395_v54, %v6392_v30  ;;  %10128 = vmatprep.subr.bf16.mxu1 %v10669_v36  ;;  %v10671_v30 = vld [vmem:[%s13849_s28 + $0x58] sm:$0xff]  }
 0x3bd   : >> { %v13826_v27 = vpop.f32.mrf.mxu0  ;;  %v10672_v54 = vld [vmem:[%s13849_s28 + $0x18] sm:$0xff]  }
 0x3be   : >> { %6517 = vrot.lane.b32.xlu0 %v6396_v62, %s10728_s20 }
 0x3bf   : >> { %v13831_v0 = vpop.f32.mrf.mxu0  ;;  %10129 = vmatpush3.bf16.msra.mxu1 %v10670_v39 }
 0x3c0   : >> { %10130 = vmatprep.subr.bf16.mxu1 %v10671_v30 }
 0x3c1   : >> { %v9906_v48 = vpop.f32.mrf.mxu0  ;;  %5895 = vmatmul.mubr.bf16.gmra.mxu1 %v5174_v49 }
 0x3c2   : >> { %5902 = vmatprep.mubr.bf16.mxu1 %v5251_v24 }
 0x3c3   : >> { %v9907_v19 = vpop.f32.mrf.mxu0  ;;  %10131 = vmatpush3.bf16.msra.mxu1 %v10672_v54 }
 0x3c4   : >> { %v13836_v33 = vadd.f32 %v9907_v19, %v9906_v48 }
 0x3c5   : >> { %v13838_v28 = vpop.f32.mrf.mxu0 }
 0x3c7   : >> { %v13842_v46 = vpop.f32.mrf.mxu0 }
 0x3c9   : >> { %5903 = vmatmul.mubr.bf16.gmra.mxu1 %v5236_v32 }
 0x3cb   : >> { %v9912_v57 = vpop.f32.mrf.mxu0 }
 0x3cd   : >> { %v9913_v34 = vpop.f32.mrf.mxu0 }
 0x3ce   : >> { %v13853_v18 = vadd.f32 %v9913_v34, %v9912_v57 }
 0x3cf   : >> { %v13855_v35 = vpop.f32.mrf.mxu0 }
 0x3d1   : >> { %v13857_v60 = vpop.f32.mrf.mxu0 }
 0x3d3   : >> { %v9918_v13 = vpop.f32.mrf.mxu0 }
 0x3d5   : >> { %v9919_v2 = vpop.f32.mrf.mxu0 }
 0x3d6   : >> { %v13859_v52 = vadd.f32 %v9919_v2, %v9918_v13 }
 0x3d7   : >> { %v13861_v16 = vpop.f32.mrf.mxu0 }
 0x3d9   : >> { %v13865_v3 = vpop.f32.mrf.mxu0 }
 0x3db   : >> { %v9924_v25 = vpop.f32.mrf.mxu0 }
 0x3dd   : >> { %v9925_v8 = vpop.f32.mrf.mxu0 }
 0x3de   : >> { %v13867_v59 = vadd.f32 %v9925_v8, %v9924_v25  ;;  %v10673_v8 = vld [vmem:[%s13849_s28 + $0x50] sm:$0xff]  }
 0x3df   : >> { %v13869_v17 = vpop.f32.mrf.mxu0  ;;  %10132 = vmatprep.subr.bf16.mxu1 %v10673_v8 }
 0x3e1   : >> { %v13871_v44 = vpop.f32.mrf.mxu0 }
 0x3e3   : >> { %v9930_v10 = vpop.f32.mrf.mxu0 }
 0x3e5   : >> { %v9931_v15 = vpop.f32.mrf.mxu0 }
 0x3e6   : >> { %v13873_v9 = vadd.f32 %v9931_v15, %v9930_v10  ;;  %v10674_v10 = vld [vmem:[%s13849_s28 + $0x10] sm:$0xff]  }
 0x3e7   : >> { %v13875_v6 = vpop.f32.mrf.mxu0  ;;  %10133 = vmatpush3.bf16.msra.mxu1 %v10674_v10 }
 0x3e9   : >> { %v13879_v31 = vpop.f32.mrf.mxu0 }
 0x3eb   : >> { %v9936_v12 = vpop.f32.mrf.mxu0 }
 0x3ed   : >> { %v9937_v50 = vpop.f32.mrf.mxu0 }
 0x3ee   : >> { %v13881_v43 = vadd.f32 %v9937_v50, %v9936_v12 }
 0x3ef   : >> { %v13883_v45 = vpop.f32.mrf.mxu0 }
 0x3f1   : >> { %v13885_v20 = vpop.f32.mrf.mxu0 }
 0x3f3   : >> { %v9942_v51 = vpop.f32.mrf.mxu0 }
 0x3f5   : >> { %v9943_v63 = vpop.f32.mrf.mxu0 }
 0x3f6   : >> { %v13887_v29 = vadd.f32 %v9943_v63, %v9942_v51 }
 0x3f7   : >> { %v13889_v1 = vpop.f32.mrf.mxu0 }
 0x3f9   : >> { %v13893_v53 = vpop.f32.mrf.mxu0 }
 0x3fb   : >> { %v9948_v4 = vpop.f32.mrf.mxu0 }
 0x3fd   : >> { %v9949_v47 = vpop.f32.mrf.mxu0 }
 0x3fe   : >> { %v13895_v26 = vadd.f32 %v9949_v47, %v9948_v4 }
 0x3ff   : >> { %v13897_v14 = vpop.f32.mrf.mxu0 }
 0x401   : >> { %v13899_v49 = vpop.f32.mrf.mxu0 }
 0x403   : >> { %v9954_v24 = vpop.f32.mrf.mxu0 }
 0x405   : >> { %v9955_v42 = vpop.f32.mrf.mxu0 }
 0x406   : >> { %v13901_v5 = vadd.f32 %v9955_v42, %v9954_v24 }
 0x407   : >> { %v13903_v48 = vpop.f32.mrf.mxu0 }
 0x409   : >> { %v13907_v41 = vpop.f32.mrf.mxu0 }
 0x40a   : >> { %16300 = vst [vmem:[#allocation87_spill] sm:$0xff] %v13907_v41 }
 0x40b   : >> { %v9960_v21 = vpop.f32.mrf.mxu0 }
 0x40d   : >> { %v9961_v19 = vpop.f32.mrf.mxu0 }
 0x40e   : >> { %v13909_v62 = vadd.f32 %v9961_v19, %v9960_v21  ;;  %v10675_v19 = vld [vmem:[%s13849_s28 + $0x48] sm:$0xff]  }
 0x40f   : >> { %v13911_v32 = vpop.f32.mrf.mxu0  ;;  %10134 = vmatprep.subr.bf16.mxu1 %v10675_v19 }
 0x410   : >> { %16301 = vst [vmem:[#allocation86_spill] sm:$0xff] %v13909_v62  ;;  %16302 = vst [vmem:[#allocation88_spill] sm:$0xff] %v13911_v32  ;;  %v10677_v32 = vld [vmem:[%s13849_s28 + $0x40] sm:$0xff]  }
 0x411   : >> { %v10006_v57 = vpop.f32.mrf.mxu1  ;;  %v13913_v7 = vpop.f32.mrf.mxu0 }
 0x412   : >> { %16303 = vst [vmem:[#allocation91_spill] sm:$0xff] %v13913_v7 }
 0x413   : >> { %v10007_v34 = vpop.f32.mrf.mxu1 }
 0x414   : >> { %v9966_v61 = vpop.f32.mrf.mxu0 }
 0x415   : >> { %v10009_v13 = vpop.f32.mrf.mxu1 }
 0x416   : >> { %v9967_v2 = vpop.f32.mrf.mxu0 }
 0x417   : >> { %v13915_v55 = vadd.f32 %v9967_v2, %v9966_v61  ;;  %v10010_v40 = vpop.f32.mrf.mxu1  ;;  %v10676_v61 = vld [vmem:[%s13849_s28 + $0x8] sm:$0xff]  }
 0x418   : >> { %v9969_v25 = vpop.f32.mrf.mxu0  ;;  %10135 = vmatpush3.bf16.msra.mxu1 %v10676_v61 }
 0x419   : >> { %16304 = vst [vmem:[#allocation93_spill] sm:$0xff] %v13915_v55  ;;  %v10012_v15 = vpop.f32.mrf.mxu1  ;;  %10136 = vmatprep.subr.bf16.mxu1 %v10677_v32 }
 0x41a   : >> { %v9970_v58 = vpop.f32.mrf.mxu0 }
 0x41b   : >> { %v13919_v56 = vadd.f32 %v9970_v58, %v9969_v25  ;;  %v10013_v12 = vpop.f32.mrf.mxu1 }
 0x41c   : >> { %v9972_v50 = vpop.f32.mrf.mxu0 }
 0x41d   : >> { %16305 = vst [vmem:[#allocation92_spill] sm:$0xff] %v13919_v56  ;;  %v10015_v51 = vpop.f32.mrf.mxu1  ;;  %v9899_v56 = vadd.f32 %v13816_v23, %v13811_v22 }
 0x41e   : >> { %v9973_v63 = vpop.f32.mrf.mxu0 }
 0x41f   : >> { %v13921_v36 = vadd.f32 %v9973_v63, %v9972_v50  ;;  %v10016_v39 = vpop.f32.mrf.mxu1 }
 0x420   : >> { %v9975_v4 = vpop.f32.mrf.mxu0 }
 0x421   : >> { %16306 = vst [vmem:[#allocation94_spill] sm:$0xff] %v13921_v36  ;;  %v10018_v47 = vpop.f32.mrf.mxu1  ;;  %v10014_v36 = vadd.f32 %v10013_v12, %v10012_v15 }
 0x422   : >> { %v9976_v24 = vpop.f32.mrf.mxu0 }
 0x423   : >> { %v13923_v42 = vadd.f32 %v9976_v24, %v9975_v4  ;;  %v10019_v30 = vpop.f32.mrf.mxu1 }
 0x424   : >> { %v9978_v54 = vpop.f32.mrf.mxu0 }
 0x425   : >> { %16307 = vst [vmem:[#allocation97_spill] sm:$0xff] %v13923_v42  ;;  %v13925_v21 = vpop.f32.mrf.mxu1 }
 0x426   : >> { %v9979_v2 = vpop.f32.mrf.mxu0 }
 0x427   : >> { %v13929_v25 = vadd.f32 %v9979_v2, %v9978_v54  ;;  %v13931_v8 = vpop.f32.mrf.mxu1 }
 0x428   : >> { %v9981_v10 = vpop.f32.mrf.mxu0 }
 0x429   : >> { %16308 = vst [vmem:[#allocation99_spill] sm:$0xff] %v13929_v25  ;;  %v10024_v58 = vpop.f32.mrf.mxu1  ;;  %v13941_v25 = vld [vmem:[%s3433_s12] ss:$0 sm:$0xff] }
 0x42a   : >> { %v9982_v50 = vpop.f32.mrf.mxu0  ;;  %v5632_v61 = vadd.f32 %v13824_v37, %v13941_v25  ;;  %v5624_v12 = vadd.f32 %v13807_v38, %v13941_v25  ;;  %v5627_v22 = vadd.f32 %v9899_v56, %v13941_v25  ;;  %v5640_v32 = vadd.f32 %v13836_v33, %v13941_v25 }
 0x42b   : >> { %v13933_v63 = vadd.f32 %v9982_v50, %v9981_v10  ;;  %v10025_v4 = vpop.f32.mrf.mxu1  ;;  %v9905_v10 = vadd.f32 %v13831_v0, %v13826_v27  ;;  %v10008_v50 = vadd.f32 %v10007_v34, %v10006_v57  ;;  %v10011_v27 = vadd.f32 %v10010_v40, %v10009_v13 }
 0x42c   : >> { %v9984_v24 = vpop.f32.mrf.mxu0  ;;  %v10026_v62 = vadd.f32 %v10025_v4, %v10024_v58  ;;  %v9917_v13 = vadd.f32 %v13857_v60, %v13855_v35  ;;  %v10023_v33 = vadd.f32 %v13931_v8, %v13925_v21 }
 0x42d   : >> { %16309 = vst [vmem:[#allocation98_spill] sm:$0xff] %v13933_v63  ;;  %v10027_v11 = vpop.f32.mrf.mxu1  ;;  %v5635_v7 = vadd.f32 %v9905_v10, %v13941_v25  ;;  %v5785_v57 = vadd.f32 %v10008_v50, %v5624_v12  ;;  %v5788_v4 = vadd.f32 %v10011_v27, %v5627_v22  ;;  %v10679_v10 = vld [vmem:[%s13849_s28 + $0xf8] sm:$0xff]   ;;  %v10682_v22 = vld [vmem:[%s13849_s28 + $0xb0] sm:$0xff]  }
 0x42e   : >> { %v9985_v42 = vpop.f32.mrf.mxu0  ;;  %v10680_v50 = vld [vmem:[%s13849_s28 + $0xb8] sm:$0xff]   ;;  %10234 = vmatprep.subr.bf16.mxu0 %v10679_v10  ;;  %v10683_v10 = vld [vmem:[%s13849_s28 + $0xe8] sm:$0xff]  }
 0x42f   : >> { %v13939_v54 = vadd.f32 %v9985_v42, %v9984_v24  ;;  %v10028_v2 = vpop.f32.mrf.mxu1  ;;  %v10017_v42 = vadd.f32 %v10016_v39, %v10015_v51  ;;  %10235 = vmatpush3.bf16.msra.mxu0 %v10680_v50  ;;  %v10684_v50 = vld [vmem:[%s13849_s28 + $0xa8] sm:$0xff]  }
 0x430   : >> { %v9987_v19 = vpop.f32.mrf.mxu0 }
 0x431   : >> { %16310 = vst [vmem:[#allocation100_spill] sm:$0xff] %v13939_v54  ;;  %v13947_v63 = vpop.f32.mrf.mxu1  ;;  %v5793_v54 = vadd.f32 %v10014_v36, %v5632_v61  ;;  %v5796_v51 = vadd.f32 %v10017_v42, %v5635_v7  ;;  %v5648_v36 = vadd.f32 %v13853_v18, %v13941_v25  ;;  %v9911_v18 = vadd.f32 %v13842_v46, %v13838_v28 }
 0x432   : >> { %v9988_v15 = vpop.f32.mrf.mxu0  ;;  %v10029_v61 = vadd.f32 %v10028_v2, %v10027_v11 }
 0x433   : >> { %v13953_v24 = vadd.f32 %v9988_v15, %v9987_v19  ;;  %v10031_v55 = vpop.f32.mrf.mxu1  ;;  %v5651_v15 = vadd.f32 %v9917_v13, %v13941_v25 }
 0x434   : >> { %v10436_v37 = vpop.f32.mrf.mxu0  ;;  %v10032_v13 = vadd.f32 %v10031_v55, %v13947_v63 }
 0x435   : >> { %v5954_v0 = vadd.f32 %v10436_v37, %v5793_v54  ;;  %v13956_v34 = vpop.f32.mrf.mxu1  ;;  %v10020_v54 = vadd.f32 %v10019_v30, %v10018_v47  ;;  %v5809_v47 = vadd.f32 %v10026_v62, %v5648_v36  ;;  %v5643_v62 = vadd.f32 %v9911_v18, %v13941_v25  ;;  %v6249_v36 = vld [vmem:[#allocation3 + $0x20] sm:$0xff] }
 0x436   : >> { %v5945_v23 = vpop.f32.mrf.mxu0  ;;  %v5812_v21 = vadd.f32 %v10029_v61, %v5651_v15 }
 0x437   : >> { %v6074_v41 = vmax.f32 %v5954_v0, 0.0  ;;  %v5946_v38 = vadd.f32 %v5945_v23, %v5785_v57  ;;  %v13960_v39 = vpop.f32.mrf.mxu1  ;;  %v5801_v46 = vadd.f32 %v10020_v54, %v5640_v32  ;;  %v10681_v57 = vld [vmem:[%s13849_s28 + $0xf0] sm:$0xff]   ;;  %v5664_v23 = vadd.f32 %v13867_v59, %v13941_v25 }
 0x438   : >> { %v10437_v40 = vpop.f32.mrf.mxu0  ;;  %10236 = vmatprep.subr.bf16.mxu0 %v10681_v57  ;;  %v9923_v59 = vadd.f32 %v13865_v3, %v13861_v16  ;;  %v10035_v16 = vadd.f32 %v13960_v39, %v13956_v34  ;;  %v10686_v57 = vld [vmem:[%s13849_s28 + $0xa0] sm:$0xff]  }
 0x439   : >> { %6107 = vst.msk [vmem:[#allocation3 + $0x48] sm:$0xff] %vm334_vm0, %v6074_v41  ;;  %v6072_v56 = vmax.f32 %v5946_v38, 0.0  ;;  %v5957_v58 = vadd.f32 %v10437_v40, %v5796_v51  ;;  %v10036_v7 = vpop.f32.mrf.mxu1  ;;  %v10678_v41 = vld [vmem:[%s13849_s28] sm:$0xff]   ;;  %v9929_v38 = vadd.f32 %v13871_v44, %v13869_v17  ;;  %10237 = vmatpush3.bf16.msra.mxu0 %v10682_v22 }
 0x43a   : >> { %v5948_v19 = vpop.f32.mrf.mxu0  ;;  %10137 = vmatpush3.bf16.msra.mxu1 %v10678_v41  ;;  %v5659_v15 = vadd.f32 %v9923_v59, %v13941_v25  ;;  %10238 = vmatprep.subr.bf16.mxu0 %v10683_v10 }
 0x43b   : >> { %6105 = vst.msk [vmem:[#allocation3 + $0x28] sm:$0xff] %vm334_vm0, %v6072_v56  ;;  %v6075_v35 = vmax.f32 %v5957_v58, 0.0  ;;  %v5949_v60 = vadd.f32 %v5948_v19, %v5788_v4  ;;  %v10037_v30 = vpop.f32.mrf.mxu1  ;;  %v5804_v56 = vadd.f32 %v10023_v33, %v5643_v62  ;;  %v5656_v4 = vadd.f32 %v13859_v52, %v13941_v25 }
 0x43c   : >> { %v10440_v12 = vpop.f32.mrf.mxu0  ;;  %v10038_v27 = vadd.f32 %v10037_v30, %v10036_v7  ;;  %v5667_v61 = vadd.f32 %v9929_v38, %v13941_v25 }
 0x43d   : >> { %6108 = vst.msk [vmem:[#allocation3 + $0x50] sm:$0xff] %vm334_vm0, %v6075_v35  ;;  %v6073_v28 = vmax.f32 %v5949_v60, 0.0  ;;  %v5970_v11 = vadd.f32 %v10440_v12, %v5809_v47  ;;  %v10039_v2 = vpop.f32.mrf.mxu1  ;;  %v5817_v47 = vadd.f32 %v10032_v13, %v5656_v4  ;;  %10239 = vmatpush3.bf16.msra.mxu0 %v10684_v50  ;;  %v10688_v50 = vld [vmem:[%s13849_s28 + $0xd8] sm:$0xff]  }
 0x43e   : >> { %v5961_v42 = vpop.f32.mrf.mxu0  ;;  %v5825_v63 = vadd.f32 %v10038_v27, %v5664_v23  ;;  %v5672_v27 = vadd.f32 %v13873_v9, %v13941_v25 }
 0x43f   : >> { %6106 = vst.msk [vmem:[#allocation3 + $0x30] sm:$0xff] %vm334_vm0, %v6073_v28  ;;  %v6078_v37 = vmax.f32 %v5970_v11, 0.0  ;;  %v5962_v0 = vadd.f32 %v5961_v42, %v5801_v46  ;;  %v10040_v8 = vpop.f32.mrf.mxu1 }
 0x440   : >> { %v10441_v51 = vpop.f32.mrf.mxu0  ;;  %v10041_v7 = vadd.f32 %v10040_v8, %v10039_v2  ;;  %v6254_v41 = vld [vmem:[#allocation3 + $0x48] sm:$0xff]  ;;  %v10685_v8 = vld [vmem:[%s13849_s28 + $0xe0] sm:$0xff]  }
 0x441   : >> { %6111 = vst.msk [vmem:[#allocation3 + $0x88] sm:$0xff] %vm334_vm0, %v6078_v37  ;;  %v6076_v40 = vmax.f32 %v5962_v0, 0.0  ;;  %v5973_v54 = vadd.f32 %v10441_v51, %v5812_v21  ;;  %v10042_v58 = vpop.f32.mrf.mxu1  ;;  %v6253_v37 = vld [vmem:[#allocation3 + $0x40] sm:$0xff]  ;;  %v9935_v0 = vadd.f32 %v13879_v31, %v13875_v6  ;;  %v5820_v51 = vadd.f32 %v10035_v16, %v5659_v15  ;;  %10240 = vmatprep.subr.bf16.mxu0 %v10685_v8  ;;  %v10689_v15 = vld [vmem:[%s13849_s28 + $0x98] sm:$0xff]  }
 0x442   : >> { %v5964_v32 = vpop.f32.mrf.mxu0  ;;  %v6250_v17 = vld [vmem:[#allocation3 + $0x28] sm:$0xff]  ;;  %v5828_v33 = vadd.f32 %v10041_v7, %v5667_v61  ;;  %v14024_v6 = vpack.c.bf16 %v6254_v41, %v6253_v37  ;;  %10241 = vmatpush3.bf16.msra.mxu0 %v10686_v57 }
 0x443   : >> { %6109 = vst.msk [vmem:[#allocation3 + $0x68] sm:$0xff] %vm334_vm0, %v6076_v40  ;;  %v6079_v44 = vmax.f32 %v5973_v54, 0.0  ;;  %v5965_v55 = vadd.f32 %v5964_v32, %v5804_v56  ;;  %v13994_v18 = vpack.c.bf16 %v6250_v17, %v6249_v36  ;;  %v10043_v19 = vpop.f32.mrf.mxu1  ;;  %v10687_v36 = vld [vmem:[%s13849_s28 + $0x118] sm:$0xff]   ;;  %v6261_v40 = vld [vmem:[#allocation3 + $0x80] sm:$0xff]  ;;  %10242 = vmatprep.subr.bf16.mxu0 %v10688_v50 }
 0x444   : >> { %v10444_v52 = vpop.f32.mrf.mxu0  ;;  %v6255_v35 = vld [vmem:[#allocation3 + $0x50] sm:$0xff]  ;;  %v10044_v22 = vadd.f32 %v10043_v19, %v10042_v58  ;;  %16314 = vst [vmem:[#allocation76_spill] sm:$0xff] %v14024_v6  ;;  %v6257_v32 = vld [vmem:[#allocation3 + $0x60] sm:$0xff]  ;;  %10466 = vmatprep.subr.bf16.mxu1 %v10687_v36  ;;  %v9941_v19 = vadd.f32 %v13885_v20, %v13883_v45 }
 0x445   : >> { %16311 = vst [vmem:[#allocation103_spill] sm:$0xff] %v13994_v18  ;;  %6112 = vst.msk [vmem:[#allocation3 + $0x90] sm:$0xff] %vm334_vm0, %v6079_v44  ;;  %v6077_v3 = vmax.f32 %v5965_v55, 0.0  ;;  %v5986_v60 = vadd.f32 %v10444_v52, %v5825_v63  ;;  %6661 = vrot.lane.b32.xlu0 %v13994_v18, %s10728_s20  ;;  %v10045_v30 = vpop.f32.mrf.mxu1  ;;  %v14005_v34 = vpack.c.bf16 %v6255_v35, %v6255_v35  ;;  %v10691_v36 = vld [vmem:[%s13849_s28 + $0x90] sm:$0xff]  }
 0x446   : >> { %v5977_v12 = vpop.f32.mrf.mxu0  ;;  %v6251_v28 = vld [vmem:[#allocation3 + $0x30] sm:$0xff]  ;;  %v14007_v39 = vpack.c.bf16 %v6255_v35, %v6254_v41  ;;  %v5680_v63 = vadd.f32 %v13881_v43, %v13941_v25  ;;  %v5675_v35 = vadd.f32 %v9935_v0, %v13941_v25  ;;  %v5833_v43 = vadd.f32 %v10044_v22, %v5672_v27  ;;  %10243 = vmatpush3.bf16.msra.mxu0 %v10689_v15 }
 0x447   : >> { %16312 = vst [vmem:[#allocation105_spill] sm:$0xff] %v14005_v34  ;;  %6110 = vst.msk [vmem:[#allocation3 + $0x70] sm:$0xff] %vm334_vm0, %v6077_v3  ;;  %v6082_v11 = vmax.f32 %v5986_v60, 0.0  ;;  %v5978_v46 = vadd.f32 %v5977_v12, %v5817_v47  ;;  %v14010_v2 = vpack.c.bf16 %v6251_v28, %v6251_v28  ;;  %v6350_v62 = vpack.c.bf16 %v6251_v28, %v6250_v17  ;;  %v10046_v42 = vpop.f32.mrf.mxu1  ;;  %v10690_v22 = vld [vmem:[%s13849_s28 + $0xd0] sm:$0xff]  }
 0x448   : >> { %v10445_v21 = vpop.f32.mrf.mxu0  ;;  %v6406_v54 = vshrl.u32 %v14007_v39, 16  ;;  %v6409_v56 = vshll.u32 %v14007_v39, 16  ;;  %v6262_v7 = vld [vmem:[#allocation3 + $0x88] sm:$0xff]  ;;  %v10047_v16 = vadd.f32 %v10046_v42, %v10045_v30  ;;  %10244 = vmatprep.subr.bf16.mxu0 %v10690_v22 }
 0x449   : >> { %16313 = vst [vmem:[#allocation104_spill] sm:$0xff] %v14010_v2  ;;  %6115 = vst.msk [vmem:[#allocation3 + $0xc8] sm:$0xff] %vm334_vm0, %v6082_v11  ;;  %v6080_v23 = vmax.f32 %v5978_v46, 0.0  ;;  %v5989_v38 = vadd.f32 %v10445_v21, %v5828_v33  ;;  %6663 = vrot.lane.b32.xlu1 %v14010_v2, %s10728_s20  ;;  %6667 = vrot.lane.b32.xlu0 %v14005_v34, %s10728_s20  ;;  %v10048_v9 = vpop.f32.mrf.mxu1  ;;  %v14026_v31 = vrot.slane %v6350_v62, 5  ;;  %v6398_v44 = vshrl.u32 %v6350_v62, 16  ;;  %v6252_v46 = vld [vmem:[#allocation3 + $0x38] sm:$0xff] }
 0x44a   : >> { %v5980_v13 = vpop.f32.mrf.mxu0  ;;  %v14031_v17 = vld [vmem:[#allocation3 + $0x68] sm:$0xff]  ;;  %v6401_v55 = vshll.u32 %v6350_v62, 16  ;;  %v14043_v47 = vpack.c.bf16 %v6262_v7, %v6261_v40  ;;  %v6408_v10 = vrot.slane %v6406_v54, 4  ;;  %v6411_v11 = vrot.slane %v6409_v56, 5  ;;  %10245 = vmatpush3.bf16.msra.mxu0 %v10691_v36  ;;  %v6269_v36 = vld [vmem:[#allocation3 + $0xc0] sm:$0xff] }
 0x44b   : >> { %6113 = vst.msk [vmem:[#allocation3 + $0xa8] sm:$0xff] %vm334_vm0, %v6080_v23  ;;  %v6083_v58 = vmax.f32 %v5989_v38, 0.0  ;;  %v5981_v4 = vadd.f32 %v5980_v13, %v5820_v51  ;;  %v10049_v59 = vpop.f32.mrf.mxu1  ;;  %v14046_v41 = vpack.c.bf16 %v14031_v17, %v6257_v32  ;;  %v6400_v33 = vrot.slane %v6398_v44, 4 }
 0x44c   : >> { %v10448_v61 = vpop.f32.mrf.mxu0  ;;  %v10050_v52 = vadd.f32 %v10049_v59, %v10048_v9  ;;  %16315 = vst [vmem:[#allocation106_spill] sm:$0xff] %v14043_v47  ;;  %v6403_v28 = vrot.slane %v6401_v55, 5  ;;  %v5683_v62 = vadd.f32 %v9941_v19, %v13941_v25  ;;  %v6263_v0 = vld [vmem:[#allocation3 + $0x90] sm:$0xff]  ;;  %v5836_v8 = vadd.f32 %v10047_v16, %v5675_v35  ;;  %v10693_v35 = vld [vmem:[%s13849_s28 + $0x88] sm:$0xff]  }
 0x44d   : >> { %6116 = vst.msk [vmem:[#allocation3 + $0xd0] sm:$0xff] %vm334_vm0, %v6083_v58  ;;  %v6081_v3 = vmax.f32 %v5981_v4, 0.0  ;;  %6665 = vrot.lane.b32.xlu1 %v14024_v6, %s10728_s20  ;;  %6738 = vrot.lane.b32.xlu0 %v14026_v31, %s10728_s20  ;;  %v10051_v60 = vpop.f32.mrf.mxu1  ;;  %16316 = vst [vmem:[#allocation77_spill] sm:$0xff] %v14046_v41  ;;  %v6366_v9 = vpack.c.bf16 %v6252_v46, %v6252_v46  ;;  %v14061_v54 = vor.u32 %v6411_v11, %v6408_v10 }
 0x44e   : >> { %v5841_v45 = vadd.f32 %v10050_v52, %v5680_v63  ;;  %v5993_v20 = vpop.f32.mrf.mxu0  ;;  %v14059_v40 = vor.u32 %v6403_v28, %v6400_v33  ;;  %v6259_v58 = vld [vmem:[#allocation3 + $0x70] sm:$0xff]  ;;  %v14063_v4 = vpack.c.bf16 %v6263_v0, %v6262_v7  ;;  %v5688_v59 = vadd.f32 %v13887_v29, %v13941_v25  ;;  %v10694_v28 = vld [vmem:[%s13849_s28 + $0xc0] sm:$0xff]  }
 0x44f   : >> { %6114 = vst.msk [vmem:[#allocation3 + $0xb0] sm:$0xff] %vm334_vm0, %v6081_v3  ;;  %v5994_v30 = vadd.f32 %v5993_v20, %v5833_v43  ;;  %v10052_v12 = vpop.f32.mrf.mxu1  ;;  %16317 = vst [vmem:[#allocation109_spill] sm:$0xff] %v14061_v54  ;;  %v9947_v32 = vadd.f32 %v13893_v53, %v13889_v1  ;;  %v14078_v52 = vpack.c.bf16 %v6259_v58, %v14031_v17  ;;  %v6585_v15 = vrot.slane %v6366_v9, 5 }
 0x450   : >> { %v6002_v42 = vadd.f32 %v10448_v61, %v5841_v45  ;;  %v10449_v37 = vpop.f32.mrf.mxu0  ;;  %v10053_v27 = vadd.f32 %v10052_v12, %v10051_v60  ;;  %v10692_v61 = vld [vmem:[%s13849_s28 + $0xc8] sm:$0xff]   ;;  %v14082_v16 = vpack.c.bf16 %v6259_v58, %v6259_v58  ;;  %v14084_v3 = vpack.c.bf16 %v6263_v0, %v6263_v0 }
 0x451   : >> { %v6084_v21 = vmax.f32 %v5994_v30, 0.0  ;;  %6673 = vrot.lane.b32.xlu1 %v14043_v47, %s10728_s20  ;;  %6669 = vrot.lane.b32.xlu0 %v14046_v41, %s10728_s20  ;;  %v10054_v57 = vpop.f32.mrf.mxu1  ;;  %v6422_v60 = vshrl.u32 %v14063_v4, 16  ;;  %v6425_v45 = vshll.u32 %v14063_v4, 16  ;;  %v5691_v17 = vadd.f32 %v9947_v32, %v13941_v25  ;;  %v6265_v30 = vld [vmem:[#allocation3 + $0xa0] sm:$0xff] }
 0x452   : >> { %v6086_v23 = vmax.f32 %v6002_v42, 0.0  ;;  %v5844_v38 = vadd.f32 %v10053_v27, %v5683_v62  ;;  %v5996_v51 = vpop.f32.mrf.mxu0  ;;  %16318 = vst [vmem:[#allocation78_spill] sm:$0xff] %v14082_v16  ;;  %16319 = vst [vmem:[#allocation79_spill] sm:$0xff] %v14084_v3  ;;  %10246 = vmatprep.subr.bf16.mxu0 %v10692_v61  ;;  %v14090_v12 = vld [vmem:[#allocation3 + $0xa8] sm:$0xff]  ;;  %v5696_v11 = vadd.f32 %v13895_v26, %v13941_v25  ;;  %v10695_v27 = vld [vmem:[%s13849_s28 + $0x80] sm:$0xff]   ;;  %v6417_v22 = vshll.u32 %v14078_v52, 16 }
 0x453   : >> { %6117 = vst.msk [vmem:[#allocation3 + $0xe8] sm:$0xff] %vm334_vm0, %v6084_v21  ;;  %v5997_v13 = vadd.f32 %v5996_v51, %v5836_v8  ;;  %v10055_v56 = vpop.f32.mrf.mxu1  ;;  %10247 = vmatpush3.bf16.msra.mxu0 %v10693_v35  ;;  %v14102_v0 = vpack.c.bf16 %v14090_v12, %v6265_v30  ;;  %v6424_v8 = vrot.slane %v6422_v60, 4  ;;  %v9953_v26 = vadd.f32 %v13899_v49, %v13897_v14  ;;  %v16325_v30 = vld [vmem:[#allocation87_spill] sm:$0xff] }
 0x454   : >> { %6119 = vst.msk [vmem:[#allocation3 + $0x108] sm:$0xff] %vm334_vm0, %v6086_v23  ;;  %v6005_v44 = vadd.f32 %v10449_v37, %v5844_v38  ;;  %v10056_v55 = vadd.f32 %v10055_v56, %v10054_v57  ;;  %v14070_v63 = vpop.f32.mrf.mxu0  ;;  %v6414_v37 = vshrl.u32 %v14078_v52, 16  ;;  %v6427_v57 = vrot.slane %v6425_v45, 5  ;;  %v6256_v23 = vld [vmem:[#allocation3 + $0x58] sm:$0xff]  ;;  %10248 = vmatprep.subr.bf16.mxu0 %v10694_v28 }
 0x455   : >> { %v6085_v19 = vmax.f32 %v5997_v13, 0.0  ;;  %6519 = vrot.lane.b32.xlu1 %v14059_v40, %s10728_s20  ;;  %6521 = vrot.lane.b32.xlu0 %v14061_v54, %s10728_s20  ;;  %v10057_v7 = vpop.f32.mrf.mxu1  ;;  %16320 = vst [vmem:[#allocation83_spill] sm:$0xff] %v14102_v0  ;;  %v14110_v38 = vsel %vm953_vm1, %v14026_v31, %v6585_v15  ;;  %v6270_v13 = vld [vmem:[#allocation3 + $0xc8] sm:$0xff]  ;;  %v5699_v61 = vadd.f32 %v9953_v26, %v13941_v25  ;;  %v14138_v28 = vrot.slane %v14007_v39, 5 }
 0x456   : >> { %v6087_v29 = vmax.f32 %v6005_v44, 0.0  ;;  %v5849_v1 = vadd.f32 %v10056_v55, %v5688_v59  ;;  %v6009_v53 = vpop.f32.mrf.mxu0  ;;  %v6367_v59 = vpack.c.bf16 %v6256_v23, %v6256_v23  ;;  %v14118_v32 = vpack.c.bf16 %v6270_v13, %v6269_v36 }
 0x457   : >> { %6118 = vst.msk [vmem:[#allocation3 + $0xf0] sm:$0xff] %vm334_vm0, %v6085_v19  ;;  %v10058_v43 = vpop.f32.mrf.mxu1  ;;  %10249 = vmatpush3.bf16.msra.mxu0 %v10695_v27  ;;  %v14120_v44 = vor.u32 %v6427_v57, %v6424_v8  ;;  %v6416_v19 = vrot.slane %v6414_v37, 4 }
 0x458   : >> { %6120 = vst.msk [vmem:[#allocation3 + $0x110] sm:$0xff] %vm334_vm0, %v6087_v29  ;;  %v10059_v20 = vadd.f32 %v10058_v43, %v10057_v7  ;;  %v6010_v10 = vadd.f32 %v6009_v53, %v5849_v1  ;;  %v10453_v50 = vpop.f32.mrf.mxu0  ;;  %16321 = vst [vmem:[#allocation84_spill] sm:$0xff] %v14118_v32  ;;  %v6419_v7 = vrot.slane %v6417_v22, 5  ;;  %v6271_v1 = vld [vmem:[#allocation3 + $0xd0] sm:$0xff]  ;;  %v6588_v15 = vrot.slane %v6367_v59, 5 }
 0x459   : >> { %6671 = vrot.lane.b32.xlu1 %v14082_v16, %s10728_s20  ;;  %6675 = vrot.lane.b32.xlu0 %v14084_v3, %s10728_s20  ;;  %v10060_v33 = vpop.f32.mrf.mxu1  ;;  %16322 = vst [vmem:[#allocation89_spill] sm:$0xff] %v14120_v44  ;;  %v14147_v37 = vpack.c.bf16 %v6271_v1, %v6270_v13 }
 0x45a   : >> { %v6088_v46 = vmax.f32 %v6010_v10, 0.0  ;;  %v5852_v62 = vadd.f32 %v10059_v20, %v5691_v17  ;;  %v6012_v42 = vpop.f32.mrf.mxu0  ;;  %v5704_v17 = vadd.f32 %v13901_v5, %v13941_v25  ;;  %v14131_v20 = vor.u32 %v6419_v7, %v6416_v19  ;;  %v16328_v19 = vld [vmem:[#allocation86_spill] sm:$0xff] }
 0x45b   : >> { %v10061_v21 = vpop.f32.mrf.mxu1  ;;  %v14158_v57 = vsel %vm953_vm1, %v14138_v28, %v6588_v15  ;;  %v6438_v36 = vshrl.u32 %v14147_v37, 16  ;;  %v6441_v13 = vshll.u32 %v14147_v37, 16  ;;  %v5712_v7 = vadd.f32 %v16328_v19, %v13941_v25 }
 0x45c   : >> { %6121 = vst.msk [vmem:[#allocation3 + $0x128] sm:$0xff] %vm334_vm0, %v6088_v46  ;;  %v10062_v51 = vadd.f32 %v10061_v21, %v10060_v33  ;;  %v6013_v9 = vadd.f32 %v6012_v42, %v5852_v62  ;;  %v14116_v58 = vpop.f32.mrf.mxu0  ;;  %16323 = vst [vmem:[#allocation117_spill] sm:$0xff] %v14131_v20  ;;  %v9959_v33 = vadd.f32 %v16325_v30, %v13903_v48 }
 0x45d   : >> { %6740 = vrot.lane.b32.xlu1 %v14110_v38, %s10728_s20  ;;  %6677 = vrot.lane.b32.xlu0 %v14102_v0, %s10728_s20  ;;  %v10063_v56 = vpop.f32.mrf.mxu1  ;;  %16327 = vst [vmem:[#allocation116_spill] sm:$0xff] %v14158_v57  ;;  %v6440_v30 = vrot.slane %v6438_v36, 4 }
 0x45e   : >> { %v5857_v14 = vadd.f32 %v10062_v51, %v5696_v11  ;;  %v6089_v49 = vmax.f32 %v6013_v9, 0.0  ;;  %v6025_v43 = vpop.f32.mrf.mxu0  ;;  %v6267_v11 = vld [vmem:[#allocation3 + $0xb0] sm:$0xff]  ;;  %v5707_v8 = vadd.f32 %v9959_v33, %v13941_v25  ;;  %v6443_v33 = vrot.slane %v6441_v13, 5 }
 0x45f   : >> { %v10064_v55 = vpop.f32.mrf.mxu1  ;;  %v14150_v39 = vpack.c.bf16 %v6267_v11, %v14090_v12  ;;  %v14152_v21 = vpack.c.bf16 %v6267_v11, %v6267_v11 }
 0x460   : >> { %v6018_v29 = vadd.f32 %v14070_v63, %v5857_v14  ;;  %6122 = vst.msk [vmem:[#allocation3 + $0x130] sm:$0xff] %vm334_vm0, %v6089_v49  ;;  %v10065_v53 = vadd.f32 %v10064_v55, %v10063_v56  ;;  %v14133_v63 = vpack.c.bf16 %v6271_v1, %v6271_v1  ;;  %v14145_v42 = vpop.f32.mrf.mxu0  ;;  %v14167_v56 = vrot.slane %v14078_v52, 5  ;;  %v6273_v49 = vld [vmem:[#allocation3 + $0xe0] sm:$0xff]  ;;  %v6274_v52 = vld [vmem:[#allocation3 + $0xe8] sm:$0xff] }
 0x461   : >> { %6681 = vrot.lane.b32.xlu1 %v14118_v32, %s10728_s20  ;;  %6525 = vrot.lane.b32.xlu0 %v14120_v44, %s10728_s20  ;;  %v10066_v35 = vpop.f32.mrf.mxu1  ;;  %16326 = vst [vmem:[#allocation90_spill] sm:$0xff] %v14152_v21  ;;  %v6430_v59 = vshrl.u32 %v14150_v39, 16  ;;  %v6433_v55 = vshll.u32 %v14150_v39, 16  ;;  %v14195_v13 = vor.u32 %v6443_v33, %v6440_v30  ;;  %v16338_v30 = vld [vmem:[#allocation92_spill] sm:$0xff] }
 0x462   : >> { %v6090_v60 = vmax.f32 %v6018_v29, 0.0  ;;  %v5860_v45 = vadd.f32 %v10065_v53, %v5699_v61  ;;  %16324 = vst [vmem:[#allocation119_spill] sm:$0xff] %v14133_v63  ;;  %v6028_v26 = vpop.f32.mrf.mxu0  ;;  %v16329_v61 = vld [vmem:[#allocation88_spill] sm:$0xff]  ;;  %v16330_v29 = vld [vmem:[#allocation91_spill] sm:$0xff]  ;;  %v5723_v33 = vadd.f32 %v16338_v30, %v13941_v25 }
 0x463   : >> { %v10067_v10 = vpop.f32.mrf.mxu1  ;;  %v9965_v1 = vadd.f32 %v16330_v29, %v16329_v61  ;;  %16334 = vst [vmem:[#allocation125_spill] sm:$0xff] %v14195_v13 }
 0x464   : >> { %6123 = vst.msk [vmem:[#allocation3 + $0x148] sm:$0xff] %vm334_vm0, %v6090_v60  ;;  %v6021_v46 = vadd.f32 %v10453_v50, %v5860_v45  ;;  %v10068_v62 = vadd.f32 %v10067_v10, %v10066_v35  ;;  %v6278_v60 = vld [vmem:[#allocation3 + $0x108] sm:$0xff] }
 0x465   : >> { %6523 = vrot.lane.b32.xlu1 %v14131_v20, %s10728_s20  ;;  %6683 = vrot.lane.b32.xlu0 %v14133_v63, %s10728_s20  ;;  %v10069_v5 = vpop.f32.mrf.mxu1  ;;  %v16362_v20 = vld [vmem:[#allocation85_spill] sm:$0xff] }
 0x466   : >> { %v6091_v48 = vmax.f32 %v6021_v46, 0.0  ;;  %v5865_v27 = vadd.f32 %v10068_v62, %v5704_v17  ;;  %v14180_v17 = vpop.f32.mrf.mxu0  ;;  %v14184_v46 = vpack.c.bf16 %v6274_v52, %v6273_v49  ;;  %v15928_v54 = vrot.slane %v16362_v20, 5 }
 0x467   : >> { %v10070_v50 = vpop.f32.mrf.mxu1 }
 0x468   : >> { %6124 = vst.msk [vmem:[#allocation3 + $0x150] sm:$0xff] %vm334_vm0, %v6091_v48  ;;  %v10071_v22 = vadd.f32 %v10070_v50, %v10069_v5  ;;  %v6026_v23 = vadd.f32 %v6025_v43, %v5865_v27  ;;  %v6277_v43 = vld [vmem:[#allocation3 + $0x100] sm:$0xff]  ;;  %16332 = vst [vmem:[#allocation95_spill] sm:$0xff] %v14184_v46  ;;  %v6432_v5 = vrot.slane %v6430_v59, 4  ;;  %v6435_v48 = vrot.slane %v6433_v55, 5 }
 0x469   : >> { %6679 = vrot.lane.b32.xlu1 %v14152_v21, %s10728_s20  ;;  %6744 = vrot.lane.b32.xlu0 %v14158_v57, %s10728_s20  ;;  %v10072_v12 = vpop.f32.mrf.mxu1  ;;  %v14182_v11 = vpack.c.bf16 %v6278_v60, %v6277_v43  ;;  %v5715_v27 = vadd.f32 %v9965_v1, %v13941_v25  ;;  %v16335_v59 = vld [vmem:[#allocation93_spill] sm:$0xff] }
 0x46a   : >> { %v6092_v51 = vmax.f32 %v6026_v23, 0.0  ;;  %v5868_v9 = vadd.f32 %v10071_v22, %v5707_v8  ;;  %v6279_v22 = vld [vmem:[#allocation3 + $0x110] sm:$0xff]  ;;  %v14193_v36 = vor.u32 %v6435_v48, %v6432_v5  ;;  %v5720_v55 = vadd.f32 %v16335_v59, %v13941_v25  ;;  %v6264_v59 = vld [vmem:[#allocation3 + $0x98] sm:$0xff] }
 0x46b   : >> { %v10073_v14 = vpop.f32.mrf.mxu1  ;;  %16331 = vst [vmem:[#allocation124_spill] sm:$0xff] %v14182_v11  ;;  %v14197_v49 = vpack.c.bf16 %v6279_v22, %v6278_v60 }
 0x46c   : >> { %6125 = vst.msk [vmem:[#allocation3 + $0x168] sm:$0xff] %vm334_vm0, %v6092_v51  ;;  %v10074_v53 = vadd.f32 %v10073_v14, %v10072_v12  ;;  %v6029_v35 = vadd.f32 %v6028_v26, %v5868_v9  ;;  %v6041_v12 = vpop.f32.mrf.mxu0  ;;  %v6260_v26 = vld [vmem:[#allocation3 + $0x78] sm:$0xff]  ;;  %16333 = vst [vmem:[#allocation118_spill] sm:$0xff] %v14193_v36  ;;  %v6275_v14 = vld [vmem:[#allocation3 + $0xf0] sm:$0xff] }
 0x46d   : >> { %6742 = vrot.lane.b32.xlu1 %v14138_v28, %s10728_s20  ;;  %6746 = vrot.lane.b32.xlu0 %v14167_v56, %s10728_s20  ;;  %v10075_v45 = vpop.f32.mrf.mxu1  ;;  %v6368_v61 = vpack.c.bf16 %v6260_v26, %v6260_v26  ;;  %v14211_v60 = vpack.c.bf16 %v6275_v14, %v6275_v14 }
 0x46e   : >> { %v5873_v10 = vadd.f32 %v10074_v53, %v5712_v7  ;;  %v6093_v15 = vmax.f32 %v6029_v35, 0.0  ;;  %v14207_v1 = vpop.f32.mrf.mxu0  ;;  %v14209_v35 = vpack.c.bf16 %v6275_v14, %v6274_v52  ;;  %v6281_v52 = vld [vmem:[#allocation3 + $0x120] sm:$0xff] }
 0x46f   : >> { %v10076_v62 = vpop.f32.mrf.mxu1  ;;  %16336 = vst [vmem:[#allocation81_spill] sm:$0xff] %v14211_v60  ;;  %v6591_v48 = vrot.slane %v6368_v61, 5 }
 0x470   : >> { %v6034_v50 = vadd.f32 %v14116_v58, %v5873_v10  ;;  %6126 = vst.msk [vmem:[#allocation3 + $0x170] sm:$0xff] %vm334_vm0, %v6093_v15  ;;  %v10077_v8 = vadd.f32 %v10076_v62, %v10075_v45  ;;  %v14213_v45 = vpack.c.bf16 %v6279_v22, %v6279_v22  ;;  %v6454_v10 = vshrl.u32 %v14197_v49, 16 }
 0x471   : >> { %6689 = vrot.lane.b32.xlu1 %v14182_v11, %s10728_s20  ;;  %6685 = vrot.lane.b32.xlu0 %v14184_v46, %s10728_s20  ;;  %v10078_v23 = vpop.f32.mrf.mxu1  ;;  %v6457_v15 = vshll.u32 %v14197_v49, 16  ;;  %v6446_v26 = vshrl.u32 %v14209_v35, 16  ;;  %v6449_v14 = vshll.u32 %v14209_v35, 16  ;;  %v14376_v32 = vrot.slane %v14209_v35, 5 }
 0x472   : >> { %v6094_v51 = vmax.f32 %v6034_v50, 0.0  ;;  %v5876_v9 = vadd.f32 %v10077_v8, %v5715_v27  ;;  %16337 = vst [vmem:[#allocation120_spill] sm:$0xff] %v14213_v45  ;;  %v6282_v27 = vld [vmem:[#allocation3 + $0x128] sm:$0xff]  ;;  %v6044_v8 = vpop.f32.mrf.mxu0 }
 0x473   : >> { %v10079_v58 = vpop.f32.mrf.mxu1 }
 0x474   : >> { %6127 = vst.msk [vmem:[#allocation3 + $0x188] sm:$0xff] %vm334_vm0, %v6094_v51  ;;  %v6037_v19 = vadd.f32 %v14145_v42, %v5876_v9  ;;  %v10080_v7 = vadd.f32 %v10079_v58, %v10078_v23  ;;  %v14225_v51 = vpack.c.bf16 %v6282_v27, %v6281_v52  ;;  %v6456_v58 = vrot.slane %v6454_v10, 4 }
 0x475   : >> { %6527 = vrot.lane.b32.xlu1 %v14193_v36, %s10728_s20  ;;  %6529 = vrot.lane.b32.xlu0 %v14195_v13, %s10728_s20  ;;  %v10081_v29 = vpop.f32.mrf.mxu1  ;;  %v14239_v10 = vpop.f32.mrf.mxu0  ;;  %v6448_v52 = vrot.slane %v6446_v26, 4  ;;  %v10701_v13 = vld [vmem:[#allocation3 + $0x8] sm:$0xff] }
 0x476   : >> { %v6095_v53 = vmax.f32 %v6037_v19, 0.0  ;;  %v5881_v43 = vadd.f32 %v10080_v7, %v5720_v55  ;;  %16339 = vst [vmem:[#allocation126_spill] sm:$0xff] %v14225_v51  ;;  %v16340_v55 = vld [vmem:[#allocation94_spill] sm:$0xff]  ;;  %v14233_v7 = vsel %vm953_vm1, %v14167_v56, %v6591_v48 }
 0x477   : >> { %v10082_v42 = vpop.f32.mrf.mxu1  ;;  %v5728_v19 = vadd.f32 %v16340_v55, %v13941_v25  ;;  %16341 = vst [vmem:[#allocation96_spill] sm:$0xff] %v14233_v7  ;;  %v6287_v55 = vld [vmem:[#allocation3 + $0x150] sm:$0xff] }
 0x478   : >> { %6128 = vst.msk [vmem:[#allocation3 + $0x190] sm:$0xff] %vm334_vm0, %v6095_v53  ;;  %v10083_v62 = vadd.f32 %v10082_v42, %v10081_v29  ;;  %v6042_v5 = vadd.f32 %v6041_v12, %v5881_v43  ;;  %v6459_v12 = vrot.slane %v6457_v15, 5  ;;  %v6285_v53 = vld [vmem:[#allocation3 + $0x140] sm:$0xff]  ;;  %v6286_v43 = vld [vmem:[#allocation3 + $0x148] sm:$0xff] }
 0x479   : >> { %6687 = vrot.lane.b32.xlu1 %v14211_v60, %s10728_s20  ;;  %6691 = vrot.lane.b32.xlu0 %v14213_v45, %s10728_s20  ;;  %v10084_v50 = vpop.f32.mrf.mxu1  ;;  %v6280_v45 = vld [vmem:[#allocation3 + $0x118] sm:$0xff] }
 0x47a   : >> { %v6096_v22 = vmax.f32 %v6042_v5, 0.0  ;;  %v5884_v23 = vadd.f32 %v10083_v62, %v5723_v33  ;;  %v6369_v33 = vpack.c.bf16 %v6264_v59, %v6264_v59  ;;  %v14241_v62 = vpack.c.bf16 %v6286_v43, %v6285_v53  ;;  %v16347_v53 = vld [vmem:[#allocation99_spill] sm:$0xff] }
 0x47b   : >> { %v10085_v9 = vpop.f32.mrf.mxu1  ;;  %v14243_v5 = vor.u32 %v6459_v12, %v6456_v58  ;;  %v6057_v12 = vpop.f32.mrf.mxu0 }
 0x47c   : >> { %6129 = vst.msk [vmem:[#allocation3 + $0x1a8] sm:$0xff] %vm334_vm0, %v6096_v22  ;;  %v10086_v61 = vadd.f32 %v10085_v9, %v10084_v50  ;;  %v6045_v29 = vadd.f32 %v6044_v8, %v5884_v23  ;;  %16342 = vst [vmem:[#allocation80_spill] sm:$0xff] %v14241_v62  ;;  %v6451_v50 = vrot.slane %v6449_v14, 5  ;;  %v16344_v8 = vld [vmem:[#allocation97_spill] sm:$0xff] }
 0x47d   : >> { %6748 = vrot.lane.b32.xlu1 %v14233_v7, %s10728_s20  ;;  %6693 = vrot.lane.b32.xlu0 %v14225_v51, %s10728_s20  ;;  %v10087_v42 = vpop.f32.mrf.mxu1  ;;  %16343 = vst [vmem:[#allocation121_spill] sm:$0xff] %v14243_v5  ;;  %v5731_v22 = vadd.f32 %v16344_v8, %v13941_v25 }
 0x47e   : >> { %v5889_v15 = vadd.f32 %v10086_v61, %v5728_v19  ;;  %v6097_v30 = vmax.f32 %v6045_v29, 0.0  ;;  %v14253_v14 = vor.u32 %v6451_v50, %v6448_v52  ;;  %v14255_v19 = vpack.c.bf16 %v6287_v55, %v6287_v55  ;;  %v14268_v50 = vpop.f32.mrf.mxu0 }
 0x47f   : >> { %v10088_v48 = vpop.f32.mrf.mxu1  ;;  %v6594_v29 = vrot.slane %v6369_v33, 5 }
 0x480   : >> { %v6050_v23 = vadd.f32 %v14180_v17, %v5889_v15  ;;  %6130 = vst.msk [vmem:[#allocation3 + $0x1b0] sm:$0xff] %vm334_vm0, %v6097_v30  ;;  %v10089_v9 = vadd.f32 %v10088_v48, %v10087_v42  ;;  %16345 = vst [vmem:[#allocation127_spill] sm:$0xff] %v14253_v14  ;;  %v6283_v17 = vld [vmem:[#allocation3 + $0x130] sm:$0xff]  ;;  %v5736_v42 = vadd.f32 %v16347_v53, %v13941_v25  ;;  %v14260_v15 = vrot.slane %v14063_v4, 5 }
 0x481   : >> { %6697 = vrot.lane.b32.xlu1 %v14241_v62, %s10728_s20  ;;  %6533 = vrot.lane.b32.xlu0 %v14243_v5, %s10728_s20  ;;  %v10090_v58 = vpop.f32.mrf.mxu1  ;;  %16346 = vst [vmem:[#allocation122_spill] sm:$0xff] %v14255_v19  ;;  %v14270_v8 = vpack.c.bf16 %v6283_v17, %v6282_v27  ;;  %v14272_v4 = vpack.c.bf16 %v6287_v55, %v6286_v43  ;;  %v6060_v43 = vpop.f32.mrf.mxu0  ;;  %v6290_v5 = vld [vmem:[#allocation3 + $0x168] sm:$0xff]  ;;  %v10702_v62 = vld [vmem:[#allocation3 + $0x10] sm:$0xff] }
 0x482   : >> { %v6098_v59 = vmax.f32 %v6050_v23, 0.0  ;;  %v5892_v26 = vadd.f32 %v10089_v9, %v5731_v22  ;;  %16348 = vst [vmem:[#allocation128_spill] sm:$0xff] %v14260_v15  ;;  %v14274_v23 = vpack.c.bf16 %v6283_v17, %v6283_v17 }
 0x483   : >> { %v10091_v61 = vpop.f32.mrf.mxu1  ;;  %v6462_v53 = vshrl.u32 %v14270_v8, 16 }
 0x484   : >> { %6131 = vst.msk [vmem:[#allocation3 + $0x1c8] sm:$0xff] %vm334_vm0, %v6098_v59  ;;  %v6053_v30 = vadd.f32 %v14207_v1, %v5892_v26  ;;  %v10092_v48 = vadd.f32 %v10091_v61, %v10090_v58  ;;  %16349 = vst [vmem:[#allocation101_spill] sm:$0xff] %v14274_v23  ;;  %v16350_v1 = vld [vmem:[#allocation98_spill] sm:$0xff]  ;;  %v14281_v59 = vsel %vm953_vm1, %v14260_v15, %v6594_v29  ;;  %v14290_v29 = vrot.slane %v14150_v39, 5 }
 0x485   : >> { %6531 = vrot.lane.b32.xlu1 %v14253_v14, %s10728_s20  ;;  %6699 = vrot.lane.b32.xlu0 %v14255_v19, %s10728_s20  ;;  %v10093_v52 = vpop.f32.mrf.mxu1  ;;  %v5739_v58 = vadd.f32 %v16350_v1, %v13941_v25  ;;  %16351 = vst [vmem:[#allocation82_spill] sm:$0xff] %v14281_v59  ;;  %v6272_v14 = vld [vmem:[#allocation3 + $0xd8] sm:$0xff] }
 0x486   : >> { %v6099_v33 = vmax.f32 %v6053_v30, 0.0  ;;  %v5897_v22 = vadd.f32 %v10092_v48, %v5736_v42  ;;  %v6465_v42 = vshll.u32 %v14270_v8, 16  ;;  %v6245_v30 = vld [vmem:[#allocation3] sm:$0xff]  ;;  %16352 = vst [vmem:[#allocation123_spill] sm:$0xff] %v14290_v29 }
 0x487   : >> { %v10094_v9 = vpop.f32.mrf.mxu1  ;;  %v6317_v19 = vpack.c.bf16 %v10701_v13, %v6245_v30  ;;  %v5747_v13 = vadd.f32 %v13953_v24, %v13941_v25  ;;  %v6518_v30 = vpop.permute.xlu0 %6517 }
 0x488   : >> { %6132 = vst.msk [vmem:[#allocation3 + $0x1d0] sm:$0xff] %vm334_vm0, %v6099_v33  ;;  %v10095_v26 = vadd.f32 %v10094_v9, %v10093_v52  ;;  %v6058_v61 = vadd.f32 %v6057_v12, %v5897_v22  ;;  %v6289_v12 = vld [vmem:[#allocation3 + $0x160] sm:$0xff]  ;;  %v6470_v52 = vshrl.u32 %v14272_v4, 16  ;;  %v6473_v33 = vshll.u32 %v14272_v4, 16  ;;  %v16353_v22 = vld [vmem:[#allocation100_spill] sm:$0xff] }
 0x489   : >> { %6695 = vrot.lane.b32.xlu1 %v14274_v23, %s10728_s20  ;;  %6752 = vrot.lane.b32.xlu0 %v14281_v59, %s10728_s20  ;;  %v10096_v27 = vpop.f32.mrf.mxu1  ;;  %v5744_v9 = vadd.f32 %v16353_v22, %v13941_v25  ;;  %v6318_v22 = vpack.c.bf16 %v10702_v62, %v10702_v62  ;;  %v14306_v36 = vpack.c.bf16 %v6290_v5, %v6289_v12 }
 0x48a   : >> { %v6100_v55 = vmax.f32 %v6058_v61, 0.0  ;;  %v5900_v17 = vadd.f32 %v10095_v26, %v5739_v58  ;;  %v6293_v26 = vld [vmem:[#allocation3 + $0x180] sm:$0xff]  ;;  %v14297_v61 = vld [vmem:[#allocation3 + $0x188] sm:$0xff]  ;;  %v6472_v60 = vrot.slane %v6470_v52, 4  ;;  %v6475_v46 = vrot.slane %v6473_v33, 5 }
 0x48b   : >> { %v10097_v48 = vpop.f32.mrf.mxu1  ;;  %v14304_v51 = vpack.c.bf16 %v14297_v61, %v6293_v26  ;;  %16355 = vst [vmem:[#allocation113_spill] sm:$0xff] %v14306_v36  ;;  %v6821_v33 = vsel %vm334_vm0, %v6317_v19, %v6518_v30 }
 0x48c   : >> { %6133 = vst.msk [vmem:[#allocation3 + $0x1e8] sm:$0xff] %vm334_vm0, %v6100_v55  ;;  %v10098_v1 = vadd.f32 %v10097_v48, %v10096_v27  ;;  %v6061_v58 = vadd.f32 %v6060_v43, %v5900_v17  ;;  %v6464_v27 = vrot.slane %v6462_v53, 4  ;;  %v6467_v43 = vrot.slane %v6465_v42, 5  ;;  %v6268_v17 = vld [vmem:[#allocation3 + $0xb8] sm:$0xff] }
 0x48d   : >> { %6750 = vrot.lane.b32.xlu1 %v14260_v15, %s10728_s20  ;;  %6754 = vrot.lane.b32.xlu0 %v14290_v29, %s10728_s20  ;;  %v10099_v39 = vpop.f32.mrf.mxu1  ;;  %v6276_v48 = vld [vmem:[#allocation3 + $0xf8] sm:$0xff]  ;;  %16354 = vst [vmem:[#allocation129_spill] sm:$0xff] %v14304_v51  ;;  %v6371_v42 = vpack.c.bf16 %v6272_v14, %v6272_v14  ;;  %v6370_v12 = vpack.c.bf16 %v6268_v17, %v6268_v17 }
 0x48e   : >> { %v5905_v23 = vadd.f32 %v10098_v1, %v5744_v9  ;;  %v6101_v55 = vmax.f32 %v6061_v58, 0.0  ;;  %v6284_v9 = vld [vmem:[#allocation3 + $0x138] sm:$0xff]  ;;  %v6372_v52 = vpack.c.bf16 %v6276_v48, %v6276_v48  ;;  %v14320_v14 = vor.u32 %v6475_v46, %v6472_v60  ;;  %v6291_v58 = vld [vmem:[#allocation3 + $0x170] sm:$0xff] }
 0x48f   : >> { %v10100_v44 = vpop.f32.mrf.mxu1  ;;  %v6288_v1 = vld [vmem:[#allocation3 + $0x158] sm:$0xff]  ;;  %v6374_v26 = vpack.c.bf16 %v6284_v9, %v6284_v9  ;;  %v6600_v17 = vrot.slane %v6371_v42, 5  ;;  %v7085_v48 = vshrl.u32 %v6821_v33, 16  ;;  %v14334_v42 = vpack.c.bf16 %v6291_v58, %v6291_v58 }
 0x490   : >> { %v6066_v62 = vadd.f32 %v14239_v10, %v5905_v23  ;;  %6134 = vst.msk [vmem:[#allocation3 + $0x1f0] sm:$0xff] %vm334_vm0, %v6101_v55  ;;  %v10101_v53 = vadd.f32 %v10100_v44, %v10099_v39  ;;  %v6823_v10 = vsel %vm334_vm0, %v6318_v22, %v6518_v30  ;;  %v6373_v23 = vpack.c.bf16 %v6280_v45, %v6280_v45  ;;  %v6295_v55 = vld [vmem:[#allocation3 + $0x190] sm:$0xff] }
 0x491   : >> { %6705 = vrot.lane.b32.xlu1 %v14304_v51, %s10728_s20  ;;  %6701 = vrot.lane.b32.xlu0 %v14306_v36, %s10728_s20  ;;  %v14318_v44 = vor.u32 %v6467_v43, %v6464_v27  ;;  %16357 = vst [vmem:[#allocation102_spill] sm:$0xff] %v14320_v14  ;;  %v6375_v19 = vpack.c.bf16 %v6288_v1, %v6288_v1  ;;  %v6597_v45 = vrot.slane %v6370_v12, 5  ;;  %v7088_v22 = vshll.u32 %v6821_v33, 16  ;;  %v6292_v27 = vld [vmem:[#allocation3 + $0x178] sm:$0xff] }
 0x492   : >> { %v6102_v25 = vmax.f32 %v6066_v62, 0.0  ;;  %v5908_v24 = vadd.f32 %v10101_v53, %v5747_v13  ;;  %v7092_v46 = vshrl.u32 %v6823_v10, 16  ;;  %v7095_v60 = vshll.u32 %v6823_v10, 16  ;;  %v6248_v53 = vld [vmem:[#allocation3 + $0x18] sm:$0xff]  ;;  %16358 = vst [vmem:[#allocation107_spill] sm:$0xff] %v14334_v42 }
 0x493   : >> { %16356 = vst [vmem:[#allocation130_spill] sm:$0xff] %v14318_v44  ;;  %v14328_v13 = vpack.c.bf16 %v6291_v58, %v6290_v5  ;;  %v14330_v62 = vrot.slane %v6372_v52, 5  ;;  %v14336_v30 = vpack.c.bf16 %v6295_v55, %v6295_v55  ;;  %v14339_v9 = vpack.c.bf16 %v6295_v55, %v14297_v61  ;;  %v6296_v33 = vld [vmem:[#allocation3 + $0x198] sm:$0xff]  ;;  %v6306_v41 = vld [vmem:[#allocation3 + $0x1e8] sm:$0xff] }
 0x494   : >> { %6135 = vst.msk [vmem:[#allocation3 + $0x208] sm:$0xff] %vm334_vm0, %v6102_v25  ;;  %v6069_v39 = vadd.f32 %v14268_v50, %v5908_v24  ;;  %v14332_v50 = vrot.slane %v6373_v23, 5  ;;  %v14341_v12 = vrot.slane %v6374_v26, 5  ;;  %v14344_v1 = vrot.slane %v14147_v37, 5  ;;  %v6300_v24 = vld [vmem:[#allocation3 + $0x1b8] sm:$0xff] }
 0x495   : >> { %6535 = vrot.lane.b32.xlu1 %v14318_v44, %s10728_s20  ;;  %6537 = vrot.lane.b32.xlu0 %v14320_v14, %s10728_s20  ;;  %16359 = vst [vmem:[#allocation114_spill] sm:$0xff] %v14336_v30  ;;  %v7087_v5 = vrot.slane %v7085_v48, 3  ;;  %v14347_v52 = vrot.slane %v6375_v19, 5  ;;  %v6376_v25 = vpack.c.bf16 %v6292_v27, %v6292_v27  ;;  %v7090_v61 = vrot.slane %v7088_v22, 4  ;;  %v6304_v26 = vld [vmem:[#allocation3 + $0x1d8] sm:$0xff] }
 0x496   : >> { %v6103_v43 = vmax.f32 %v6069_v39, 0.0  ;;  %v7094_v10 = vrot.slane %v7092_v46, 3  ;;  %v7097_v23 = vrot.slane %v7095_v60, 4  ;;  %v6365_v58 = vpack.c.bf16 %v6248_v53, %v6248_v53  ;;  %v6308_v37 = vld [vmem:[#allocation3 + $0x1f8] sm:$0xff]  ;;  %v6297_v53 = vld [vmem:[#allocation3 + $0x1a0] sm:$0xff] }
 0x497   : >> { %v7227_v39 = vshrl.u32 %v14233_v7, 16  ;;  %v7230_v55 = vshll.u32 %v14233_v7, 16  ;;  %v6478_v48 = vshrl.u32 %v14328_v13, 16  ;;  %v6377_v19 = vpack.c.bf16 %v6296_v33, %v6296_v33  ;;  %v6312_v27 = vld [vmem:[#allocation3 + $0x218] sm:$0xff] }
 0x498   : >> { %6136 = vst.msk [vmem:[#allocation3 + $0x210] sm:$0xff] %vm334_vm0, %v6103_v43  ;;  %v6481_v43 = vshll.u32 %v14328_v13, 16  ;;  %v6486_v14 = vshrl.u32 %v14339_v9, 16  ;;  %v6489_v44 = vshll.u32 %v14339_v9, 16  ;;  %v6378_v22 = vpack.c.bf16 %v6300_v24, %v6300_v24 }
 0x499   : >> { %6703 = vrot.lane.b32.xlu1 %v14334_v42, %s10728_s20  ;;  %6707 = vrot.lane.b32.xlu0 %v14336_v30, %s10728_s20  ;;  %v14361_v46 = vsel %vm953_vm1, %v14290_v29, %v6597_v45  ;;  %v14365_v60 = vsel %vm953_vm1, %v14344_v1, %v6600_v17  ;;  %v6298_v30 = vld [vmem:[#allocation3 + $0x1a8] sm:$0xff]  ;;  %v6379_v51 = vpack.c.bf16 %v6304_v26, %v6304_v26  ;;  %v6582_v36 = vrot.slane %v6365_v58, 5 }
 0x49a   : >> { %16360 = vst [vmem:[#allocation131_spill] sm:$0xff] %v14361_v46  ;;  %v6380_v33 = vpack.c.bf16 %v6308_v37, %v6308_v37  ;;  %v7091_v42 = vor.u32 %v7090_v61, %v7087_v5  ;;  %v7098_v24 = vor.u32 %v7097_v23, %v7094_v10  ;;  %v6384_v11 = vpack.c.bf16 %v6312_v27, %v6312_v27  ;;  %v6315_v23 = vld [vmem:[#allocation3 + $0x230] sm:$0xff] }
 0x49b   : >> { %v14371_v45 = vrot.slane %v7227_v39, 3  ;;  %v14373_v63 = vrot.slane %v7230_v55, 4  ;;  %v6480_v17 = vrot.slane %v6478_v48, 4  ;;  %v14378_v26 = vpack.c.bf16 %v6298_v30, %v6297_v53  ;;  %v6299_v27 = vld [vmem:[#allocation3 + $0x1b0] sm:$0xff] }
 0x49c   : >> { %v6483_v37 = vrot.slane %v6481_v43, 5  ;;  %v6488_v21 = vrot.slane %v6486_v14, 4  ;;  %v6491_v0 = vrot.slane %v6489_v44, 5  ;;  %v14381_v16 = vrot.slane %v6376_v25, 5  ;;  %v6314_v25 = vld [vmem:[#allocation3 + $0x228] sm:$0xff]  ;;  %v6303_v53 = vld [vmem:[#allocation3 + $0x1d0] sm:$0xff] }
 0x49d   : >> { %6756 = vrot.lane.b32.xlu1 %v14361_v46, %s10728_s20  ;;  %6760 = vrot.lane.b32.xlu0 %v14365_v60, %s10728_s20  ;;  %16361 = vst [vmem:[#allocation115_spill] sm:$0xff] %v14378_v26  ;;  %v7145_v5 = vshrl.u32 %v14138_v28, 16  ;;  %v7148_v61 = vshll.u32 %v14138_v28, 16  ;;  %v14389_v35 = vrot.slane %v6377_v19, 5  ;;  %v14391_v10 = vrot.slane %v6378_v22, 5 }
 0x49e   : >> { %v14393_v14 = vrot.slane %v6379_v51, 5  ;;  %v14395_v44 = vrot.slane %v6380_v33, 5  ;;  %v14402_v39 = vsel %vm953_vm1, %v15928_v54, %v6582_v36  ;;  %v14405_v55 = vsel %vm1458_vm2, %v7091_v42, %v7098_v24 }
 0x49f   : >> { %16363 = vst [vmem:[#allocation133_spill] sm:$0xff] %v14405_v55  ;;  %v14407_v48 = vrot.slane %v6384_v11, 5  ;;  %v14409_v19 = vor.u32 %v6483_v37, %v6480_v17  ;;  %v14411_v51 = vor.u32 %v6491_v0, %v6488_v21  ;;  %v14416_v43 = vsel %vm953_vm1, %v14376_v32, %v14330_v62  ;;  %v6302_v37 = vld [vmem:[#allocation3 + $0x1c8] sm:$0xff] }
 0x4a0   : >> { %v7152_v22 = vshrl.u32 %v14158_v57, 16  ;;  %v14419_v36 = vpack.c.bf16 %v6315_v23, %v6314_v25  ;;  %v14421_v33 = vrot.slane %v7145_v5, 3  ;;  %v14423_v42 = vrot.slane %v7148_v61, 4 }
 0x4a1   : >> { %6758 = vrot.lane.b32.xlu1 %v14344_v1, %s10728_s20  ;;  %6709 = vrot.lane.b32.xlu0 %v14378_v26, %s10728_s20  ;;  %16364 = vst [vmem:[#allocation108_spill] sm:$0xff] %v14407_v48  ;;  %16365 = vst [vmem:[#allocation136_spill] sm:$0xff] %v14409_v19  ;;  %v7155_v11 = vshll.u32 %v14158_v57, 16  ;;  %v14427_v0 = vrot.slane %v14197_v49, 5  ;;  %v7347_v21 = vshrl.u32 %v14361_v46, 16  ;;  %v7350_v24 = vshll.u32 %v14361_v46, 16 }
 0x4a2   : >> { %16366 = vst [vmem:[#allocation111_spill] sm:$0xff] %v14411_v51  ;;  %16367 = vst [vmem:[#allocation110_spill] sm:$0xff] %v14419_v36  ;;  %v14436_v62 = vrot.slane %v14270_v8, 5  ;;  %v14438_v17 = vpack.c.bf16 %v6299_v27, %v6298_v30  ;;  %v7220_v61 = vshrl.u32 %v14167_v56, 16  ;;  %v14443_v25 = vpack.c.bf16 %v6299_v27, %v6299_v27  ;;  %v6305_v46 = vld [vmem:[#allocation3 + $0x1e0] sm:$0xff] }
 0x4a3   : >> { %v14445_v23 = vpack.c.bf16 %v6303_v53, %v6303_v53  ;;  %v14447_v54 = vpack.c.bf16 %v6303_v53, %v6302_v37  ;;  %v7154_v58 = vrot.slane %v7152_v22, 3  ;;  %v6803_v8 = vshrl.u32 %v14419_v36, 16 }
 0x4a4   : >> { %16368 = vst [vmem:[#allocation112_spill] sm:$0xff] %v14443_v25  ;;  %v6806_v30 = vshll.u32 %v14419_v36, 16  ;;  %v7157_v5 = vrot.slane %v7155_v11, 4  ;;  %v14460_v27 = vsel %vm953_vm1, %v14436_v62, %v14341_v12  ;;  %v7223_v22 = vshll.u32 %v14167_v56, 16 }
 0x4a5   : >> { %6539 = vrot.lane.b32.xlu1 %v14409_v19, %s10728_s20  ;;  %6541 = vrot.lane.b32.xlu0 %v14411_v51, %s10728_s20  ;;  %16369 = vst [vmem:[#allocation135_spill] sm:$0xff] %v14445_v23  ;;  %v6301_v51 = vld [vmem:[#allocation3 + $0x1c0] sm:$0xff]  ;;  %v7151_v19 = vor.u32 %v14423_v42, %v14421_v33  ;;  %v7280_v53 = vshrl.u32 %v14260_v15, 16  ;;  %v7283_v49 = vshll.u32 %v14260_v15, 16  ;;  %v6494_v33 = vshrl.u32 %v14438_v17, 16 }
 0x4a6   : >> { %v7287_v42 = vshrl.u32 %v14281_v59, 16  ;;  %v7290_v11 = vshll.u32 %v14281_v59, 16  ;;  %v7340_v36 = vshrl.u32 %v14290_v29, 16  ;;  %v6502_v12 = vshrl.u32 %v14447_v54, 16 }
 0x4a7   : >> { %v6505_v26 = vshll.u32 %v14447_v54, 16  ;;  %v14474_v3 = vrot.slane %v6803_v8, 4  ;;  %v14476_v47 = vrot.slane %v6806_v30, 5  ;;  %v7158_v15 = vor.u32 %v7157_v5, %v7154_v58 }
 0x4a8   : >> { %v7343_v7 = vshll.u32 %v14290_v29, 16  ;;  %v7282_v59 = vrot.slane %v7280_v53, 3  ;;  %v7285_v57 = vrot.slane %v7283_v49, 4  ;;  %v6496_v34 = vrot.slane %v6494_v33, 4 }
 0x4a9   : >> { %6711 = vrot.lane.b32.xlu1 %v14443_v25, %s10728_s20  ;;  %6715 = vrot.lane.b32.xlu0 %v14445_v23, %s10728_s20  ;;  %v14469_v23 = vpack.c.bf16 %v6302_v37, %v6301_v51  ;;  %v6497_v25 = vshll.u32 %v14438_v17, 16  ;;  %v7222_v51 = vrot.slane %v7220_v61, 3  ;;  %v7225_v37 = vrot.slane %v7223_v22, 4 }
 0x4aa   : >> { %v7289_v6 = vrot.slane %v7287_v42, 3  ;;  %v7292_v2 = vrot.slane %v7290_v11, 4  ;;  %v7342_v8 = vrot.slane %v7340_v36, 3  ;;  %v14483_v18 = vpack.c.bf16 %v6306_v41, %v6305_v46 }
 0x4ab   : >> { %16370 = vst [vmem:[#allocation134_spill] sm:$0xff] %v14469_v23  ;;  %v6499_v30 = vrot.slane %v6497_v25, 5  ;;  %v6504_v58 = vrot.slane %v6502_v12, 4  ;;  %v6507_v5 = vrot.slane %v6505_v26, 5  ;;  %v14486_v29 = vrot.slane %v14328_v13, 5 }
 0x4ac   : >> { %v7349_v55 = vrot.slane %v7347_v21, 3  ;;  %v7352_v48 = vrot.slane %v7350_v24, 4  ;;  %v14495_v46 = vsel %vm953_vm1, %v14427_v0, %v14332_v50  ;;  %v14498_v36 = vrot.slane %v14272_v4, 5  ;;  %v6307_v4 = vld [vmem:[#allocation3 + $0x1f0] sm:$0xff] }
 0x4ad   : >> { %6713 = vrot.lane.b32.xlu1 %v14469_v23, %s10728_s20  ;;  %6762 = vrot.lane.b32.xlu0 %v14376_v32, %s10728_s20  ;;  %v7345_v23 = vrot.slane %v7343_v7, 4  ;;  %v7400_v13 = vshrl.u32 %v14344_v1, 16  ;;  %v7403_v7 = vshll.u32 %v14344_v1, 16  ;;  %v7226_v49 = vor.u32 %v7225_v37, %v7222_v51  ;;  %v6310_v51 = vld [vmem:[#allocation3 + $0x208] sm:$0xff] }
 0x4ae   : >> { %v14506_v61 = vor.u32 %v6499_v30, %v6496_v34  ;;  %v14508_v25 = vor.u32 %v6507_v5, %v6504_v58  ;;  %v7286_v50 = vor.u32 %v7285_v57, %v7282_v59  ;;  %v7293_v22 = vor.u32 %v7292_v2, %v7289_v6  ;;  %v6311_v34 = vld [vmem:[#allocation3 + $0x210] sm:$0xff] }
 0x4af   : >> { %v14513_v53 = vsel %vm953_vm1, %v14486_v29, %v14381_v16  ;;  %v14516_v33 = vsel %vm1458_vm2, %v7151_v19, %v7158_v15  ;;  %v7346_v42 = vor.u32 %v7345_v23, %v7342_v8  ;;  %v7353_v11 = vor.u32 %v7352_v48, %v7349_v55 }
 0x4b0   : >> { %16371 = vst [vmem:[#allocation132_spill] sm:$0xff] %v14506_v61  ;;  %16372 = vst [vmem:[#allocation87_spill] sm:$0xff] %v14508_v25  ;;  %v14525_v2 = vsel %vm953_vm1, %v14498_v36, %v14347_v52  ;;  %v14527_v6 = vrot.slane %v7400_v13, 3  ;;  %v14529_v16 = vrot.slane %v7403_v7, 4  ;;  %v7407_v57 = vshrl.u32 %v14365_v60, 16 }
 0x4b1   : >> { %6764 = vrot.lane.b32.xlu1 %v14416_v43, %s10728_s20  ;;  %6717 = vrot.lane.b32.xlu0 %v14483_v18, %s10728_s20  ;;  %16373 = vst [vmem:[#allocation86_spill] sm:$0xff] %v14516_v33  ;;  %v14533_v15 = vrot.slane %v14339_v9, 5  ;;  %v14536_v59 = vrot.slane %v14438_v17, 5  ;;  %v16374_v55 = vor.u32 %v14373_v63, %v14371_v45  ;;  %v7410_v52 = vshll.u32 %v14365_v60, 16 }
 0x4b2   : >> { %v14545_v23 = vpack.c.bf16 %v6307_v4, %v6307_v4  ;;  %v6364_v12 = vpack.c.bf16 %v6307_v4, %v6306_v41  ;;  %v14549_v9 = vsel %vm1458_vm2, %v7286_v50, %v7293_v22  ;;  %v16377_v17 = vrot.slane %v16362_v20, 5 }
 0x4b3   : >> { %v14542_v48 = vsel %vm1458_vm2, %v7226_v49, %v16374_v55  ;;  %16376 = vst [vmem:[#allocation91_spill] sm:$0xff] %v14549_v9  ;;  %v6383_v63 = vpack.c.bf16 %v6311_v34, %v6310_v51  ;;  %v14556_v30 = vsel %vm1458_vm2, %v7346_v42, %v7353_v11  ;;  %v14564_v20 = vrot.slane %v7407_v57, 3  ;;  %v6309_v11 = vld [vmem:[#allocation3 + $0x200] sm:$0xff] }
 0x4b4   : >> { %16375 = vst [vmem:[#allocation88_spill] sm:$0xff] %v14542_v48  ;;  %16378 = vst [vmem:[#allocation93_spill] sm:$0xff] %v14556_v30  ;;  %v14569_v13 = vsel %vm953_vm1, %v14533_v15, %v14389_v35  ;;  %v14574_v7 = vsel %vm953_vm1, %v14536_v59, %v14391_v10  ;;  %v14576_v49 = vrot.slane %v7410_v52, 4  ;;  %v14579_v42 = vpack.c.bf16 %v6311_v34, %v6311_v34 }
 0x4b5   : >> { %6543 = vrot.lane.b32.xlu1 %v14506_v61, %s10728_s20  ;;  %6545 = vrot.lane.b32.xlu0 %v14508_v25, %s10728_s20  ;;  %v6510_v57 = vshrl.u32 %v6364_v12, 16  ;;  %v6513_v55 = vshll.u32 %v6364_v12, 16  ;;  %v6726_v52 = vshrl.u32 %v6383_v63, 16 }
 0x4b6   : >> { %16379 = vst [vmem:[#allocation92_spill] sm:$0xff] %v14579_v42 }
 0x4b7   : >> { %v6662_v19 = vpop.permute.xlu0 %6661  ;;  %v6728_v24 = vrot.slane %v6726_v52, 4 }
 0x4b8   : >> { %v6901_v8 = vsel %vm334_vm0, %v16377_v17, %v6662_v19  ;;  %v14582_v19 = vrot.slane %v14447_v54, 5  ;;  %v6729_v17 = vshll.u32 %v6383_v63, 16  ;;  %v14592_v54 = vrot.slane %v6364_v12, 5 }
 0x4b9   : >> { %v7100_v58 = vshrl.u32 %v6901_v8, 16  ;;  %v7103_v5 = vshll.u32 %v6901_v8, 16  ;;  %6719 = vrot.lane.b32.xlu1 %v14545_v23, %s10728_s20  ;;  %6768 = vrot.lane.b32.xlu0 %v14495_v46, %s10728_s20 }
 0x4bb   : >> { %v6664_v22 = vpop.permute.xlu1 %6663  ;;  %v6668_v4 = vpop.permute.xlu0 %6667  ;;  %v7102_v8 = vrot.slane %v7100_v58, 3  ;;  %v7105_v45 = vrot.slane %v7103_v5, 4  ;;  %v6512_v58 = vrot.slane %v6510_v57, 4  ;;  %v6515_v5 = vrot.slane %v6513_v55, 5 }
 0x4bc   : >> { %v6904_v35 = vsel %vm334_vm0, %v14402_v39, %v6664_v22  ;;  %v6910_v10 = vsel %vm334_vm0, %v14110_v38, %v6668_v4  ;;  %v14594_v39 = vpack.c.bf16 %v6310_v51, %v6309_v11  ;;  %v6731_v51 = vrot.slane %v6729_v17, 5 }
 0x4bd   : >> { %v7107_v37 = vshrl.u32 %v6904_v35, 16  ;;  %v7110_v21 = vshll.u32 %v6904_v35, 16  ;;  %6766 = vrot.lane.b32.xlu1 %v14427_v0, %s10728_s20  ;;  %6723 = vrot.lane.b32.xlu0 %v14579_v42, %s10728_s20  ;;  %v7182_v34 = vshrl.u32 %v6910_v10, 16  ;;  %v7185_v26 = vshll.u32 %v6910_v10, 16 }
 0x4be   : >> { %16380 = vst [vmem:[#allocation94_spill] sm:$0xff] %v14594_v39  ;;  %v14600_v42 = vrot.slane %v6383_v63, 5 }
 0x4bf   : >> { %v7109_v22 = vrot.slane %v7107_v37, 3  ;;  %v7112_v38 = vrot.slane %v7110_v21, 4  ;;  %v6666_v4 = vpop.permute.xlu1 %6665  ;;  %v6739_v41 = vpop.permute.xlu0 %6738  ;;  %v7106_v21 = vor.u32 %v7105_v45, %v7102_v8  ;;  %v7184_v37 = vrot.slane %v7182_v34, 3 }
 0x4c0   : >> { %v6907_v35 = vsel %vm334_vm0, %v14026_v31, %v6666_v4  ;;  %v6997_v50 = vsel %vm334_vm0, %v14059_v40, %v6739_v41  ;;  %16381 = vst [vmem:[#allocation97_spill] sm:$0xff] %v14600_v42  ;;  %v7187_v11 = vrot.slane %v7185_v26, 4  ;;  %v14606_v4 = vor.u32 %v6515_v5, %v6512_v58 }
 0x4c1   : >> { %v7175_v12 = vshrl.u32 %v6907_v35, 16  ;;  %v7178_v25 = vshll.u32 %v6907_v35, 16  ;;  %6721 = vrot.lane.b32.xlu1 %v14594_v39, %s10728_s20  ;;  %6770 = vrot.lane.b32.xlu0 %v14436_v62, %s10728_s20  ;;  %v7115_v31 = vshrl.u32 %v6997_v50, 16  ;;  %v7113_v57 = vor.u32 %v7112_v38, %v7109_v22  ;;  %v16385_v38 = vld [vmem:[#allocation133_spill] sm:$0xff] }
 0x4c2   : >> { %v7118_v10 = vshll.u32 %v6997_v50, 16  ;;  %16382 = vst [vmem:[#allocation99_spill] sm:$0xff] %v14606_v4  ;;  %v14618_v26 = vsel %vm953_vm1, %v14582_v19, %v14393_v14  ;;  %v14623_v8 = vor.u32 %v6731_v51, %v6728_v24  ;;  %v7188_v58 = vor.u32 %v7187_v11, %v7184_v37  ;;  %v16388_v11 = vld [vmem:[#allocation76_spill] sm:$0xff] }
 0x4c3   : >> { %v7177_v55 = vrot.slane %v7175_v12, 3  ;;  %v7180_v41 = vrot.slane %v7178_v25, 4  ;;  %v6674_v63 = vpop.permute.xlu1 %6673  ;;  %v6670_v52 = vpop.permute.xlu0 %6669  ;;  %v7114_v17 = vsel %vm1458_vm2, %v7106_v21, %v7113_v57  ;;  %v10696_v25 = vld [vmem:[%s13849_s28 + $0x110] sm:$0xff]   ;;  %v14635_v14 = vrot.slane %v7115_v31, 3  ;;  %v10703_v57 = vld [vmem:[%s13849_s28 + $0x118] sm:$0xff]  }
 0x4c4   : >> { %v14610_v35 = vsel %vm334_vm0, %v14167_v56, %v6674_v63  ;;  %v6913_v45 = vsel %vm334_vm0, %v14138_v28, %v6670_v52  ;;  %8431 = vmatprep.mubr.bf16.mxu1 %v7114_v17  ;;  %16383 = vst [vmem:[#allocation98_spill] sm:$0xff] %v14623_v8  ;;  %v14628_v28 = vsel %vm953_vm1, %v14592_v54, %v14395_v44  ;;  %v16384_v56 = vld [vmem:[#allocation108_spill] sm:$0xff]  ;;  %v14640_v5 = vrot.slane %v7118_v10, 4  ;;  %v16386_v52 = vld [vmem:[#allocation103_spill] sm:$0xff] }
 0x4c5   : >> { %v7235_v50 = vshrl.u32 %v6913_v45, 16  ;;  %6547 = vrot.lane.b32.xlu1 %v14606_v4, %s10728_s20  ;;  %v14633_v34 = vsel %vm953_vm1, %v14600_v42, %v16384_v56  ;;  %v7238_v22 = vshll.u32 %v6913_v45, 16  ;;  %6774 = vrot.lane.b32.xlu0 %v14498_v36, %s10728_s20  ;;  %v7181_v24 = vor.u32 %v7180_v41, %v7177_v55  ;;  %v16387_v17 = vld [vmem:[#allocation104_spill] sm:$0xff]  ;;  %v10697_v41 = vld [vmem:[%s13849_s28 + $0x108] sm:$0xff]  }
 0x4c6   : >> { %8432 = vmatmul.mubr.bf16.vlgmr.msra.gmra.mxu1 %v16385_v38  ;;  %v7295_v44 = vshrl.u32 %v14610_v35, 16  ;;  %v7298_v12 = vshll.u32 %v14610_v35, 16 }
 0x4c7   : >> { %v14644_v21 = vrot.slane %v7235_v50, 3  ;;  %v6520_v51 = vpop.permute.xlu1 %6519  ;;  %v6522_v31 = vpop.permute.xlu0 %6521  ;;  %10467 = vmatpush3.bf16.msra.mxu1 %v10703_v57  ;;  %v14647_v63 = vrot.slane %v7238_v22, 4  ;;  %v16389_v22 = vld [vmem:[#allocation105_spill] sm:$0xff] }
 0x4c8   : >> { %v6826_v45 = vsel %vm334_vm0, %v16386_v52, %v6520_v51  ;;  %v6828_v37 = vsel %vm334_vm0, %v16387_v17, %v6520_v51  ;;  %v6831_v55 = vsel %vm334_vm0, %v16388_v11, %v6522_v31  ;;  %10468 = vmatprep.subr.bf16.mxu1 %v10696_v25  ;;  %v6833_v38 = vsel %vm334_vm0, %v16389_v22, %v6522_v31  ;;  %v16390_v22 = vld [vmem:[#allocation116_spill] sm:$0xff] }
 0x4c9   : >> { %v7160_v10 = vshrl.u32 %v6826_v45, 16  ;;  %v7163_v35 = vshll.u32 %v6826_v45, 16  ;;  %v7167_v50 = vshrl.u32 %v6828_v37, 16  ;;  %v7170_v56 = vshll.u32 %v6828_v37, 16  ;;  %6772 = vrot.lane.b32.xlu1 %v14460_v27, %s10728_s20  ;;  %6778 = vrot.lane.b32.xlu0 %v14486_v29, %s10728_s20 }
 0x4ca   : >> { %v7130_v57 = vshrl.u32 %v6831_v55, 16  ;;  %v7133_v52 = vshll.u32 %v6831_v55, 16  ;;  %v7189_v51 = vsel %vm1458_vm2, %v7181_v24, %v7188_v58  ;;  %v7137_v9 = vshrl.u32 %v6833_v38, 16  ;;  %v10698_v55 = vld [vmem:[%s13849_s28 + $0x100] sm:$0xff]   ;;  %v16391_v58 = vld [vmem:[#allocation96_spill] sm:$0xff] }
 0x4cb   : >> { %v7162_v17 = vrot.slane %v7160_v10, 3  ;;  %v7165_v11 = vrot.slane %v7163_v35, 4  ;;  %v7169_v4 = vrot.slane %v7167_v50, 3  ;;  %v7172_v45 = vrot.slane %v7170_v56, 4  ;;  %8439 = vmatprep.mubr.bf16.mxu1 %v7189_v51  ;;  %v6672_v37 = vpop.permute.xlu1 %6671  ;;  %v6676_v39 = vpop.permute.xlu0 %6675  ;;  %10469 = vmatpush3.bf16.msra.mxu1 %v10696_v25 }
 0x4cc   : >> { %v7132_v61 = vrot.slane %v7130_v57, 3  ;;  %v7135_v30 = vrot.slane %v7133_v52, 4  ;;  %v7140_v31 = vshll.u32 %v6833_v38, 16  ;;  %10470 = vmatprep.subr.bf16.mxu1 %v10697_v41  ;;  %v6916_v24 = vsel %vm334_vm0, %v16390_v22, %v6672_v37 }
 0x4cd   : >> { %v6922_v48 = vsel %vm334_vm0, %v16391_v58, %v6676_v39  ;;  %6776 = vrot.lane.b32.xlu1 %v14525_v2, %s10728_s20  ;;  %v7166_v10 = vor.u32 %v7165_v11, %v7162_v17  ;;  %v7173_v35 = vor.u32 %v7172_v45, %v7169_v4  ;;  %v7139_v50 = vrot.slane %v7137_v9, 3  ;;  %6782 = vrot.lane.b32.xlu0 %v14533_v15, %s10728_s20  ;;  %v16392_v9 = vld [vmem:[#allocation128_spill] sm:$0xff] }
 0x4ce   : >> { %v7142_v56 = vrot.slane %v7140_v31, 4  ;;  %v7242_v25 = vshrl.u32 %v6916_v24, 16  ;;  %v7245_v57 = vshll.u32 %v6916_v24, 16  ;;  %v7302_v38 = vshrl.u32 %v6922_v48, 16 }
 0x4cf   : >> { %v7305_v52 = vshll.u32 %v6922_v48, 16  ;;  %v6741_v51 = vpop.permute.xlu1 %6740  ;;  %v6678_v33 = vpop.permute.xlu0 %6677  ;;  %v7174_v37 = vsel %vm1458_vm2, %v7166_v10, %v7173_v35  ;;  %v7136_v22 = vor.u32 %v7135_v30, %v7132_v61  ;;  %10471 = vmatpush3.bf16.msra.mxu1 %v10697_v41  ;;  %v14677_v11 = vrot.slane %v7295_v44, 3 }
 0x4d0   : >> { %v7244_v39 = vrot.slane %v7242_v25, 3  ;;  %v7247_v58 = vrot.slane %v7245_v57, 4  ;;  %v6999_v4 = vsel %vm334_vm0, %v14059_v40, %v6741_v51  ;;  %v6925_v17 = vsel %vm334_vm0, %v16392_v9, %v6678_v33  ;;  %8440 = vmatmul.mubr.bf16.gmra.mxu1 %v7174_v37  ;;  %10472 = vmatprep.subr.bf16.mxu1 %v10698_v55  ;;  %v16393_v51 = vld [vmem:[#allocation123_spill] sm:$0xff] }
 0x4d1   : >> { %v14679_v45 = vrot.slane %v7298_v12, 4  ;;  %v7122_v48 = vshrl.u32 %v6999_v4, 16  ;;  %v7125_v31 = vshll.u32 %v6999_v4, 16  ;;  %6780 = vrot.lane.b32.xlu1 %v14513_v53, %s10728_s20  ;;  %v7121_v61 = vor.u32 %v14640_v5, %v14635_v14  ;;  %6786 = vrot.lane.b32.xlu0 %v14536_v59, %s10728_s20 }
 0x4d2   : >> { %v14685_v30 = vrot.slane %v7302_v38, 3  ;;  %v7355_v40 = vshrl.u32 %v6925_v17, 16  ;;  %v7143_v41 = vor.u32 %v7142_v56, %v7139_v50  ;;  %v7358_v24 = vshll.u32 %v6925_v17, 16  ;;  %v16394_v38 = vld [vmem:[#allocation106_spill] sm:$0xff] }
 0x4d3   : >> { %v7124_v33 = vrot.slane %v7122_v48, 3  ;;  %v7127_v44 = vrot.slane %v7125_v31, 4  ;;  %v6682_v12 = vpop.permute.xlu1 %6681  ;;  %v6526_v10 = vpop.permute.xlu0 %6525  ;;  %v7248_v35 = vor.u32 %v7247_v58, %v7244_v39  ;;  %10473 = vmatpush3.bf16.msra.mxu1 %v10698_v55  ;;  %v7307_v25 = vrot.slane %v7305_v52, 4 }
 0x4d4   : >> { %v7144_v57 = vsel %vm1458_vm2, %v7136_v22, %v7143_v41  ;;  %v6931_v14 = vsel %vm334_vm0, %v16393_v51, %v6682_v12  ;;  %v7241_v5 = vor.u32 %v14647_v63, %v14644_v21  ;;  %v6841_v37 = vsel %vm334_vm0, %v16394_v38, %v6526_v10  ;;  %v16395_v22 = vld [vmem:[#allocation79_spill] sm:$0xff]  ;;  %v16396_v41 = vld [vmem:[#allocation77_spill] sm:$0xff] }
 0x4d5   : >> { %8592 = vmatprep.mubr.bf16.mxu0 %v7144_v57  ;;  %v7415_v50 = vshrl.u32 %v6931_v14, 16  ;;  %v7418_v56 = vshll.u32 %v6931_v14, 16  ;;  %6784 = vrot.lane.b32.xlu1 %v14569_v13, %s10728_s20  ;;  %v7301_v55 = vor.u32 %v14679_v45, %v14677_v11  ;;  %v7128_v52 = vor.u32 %v7127_v44, %v7124_v33  ;;  %v16397_v44 = vld [vmem:[#allocation78_spill] sm:$0xff] }
 0x4d6   : >> { %v6843_v39 = vsel %vm334_vm0, %v16395_v22, %v6526_v10  ;;  %v7265_v58 = vshrl.u32 %v6841_v37, 16  ;;  %v7249_v4 = vsel %vm1458_vm2, %v7241_v5, %v7248_v35  ;;  %6790 = vrot.lane.b32.xlu0 %v14582_v19, %s10728_s20  ;;  %v14705_v21 = vrot.slane %v7355_v40, 3  ;;  %v16398_v5 = vld [vmem:[#allocation131_spill] sm:$0xff] }
 0x4d7   : >> { %v14707_v63 = vrot.slane %v7358_v24, 4  ;;  %v7268_v9 = vshll.u32 %v6841_v37, 16  ;;  %v7272_v17 = vshrl.u32 %v6843_v39, 16  ;;  %8447 = vmatprep.mubr.bf16.mxu1 %v7249_v4  ;;  %v6524_v48 = vpop.permute.xlu1 %6523  ;;  %v6684_v31 = vpop.permute.xlu0 %6683  ;;  %v14709_v11 = vrot.slane %v7415_v50, 3 }
 0x4d8   : >> { %v14711_v45 = vrot.slane %v7418_v56, 4  ;;  %v6836_v33 = vsel %vm334_vm0, %v16396_v41, %v6524_v48  ;;  %v6838_v12 = vsel %vm334_vm0, %v16397_v44, %v6524_v48  ;;  %8448 = vmatmul.mubr.bf16.gmra.mxu1 %v7144_v57  ;;  %v14717_v40 = vrot.slane %v7265_v58, 3 }
 0x4d9   : >> { %v7275_v24 = vshll.u32 %v6843_v39, 16  ;;  %v7205_v10 = vshrl.u32 %v6836_v33, 16  ;;  %v7208_v35 = vshll.u32 %v6836_v33, 16  ;;  %6788 = vrot.lane.b32.xlu1 %v14574_v7, %s10728_s20  ;;  %v7212_v51 = vshrl.u32 %v6838_v12, 16  ;;  %v16399_v33 = vld [vmem:[#allocation82_spill] sm:$0xff] }
 0x4da   : >> { %v7215_v14 = vshll.u32 %v6838_v12, 16  ;;  %v6934_v50 = vsel %vm334_vm0, %v16398_v5, %v6684_v31  ;;  %v7129_v56 = vsel %vm1458_vm2, %v7121_v61, %v7128_v52  ;;  %6810 = vrot.lane.b32.xlu0 %v14623_v8, %s10728_s20  ;;  %v14726_v38 = vrot.slane %v7268_v9, 4 }
 0x4db   : >> { %v14728_v57 = vrot.slane %v7272_v17, 3  ;;  %v7207_v37 = vrot.slane %v7205_v10, 3  ;;  %v7210_v22 = vrot.slane %v7208_v35, 4  ;;  %8593 = vmatmul.mubr.bf16.vlgmr.msra.gmra.mxu0 %v7129_v56  ;;  %v6680_v39 = vpop.permute.xlu1 %6679  ;;  %v6745_v58 = vpop.permute.xlu0 %6744  ;;  %v7214_v4 = vrot.slane %v7212_v51, 3  ;;  %v16400_v17 = vld [vmem:[#allocation109_spill] sm:$0xff] }
 0x4dc   : >> { %v7217_v48 = vrot.slane %v7215_v14, 4  ;;  %v7308_v41 = vor.u32 %v7307_v25, %v14685_v30  ;;  %v6928_v31 = vsel %vm334_vm0, %v16399_v33, %v6680_v39  ;;  %v7277_v61 = vrot.slane %v7275_v24, 4 }
 0x4dd   : >> { %v7422_v52 = vshrl.u32 %v6934_v50, 16  ;;  %v7362_v44 = vshrl.u32 %v6928_v31, 16  ;;  %v7365_v12 = vshll.u32 %v6928_v31, 16  ;;  %6792 = vrot.lane.b32.xlu1 %v14618_v26, %s10728_s20  ;;  %v7004_v10 = vsel %vm334_vm0, %v16400_v17, %v6745_v58 }
 0x4de   : >> { %v7309_v9 = vsel %vm1458_vm2, %v7301_v55, %v7308_v41  ;;  %6796 = vrot.lane.b32.xlu0 %v14628_v28, %s10728_s20  ;;  %v7211_v35 = vor.u32 %v7210_v22, %v7207_v37  ;;  %v7218_v30 = vor.u32 %v7217_v48, %v7214_v4  ;;  %v7197_v24 = vshrl.u32 %v7004_v10, 16  ;;  %v16401_v55 = vld [vmem:[#allocation117_spill] sm:$0xff] }
 0x4df   : >> { %8455 = vmatprep.mubr.bf16.mxu1 %v7309_v9  ;;  %v7364_v25 = vrot.slane %v7362_v44, 3  ;;  %v7367_v51 = vrot.slane %v7365_v12, 4  ;;  %v7200_v14 = vshll.u32 %v7004_v10, 16  ;;  %v6743_v5 = vpop.permute.xlu1 %6742  ;;  %v6747_v56 = vpop.permute.xlu0 %6746  ;;  %v7425_v39 = vshll.u32 %v6934_v50, 16 }
 0x4e0   : >> { %v7002_v33 = vsel %vm334_vm0, %v16400_v17, %v6743_v5  ;;  %v7007_v41 = vsel %vm334_vm0, %v16401_v55, %v6747_v56  ;;  %v7219_v58 = vsel %vm1458_vm2, %v7211_v35, %v7218_v30  ;;  %v14745_v31 = vrot.slane %v7197_v24, 3 }
 0x4e1   : >> { %v14747_v37 = vrot.slane %v7200_v14, 4  ;;  %v7190_v22 = vshrl.u32 %v7002_v33, 16  ;;  %v7193_v4 = vshll.u32 %v7002_v33, 16  ;;  %8456 = vmatmul.mubr.bf16.gmra.mxu1 %v7219_v58  ;;  %8600 = vmatprep.mubr.bf16.mxu0 %v7219_v58  ;;  %v14749_v48 = vrot.slane %v7422_v52, 3 }
 0x4e2   : >> { %v7250_v44 = vshrl.u32 %v7007_v41, 16  ;;  %v7253_v50 = vshll.u32 %v7007_v41, 16  ;;  %6794 = vrot.lane.b32.xlu1 %v14592_v54, %s10728_s20  ;;  %6798 = vrot.lane.b32.xlu0 %v14600_v42, %s10728_s20  ;;  %v7368_v12 = vor.u32 %v7367_v51, %v7364_v25  ;;  %v7271_v30 = vor.u32 %v14726_v38, %v14717_v40 }
 0x4e3   : >> { %v7192_v9 = vrot.slane %v7190_v22, 3  ;;  %v7195_v17 = vrot.slane %v7193_v4, 4  ;;  %v6690_v10 = vpop.permute.xlu1 %6689  ;;  %v6686_v35 = vpop.permute.xlu0 %6685  ;;  %v7278_v24 = vor.u32 %v7277_v61, %v14728_v57  ;;  %v7427_v52 = vrot.slane %v7425_v39, 4 }
 0x4e4   : >> { %v6943_v14 = vsel %vm334_vm0, %v14376_v32, %v6690_v10  ;;  %v6937_v5 = vsel %vm334_vm0, %v14344_v1, %v6686_v35  ;;  %v7361_v56 = vor.u32 %v14707_v63, %v14705_v21  ;;  %v14764_v25 = vrot.slane %v7250_v44, 3  ;;  %v16404_v44 = vld [vmem:[#allocation90_spill] sm:$0xff] }
 0x4e5   : >> { %v14766_v51 = vrot.slane %v7253_v50, 4  ;;  %v7535_v33 = vshrl.u32 %v6943_v14, 16  ;;  %v7203_v40 = vor.u32 %v14747_v37, %v14745_v31  ;;  %v7538_v38 = vshll.u32 %v6943_v14, 16  ;;  %v16403_v37 = vld [vmem:[#allocation83_spill] sm:$0xff] }
 0x4e6   : >> { %v7475_v57 = vshrl.u32 %v6937_v5, 16  ;;  %v7478_v61 = vshll.u32 %v6937_v5, 16  ;;  %v7369_v39 = vsel %vm1458_vm2, %v7361_v56, %v7368_v12  ;;  %v16402_v1 = vor.u32 %v14476_v47, %v14474_v3  ;;  %v16405_v12 = vld [vmem:[#allocation84_spill] sm:$0xff]  ;;  %v16406_v3 = vld [vmem:[#allocation119_spill] sm:$0xff] }
 0x4e7   : >> { %v14775_v41 = vrot.slane %v7535_v33, 3  ;;  %8463 = vmatprep.mubr.bf16.mxu1 %v7369_v39  ;;  %v6528_v21 = vpop.permute.xlu1 %6527  ;;  %v6530_v63 = vpop.permute.xlu0 %6529  ;;  %v7279_v58 = vsel %vm1458_vm2, %v7271_v30, %v7278_v24  ;;  %v7196_v22 = vor.u32 %v7195_v17, %v7192_v9  ;;  %v7421_v31 = vor.u32 %v14711_v45, %v14709_v11 }
 0x4e8   : >> { %6812 = vrot.lane.b32.xlu1 %v16402_v1, %s10728_s20  ;;  %v6846_v4 = vsel %vm334_vm0, %v16403_v37, %v6528_v21  ;;  %v6848_v50 = vsel %vm334_vm0, %v16404_v44, %v6528_v21  ;;  %v6851_v47 = vsel %vm334_vm0, %v16405_v12, %v6530_v63  ;;  %v6853_v10 = vsel %vm334_vm0, %v16406_v3, %v6530_v63 }
 0x4e9   : >> { %v7325_v35 = vshrl.u32 %v6846_v4, 16  ;;  %v7328_v14 = vshll.u32 %v6846_v4, 16  ;;  %v7332_v5 = vshrl.u32 %v6848_v50, 16  ;;  %v7335_v30 = vshll.u32 %v6848_v50, 16  ;;  %8464 = vmatmul.mubr.bf16.gmra.mxu1 %v7279_v58 }
 0x4ea   : >> { %v14788_v9 = vrot.slane %v7538_v38, 4  ;;  %v7477_v11 = vrot.slane %v7475_v57, 3  ;;  %v7385_v45 = vshrl.u32 %v6851_v47, 16  ;;  %v7388_v17 = vshll.u32 %v6851_v47, 16 }
 0x4eb   : >> { %v7327_v24 = vrot.slane %v7325_v35, 3  ;;  %v7330_v56 = vrot.slane %v7328_v14, 4  ;;  %v7334_v33 = vrot.slane %v7332_v5, 3  ;;  %v7337_v39 = vrot.slane %v7335_v30, 4  ;;  %v6688_v1 = vpop.permute.xlu1 %6687  ;;  %v6692_v21 = vpop.permute.xlu0 %6691 }
 0x4ec   : >> { %6800 = vrot.lane.b32.xlu1 %v14633_v34, %s10728_s20  ;;  %v7480_v63 = vrot.slane %v7478_v61, 4  ;;  %v14792_v37 = vrot.slane %v7385_v45, 3  ;;  %v7392_v4 = vshrl.u32 %v6853_v10, 16  ;;  %v7395_v44 = vshll.u32 %v6853_v10, 16 }
 0x4ed   : >> { %v7204_v38 = vsel %vm1458_vm2, %v7196_v22, %v7203_v40  ;;  %v7428_v57 = vor.u32 %v7427_v52, %v14749_v48  ;;  %v6940_v50 = vsel %vm334_vm0, %v14365_v60, %v6688_v1  ;;  %v6946_v12 = vsel %vm334_vm0, %v14416_v43, %v6692_v21 }
 0x4ee   : >> { %8601 = vmatmul.mubr.bf16.gmra.mxu0 %v7204_v38  ;;  %v7482_v47 = vshrl.u32 %v6940_v50, 16  ;;  %v7485_v3 = vshll.u32 %v6940_v50, 16  ;;  %v7542_v35 = vshrl.u32 %v6946_v12, 16  ;;  %v7545_v14 = vshll.u32 %v6946_v12, 16 }
 0x4ef   : >> { %v7390_v61 = vrot.slane %v7388_v17, 4  ;;  %v7429_v5 = vsel %vm1458_vm2, %v7421_v31, %v7428_v57  ;;  %8608 = vmatprep.mubr.bf16.mxu0 %v7279_v58  ;;  %v6749_v10 = vpop.permute.xlu1 %6748  ;;  %v6694_v30 = vpop.permute.xlu0 %6693  ;;  %v7331_v40 = vor.u32 %v7330_v56, %v7327_v24  ;;  %v7338_v22 = vor.u32 %v7337_v39, %v7334_v33 }
 0x4f0   : >> { %v7394_v48 = vrot.slane %v7392_v4, 3  ;;  %v7397_v52 = vrot.slane %v7395_v44, 4  ;;  %8471 = vmatprep.mubr.bf16.mxu1 %v7429_v5  ;;  %v7484_v60 = vrot.slane %v7482_v47, 3  ;;  %v7487_v45 = vrot.slane %v7485_v3, 4 }
 0x4f1   : >> { %v7009_v1 = vsel %vm334_vm0, %v16401_v55, %v6749_v10  ;;  %v6949_v21 = vsel %vm334_vm0, %v14427_v0, %v6694_v30  ;;  %v7339_v17 = vsel %vm1458_vm2, %v7331_v40, %v7338_v22  ;;  %v7481_v38 = vor.u32 %v7480_v63, %v7477_v11  ;;  %v16407_v63 = vld [vmem:[#allocation124_spill] sm:$0xff] }
 0x4f2   : >> { %v7544_v31 = vrot.slane %v7542_v35, 3  ;;  %v7547_v58 = vrot.slane %v7545_v14, 4  ;;  %v7257_v57 = vshrl.u32 %v7009_v1, 16  ;;  %v7260_v50 = vshll.u32 %v7009_v1, 16  ;;  %8472 = vmatmul.mubr.bf16.gmra.mxu1 %v7339_v17  ;;  %v16408_v14 = vld [vmem:[#allocation120_spill] sm:$0xff] }
 0x4f3   : >> { %v7595_v24 = vshrl.u32 %v6949_v21, 16  ;;  %v7598_v56 = vshll.u32 %v6949_v21, 16  ;;  %v6698_v33 = vpop.permute.xlu1 %6697  ;;  %v6534_v39 = vpop.permute.xlu0 %6533  ;;  %v7488_v4 = vor.u32 %v7487_v45, %v7484_v60  ;;  %v7391_v44 = vor.u32 %v7390_v61, %v14792_v37 }
 0x4f4   : >> { %v7259_v12 = vrot.slane %v7257_v57, 3  ;;  %v7262_v55 = vrot.slane %v7260_v50, 4  ;;  %v7398_v47 = vor.u32 %v7397_v52, %v7394_v48  ;;  %v7256_v3 = vor.u32 %v14766_v51, %v14764_v25 }
 0x4f5   : >> { %v14811_v11 = vsel %vm334_vm0, %v14436_v62, %v6698_v33  ;;  %v6861_v35 = vsel %vm334_vm0, %v16407_v63, %v6534_v39  ;;  %v6863_v5 = vsel %vm334_vm0, %v16408_v14, %v6534_v39  ;;  %v7489_v10 = vsel %vm1458_vm2, %v7481_v38, %v7488_v4 }
 0x4f6   : >> { %v7655_v37 = vshrl.u32 %v14811_v11, 16  ;;  %v7505_v61 = vshrl.u32 %v6861_v35, 16  ;;  %v7508_v30 = vshll.u32 %v6861_v35, 16  ;;  %8479 = vmatprep.mubr.bf16.mxu1 %v7489_v10  ;;  %v7541_v25 = vor.u32 %v14788_v9, %v14775_v41  ;;  %v16409_v41 = vld [vmem:[#allocation95_spill] sm:$0xff] }
 0x4f7   : >> { %v14821_v51 = vrot.slane %v7595_v24, 3  ;;  %v14823_v40 = vrot.slane %v7598_v56, 4  ;;  %v7512_v22 = vshrl.u32 %v6863_v5, 16  ;;  %v6532_v48 = vpop.permute.xlu1 %6531  ;;  %v6700_v52 = vpop.permute.xlu0 %6699  ;;  %v7263_v60 = vor.u32 %v7262_v55, %v7259_v12  ;;  %v16410_v24 = vld [vmem:[#allocation81_spill] sm:$0xff] }
 0x4f8   : >> { %v14825_v45 = vrot.slane %v7655_v37, 3  ;;  %v7658_v1 = vshll.u32 %v14811_v11, 16  ;;  %v7515_v21 = vshll.u32 %v6863_v5, 16  ;;  %v14829_v38 = vsel %vm1458_vm2, %v7391_v44, %v7398_v47 }
 0x4f9   : >> { %v14831_v57 = vrot.slane %v7505_v61, 3  ;;  %v14833_v50 = vrot.slane %v7508_v30, 4  ;;  %v6856_v9 = vsel %vm334_vm0, %v16409_v41, %v6532_v48  ;;  %v6858_v56 = vsel %vm334_vm0, %v16410_v24, %v6532_v48 }
 0x4fa   : >> { %v7445_v33 = vshrl.u32 %v6856_v9, 16  ;;  %v7448_v39 = vshll.u32 %v6856_v9, 16  ;;  %v7452_v4 = vshrl.u32 %v6858_v56, 16  ;;  %v7455_v12 = vshll.u32 %v6858_v56, 16  ;;  %8480 = vmatmul.mubr.bf16.gmra.mxu1 %v14829_v38 }
 0x4fb   : >> { %v14840_v55 = vrot.slane %v7512_v22, 3  ;;  %v6958_v44 = vsel %vm334_vm0, %v14460_v27, %v6700_v52  ;;  %v7264_v47 = vsel %vm1458_vm2, %v7256_v3, %v7263_v60  ;;  %v7548_v11 = vor.u32 %v7547_v58, %v7544_v31  ;;  %v6696_v63 = vpop.permute.xlu1 %6695  ;;  %v6753_v35 = vpop.permute.xlu0 %6752  ;;  %v16411_v3 = vld [vmem:[#allocation89_spill] sm:$0xff] }
 0x4fc   : >> { %v7517_v14 = vrot.slane %v7515_v21, 4  ;;  %v7447_v5 = vrot.slane %v7445_v33, 3  ;;  %v7450_v10 = vrot.slane %v7448_v39, 4  ;;  %8609 = vmatmul.mubr.bf16.gmra.mxu0 %v7264_v47  ;;  %v7601_v37 = vor.u32 %v14823_v40, %v14821_v51 }
 0x4fd   : >> { %v7454_v61 = vrot.slane %v7452_v4, 3  ;;  %v7457_v30 = vrot.slane %v7455_v12, 4  ;;  %v7549_v22 = vsel %vm1458_vm2, %v7541_v25, %v7548_v11  ;;  %8616 = vmatprep.mubr.bf16.mxu0 %v7339_v17  ;;  %v6952_v48 = vsel %vm334_vm0, %v14495_v46, %v6696_v63  ;;  %v16412_v25 = vld [vmem:[#allocation118_spill] sm:$0xff] }
 0x4fe   : >> { %v7662_v52 = vshrl.u32 %v6958_v44, 16  ;;  %8487 = vmatprep.mubr.bf16.mxu1 %v7549_v22  ;;  %v7602_v31 = vshrl.u32 %v6952_v48, 16  ;;  %v7605_v58 = vshll.u32 %v6952_v48, 16  ;;  %v7014_v60 = vsel %vm334_vm0, %v16411_v3, %v6753_v35 }
 0x4ff   : >> { %v7665_v21 = vshll.u32 %v6958_v44, 16  ;;  %v7317_v41 = vshrl.u32 %v7014_v60, 16  ;;  %v7320_v9 = vshll.u32 %v7014_v60, 16  ;;  %v6751_v24 = vpop.permute.xlu1 %6750  ;;  %v6755_v51 = vpop.permute.xlu0 %6754  ;;  %v7451_v40 = vor.u32 %v7450_v10, %v7447_v5 }
 0x500   : >> { %v7604_v56 = vrot.slane %v7602_v31, 3  ;;  %v7607_v33 = vrot.slane %v7605_v58, 4  ;;  %v7012_v17 = vsel %vm334_vm0, %v16411_v3, %v6751_v24  ;;  %v7017_v39 = vsel %vm334_vm0, %v16412_v25, %v6755_v51 }
 0x501   : >> { %v7319_v4 = vrot.slane %v7317_v41, 3  ;;  %v7322_v12 = vrot.slane %v7320_v9, 4  ;;  %v7310_v47 = vshrl.u32 %v7012_v17, 16  ;;  %v7313_v11 = vshll.u32 %v7012_v17, 16 }
 0x502   : >> { %v7370_v63 = vshrl.u32 %v7017_v39, 16  ;;  %v7373_v35 = vshll.u32 %v7017_v39, 16  ;;  %v7458_v44 = vor.u32 %v7457_v30, %v7454_v61  ;;  %v7608_v22 = vor.u32 %v7607_v33, %v7604_v56 }
 0x503   : >> { %v7312_v48 = vrot.slane %v7310_v47, 3  ;;  %v7315_v60 = vrot.slane %v7313_v11, 4  ;;  %v6706_v42 = vpop.permute.xlu1 %6705  ;;  %v6702_v5 = vpop.permute.xlu0 %6701  ;;  %v7511_v10 = vor.u32 %v14833_v50, %v14831_v57  ;;  %v7518_v31 = vor.u32 %v7517_v14, %v14840_v55  ;;  %v16413_v47 = vld [vmem:[#allocation126_spill] sm:$0xff] }
 0x504   : >> { %v14859_v58 = vrot.slane %v7370_v63, 3  ;;  %v14861_v3 = vrot.slane %v7373_v35, 4  ;;  %v14864_v41 = vsel %vm1458_vm2, %v7451_v40, %v7458_v44  ;;  %v14868_v61 = vsel %vm334_vm0, %v14486_v29, %v6706_v42 }
 0x505   : >> { %v7660_v30 = vrot.slane %v7658_v1, 4  ;;  %8488 = vmatmul.mubr.bf16.gmra.mxu1 %v14864_v41  ;;  %v7775_v9 = vshrl.u32 %v14868_v61, 16  ;;  %v6961_v57 = vsel %vm334_vm0, %v14498_v36, %v6702_v5  ;;  %v7609_v50 = vsel %vm1458_vm2, %v7601_v37, %v7608_v22 }
 0x506   : >> { %v7664_v55 = vrot.slane %v7662_v52, 3  ;;  %v7667_v14 = vrot.slane %v7665_v21, 4  ;;  %v7715_v51 = vshrl.u32 %v6961_v57, 16  ;;  %8495 = vmatprep.mubr.bf16.mxu1 %v7609_v50  ;;  %v7718_v40 = vshll.u32 %v6961_v57, 16  ;;  %v16414_v52 = vld [vmem:[#allocation101_spill] sm:$0xff]  ;;  %v16415_v57 = vld [vmem:[#allocation80_spill] sm:$0xff] }
 0x507   : >> { %v6536_v1 = vpop.permute.xlu1 %6535  ;;  %v6538_v56 = vpop.permute.xlu0 %6537  ;;  %v14879_v33 = vsel %vm1458_vm2, %v7511_v10, %v7518_v31  ;;  %v7316_v17 = vor.u32 %v7315_v60, %v7312_v48  ;;  %v14881_v39 = vrot.slane %v7775_v9, 3  ;;  %v7323_v11 = vor.u32 %v7322_v12, %v7319_v4  ;;  %v16416_v10 = vld [vmem:[#allocation122_spill] sm:$0xff] }
 0x508   : >> { %v6866_v37 = vsel %vm334_vm0, %v16413_v47, %v6536_v1  ;;  %v6868_v21 = vsel %vm334_vm0, %v16414_v52, %v6536_v1  ;;  %v7717_v5 = vrot.slane %v7715_v51, 3  ;;  %v6871_v50 = vsel %vm334_vm0, %v16415_v57, %v6538_v56 }
 0x509   : >> { %v7565_v63 = vshrl.u32 %v6866_v37, 16  ;;  %v7568_v35 = vshll.u32 %v6866_v37, 16  ;;  %v7572_v44 = vshrl.u32 %v6868_v21, 16  ;;  %v7575_v22 = vshll.u32 %v6868_v21, 16 }
 0x50a   : >> { %v6873_v48 = vsel %vm334_vm0, %v16416_v10, %v6538_v56  ;;  %v7324_v60 = vsel %vm1458_vm2, %v7316_v17, %v7323_v11  ;;  %v7625_v12 = vshrl.u32 %v6871_v50, 16  ;;  %v7628_v37 = vshll.u32 %v6871_v50, 16 }
 0x50b   : >> { %v7567_v31 = vrot.slane %v7565_v63, 3  ;;  %v7570_v9 = vrot.slane %v7568_v35, 4  ;;  %v7574_v47 = vrot.slane %v7572_v44, 3  ;;  %v7577_v42 = vrot.slane %v7575_v22, 4  ;;  %8617 = vmatmul.mubr.bf16.gmra.mxu0 %v7324_v60  ;;  %v6704_v1 = vpop.permute.xlu1 %6703  ;;  %v6708_v4 = vpop.permute.xlu0 %6707 }
 0x50c   : >> { %v7632_v52 = vshrl.u32 %v6873_v48, 16  ;;  %v7635_v21 = vshll.u32 %v6873_v48, 16  ;;  %8624 = vmatprep.mubr.bf16.mxu0 %v14829_v38  ;;  %v7720_v51 = vrot.slane %v7718_v40, 4  ;;  %v7661_v56 = vor.u32 %v7660_v30, %v14825_v45 }
 0x50d   : >> { %8496 = vmatmul.mubr.bf16.gmra.mxu1 %v14879_v33  ;;  %v7668_v57 = vor.u32 %v7667_v14, %v7664_v55  ;;  %v6964_v17 = vsel %vm334_vm0, %v14525_v2, %v6704_v1  ;;  %v14897_v11 = vrot.slane %v7625_v12, 3  ;;  %v14899_v63 = vrot.slane %v7628_v37, 4  ;;  %v16417_v55 = vld [vmem:[#allocation125_spill] sm:$0xff] }
 0x50e   : >> { %v6970_v35 = vsel %vm334_vm0, %v14513_v53, %v6708_v4  ;;  %v7571_v44 = vor.u32 %v7570_v9, %v7567_v31  ;;  %v7634_v22 = vrot.slane %v7632_v52, 3  ;;  %v7722_v40 = vshrl.u32 %v6964_v17, 16 }
 0x50f   : >> { %v7669_v38 = vsel %vm1458_vm2, %v7661_v56, %v7668_v57  ;;  %v7725_v50 = vshll.u32 %v6964_v17, 16  ;;  %v6757_v10 = vpop.permute.xlu1 %6756  ;;  %v6761_v48 = vpop.permute.xlu0 %6760  ;;  %v7637_v45 = vrot.slane %v7635_v21, 4  ;;  %v7578_v60 = vor.u32 %v7577_v42, %v7574_v47 }
 0x510   : >> { %8503 = vmatprep.mubr.bf16.mxu1 %v7669_v38  ;;  %v7019_v30 = vsel %vm334_vm0, %v16412_v25, %v6757_v10  ;;  %v7024_v14 = vsel %vm334_vm0, %v16417_v55, %v6761_v48  ;;  %v7724_v1 = vrot.slane %v7722_v40, 3  ;;  %v7782_v4 = vshrl.u32 %v6970_v35, 16 }
 0x511   : >> { %v7727_v12 = vrot.slane %v7725_v50, 4  ;;  %v7377_v31 = vshrl.u32 %v7019_v30, 16  ;;  %v7785_v9 = vshll.u32 %v6970_v35, 16  ;;  %v7380_v37 = vshll.u32 %v7019_v30, 16 }
 0x512   : >> { %v7437_v52 = vshrl.u32 %v7024_v14, 16  ;;  %v7440_v56 = vshll.u32 %v7024_v14, 16  ;;  %v14909_v17 = vsel %vm1458_vm2, %v7571_v44, %v7578_v60  ;;  %v7721_v24 = vor.u32 %v7720_v51, %v7717_v5 }
 0x513   : >> { %v7379_v57 = vrot.slane %v7377_v31, 3  ;;  %v6759_v21 = vpop.permute.xlu1 %6758  ;;  %v6710_v38 = vpop.permute.xlu0 %6709  ;;  %v7728_v25 = vor.u32 %v7727_v12, %v7724_v1  ;;  %v7382_v10 = vrot.slane %v7380_v37, 4  ;;  %v16418_v5 = vshll.u32 %v14868_v61, 16 }
 0x514   : >> { %v14911_v8 = vrot.slane %v7437_v52, 3  ;;  %v14913_v42 = vrot.slane %v7440_v56, 4  ;;  %v7022_v47 = vsel %vm334_vm0, %v16417_v55, %v6759_v21  ;;  %v6973_v44 = vsel %vm334_vm0, %v14533_v15, %v6710_v38  ;;  %v16420_v21 = vld [vmem:[#allocation107_spill] sm:$0xff] }
 0x515   : >> { %8504 = vmatmul.mubr.bf16.gmra.mxu1 %v14909_v17  ;;  %v7430_v35 = vshrl.u32 %v7022_v47, 16  ;;  %v7433_v40 = vshll.u32 %v7022_v47, 16  ;;  %v7729_v50 = vsel %vm1458_vm2, %v7721_v24, %v7728_v25  ;;  %v7780_v51 = vrot.slane %v16418_v5, 4  ;;  %v16419_v24 = vld [vmem:[#allocation113_spill] sm:$0xff] }
 0x516   : >> { %v7784_v48 = vrot.slane %v7782_v4, 3  ;;  %v7787_v30 = vrot.slane %v7785_v9, 4  ;;  %v7835_v14 = vshrl.u32 %v6973_v44, 16  ;;  %8511 = vmatprep.mubr.bf16.mxu1 %v7729_v50  ;;  %v7383_v60 = vor.u32 %v7382_v10, %v7379_v57 }
 0x517   : >> { %v7838_v1 = vshll.u32 %v6973_v44, 16  ;;  %v6540_v12 = vpop.permute.xlu1 %6539  ;;  %v6542_v55 = vpop.permute.xlu0 %6541  ;;  %v7631_v31 = vor.u32 %v14899_v63, %v14897_v11  ;;  %v7638_v37 = vor.u32 %v7637_v45, %v7634_v22  ;;  %v7443_v52 = vor.u32 %v14913_v42, %v14911_v8  ;;  %v16421_v44 = vld [vmem:[#allocation129_spill] sm:$0xff]  ;;  %v16422_v63 = vld [vmem:[#allocation114_spill] sm:$0xff] }
 0x518   : >> { %v7432_v56 = vrot.slane %v7430_v35, 3  ;;  %v6876_v61 = vsel %vm334_vm0, %v16419_v24, %v6540_v12  ;;  %v6878_v4 = vsel %vm334_vm0, %v16420_v21, %v6540_v12  ;;  %v7435_v9 = vrot.slane %v7433_v40, 4 }
 0x519   : >> { %v14931_v38 = vrot.slane %v7835_v14, 3  ;;  %v7685_v57 = vshrl.u32 %v6876_v61, 16  ;;  %v7688_v25 = vshll.u32 %v6876_v61, 16  ;;  %v7692_v10 = vshrl.u32 %v6878_v4, 16 }
 0x51a   : >> { %v7695_v47 = vshll.u32 %v6878_v4, 16  ;;  %v6881_v11 = vsel %vm334_vm0, %v16421_v44, %v6542_v55  ;;  %v6883_v8 = vsel %vm334_vm0, %v16422_v63, %v6542_v55  ;;  %v14937_v22 = vrot.slane %v7838_v1, 4 }
 0x51b   : >> { %v7687_v45 = vrot.slane %v7685_v57, 3  ;;  %v7745_v42 = vshrl.u32 %v6881_v11, 16  ;;  %v14940_v35 = vsel %vm1458_vm2, %v7631_v31, %v7638_v37  ;;  %v6712_v40 = vpop.permute.xlu1 %6711  ;;  %v6716_v50 = vpop.permute.xlu0 %6715  ;;  %v7690_v5 = vrot.slane %v7688_v25, 4 }
 0x51c   : >> { %v7748_v14 = vshll.u32 %v6881_v11, 16  ;;  %v7752_v12 = vshrl.u32 %v6883_v8, 16  ;;  %v7755_v24 = vshll.u32 %v6883_v8, 16  ;;  %v16423_v55 = vor.u32 %v14861_v3, %v14859_v58  ;;  %v16424_v8 = vld [vmem:[#allocation127_spill] sm:$0xff] }
 0x51d   : >> { %v14942_v61 = vrot.slane %v7745_v42, 3  ;;  %8512 = vmatmul.mubr.bf16.gmra.mxu1 %v14940_v35  ;;  %v7781_v21 = vor.u32 %v7780_v51, %v14881_v39  ;;  %v7788_v4 = vor.u32 %v7787_v30, %v7784_v48  ;;  %v7694_v31 = vrot.slane %v7692_v10, 3 }
 0x51e   : >> { %v7384_v1 = vsel %vm1458_vm2, %v16423_v55, %v7383_v60  ;;  %v7697_v37 = vrot.slane %v7695_v47, 4  ;;  %v14950_v57 = vrot.slane %v7748_v14, 4  ;;  %v6976_v25 = vsel %vm334_vm0, %v14569_v13, %v6712_v40 }
 0x51f   : >> { %8625 = vmatmul.mubr.bf16.gmra.mxu0 %v7384_v1  ;;  %v7789_v44 = vsel %vm1458_vm2, %v7781_v21, %v7788_v4  ;;  %v7842_v11 = vshrl.u32 %v6976_v25, 16  ;;  %v7845_v63 = vshll.u32 %v6976_v25, 16  ;;  %v6982_v58 = vsel %vm334_vm0, %v14574_v7, %v6716_v50  ;;  %v6714_v3 = vpop.permute.xlu1 %6713  ;;  %v6763_v39 = vpop.permute.xlu0 %6762 }
 0x520   : >> { %8632 = vmatprep.mubr.bf16.mxu0 %v14864_v41  ;;  %v7436_v51 = vor.u32 %v7435_v9, %v7432_v56  ;;  %v14958_v48 = vrot.slane %v7752_v12, 3  ;;  %v14960_v30 = vrot.slane %v7755_v24, 4  ;;  %8519 = vmatprep.mubr.bf16.mxu1 %v7789_v44  ;;  %v7902_v60 = vshrl.u32 %v6982_v58, 16 }
 0x521   : >> { %v7751_v10 = vor.u32 %v14950_v57, %v14942_v61  ;;  %v7905_v47 = vshll.u32 %v6982_v58, 16  ;;  %v6979_v41 = vsel %vm334_vm0, %v14536_v59, %v6714_v3  ;;  %v7027_v42 = vsel %vm334_vm0, %v16424_v8, %v6763_v39 }
 0x522   : >> { %v7844_v40 = vrot.slane %v7842_v11, 3  ;;  %v7847_v50 = vrot.slane %v7845_v63, 4  ;;  %v7895_v14 = vshrl.u32 %v6979_v41, 16  ;;  %v7898_v56 = vshll.u32 %v6979_v41, 16 }
 0x523   : >> { %v7490_v9 = vshrl.u32 %v7027_v42, 16  ;;  %v7493_v12 = vshll.u32 %v7027_v42, 16  ;;  %v7691_v24 = vor.u32 %v7690_v5, %v7687_v45  ;;  %v7698_v55 = vor.u32 %v7697_v37, %v7694_v31  ;;  %v6765_v1 = vpop.permute.xlu1 %6764  ;;  %v6718_v21 = vpop.permute.xlu0 %6717 }
 0x524   : >> { %v7758_v61 = vor.u32 %v14960_v30, %v14958_v48  ;;  %v14970_v4 = vrot.slane %v7902_v60, 3  ;;  %v7444_v57 = vsel %vm1458_vm2, %v7436_v51, %v7443_v52  ;;  %v7029_v25 = vsel %vm334_vm0, %v16424_v8, %v6765_v1  ;;  %v16425_v8 = vld [vmem:[#allocation115_spill] sm:$0xff] }
 0x525   : >> { %v14975_v44 = vrot.slane %v7490_v9, 3  ;;  %v14977_v11 = vrot.slane %v7493_v12, 4  ;;  %v14980_v63 = vsel %vm1458_vm2, %v7691_v24, %v7698_v55  ;;  %v7497_v45 = vshrl.u32 %v7029_v25, 16  ;;  %v16426_v9 = vld [vmem:[#allocation112_spill] sm:$0xff] }
 0x526   : >> { %8520 = vmatmul.mubr.bf16.gmra.mxu1 %v14980_v63  ;;  %v7500_v5 = vshll.u32 %v7029_v25, 16  ;;  %v6985_v31 = vsel %vm334_vm0, %v14582_v19, %v6718_v21  ;;  %v7841_v52 = vor.u32 %v14937_v22, %v14931_v38  ;;  %v7848_v37 = vor.u32 %v7847_v50, %v7844_v40  ;;  %v16428_v21 = vld [vmem:[#allocation135_spill] sm:$0xff] }
 0x527   : >> { %8633 = vmatmul.mubr.bf16.gmra.mxu0 %v7444_v57  ;;  %v7907_v58 = vrot.slane %v7905_v47, 4  ;;  %v7897_v3 = vrot.slane %v7895_v14, 3  ;;  %v7900_v39 = vrot.slane %v7898_v56, 4  ;;  %v7499_v51 = vrot.slane %v7497_v45, 3  ;;  %v6544_v48 = vpop.permute.xlu1 %6543  ;;  %v6546_v30 = vpop.permute.xlu0 %6545  ;;  %v16427_v14 = vld [vmem:[#allocation134_spill] sm:$0xff] }
 0x528   : >> { %8640 = vmatprep.mubr.bf16.mxu0 %v14879_v33  ;;  %v7955_v60 = vshrl.u32 %v6985_v31, 16  ;;  %v7849_v41 = vsel %vm1458_vm2, %v7841_v52, %v7848_v37  ;;  %v6886_v42 = vsel %vm334_vm0, %v16425_v8, %v6544_v48  ;;  %v6888_v12 = vsel %vm334_vm0, %v16426_v9, %v6544_v48 }
 0x529   : >> { %v7502_v24 = vrot.slane %v7500_v5, 4  ;;  %v7958_v38 = vshll.u32 %v6985_v31, 16  ;;  %8527 = vmatprep.mubr.bf16.mxu1 %v7849_v41  ;;  %v7805_v22 = vshrl.u32 %v6886_v42, 16  ;;  %v7808_v47 = vshll.u32 %v6886_v42, 16 }
 0x52a   : >> { %v7496_v33 = vor.u32 %v14977_v11, %v14975_v44  ;;  %v7812_v40 = vshrl.u32 %v6888_v12, 16  ;;  %v7815_v50 = vshll.u32 %v6888_v12, 16  ;;  %v6891_v56 = vsel %vm334_vm0, %v16427_v14, %v6546_v30 }
 0x52b   : >> { %v7807_v55 = vrot.slane %v7805_v22, 3  ;;  %v7810_v1 = vrot.slane %v7808_v47, 4  ;;  %v6893_v57 = vsel %vm334_vm0, %v16428_v21, %v6546_v30  ;;  %v7865_v25 = vshrl.u32 %v6891_v56, 16  ;;  %v6720_v45 = vpop.permute.xlu1 %6719  ;;  %v6769_v5 = vpop.permute.xlu0 %6768 }
 0x52c   : >> { %v14999_v31 = vrot.slane %v7955_v60, 3  ;;  %v7814_v52 = vrot.slane %v7812_v40, 3  ;;  %v7817_v37 = vrot.slane %v7815_v50, 4  ;;  %v7868_v48 = vshll.u32 %v6891_v56, 16 }
 0x52d   : >> { %v7503_v41 = vor.u32 %v7502_v24, %v7499_v51  ;;  %v15001_v44 = vrot.slane %v7958_v38, 4  ;;  %v7872_v11 = vshrl.u32 %v6893_v57, 16  ;;  %v15004_v8 = vsel %vm1458_vm2, %v7751_v10, %v7758_v61  ;;  %v16429_v51 = vld [vmem:[#allocation121_spill] sm:$0xff] }
 0x52e   : >> { %v7811_v42 = vor.u32 %v7810_v1, %v7807_v55  ;;  %v15006_v9 = vrot.slane %v7865_v25, 3  ;;  %v7875_v12 = vshll.u32 %v6893_v57, 16  ;;  %8528 = vmatmul.mubr.bf16.gmra.mxu1 %v15004_v8  ;;  %v7901_v30 = vor.u32 %v7900_v39, %v7897_v3 }
 0x52f   : >> { %v7818_v22 = vor.u32 %v7817_v37, %v7814_v52  ;;  %v7908_v60 = vor.u32 %v7907_v58, %v14970_v4  ;;  %v6988_v47 = vsel %vm334_vm0, %v14618_v26, %v6720_v45  ;;  %v7034_v24 = vsel %vm334_vm0, %v16429_v51, %v6769_v5  ;;  %v6767_v38 = vpop.permute.xlu1 %6766  ;;  %v6724_v40 = vpop.permute.xlu0 %6723 }
 0x530   : >> { %v15014_v10 = vrot.slane %v7868_v48, 4  ;;  %v7962_v61 = vshrl.u32 %v6988_v47, 16  ;;  %v7965_v50 = vshll.u32 %v6988_v47, 16  ;;  %v7557_v14 = vshrl.u32 %v7034_v24, 16 }
 0x531   : >> { %v7874_v56 = vrot.slane %v7872_v11, 3  ;;  %v7909_v55 = vsel %vm1458_vm2, %v7901_v30, %v7908_v60  ;;  %v7560_v3 = vshll.u32 %v7034_v24, 16  ;;  %v7504_v39 = vsel %vm1458_vm2, %v7496_v33, %v7503_v41 }
 0x532   : >> { %v7877_v4 = vrot.slane %v7875_v12, 4  ;;  %8535 = vmatprep.mubr.bf16.mxu1 %v7909_v55  ;;  %v7964_v58 = vrot.slane %v7962_v61, 3  ;;  %v7559_v1 = vrot.slane %v7557_v14, 3  ;;  %8641 = vmatmul.mubr.bf16.gmra.mxu0 %v7504_v39  ;;  %v7032_v21 = vsel %vm334_vm0, %v16429_v51, %v6767_v38  ;;  %v16431_v38 = vld [vmem:[#allocation130_spill] sm:$0xff] }
 0x533   : >> { %v7562_v57 = vrot.slane %v7560_v3, 4  ;;  %8648 = vmatprep.mubr.bf16.mxu0 %v14909_v17  ;;  %v7550_v25 = vshrl.u32 %v7032_v21, 16  ;;  %v7553_v45 = vshll.u32 %v7032_v21, 16  ;;  %v6994_v5 = vsel %vm334_vm0, %v14628_v28, %v6724_v40  ;;  %v6722_v52 = vpop.permute.xlu1 %6721  ;;  %v6771_v37 = vpop.permute.xlu0 %6770 }
 0x534   : >> { %v7967_v48 = vrot.slane %v7965_v50, 4  ;;  %v8024_v33 = vshrl.u32 %v6994_v5, 16  ;;  %v15024_v41 = vsel %vm1458_vm2, %v7811_v42, %v7818_v22  ;;  %v6991_v11 = vsel %vm334_vm0, %v14592_v54, %v6722_v52 }
 0x535   : >> { %v7552_v12 = vrot.slane %v7550_v25, 3  ;;  %v7555_v30 = vrot.slane %v7553_v45, 4  ;;  %v7463_v60 = vshll.u32 %v14376_v32, 16  ;;  %v16430_v17 = vshrl.u32 %v14416_v43, 16 }
 0x536   : >> { %v7871_v51 = vor.u32 %v15014_v10, %v15006_v9  ;;  %v7878_v24 = vor.u32 %v7877_v4, %v7874_v56  ;;  %8536 = vmatmul.mubr.bf16.gmra.mxu1 %v15024_v41  ;;  %v7037_v42 = vsel %vm334_vm0, %v16431_v38, %v6771_v37  ;;  %v7413_v22 = vor.u32 %v14576_v49, %v14564_v20  ;;  %v16437_v20 = vld [vmem:[#allocation136_spill] sm:$0xff] }
 0x537   : >> { %v15031_v47 = vrot.slane %v16430_v17, 3  ;;  %v7563_v40 = vor.u32 %v7562_v57, %v7559_v1  ;;  %v8026_v61 = vrot.slane %v8024_v33, 3  ;;  %v8027_v50 = vshll.u32 %v6994_v5, 16  ;;  %v6548_v55 = vpop.permute.xlu1 %6547 }
 0x538   : >> { %v8017_v14 = vshrl.u32 %v6991_v11, 16  ;;  %v8020_v3 = vshll.u32 %v6991_v11, 16  ;;  %v7961_v39 = vor.u32 %v15001_v44, %v14999_v31  ;;  %v7968_v21 = vor.u32 %v7967_v48, %v7964_v58 }
 0x539   : >> { %v6896_v9 = vsel %vm334_vm0, %v14483_v18, %v6548_v55  ;;  %v7556_v10 = vor.u32 %v7555_v30, %v7552_v12  ;;  %v7610_v56 = vshrl.u32 %v7037_v42, 16  ;;  %v6898_v4 = vsel %vm334_vm0, %v14545_v23, %v6548_v55  ;;  %v6775_v12 = vpop.permute.xlu0 %6774 }
 0x53a   : >> { %v7925_v25 = vshrl.u32 %v6896_v9, 16  ;;  %v7969_v1 = vsel %vm1458_vm2, %v7961_v39, %v7968_v21  ;;  %v7928_v57 = vshll.u32 %v6896_v9, 16  ;;  %v7932_v45 = vshrl.u32 %v6898_v4, 16 }
 0x53b   : >> { %v7935_v5 = vshll.u32 %v6898_v4, 16  ;;  %v8029_v52 = vrot.slane %v8027_v50, 4  ;;  %v8019_v37 = vrot.slane %v8017_v14, 3  ;;  %v7613_v33 = vshll.u32 %v7037_v42, 16  ;;  %8543 = vmatprep.mubr.bf16.mxu1 %v7969_v1  ;;  %v6773_v44 = vpop.permute.xlu1 %6772 }
 0x53c   : >> { %v7927_v31 = vrot.slane %v7925_v25, 3  ;;  %v8022_v58 = vrot.slane %v8020_v3, 4  ;;  %v7930_v48 = vrot.slane %v7928_v57, 4  ;;  %v7934_v18 = vrot.slane %v7932_v45, 3  ;;  %v16434_v25 = vld [vmem:[#allocation102_spill] sm:$0xff] }
 0x53d   : >> { %v7937_v11 = vrot.slane %v7935_v5, 4  ;;  %v15048_v30 = vsel %vm1458_vm2, %v7871_v51, %v7878_v24  ;;  %v7564_v23 = vsel %vm1458_vm2, %v7556_v10, %v7563_v40  ;;  %v7039_v17 = vsel %vm334_vm0, %v16431_v38, %v6773_v44  ;;  %v6779_v45 = vpop.permute.xlu0 %6778 }
 0x53e   : >> { %v16432_v50 = vshrl.u32 %v14376_v32, 16  ;;  %v7612_v42 = vrot.slane %v7610_v56, 3  ;;  %8544 = vmatmul.mubr.bf16.gmra.mxu1 %v15048_v30  ;;  %8649 = vmatmul.mubr.bf16.gmra.mxu0 %v7564_v23  ;;  %v7617_v55 = vshrl.u32 %v7039_v17, 16  ;;  %v7465_v3 = vrot.slane %v7463_v60, 4 }
 0x53f   : >> { %v16433_v39 = vshll.u32 %v14416_v43, 16  ;;  %v7615_v51 = vrot.slane %v7613_v33, 4  ;;  %v7931_v24 = vor.u32 %v7930_v48, %v7927_v31  ;;  %v7938_v9 = vor.u32 %v7937_v11, %v7934_v18  ;;  %8656 = vmatprep.mubr.bf16.mxu0 %v14940_v35  ;;  %v6777_v38 = vpop.permute.xlu1 %6776 }
 0x540   : >> { %v15055_v14 = vrot.slane %v16432_v50, 3  ;;  %v7620_v40 = vshll.u32 %v7039_v17, 16  ;;  %v7619_v10 = vrot.slane %v7617_v55, 3  ;;  %v8023_v32 = vor.u32 %v8022_v58, %v8019_v37 }
 0x541   : >> { %v7472_v21 = vrot.slane %v16433_v39, 4  ;;  %v8030_v4 = vor.u32 %v8029_v52, %v8026_v61  ;;  %v7044_v56 = vsel %vm334_vm0, %v16434_v25, %v6777_v38  ;;  %v7042_v1 = vsel %vm334_vm0, %v16434_v25, %v6775_v12 }
 0x542   : >> { %v7622_v60 = vrot.slane %v7620_v40, 4  ;;  %v7520_v43 = vshrl.u32 %v14427_v0, 16  ;;  %v7523_v57 = vshll.u32 %v14427_v0, 16  ;;  %v7677_v35 = vshrl.u32 %v7044_v56, 16 }
 0x543   : >> { %v8031_v5 = vsel %vm1458_vm2, %v8023_v32, %v8030_v4  ;;  %v7680_v33 = vshll.u32 %v7044_v56, 16  ;;  %v7527_v31 = vshrl.u32 %v14495_v46, 16  ;;  %v7530_v61 = vshll.u32 %v14495_v46, 16  ;;  %v6781_v11 = vpop.permute.xlu1 %6780 }
 0x544   : >> { %v7623_v37 = vor.u32 %v7622_v60, %v7619_v10  ;;  %8551 = vmatprep.mubr.bf16.mxu1 %v8031_v5  ;;  %v7580_v52 = vshrl.u32 %v14436_v62, 16  ;;  %v7583_v44 = vshll.u32 %v14436_v62, 16  ;;  %v7616_v58 = vor.u32 %v7615_v51, %v7612_v42  ;;  %v16436_v51 = vld [vmem:[#allocation86_spill] sm:$0xff] }
 0x545   : >> { %v7670_v48 = vshrl.u32 %v7042_v1, 16  ;;  %v7673_v18 = vshll.u32 %v7042_v1, 16  ;;  %v15073_v0 = vsel %vm1458_vm2, %v7931_v24, %v7938_v9  ;;  %v16435_v12 = vor.u32 %v14529_v16, %v14527_v6 }
 0x546   : >> { %v7466_v46 = vor.u32 %v7465_v3, %v15055_v14  ;;  %v7473_v62 = vor.u32 %v7472_v21, %v15031_v47  ;;  %v7522_v17 = vrot.slane %v7520_v43, 3  ;;  %v7679_v50 = vrot.slane %v7677_v35, 3  ;;  %8552 = vmatmul.mubr.bf16.gmra.mxu1 %v15073_v0  ;;  %v6783_v3 = vpop.permute.xlu0 %6782 }
 0x547   : >> { %v15082_v23 = vsel %vm1458_vm2, %v16435_v12, %v7413_v22  ;;  %v7682_v42 = vrot.slane %v7680_v33, 4  ;;  %v7624_v55 = vsel %vm1458_vm2, %v7616_v58, %v7623_v37  ;;  %v7525_v39 = vrot.slane %v7523_v57, 4  ;;  %10474 = vmatprep.mubr.msk.bf16.mxu1 %vm334_vm0, %v16436_v51  ;;  %v6785_v33 = vpop.permute.xlu1 %6784 }
 0x548   : >> { %v7049_v6 = vsel %vm334_vm0, %v16437_v20, %v6781_v11  ;;  %8657 = vmatmul.mubr.bf16.gmra.mxu0 %v7624_v55  ;;  %v7529_v16 = vrot.slane %v7527_v31, 3  ;;  %v7532_v49 = vrot.slane %v7530_v61, 4  ;;  %v7582_v22 = vrot.slane %v7580_v52, 3  ;;  %v16440_v11 = vld [vmem:[#allocation88_spill] sm:$0xff] }
 0x549   : >> { %v7672_v14 = vrot.slane %v7670_v48, 3  ;;  %v7675_v47 = vrot.slane %v7673_v18, 4  ;;  %8664 = vmatprep.mubr.bf16.mxu0 %v14980_v63  ;;  %v7585_v21 = vrot.slane %v7583_v44, 4  ;;  %v16438_v24 = vshrl.u32 %v14460_v27, 16 }
 0x54a   : >> { %v7047_v40 = vsel %vm334_vm0, %v16437_v20, %v6779_v45  ;;  %v16439_v38 = vshll.u32 %v14460_v27, 16  ;;  %v7640_v32 = vshrl.u32 %v14498_v36, 16  ;;  %v7643_v4 = vshll.u32 %v14498_v36, 16  ;;  %v6787_v18 = vpop.permute.xlu0 %6786 }
 0x54b   : >> { %v7589_v9 = vrot.slane %v16438_v24, 3  ;;  %v7683_v25 = vor.u32 %v7682_v42, %v7679_v50  ;;  %v7737_v56 = vshrl.u32 %v7049_v6, 16  ;;  %v7740_v1 = vshll.u32 %v7049_v6, 16 }
 0x54c   : >> { %v7592_v10 = vrot.slane %v16439_v38, 4  ;;  %v15102_v60 = vsel %vm1458_vm2, %v7466_v46, %v7473_v62  ;;  %v7526_v63 = vor.u32 %v7525_v39, %v7522_v17  ;;  %v7533_v43 = vor.u32 %v7532_v49, %v7529_v16  ;;  %v16441_v46 = vld [vmem:[#allocation111_spill] sm:$0xff] }
 0x54d   : >> { %v7647_v57 = vshrl.u32 %v14525_v2, 16  ;;  %v7650_v5 = vshll.u32 %v14525_v2, 16  ;;  %v7676_v45 = vor.u32 %v7675_v47, %v7672_v14  ;;  %v7730_v35 = vshrl.u32 %v7047_v40, 16  ;;  %v16442_v17 = vld [vmem:[#allocation91_spill] sm:$0xff] }
 0x54e   : >> { %v7733_v27 = vshll.u32 %v7047_v40, 16  ;;  %v7700_v31 = vshrl.u32 %v14486_v29, 16  ;;  %v7586_v37 = vor.u32 %v7585_v21, %v7582_v22  ;;  %v7593_v36 = vor.u32 %v7592_v10, %v7589_v9  ;;  %10475 = vmatmul.mubr.msk.bf16.vlgmr.msra.gmra.mxu1 %vm334_vm0, %v16440_v11  ;;  %v6789_v9 = vpop.permute.xlu1 %6788 }
 0x54f   : >> { %v7642_v61 = vrot.slane %v7640_v32, 3  ;;  %v7645_v52 = vrot.slane %v7643_v4, 4  ;;  %v7827_v44 = vshrl.u32 %v14574_v7, 16  ;;  %v7739_v58 = vrot.slane %v7737_v56, 3  ;;  %10478 = vmatprep.mubr.msk.bf16.mxu1 %vm334_vm0, %v16442_v17 }
 0x550   : >> { %v7742_v48 = vrot.slane %v7740_v1, 4  ;;  %v7684_v2 = vsel %vm1458_vm2, %v7676_v45, %v7683_v25  ;;  %v7830_v12 = vshll.u32 %v14574_v7, 16  ;;  %v7054_v62 = vsel %vm334_vm0, %v16441_v46, %v6785_v33  ;;  %v15130_v25 = vpop.permute.xlu0 %6790  ;;  %v16446_v33 = vld [vmem:[#allocation132_spill] sm:$0xff] }
 0x551   : >> { %8665 = vmatmul.mubr.bf16.gmra.mxu0 %v7684_v2  ;;  %v7649_v50 = vrot.slane %v7647_v57, 3  ;;  %v7652_v42 = vrot.slane %v7650_v5, 4  ;;  %v7732_v55 = vrot.slane %v7730_v35, 3  ;;  %v7735_v39 = vrot.slane %v7733_v27, 4  ;;  %v16445_v35 = vld [vmem:[#allocation93_spill] sm:$0xff] }
 0x552   : >> { %8672 = vmatprep.mubr.bf16.mxu0 %v15004_v8  ;;  %v15118_v51 = vsel %vm1458_vm2, %v7526_v63, %v7533_v43  ;;  %v7702_v20 = vrot.slane %v7700_v31, 3  ;;  %v7052_v6 = vsel %vm334_vm0, %v16441_v46, %v6783_v3  ;;  %v15123_v16 = vsel %vm1458_vm2, %v7586_v37, %v7593_v36  ;;  %v6793_v2 = vpop.permute.xlu1 %6792 }
 0x553   : >> { %v7646_v49 = vor.u32 %v7645_v52, %v7642_v61  ;;  %v7703_v22 = vshll.u32 %v14486_v29, 16  ;;  %v7743_v14 = vor.u32 %v7742_v48, %v7739_v58  ;;  %v7797_v47 = vshrl.u32 %v7054_v62, 16 }
 0x554   : >> { %v7800_v21 = vshll.u32 %v7054_v62, 16  ;;  %v7760_v24 = vshrl.u32 %v14533_v15, 16  ;;  %v7653_v8 = vor.u32 %v7652_v42, %v7649_v50  ;;  %v7763_v40 = vshll.u32 %v14533_v15, 16 }
 0x555   : >> { %v7767_v38 = vshrl.u32 %v14569_v13, 16  ;;  %v7770_v10 = vshll.u32 %v14569_v13, 16  ;;  %v7736_v3 = vor.u32 %v7735_v39, %v7732_v55  ;;  %v7790_v32 = vshrl.u32 %v7052_v6, 16  ;;  %v6811_v55 = vpop.permute.xlu0 %6810 }
 0x556   : >> { %v7793_v4 = vshll.u32 %v7052_v6, 16  ;;  %v16443_v29 = vshrl.u32 %v14513_v53, 16  ;;  %v7947_v1 = vshrl.u32 %v14628_v28, 16  ;;  %v7705_v63 = vrot.slane %v7703_v22, 4  ;;  %10479 = vmatmul.mubr.msk.bf16.gmra.mxu1 %vm334_vm0, %v16445_v35 }
 0x557   : >> { %v16444_v43 = vshll.u32 %v14513_v53, 16  ;;  %v7820_v15 = vshrl.u32 %v14536_v59, 16  ;;  %v7799_v5 = vrot.slane %v7797_v47, 3  ;;  %v7802_v45 = vrot.slane %v7800_v21, 4  ;;  %10482 = vmatprep.mubr.msk.bf16.mxu1 %vm334_vm0, %v15082_v23 }
 0x558   : >> { %v7709_v56 = vrot.slane %v16443_v29, 3  ;;  %v7744_v13 = vsel %vm1458_vm2, %v7736_v3, %v7743_v14  ;;  %v7762_v27 = vrot.slane %v7760_v24, 3  ;;  %v7059_v31 = vsel %vm334_vm0, %v16446_v33, %v6789_v9  ;;  %v16447_v24 = vld [vmem:[#allocation94_spill] sm:$0xff]  ;;  %v6313_v3 = vld [vmem:[#allocation3 + $0x220] sm:$0xff] }
 0x559   : >> { %v7712_v57 = vrot.slane %v16444_v43, 4  ;;  %8673 = vmatmul.mubr.bf16.gmra.mxu0 %v7744_v13  ;;  %v7765_v37 = vrot.slane %v7763_v40, 4  ;;  %v7769_v53 = vrot.slane %v7767_v38, 3  ;;  %v7772_v36 = vrot.slane %v7770_v10, 4  ;;  %v16448_v40 = vld [vmem:[#allocation87_spill] sm:$0xff]  ;;  %v6795_v10 = vpop.permute.xlu1 %6794  ;;  %v16449_v43 = vld [vmem:[#allocation92_spill] sm:$0xff] }
 0x55a   : >> { %v7950_v61 = vshll.u32 %v14628_v28, 16  ;;  %v7792_v52 = vrot.slane %v7790_v32, 3  ;;  %v7795_v58 = vrot.slane %v7793_v4, 4  ;;  %8680 = vmatprep.mubr.bf16.mxu0 %v15024_v41  ;;  %v7823_v48 = vshll.u32 %v14536_v59, 16 }
 0x55b   : >> { %v7057_v11 = vsel %vm334_vm0, %v16446_v33, %v6787_v18  ;;  %v15151_v46 = vsel %vm1458_vm2, %v7646_v49, %v7653_v8  ;;  %v7706_v23 = vor.u32 %v7705_v63, %v7702_v20  ;;  %v7713_v62 = vor.u32 %v7712_v57, %v7709_v56 }
 0x55c   : >> { %v7803_v17 = vor.u32 %v7802_v45, %v7799_v5  ;;  %v7857_v50 = vshrl.u32 %v7059_v31, 16  ;;  %v7860_v42 = vshll.u32 %v7059_v31, 16  ;;  %v15153_v39 = vrot.slane %v7820_v15, 3  ;;  %v10705_v31 = vld [vmem:[#allocation3 + $0x230] sm:$0xff] }
 0x55d   : >> { %v7766_v6 = vor.u32 %v7765_v37, %v7762_v27  ;;  %v7773_v22 = vor.u32 %v7772_v36, %v7769_v53  ;;  %v15157_v59 = vrot.slane %v7827_v44, 3  ;;  %v15159_v41 = vrot.slane %v7830_v12, 4  ;;  %v10704_v27 = vld [vmem:[#allocation3 + $0x228] sm:$0xff] }
 0x55e   : >> { %v7796_v18 = vor.u32 %v7795_v58, %v7792_v52  ;;  %v7850_v14 = vshrl.u32 %v7057_v11, 16  ;;  %v7853_v49 = vshll.u32 %v7057_v11, 16  ;;  %v15161_v47 = vrot.slane %v7823_v48, 4  ;;  %10483 = vmatmul.mubr.msk.bf16.gmra.mxu1 %vm334_vm0, %v15102_v60 }
 0x55f   : >> { %v8009_v20 = vshrl.u32 %v14633_v34, 16  ;;  %v8012_v21 = vshll.u32 %v14633_v34, 16  ;;  %v7077_v9 = vsel %vm334_vm0, %v16447_v24, %v6811_v55  ;;  %v15168_v8 = vsel %vm1458_vm2, %v7706_v23, %v7713_v62  ;;  %10486 = vmatprep.mubr.msk.bf16.mxu1 %vm334_vm0, %v15118_v51  ;;  %v6797_v62 = vpop.permute.xlu0 %6796  ;;  %v16450_v24 = vld [vmem:[#allocation99_spill] sm:$0xff] }
 0x560   : >> { %v7859_v7 = vrot.slane %v7857_v50, 3  ;;  %v7862_v44 = vrot.slane %v7860_v42, 4  ;;  %v7064_v12 = vsel %vm334_vm0, %v16448_v40, %v6793_v2  ;;  %v7804_v38 = vsel %vm1458_vm2, %v7796_v18, %v7803_v17  ;;  %v6813_v17 = vpop.permute.xlu1 %6812 }
 0x561   : >> { %8681 = vmatmul.mubr.bf16.gmra.mxu0 %v7804_v38  ;;  %v15178_v32 = vsel %vm1458_vm2, %v7766_v6, %v7773_v22  ;;  %v7833_v4 = vor.u32 %v15159_v41, %v15157_v59  ;;  %v7880_v29 = vshrl.u32 %v14582_v19, 16  ;;  %v7883_v56 = vshll.u32 %v14582_v19, 16 }
 0x562   : >> { %v7852_v63 = vrot.slane %v7850_v14, 3  ;;  %v7855_v60 = vrot.slane %v7853_v49, 4  ;;  %v7079_v57 = vsel %vm334_vm0, %v16449_v43, %v6811_v55  ;;  %8688 = vmatprep.mubr.bf16.mxu0 %v15048_v30  ;;  %v7826_v51 = vor.u32 %v15161_v47, %v15153_v39  ;;  %v16453_v39 = vld [vmem:[#allocation110_spill] sm:$0xff] }
 0x563   : >> { %v7062_v15 = vsel %vm334_vm0, %v16448_v40, %v15130_v25  ;;  %v7985_v5 = vshrl.u32 %v7077_v9, 16  ;;  %v7917_v45 = vshrl.u32 %v7064_v12, 16  ;;  %v7887_v35 = vshrl.u32 %v14618_v26, 16 }
 0x564   : >> { %v7863_v13 = vor.u32 %v7862_v44, %v7859_v7  ;;  %v7920_v19 = vshll.u32 %v7064_v12, 16  ;;  %v6385_v33 = vpack.c.bf16 %v10704_v27, %v6313_v3  ;;  %v6386_v37 = vpack.c.bf16 %v10705_v31, %v10705_v31 }
 0x565   : >> { %v7988_v53 = vshll.u32 %v7077_v9, 16  ;;  %v7992_v36 = vshrl.u32 %v7079_v57, 16  ;;  %v7995_v30 = vshll.u32 %v7079_v57, 16  ;;  %v7890_v52 = vshll.u32 %v14618_v26, 16 }
 0x566   : >> { %v7856_v58 = vor.u32 %v7855_v60, %v7852_v63  ;;  %v7910_v48 = vshrl.u32 %v7062_v15, 16  ;;  %v7913_v11 = vshll.u32 %v7062_v15, 16  ;;  %v7940_v25 = vshrl.u32 %v14592_v54, 16  ;;  %10487 = vmatmul.mubr.msk.bf16.gmra.mxu1 %vm334_vm0, %v15123_v16 }
 0x567   : >> { %v7987_v2 = vrot.slane %v7985_v5, 3  ;;  %v7919_v23 = vrot.slane %v7917_v45, 3  ;;  %v15195_v50 = vrot.slane %v7880_v29, 3  ;;  %v15197_v42 = vrot.slane %v7883_v56, 4  ;;  %10490 = vmatprep.mubr.msk.bf16.mxu1 %vm334_vm0, %v15151_v46  ;;  %v6316_v56 = vld [vmem:[#allocation3 + $0x238] sm:$0xff] }
 0x568   : >> { %v7922_v55 = vrot.slane %v7920_v19, 4  ;;  %v7082_v6 = vsel %vm334_vm0, %v6385_v33, %v6813_v17  ;;  %v7084_v22 = vsel %vm334_vm0, %v6386_v37, %v6813_v17  ;;  %v7864_v26 = vsel %vm1458_vm2, %v7856_v58, %v7863_v13  ;;  %v6801_v19 = vpop.permute.xlu1 %6800  ;;  %v6799_v58 = vpop.permute.xlu0 %6798 }
 0x569   : >> { %v7990_v18 = vrot.slane %v7988_v53, 4  ;;  %v7994_v14 = vrot.slane %v7992_v36, 3  ;;  %v7997_v49 = vrot.slane %v7995_v30, 4  ;;  %v7067_v9 = vsel %vm334_vm0, %v16450_v24, %v6795_v10  ;;  %8689 = vmatmul.mubr.bf16.gmra.mxu0 %v7864_v26 }
 0x56a   : >> { %v7912_v7 = vrot.slane %v7910_v48, 3  ;;  %v7915_v44 = vrot.slane %v7913_v11, 4  ;;  %v7069_v40 = vsel %vm334_vm0, %v16450_v24, %v6797_v62  ;;  %8696 = vmatprep.mubr.bf16.mxu0 %v15073_v0  ;;  %v7943_v16 = vshll.u32 %v14592_v54, 16 }
 0x56b   : >> { %v8047_v12 = vshrl.u32 %v7082_v6, 16  ;;  %v8050_v38 = vshll.u32 %v7082_v6, 16  ;;  %v8054_v3 = vshrl.u32 %v7084_v22, 16  ;;  %v8057_v29 = vshll.u32 %v7084_v22, 16 }
 0x56c   : >> { %v7923_v63 = vor.u32 %v7922_v55, %v7919_v23  ;;  %v7970_v10 = vshrl.u32 %v7067_v9, 16  ;;  %v7973_v60 = vshll.u32 %v7067_v9, 16  ;;  %v15214_v46 = vrot.slane %v7947_v1, 3 }
 0x56d   : >> { %v7991_v43 = vor.u32 %v7990_v18, %v7987_v2  ;;  %v7998_v57 = vor.u32 %v7997_v49, %v7994_v14  ;;  %v7889_v15 = vrot.slane %v7887_v35, 3  ;;  %v7892_v5 = vrot.slane %v7890_v52, 4  ;;  %v16451_v52 = vld [vmem:[#allocation98_spill] sm:$0xff]  ;;  %v16452_v2 = vld [vmem:[#allocation97_spill] sm:$0xff] }
 0x56e   : >> { %v7916_v45 = vor.u32 %v7915_v44, %v7912_v7  ;;  %v7977_v0 = vshrl.u32 %v7069_v40, 16  ;;  %v7980_v13 = vshll.u32 %v7069_v40, 16  ;;  %v6388_v27 = vpack.c.bf16 %v6316_v56, %v6316_v56  ;;  %10491 = vmatmul.mubr.msk.bf16.gmra.mxu1 %vm334_vm0, %v15168_v8 }
 0x56f   : >> { %v8049_v33 = vrot.slane %v8047_v12, 3  ;;  %v8052_v31 = vrot.slane %v8050_v38, 4  ;;  %v8056_v37 = vrot.slane %v8054_v3, 3  ;;  %v8059_v53 = vrot.slane %v8057_v29, 4  ;;  %10494 = vmatprep.mubr.msk.bf16.mxu1 %vm334_vm0, %v15178_v32 }
 0x570   : >> { %v7972_v36 = vrot.slane %v7970_v10, 3  ;;  %v7975_v30 = vrot.slane %v7973_v60, 4  ;;  %v7924_v1 = vsel %vm1458_vm2, %v7916_v45, %v7923_v63  ;;  %v7834_v35 = vsel %vm1458_vm2, %v7826_v51, %v7833_v4 }
 0x571   : >> { %v7074_v48 = vsel %vm334_vm0, %v16451_v52, %v6801_v19  ;;  %8697 = vmatmul.mubr.bf16.gmra.mxu0 %v7924_v1  ;;  %v7999_v11 = vsel %vm1458_vm2, %v7991_v43, %v7998_v57  ;;  %v7886_v8 = vor.u32 %v15197_v42, %v15195_v50  ;;  %v8001_v23 = vshrl.u32 %v16452_v2, 16 }
 0x572   : >> { %v7979_v59 = vrot.slane %v7977_v0, 3  ;;  %v7982_v41 = vrot.slane %v7980_v13, 4  ;;  %8704 = vmatprep.mubr.bf16.mxu0 %v7999_v11  ;;  %v6816_v47 = vrot.slane %v16453_v39, 5  ;;  %v6817_v4 = vrot.slane %v6388_v27, 5 }
 0x573   : >> { %v7072_v51 = vsel %vm334_vm0, %v16451_v52, %v6799_v58  ;;  %v7893_v62 = vor.u32 %v7892_v5, %v7889_v15  ;;  %v8053_v17 = vor.u32 %v8052_v31, %v8049_v33  ;;  %v8060_v32 = vor.u32 %v8059_v53, %v8056_v37 }
 0x574   : >> { %v7976_v55 = vor.u32 %v7975_v30, %v7972_v36  ;;  %v8039_v6 = vshrl.u32 %v7074_v48, 16  ;;  %v8042_v22 = vshll.u32 %v7074_v48, 16  ;;  %v8004_v26 = vshll.u32 %v16452_v2, 16 }
 0x575   : >> { %v7942_v50 = vrot.slane %v7940_v25, 3  ;;  %v7945_v42 = vrot.slane %v7943_v16, 4  ;;  %v7952_v18 = vrot.slane %v7950_v61, 4  ;;  %v8011_v14 = vrot.slane %v8009_v20, 3 }
 0x576   : >> { %v7983_v49 = vor.u32 %v7982_v41, %v7979_v59  ;;  %v8032_v24 = vshrl.u32 %v7072_v51, 16  ;;  %v8035_v9 = vshll.u32 %v7072_v51, 16  ;;  %v6818_v7 = vsel %vm953_vm1, %v6816_v47, %v6817_v4  ;;  %10495 = vmatmul.mubr.msk.bf16.gmra.mxu1 %vm334_vm0, %v7834_v35  ;;  %v15268_v41 = vld [vmem:[%s6243_s14] ss:$0 sm:$0xff] }
 0x577   : >> { %v7894_v44 = vsel %vm1458_vm2, %v7886_v8, %v7893_v62  ;;  %v8061_v40 = vsel %vm1458_vm2, %v8053_v17, %v8060_v32  ;;  %v8003_v12 = vrot.slane %v8001_v23, 3  ;;  %v8014_v54 = vrot.slane %v8012_v21, 4 }
 0x578   : >> { %v8041_v25 = vrot.slane %v8039_v6, 3  ;;  %v8044_v16 = vrot.slane %v8042_v22, 4  ;;  %v7984_v28 = vsel %vm1458_vm2, %v7976_v55, %v7983_v49  ;;  %v8006_v61 = vrot.slane %v8004_v26, 4  ;;  %10498 = vmatprep.mubr.msk.bf16.mxu1 %vm334_vm0, %v7894_v44 }
 0x579   : >> { %8705 = vmatmul.mubr.bf16.gmra.mxu0 %v7984_v28  ;;  %v8063_v20 = vshrl.u32 %v6816_v47, 16  ;;  %v8066_v38 = vshll.u32 %v6816_v47, 16  ;;  %v8071_v3 = vshrl.u32 %v6818_v7, 16  ;;  %v8074_v29 = vshll.u32 %v6818_v7, 16 }
 0x57a   : >> { %v8034_v56 = vrot.slane %v8032_v24, 3  ;;  %v8037_v63 = vrot.slane %v8035_v9, 4  ;;  %8712 = vmatprep.mubr.bf16.mxu0 %v8061_v40  ;;  %v7946_v10 = vor.u32 %v7945_v42, %v7942_v50  ;;  %v7953_v34 = vor.u32 %v7952_v18, %v15214_v46 }
 0x57b   : >> { %v8045_v21 = vor.u32 %v8044_v16, %v8041_v25  ;;  %v8007_v60 = vor.u32 %v8006_v61, %v8003_v12  ;;  %v8015_v43 = vor.u32 %v8014_v54, %v8011_v14  ;;  %v8065_v57 = vrot.slane %v8063_v20, 3 }
 0x57c   : >> { %v8068_v15 = vrot.slane %v8066_v38, 4  ;;  %v8073_v5 = vrot.slane %v8071_v3, 3  ;;  %v8076_v45 = vrot.slane %v8074_v29, 4  ;;  %v8038_v0 = vor.u32 %v8037_v63, %v8034_v56 }
 0x57d   : >> { %v7954_v13 = vsel %vm1458_vm2, %v7946_v10, %v7953_v34  ;;  %v8016_v19 = vsel %vm1458_vm2, %v8007_v60, %v8015_v43 }
 0x57e   : >> { %10499 = vmatmul.mubr.msk.bf16.gmra.mxu1 %vm334_vm0, %v7954_v13  ;;  %v8046_v27 = vsel %vm1458_vm2, %v8038_v0, %v8045_v21  ;;  %v8069_v46 = vor.u32 %v8068_v15, %v8065_v57  ;;  %v8077_v33 = vor.u32 %v8076_v45, %v8073_v5 }
 0x57f   : >> { %10502 = vmatprep.mubr.msk.bf16.mxu1 %vm334_vm0, %v8016_v19 }
 0x580   : >> { %v8078_v31 = vsel %vm1458_vm2, %v8069_v46, %v8077_v33 }
 0x581   : >> { %8713 = vmatmul.mubr.bf16.gmra.mxu0 %v8046_v27 }
 0x586   : >> { %10503 = vmatmul.mubr.msk.bf16.gmra.mxu1 %vm334_vm0, %v8078_v31  ;;  %v10138_v37 = vpop.f32.mrf.mxu1 }
 0x588   : >> { %v10139_v53 = vpop.f32.mrf.mxu1 }
 0x589   : >> { %v10140_v36 = vadd.f32 %v10139_v53, %v10138_v37 }
 0x58a   : >> { %v10141_v30 = vpop.f32.mrf.mxu1 }
 0x58b   : >> { %v8434_v62 = vadd.f32 %v10140_v36, %v15268_v41 }
 0x58c   : >> { %v10142_v58 = vpop.f32.mrf.mxu1 }
 0x58d   : >> { %v10143_v1 = vadd.f32 %v10142_v58, %v10141_v30 }
 0x58f   : >> { %v8437_v42 = vadd.f32 %v10143_v1, %v15268_v41 }
 0x590   : >> { %v10144_v35 = vpop.f32.mrf.mxu1 }
 0x592   : >> { %v10145_v52 = vpop.f32.mrf.mxu1 }
 0x593   : >> { %v15260_v48 = vadd.f32 %v10145_v52, %v10144_v35 }
 0x594   : >> { %v10147_v11 = vpop.f32.mrf.mxu1 }
 0x596   : >> { %v10148_v8 = vpop.f32.mrf.mxu1 }
 0x597   : >> { %v15262_v2 = vadd.f32 %v10148_v8, %v10147_v11 }
 0x598   : >> { %v10150_v23 = vpop.f32.mrf.mxu1 }
 0x59a   : >> { %v10151_v59 = vpop.f32.mrf.mxu1 }
 0x59b   : >> { %v10250_v39 = vpop.f32.mrf.mxu0  ;;  %v15270_v47 = vadd.f32 %v10151_v59, %v10150_v23 }
 0x59c   : >> { %v10153_v4 = vpop.f32.mrf.mxu1 }
 0x59d   : >> { %v10251_v51 = vpop.f32.mrf.mxu0 }
 0x59e   : >> { %v10252_v17 = vadd.f32 %v10251_v51, %v10250_v39  ;;  %v10154_v32 = vpop.f32.mrf.mxu1 }
 0x59f   : >> { %v10253_v55 = vpop.f32.mrf.mxu0  ;;  %v15273_v6 = vadd.f32 %v10154_v32, %v10153_v4 }
 0x5a0   : >> { %v15275_v22 = vadd.f32 %v10252_v17, %v8434_v62 }
 0x5a1   : >> { %v10254_v26 = vpop.f32.mrf.mxu0  ;;  %v10156_v50 = vpop.f32.mrf.mxu1 }
 0x5a2   : >> { %v10255_v18 = vadd.f32 %v10254_v26, %v10253_v55 }
 0x5a3   : >> { %v10157_v14 = vpop.f32.mrf.mxu1 }
 0x5a4   : >> { %v15278_v49 = vadd.f32 %v10157_v14, %v10156_v50  ;;  %v15280_v24 = vadd.f32 %v10255_v18, %v8437_v42 }
 0x5a5   : >> { %v10159_v9 = vpop.f32.mrf.mxu1 }
 0x5a7   : >> { %v10160_v7 = vpop.f32.mrf.mxu1 }
 0x5a8   : >> { %v15282_v44 = vadd.f32 %v10160_v7, %v10159_v9 }
 0x5a9   : >> { %v10162_v40 = vpop.f32.mrf.mxu1 }
 0x5ab   : >> { %v10163_v12 = vpop.f32.mrf.mxu1 }
 0x5ac   : >> { %v15284_v54 = vadd.f32 %v10163_v12, %v10162_v40 }
 0x5ad   : >> { %v10165_v25 = vpop.f32.mrf.mxu1 }
 0x5ae   : >> { %v15288_v20 = vpop.f32.mrf.mxu0 }
 0x5af   : >> { %v10166_v16 = vpop.f32.mrf.mxu1 }
 0x5b0   : >> { %v15286_v28 = vadd.f32 %v10166_v16, %v10165_v25  ;;  %v15292_v56 = vpop.f32.mrf.mxu0 }
 0x5b2   : >> { %v10168_v61 = vpop.f32.mrf.mxu1  ;;  %v15296_v21 = vpop.f32.mrf.mxu0 }
 0x5b4   : >> { %v10169_v38 = vpop.f32.mrf.mxu1  ;;  %v15300_v15 = vpop.f32.mrf.mxu0 }
 0x5b5   : >> { %v15290_v3 = vadd.f32 %v10169_v38, %v10168_v61 }
 0x5b6   : >> { %v10171_v29 = vpop.f32.mrf.mxu1 }
 0x5b8   : >> { %v10172_v63 = vpop.f32.mrf.mxu1 }
 0x5b9   : >> { %v15294_v10 = vadd.f32 %v10172_v63, %v10171_v29 }
 0x5ba   : >> { %v10174_v34 = vpop.f32.mrf.mxu1 }
 0x5bc   : >> { %v10175_v60 = vpop.f32.mrf.mxu1  ;;  %v15304_v0 = vpop.f32.mrf.mxu0 }
 0x5bd   : >> { %v15298_v43 = vadd.f32 %v10175_v60, %v10174_v34 }
 0x5be   : >> { %v10177_v57 = vpop.f32.mrf.mxu1  ;;  %v15306_v19 = vpop.f32.mrf.mxu0 }
 0x5c0   : >> { %v10178_v5 = vpop.f32.mrf.mxu1  ;;  %v15310_v31 = vpop.f32.mrf.mxu0 }
 0x5c1   : >> { %v15302_v45 = vadd.f32 %v10178_v5, %v10177_v57 }
 0x5c2   : >> { %v15314_v30 = vpop.f32.mrf.mxu0 }
 0x5c5   : >> { %v10180_v13 = vpop.f32.mrf.mxu1 }
 0x5c7   : >> { %v10181_v27 = vpop.f32.mrf.mxu1 }
 0x5c8   : >> { %v15308_v46 = vadd.f32 %v10181_v27, %v10180_v13 }
 0x5c9   : >> { %v10183_v33 = vpop.f32.mrf.mxu1 }
 0x5cb   : >> { %v10184_v37 = vpop.f32.mrf.mxu1  ;;  %v15316_v1 = vpop.f32.mrf.mxu0 }
 0x5cc   : >> { %v15312_v53 = vadd.f32 %v10184_v37, %v10183_v33 }
 0x5cd   : >> { %v10186_v36 = vpop.f32.mrf.mxu1  ;;  %v15320_v8 = vpop.f32.mrf.mxu0 }
 0x5cf   : >> { %v10187_v58 = vpop.f32.mrf.mxu1  ;;  %v15324_v4 = vpop.f32.mrf.mxu0 }
 0x5d0   : >> { %v15318_v35 = vadd.f32 %v10187_v58, %v10186_v36 }
 0x5d1   : >> { %v10189_v52 = vpop.f32.mrf.mxu1  ;;  %v15328_v32 = vpop.f32.mrf.mxu0 }
 0x5d3   : >> { %v10190_v11 = vpop.f32.mrf.mxu1 }
 0x5d4   : >> { %v15322_v23 = vadd.f32 %v10190_v11, %v10189_v52 }
 0x5d5   : >> { %v10192_v59 = vpop.f32.mrf.mxu1 }
 0x5d6   : >> { %16454 = vst [vmem:[#allocation100_spill] sm:$0xff] %v15322_v23 }
 0x5d7   : >> { %v10193_v39 = vpop.f32.mrf.mxu1 }
 0x5d8   : >> { %v15326_v51 = vadd.f32 %v10193_v39, %v10192_v59 }
 0x5d9   : >> { %v10195_v62 = vpop.f32.mrf.mxu1 }
 0x5db   : >> { %v10196_v17 = vpop.f32.mrf.mxu1 }
 0x5dc   : >> { %v15330_v55 = vadd.f32 %v10196_v17, %v10195_v62 }
 0x5dd   : >> { %v10198_v26 = vpop.f32.mrf.mxu1 }
 0x5df   : >> { %v15332_v50 = vpop.f32.mrf.mxu0  ;;  %v10199_v42 = vpop.f32.mrf.mxu1 }
 0x5e0   : >> { %v15334_v18 = vadd.f32 %v10199_v42, %v10198_v26 }
 0x5e1   : >> { %v15336_v14 = vpop.f32.mrf.mxu0  ;;  %v10201_v9 = vpop.f32.mrf.mxu1 }
 0x5e2   : >> { %16455 = vst [vmem:[#allocation85_spill] sm:$0xff] %v15334_v18 }
 0x5e3   : >> { %v15338_v7 = vpop.f32.mrf.mxu0  ;;  %v10202_v40 = vpop.f32.mrf.mxu1 }
 0x5e4   : >> { %v15340_v12 = vadd.f32 %v10202_v40, %v10201_v9 }
 0x5e5   : >> { %v15342_v25 = vpop.f32.mrf.mxu0 }
 0x5e6   : >> { %16456 = vst [vmem:[#allocation108_spill] sm:$0xff] %v15340_v12  ;;  %v10204_v16 = vpop.f32.mrf.mxu1 }
 0x5e7   : >> { %v15344_v61 = vpop.f32.mrf.mxu0 }
 0x5e8   : >> { %v10205_v38 = vpop.f32.mrf.mxu1 }
 0x5e9   : >> { %v15346_v29 = vpop.f32.mrf.mxu0  ;;  %v15348_v63 = vadd.f32 %v10205_v38, %v10204_v16 }
 0x5ea   : >> { %v10207_v34 = vpop.f32.mrf.mxu1 }
 0x5eb   : >> { %16457 = vst [vmem:[#allocation133_spill] sm:$0xff] %v15348_v63  ;;  %v15350_v60 = vpop.f32.mrf.mxu0 }
 0x5ec   : >> { %v10208_v57 = vpop.f32.mrf.mxu1 }
 0x5ed   : >> { %v15352_v5 = vadd.f32 %v10208_v57, %v10207_v34  ;;  %v15354_v27 = vpop.f32.mrf.mxu0 }
 0x5ee   : >> { %v10210_v13 = vpop.f32.mrf.mxu1 }
 0x5ef   : >> { %16458 = vst [vmem:[#allocation103_spill] sm:$0xff] %v15352_v5  ;;  %v6137_v5 = vld [vmem:[#allocation2 + $0x28] sm:$0xff] }
 0x5f0   : >> { %v10211_v33 = vpop.f32.mrf.mxu1 }
 0x5f1   : >> { %v15356_v37 = vadd.f32 %v10211_v33, %v10210_v13 }
 0x5f2   : >> { %v10213_v36 = vpop.f32.mrf.mxu1  ;;  %v15358_v58 = vpop.f32.mrf.mxu0 }
 0x5f3   : >> { %16459 = vst [vmem:[#allocation104_spill] sm:$0xff] %v15356_v37 }
 0x5f4   : >> { %v10214_v52 = vpop.f32.mrf.mxu1  ;;  %v15360_v11 = vpop.f32.mrf.mxu0 }
 0x5f5   : >> { %v15362_v59 = vadd.f32 %v10214_v52, %v10213_v36 }
 0x5f6   : >> { %v10216_v39 = vpop.f32.mrf.mxu1  ;;  %v15364_v62 = vpop.f32.mrf.mxu0 }
 0x5f7   : >> { %16460 = vst [vmem:[#allocation76_spill] sm:$0xff] %v15362_v59 }
 0x5f8   : >> { %v10217_v17 = vpop.f32.mrf.mxu1  ;;  %v15368_v9 = vpop.f32.mrf.mxu0 }
 0x5f9   : >> { %v15366_v26 = vadd.f32 %v10217_v17, %v10216_v39 }
 0x5fa   : >> { %v10219_v42 = vpop.f32.mrf.mxu1 }
 0x5fb   : >> { %16461 = vst [vmem:[#allocation105_spill] sm:$0xff] %v15366_v26 }
 0x5fc   : >> { %v10220_v40 = vpop.f32.mrf.mxu1 }
 0x5fd   : >> { %v15370_v16 = vadd.f32 %v10220_v40, %v10219_v42 }
 0x5fe   : >> { %v10222_v38 = vpop.f32.mrf.mxu1  ;;  %v15372_v34 = vpop.f32.mrf.mxu0 }
 0x5ff   : >> { %16462 = vst [vmem:[#allocation116_spill] sm:$0xff] %v15370_v16  ;;  %v10258_v16 = vadd.f32 %v15292_v56, %v15288_v20  ;;  %v8445_v20 = vadd.f32 %v15262_v2, %v15268_v41  ;;  %v10264_v2 = vadd.f32 %v15306_v19, %v15304_v0 }
 0x600   : >> { %v10223_v57 = vpop.f32.mrf.mxu1  ;;  %v15374_v13 = vpop.f32.mrf.mxu0 }
 0x601   : >> { %v15376_v33 = vadd.f32 %v10223_v57, %v10222_v38  ;;  %v8442_v57 = vadd.f32 %v15260_v48, %v15268_v41  ;;  %v10270_v48 = vadd.f32 %v15320_v8, %v15316_v1  ;;  %v8450_v8 = vadd.f32 %v15270_v47, %v15268_v41 }
 0x602   : >> { %v10225_v36 = vpop.f32.mrf.mxu1  ;;  %v15378_v52 = vpop.f32.mrf.mxu0 }
 0x603   : >> { %16463 = vst [vmem:[#allocation96_spill] sm:$0xff] %v15376_v33  ;;  %v8603_v33 = vadd.f32 %v10258_v16, %v8442_v57  ;;  %v8458_v16 = vadd.f32 %v15278_v49, %v15268_v41  ;;  %v8611_v47 = vadd.f32 %v10264_v2, %v8450_v8 }
 0x604   : >> { %v10226_v59 = vpop.f32.mrf.mxu1  ;;  %v15382_v17 = vpop.f32.mrf.mxu0 }
 0x605   : >> { %v15380_v39 = vadd.f32 %v10226_v59, %v10225_v36 }
 0x606   : >> { %v15384_v37 = vpop.f32.mrf.mxu1 }
 0x607   : >> { %16464 = vst [vmem:[#allocation128_spill] sm:$0xff] %v15380_v39  ;;  %16465 = vst [vmem:[#allocation123_spill] sm:$0xff] %v15384_v37  ;;  %v10261_v39 = vadd.f32 %v15300_v15, %v15296_v21 }
 0x608   : >> { %v15386_v42 = vpop.f32.mrf.mxu0  ;;  %v15388_v40 = vpop.f32.mrf.mxu1 }
 0x609   : >> { %16466 = vst [vmem:[#allocation106_spill] sm:$0xff] %v15388_v40  ;;  %v6139_v40 = vld [vmem:[#allocation2 + $0x48] sm:$0xff]  ;;  %v8606_v21 = vadd.f32 %v10261_v39, %v8445_v20  ;;  %v8619_v39 = vadd.f32 %v10270_v48, %v8458_v16 }
 0x60a   : >> { %v15392_v26 = vpop.f32.mrf.mxu0  ;;  %v15394_v38 = vpop.f32.mrf.mxu1 }
 0x60b   : >> { %16467 = vst [vmem:[#allocation79_spill] sm:$0xff] %v15394_v38 }
 0x60c   : >> { %v15398_v59 = vpop.f32.mrf.mxu0  ;;  %v15400_v36 = vpop.f32.mrf.mxu1 }
 0x60d   : >> { %16468 = vst [vmem:[#allocation77_spill] sm:$0xff] %v15400_v36 }
 0x60e   : >> { %v15404_v37 = vpop.f32.mrf.mxu0  ;;  %v10476_v12 = vpop.f32.mrf.mxu1 }
 0x60f   : >> { %16469 = vst [vmem:[#allocation78_spill] sm:$0xff] %v15404_v37  ;;  %v8764_v56 = vadd.f32 %v10476_v12, %v8603_v33  ;;  %v6140_v12 = vld [vmem:[#allocation2 + $0x50] sm:$0xff] }
 0x610   : >> { %v8755_v18 = vpop.f32.mrf.mxu1 }
 0x611   : >> { %v15408_v38 = vpop.f32.mrf.mxu0  ;;  %v8884_v36 = vadd.f32 %v8764_v56, %v6139_v40  ;;  %v8756_v63 = vadd.f32 %v8755_v18, %v15275_v22  ;;  %v6138_v22 = vld [vmem:[#allocation2 + $0x30] sm:$0xff]  ;;  %v10273_v40 = vadd.f32 %v15328_v32, %v15324_v4  ;;  %v10267_v56 = vadd.f32 %v15314_v30, %v15310_v31 }
 0x612   : >> { %v10477_v33 = vpop.f32.mrf.mxu1 }
 0x613   : >> { %v15413_v15 = vpop.f32.mrf.mxu0  ;;  %v8916_v57 = vmax.f32 %v8884_v36, 0.0  ;;  %v8882_v23 = vadd.f32 %v8756_v63, %v6137_v5  ;;  %v8767_v37 = vadd.f32 %v10477_v33, %v8606_v21  ;;  %v8461_v63 = vadd.f32 %v15282_v44, %v15268_v41  ;;  %v6143_v5 = vld [vmem:[#allocation2 + $0x88] sm:$0xff] }
 0x614   : >> { %v8758_v18 = vpop.f32.mrf.mxu1  ;;  %v6141_v44 = vld [vmem:[#allocation2 + $0x68] sm:$0xff]  ;;  %v8474_v33 = vadd.f32 %v15290_v3, %v15268_v41  ;;  %v10285_v3 = vadd.f32 %v15354_v27, %v15350_v60 }
 0x615   : >> { %v15419_v1 = vpop.f32.mrf.mxu0  ;;  %8948 = vst.msk [vmem:[#allocation2 + $0x48] sm:$0xff] %vm334_vm0, %v8916_v57  ;;  %v8914_v49 = vmax.f32 %v8882_v23, 0.0  ;;  %v8885_v0 = vadd.f32 %v8767_v37, %v6140_v12  ;;  %v8759_v19 = vadd.f32 %v8758_v18, %v15280_v24  ;;  %v8453_v24 = vadd.f32 %v15273_v6, %v15268_v41  ;;  %v6144_v6 = vld [vmem:[#allocation2 + $0x90] sm:$0xff] }
 0x616   : >> { %v10480_v20 = vpop.f32.mrf.mxu1  ;;  %v10282_v37 = vadd.f32 %v15346_v29, %v15344_v61  ;;  %v8622_v30 = vadd.f32 %v10273_v40, %v8461_v63  ;;  %v10276_v57 = vadd.f32 %v15336_v14, %v15332_v50  ;;  %v8466_v40 = vadd.f32 %v15284_v54, %v15268_v41 }
 0x617   : >> { %v15427_v36 = vpop.f32.mrf.mxu0  ;;  %8946 = vst.msk [vmem:[#allocation2 + $0x28] sm:$0xff] %vm334_vm0, %v8914_v49  ;;  %v8917_v4 = vmax.f32 %v8885_v0, 0.0  ;;  %v8883_v32 = vadd.f32 %v8759_v19, %v6138_v22  ;;  %v8780_v48 = vadd.f32 %v10480_v20, %v8619_v39  ;;  %v8614_v18 = vadd.f32 %v10267_v56, %v8453_v24  ;;  %v6142_v49 = vld [vmem:[#allocation2 + $0x70] sm:$0xff] }
 0x618   : >> { %v8771_v21 = vpop.f32.mrf.mxu1  ;;  %v8635_v19 = vadd.f32 %v10282_v37, %v8474_v33  ;;  %v8477_v20 = vadd.f32 %v15294_v10, %v15268_v41  ;;  %v10279_v54 = vadd.f32 %v15342_v25, %v15338_v7  ;;  %v8469_v24 = vadd.f32 %v15286_v28, %v15268_v41  ;;  %v6145_v10 = vld [vmem:[#allocation2 + $0xa8] sm:$0xff]  ;;  %v6148_v28 = vld [vmem:[#allocation2 + $0xd0] sm:$0xff] }
 0x619   : >> { %v15434_v23 = vpop.f32.mrf.mxu0  ;;  %8949 = vst.msk [vmem:[#allocation2 + $0x50] sm:$0xff] %vm334_vm0, %v8917_v4  ;;  %v8915_v16 = vmax.f32 %v8883_v32, 0.0  ;;  %v8888_v2 = vadd.f32 %v8780_v48, %v6143_v5  ;;  %v8772_v31 = vadd.f32 %v8771_v21, %v8611_v47  ;;  %v6147_v47 = vld [vmem:[#allocation2 + $0xc8] sm:$0xff]  ;;  %v8627_v4 = vadd.f32 %v10276_v57, %v8466_v40 }
 0x61a   : >> { %v10481_v8 = vpop.f32.mrf.mxu1  ;;  %v10294_v37 = vadd.f32 %v15374_v13, %v15372_v34  ;;  %v8638_v25 = vadd.f32 %v10285_v3, %v8477_v20  ;;  %v8485_v20 = vadd.f32 %v15302_v45, %v15268_v41  ;;  %v6152_v45 = vld [vmem:[#allocation2 + $0x110] sm:$0xff] }
 0x61b   : >> { %v15441_v12 = vpop.f32.mrf.mxu0  ;;  %8947 = vst.msk [vmem:[#allocation2 + $0x30] sm:$0xff] %vm334_vm0, %v8915_v16  ;;  %v8920_v61 = vmax.f32 %v8888_v2, 0.0  ;;  %v8886_v29 = vadd.f32 %v8772_v31, %v6141_v44  ;;  %v8783_v22 = vadd.f32 %v10481_v8, %v8622_v30  ;;  %v8490_v31 = vadd.f32 %v15308_v46, %v15268_v41 }
 0x61c   : >> { %v8774_v0 = vpop.f32.mrf.mxu1  ;;  %v10288_v30 = vadd.f32 %v15360_v11, %v15358_v58  ;;  %v10297_v46 = vadd.f32 %v15382_v17, %v15378_v52 }
 0x61d   : >> { %v15448_v39 = vpop.f32.mrf.mxu0  ;;  %8952 = vst.msk [vmem:[#allocation2 + $0x88] sm:$0xff] %vm334_vm0, %v8920_v61  ;;  %v8918_v50 = vmax.f32 %v8886_v29, 0.0  ;;  %v8889_v14 = vadd.f32 %v8783_v22, %v6144_v6  ;;  %v8775_v63 = vadd.f32 %v8774_v0, %v8614_v18  ;;  %v8630_v6 = vadd.f32 %v10279_v54, %v8469_v24  ;;  %v6146_v29 = vld [vmem:[#allocation2 + $0xb0] sm:$0xff] }
 0x61e   : >> { %v10484_v56 = vpop.f32.mrf.mxu1  ;;  %v8482_v61 = vadd.f32 %v15298_v43, %v15268_v41  ;;  %v8651_v18 = vadd.f32 %v10294_v37, %v8490_v31  ;;  %v8493_v0 = vadd.f32 %v15312_v53, %v15268_v41  ;;  %v10291_v43 = vadd.f32 %v15368_v9, %v15364_v62  ;;  %v6149_v53 = vld [vmem:[#allocation2 + $0xe8] sm:$0xff] }
 0x61f   : >> { %v15455_v5 = vpop.f32.mrf.mxu0  ;;  %8950 = vst.msk [vmem:[#allocation2 + $0x68] sm:$0xff] %vm334_vm0, %v8918_v50  ;;  %v8921_v32 = vmax.f32 %v8889_v14, 0.0  ;;  %v8887_v60 = vadd.f32 %v8775_v63, %v6142_v49  ;;  %v8796_v27 = vadd.f32 %v10484_v56, %v8635_v19  ;;  %v6151_v19 = vld [vmem:[#allocation2 + $0x108] sm:$0xff] }
 0x620   : >> { %v8787_v44 = vpop.f32.mrf.mxu1  ;;  %v8643_v50 = vadd.f32 %v10288_v30, %v8482_v61  ;;  %v8654_v9 = vadd.f32 %v10297_v46, %v8493_v0  ;;  %v6153_v46 = vld [vmem:[#allocation2 + $0x128] sm:$0xff] }
 0x621   : >> { %v15462_v48 = vpop.f32.mrf.mxu0  ;;  %8953 = vst.msk [vmem:[#allocation2 + $0x90] sm:$0xff] %vm334_vm0, %v8921_v32  ;;  %v8919_v21 = vmax.f32 %v8887_v60, 0.0  ;;  %v8892_v16 = vadd.f32 %v8796_v27, %v6147_v47  ;;  %v8788_v7 = vadd.f32 %v8787_v44, %v8627_v4  ;;  %v10306_v47 = vadd.f32 %v15413_v15, %v15408_v38 }
 0x622   : >> { %v10485_v33 = vpop.f32.mrf.mxu1  ;;  %v8506_v60 = vadd.f32 %v15326_v51, %v15268_v41  ;;  %v10300_v27 = vadd.f32 %v15392_v26, %v15386_v42  ;;  %v10309_v51 = vadd.f32 %v15427_v36, %v15419_v1 }
 0x623   : >> { %v15469_v2 = vpop.f32.mrf.mxu0  ;;  %8951 = vst.msk [vmem:[#allocation2 + $0x70] sm:$0xff] %vm334_vm0, %v8919_v21  ;;  %v8924_v34 = vmax.f32 %v8892_v16, 0.0  ;;  %v8890_v13 = vadd.f32 %v8788_v7, %v6145_v10  ;;  %v8799_v57 = vadd.f32 %v10485_v33, %v8638_v25  ;;  %v8646_v10 = vadd.f32 %v10291_v43, %v8485_v20  ;;  %v6150_v16 = vld [vmem:[#allocation2 + $0xf0] sm:$0xff]  ;;  %v6155_v33 = vld [vmem:[#allocation2 + $0x148] sm:$0xff] }
 0x624   : >> { %v8790_v22 = vpop.f32.mrf.mxu1  ;;  %v8498_v21 = vadd.f32 %v15318_v35, %v15268_v41  ;;  %v8667_v25 = vadd.f32 %v10306_v47, %v8506_v60  ;;  %v16470_v35 = vld [vmem:[#allocation78_spill] sm:$0xff]  ;;  %v6156_v43 = vld [vmem:[#allocation2 + $0x150] sm:$0xff]  ;;  %v16473_v47 = vld [vmem:[#allocation85_spill] sm:$0xff] }
 0x625   : >> { %v15476_v8 = vpop.f32.mrf.mxu0  ;;  %8956 = vst.msk [vmem:[#allocation2 + $0xc8] sm:$0xff] %vm334_vm0, %v8924_v34  ;;  %v8922_v58 = vmax.f32 %v8890_v13, 0.0  ;;  %v8893_v11 = vadd.f32 %v8799_v57, %v6148_v28  ;;  %v8791_v40 = vadd.f32 %v8790_v22, %v8630_v6  ;;  %v8509_v28 = vadd.f32 %v15330_v55, %v15268_v41 }
 0x626   : >> { %v10488_v3 = vpop.f32.mrf.mxu1  ;;  %v8659_v13 = vadd.f32 %v10300_v27, %v8498_v21  ;;  %v10303_v57 = vadd.f32 %v16470_v35, %v15398_v59  ;;  %v16474_v27 = vld [vmem:[#allocation103_spill] sm:$0xff] }
 0x627   : >> { %v15483_v49 = vpop.f32.mrf.mxu0  ;;  %8954 = vst.msk [vmem:[#allocation2 + $0xa8] sm:$0xff] %vm334_vm0, %v8922_v58  ;;  %v8925_v14 = vmax.f32 %v8893_v11, 0.0  ;;  %v8891_v52 = vadd.f32 %v8791_v40, %v6146_v29  ;;  %v8812_v17 = vadd.f32 %v10488_v3, %v8651_v18  ;;  %v16471_v29 = vld [vmem:[#allocation100_spill] sm:$0xff]  ;;  %v10318_v18 = vadd.f32 %v15469_v2, %v15462_v48  ;;  %v6160_v35 = vld [vmem:[#allocation2 + $0x190] sm:$0xff] }
 0x628   : >> { %v8803_v56 = vpop.f32.mrf.mxu1  ;;  %v8501_v22 = vadd.f32 %v16471_v29, %v15268_v41  ;;  %v8670_v59 = vadd.f32 %v10309_v51, %v8509_v28  ;;  %v6157_v51 = vld [vmem:[#allocation2 + $0x168] sm:$0xff] }
 0x629   : >> { %v15490_v63 = vpop.f32.mrf.mxu0  ;;  %8957 = vst.msk [vmem:[#allocation2 + $0xd0] sm:$0xff] %vm334_vm0, %v8925_v14  ;;  %v8923_v4 = vmax.f32 %v8891_v52, 0.0  ;;  %v8896_v54 = vadd.f32 %v8812_v17, %v6151_v19  ;;  %v8804_v62 = vadd.f32 %v8803_v56, %v8643_v50  ;;  %v16472_v19 = vld [vmem:[#allocation133_spill] sm:$0xff]  ;;  %v10312_v50 = vadd.f32 %v15441_v12, %v15434_v23  ;;  %v6154_v56 = vld [vmem:[#allocation2 + $0x130] sm:$0xff] }
 0x62a   : >> { %v10489_v24 = vpop.f32.mrf.mxu1  ;;  %v8522_v3 = vadd.f32 %v16472_v19, %v15268_v41  ;;  %v8662_v17 = vadd.f32 %v10303_v57, %v8501_v22  ;;  %v16477_v22 = vld [vmem:[#allocation104_spill] sm:$0xff] }
 0x62b   : >> { %v15497_v32 = vpop.f32.mrf.mxu0  ;;  %8955 = vst.msk [vmem:[#allocation2 + $0xb0] sm:$0xff] %vm334_vm0, %v8923_v4  ;;  %v8928_v38 = vmax.f32 %v8896_v54, 0.0  ;;  %v8894_v15 = vadd.f32 %v8804_v62, %v6149_v53  ;;  %v8815_v37 = vadd.f32 %v10489_v24, %v8654_v9  ;;  %v8514_v53 = vadd.f32 %v16473_v47, %v15268_v41  ;;  %v6159_v24 = vld [vmem:[#allocation2 + $0x188] sm:$0xff] }
 0x62c   : >> { %v8806_v7 = vpop.f32.mrf.mxu1  ;;  %v8683_v54 = vadd.f32 %v10318_v18, %v8522_v3  ;;  %v10321_v62 = vadd.f32 %v15483_v49, %v15476_v8  ;;  %v8530_v18 = vadd.f32 %v16477_v22, %v15268_v41  ;;  %v16479_v3 = vld [vmem:[#allocation123_spill] sm:$0xff] }
 0x62d   : >> { %v15504_v44 = vpop.f32.mrf.mxu0  ;;  %8960 = vst.msk [vmem:[#allocation2 + $0x108] sm:$0xff] %vm334_vm0, %v8928_v38  ;;  %v8926_v26 = vmax.f32 %v8894_v15, 0.0  ;;  %v8897_v42 = vadd.f32 %v8815_v37, %v6152_v45  ;;  %v8807_v31 = vadd.f32 %v8806_v7, %v8646_v10  ;;  %v8525_v45 = vadd.f32 %v16474_v27, %v15268_v41 }
 0x62e   : >> { %v10492_v34 = vpop.f32.mrf.mxu1  ;;  %v8675_v15 = vadd.f32 %v10312_v50, %v8514_v53  ;;  %v10315_v37 = vadd.f32 %v15455_v5, %v15448_v39  ;;  %v16476_v39 = vld [vmem:[#allocation105_spill] sm:$0xff]  ;;  %v16480_v50 = vld [vmem:[#allocation106_spill] sm:$0xff] }
 0x62f   : >> { %v15511_v30 = vpop.f32.mrf.mxu0  ;;  %8958 = vst.msk [vmem:[#allocation2 + $0xe8] sm:$0xff] %vm334_vm0, %v8926_v26  ;;  %v8929_v6 = vmax.f32 %v8897_v42, 0.0  ;;  %v8895_v1 = vadd.f32 %v8807_v31, %v6150_v16  ;;  %v8828_v36 = vadd.f32 %v10492_v34, %v8667_v25  ;;  %v16475_v16 = vld [vmem:[#allocation108_spill] sm:$0xff]  ;;  %v8538_v5 = vadd.f32 %v16476_v39, %v15268_v41 }
 0x630   : >> { %v8819_v55 = vpop.f32.mrf.mxu1  ;;  %v8517_v7 = vadd.f32 %v16475_v16, %v15268_v41 }
 0x631   : >> { %v10328_v61 = vpop.f32.mrf.mxu0  ;;  %8961 = vst.msk [vmem:[#allocation2 + $0x110] sm:$0xff] %vm334_vm0, %v8929_v6  ;;  %v8927_v58 = vmax.f32 %v8895_v1, 0.0  ;;  %v8900_v11 = vadd.f32 %v8828_v36, %v6155_v33  ;;  %v8820_v40 = vadd.f32 %v8819_v55, %v8659_v13  ;;  %v8686_v33 = vadd.f32 %v10321_v62, %v8525_v45  ;;  %v16483_v45 = vld [vmem:[#allocation77_spill] sm:$0xff] }
 0x632   : >> { %v10493_v14 = vpop.f32.mrf.mxu1  ;;  %v10324_v13 = vadd.f32 %v15497_v32, %v15490_v63 }
 0x633   : >> { %v10329_v0 = vpop.f32.mrf.mxu0  ;;  %8959 = vst.msk [vmem:[#allocation2 + $0xf0] sm:$0xff] %vm334_vm0, %v8927_v58  ;;  %v8932_v48 = vmax.f32 %v8900_v11, 0.0  ;;  %v8898_v2 = vadd.f32 %v8820_v40, %v6153_v46  ;;  %v8831_v52 = vadd.f32 %v10493_v14, %v8670_v59  ;;  %v6158_v46 = vld [vmem:[#allocation2 + $0x170] sm:$0xff]  ;;  %v6163_v14 = vld [vmem:[#allocation2 + $0x1c8] sm:$0xff] }
 0x634   : >> { %v8822_v4 = vpop.f32.mrf.mxu1  ;;  %v10330_v25 = vadd.f32 %v10329_v0, %v10328_v61  ;;  %v8678_v61 = vadd.f32 %v10315_v37, %v8517_v7  ;;  %v16478_v0 = vld [vmem:[#allocation116_spill] sm:$0xff] }
 0x635   : >> { %v10331_v20 = vpop.f32.mrf.mxu0  ;;  %8964 = vst.msk [vmem:[#allocation2 + $0x148] sm:$0xff] %vm334_vm0, %v8932_v48  ;;  %v8930_v23 = vmax.f32 %v8898_v2, 0.0  ;;  %v8901_v12 = vadd.f32 %v8831_v52, %v6156_v43  ;;  %v8823_v9 = vadd.f32 %v8822_v4, %v8662_v17  ;;  %v8541_v19 = vadd.f32 %v16478_v0, %v15268_v41  ;;  %v6168_v0 = vld [vmem:[#allocation2 + $0x210] sm:$0xff] }
 0x636   : >> { %v10496_v38 = vpop.f32.mrf.mxu1  ;;  %v8699_v58 = vadd.f32 %v10330_v25, %v8538_v5  ;;  %v10230_v43 = vadd.f32 %v16480_v50, %v16479_v3  ;;  %v8691_v2 = vadd.f32 %v10324_v13, %v8530_v18  ;;  %v10327_v52 = vadd.f32 %v15511_v30, %v15504_v44  ;;  %v16482_v30 = vld [vmem:[#allocation79_spill] sm:$0xff]  ;;  %v6167_v13 = vld [vmem:[#allocation2 + $0x208] sm:$0xff] }
 0x637   : >> { %v10332_v60 = vpop.f32.mrf.mxu0  ;;  %8962 = vst.msk [vmem:[#allocation2 + $0x128] sm:$0xff] %vm334_vm0, %v8930_v23  ;;  %v8933_v10 = vmax.f32 %v8901_v12, 0.0  ;;  %v8899_v21 = vadd.f32 %v8823_v9, %v6154_v56  ;;  %v8844_v8 = vadd.f32 %v10496_v38, %v8683_v54  ;;  %v16481_v56 = vld [vmem:[#allocation76_spill] sm:$0xff]  ;;  %v6161_v54 = vld [vmem:[#allocation2 + $0x1a8] sm:$0xff] }
 0x638   : >> { %v8835_v26 = vpop.f32.mrf.mxu1  ;;  %v10333_v11 = vadd.f32 %v10332_v60, %v10331_v20  ;;  %v8533_v4 = vadd.f32 %v16481_v56, %v15268_v41  ;;  %v8554_v44 = vadd.f32 %v10230_v43, %v15268_v41  ;;  %v6165_v18 = vld [vmem:[#allocation2 + $0x1e8] sm:$0xff]  ;;  %v6166_v43 = vld [vmem:[#allocation2 + $0x1f0] sm:$0xff] }
 0x639   : >> { %v10334_v49 = vpop.f32.mrf.mxu0  ;;  %8965 = vst.msk [vmem:[#allocation2 + $0x150] sm:$0xff] %vm334_vm0, %v8933_v10  ;;  %v8931_v42 = vmax.f32 %v8899_v21, 0.0  ;;  %v8904_v31 = vadd.f32 %v8844_v8, %v6159_v24  ;;  %v8836_v28 = vadd.f32 %v8835_v26, %v8675_v15  ;;  %v10233_v24 = vadd.f32 %v16483_v45, %v16482_v30  ;;  %v6164_v15 = vld [vmem:[#allocation2 + $0x1d0] sm:$0xff]  ;;  %v10708_v56 = vld [vmem:[%s15718_s7 + $0x8] sm:$0xff] (%p3354_p4)   ;;  %v9026_v30 = vld [vmem:[#allocation4 + $0x80] sm:$0xff] (%p3354_p4) }
 0x63a   : >> { %v10497_v57 = vpop.f32.mrf.mxu1  ;;  %v8702_v60 = vadd.f32 %v10333_v11, %v8541_v19  ;;  %v8694_v7 = vadd.f32 %v10327_v52, %v8533_v4  ;;  %v8978_v4 = vld [vmem:[#allocation2 + $0x28] sm:$0xff] (%p3354_p4) }
 0x63b   : >> { %v10335_v34 = vpop.f32.mrf.mxu0  ;;  %8963 = vst.msk [vmem:[#allocation2 + $0x130] sm:$0xff] %vm334_vm0, %v8931_v42  ;;  %v8936_v6 = vmax.f32 %v8904_v31, 0.0  ;;  %v8902_v1 = vadd.f32 %v8836_v28, %v6157_v51  ;;  %v8847_v36 = vadd.f32 %v10497_v57, %v8686_v33  ;;  %v16484_v51 = vld [vmem:[#allocation96_spill] sm:$0xff]  ;;  %v6162_v42 = vld [vmem:[#allocation2 + $0x1b0] sm:$0xff]  ;;  %v8557_v5 = vadd.f32 %v10233_v24, %v15268_v41  ;;  %v9027_v45 = vld [vmem:[#allocation4 + $0x88] sm:$0xff] (%p3354_p4) }
 0x63c   : >> { %v8838_v55 = vpop.f32.mrf.mxu1  ;;  %v10336_v38 = vadd.f32 %v10335_v34, %v10334_v49  ;;  %v8546_v26 = vadd.f32 %v16484_v51, %v15268_v41  ;;  %v8980_v24 = vld [vmem:[#allocation2 + $0x48] sm:$0xff] (%p3354_p4) }
 0x63d   : >> { %v10337_v29 = vpop.f32.mrf.mxu0  ;;  %8968 = vst.msk [vmem:[#allocation2 + $0x188] sm:$0xff] %vm334_vm0, %v8936_v6  ;;  %v8934_v40 = vmax.f32 %v8902_v1, 0.0  ;;  %v8905_v63 = vadd.f32 %v8847_v36, %v6160_v35  ;;  %v8839_v32 = vadd.f32 %v8838_v55, %v8678_v61 }
 0x63e   : >> { %v10500_v48 = vpop.f32.mrf.mxu1  ;;  %v8707_v6 = vadd.f32 %v10336_v38, %v8546_v26  ;;  %v9029_v26 = vld [vmem:[#allocation4 + $0x98] sm:$0xff] (%p3354_p4) }
 0x63f   : >> { %v10338_v59 = vpop.f32.mrf.mxu0  ;;  %8966 = vst.msk [vmem:[#allocation2 + $0x168] sm:$0xff] %vm334_vm0, %v8934_v40  ;;  %v8937_v17 = vmax.f32 %v8905_v63, 0.0  ;;  %v8903_v20 = vadd.f32 %v8839_v32, %v6158_v46  ;;  %v8860_v47 = vadd.f32 %v10500_v48, %v8699_v58  ;;  %v16485_v58 = vld [vmem:[#allocation128_spill] sm:$0xff] }
 0x640   : >> { %v8851_v62 = vpop.f32.mrf.mxu1  ;;  %v10339_v1 = vadd.f32 %v10338_v59, %v10337_v29  ;;  %v8549_v11 = vadd.f32 %v16485_v58, %v15268_v41  ;;  %v9017_v58 = vld [vmem:[#allocation4 + $0x38] sm:$0xff] (%p3354_p4) }
 0x641   : >> { %v10340_v53 = vpop.f32.mrf.mxu0  ;;  %8969 = vst.msk [vmem:[#allocation2 + $0x190] sm:$0xff] %vm334_vm0, %v8937_v17  ;;  %v8935_v23 = vmax.f32 %v8903_v20, 0.0  ;;  %v8908_v12 = vadd.f32 %v8860_v47, %v6163_v14  ;;  %v8852_v9 = vadd.f32 %v8851_v62, %v8691_v2  ;;  %v10706_v47 = vld [vmem:[%s15718_s7 + $0x18] sm:$0xff] (%p3354_p4)   ;;  %v9010_v62 = vld [vmem:[#allocation4] sm:$0xff] (%p3354_p4) }
 0x642   : >> { %v10501_v37 = vpop.f32.mrf.mxu1  ;;  %v8710_v50 = vadd.f32 %v10339_v1, %v8549_v11  ;;  %10506 = vmatprep.subr.bf16.mxu0 (%p3354_p4), %v10706_v47  ;;  %10562 = vmatprep.subr.bf16.mxu1 (%p3354_p4), %v10706_v47  ;;  %v9030_v1 = vld [vmem:[#allocation4 + $0xa0] sm:$0xff] (%p3354_p4) }
 0x643   : >> { %v10341_v27 = vpop.f32.mrf.mxu0  ;;  %8967 = vst.msk [vmem:[#allocation2 + $0x170] sm:$0xff] %vm334_vm0, %v8935_v23  ;;  %v8940_v21 = vmax.f32 %v8908_v12, 0.0  ;;  %v8906_v8 = vadd.f32 %v8852_v9, %v6161_v54  ;;  %v8863_v16 = vadd.f32 %v10501_v37, %v8702_v60  ;;  %10507 = vmatpush3.bf16.msra.mxu0 (%p3354_p4), %v10706_v47  ;;  %10566 = vmatpush3.bf16.msra.mxu1 (%p3354_p4), %v10706_v47  ;;  %v8979_v54 = vld [vmem:[#allocation2 + $0x30] sm:$0xff] (%p3354_p4)  ;;  %v9011_v23 = vld [vmem:[#allocation4 + $0x8] sm:$0xff] (%p3354_p4) }
 0x644   : >> { %v10342_v10 = vadd.f32 %v10341_v27, %v10340_v53  ;;  %v8854_v31 = vpop.f32.mrf.mxu1  ;;  %v10707_v53 = vld [vmem:[%s15718_s7 + $0x10] sm:$0xff] (%p3354_p4)   ;;  %v9042_v12 = vadd.f32 (%p3354_p4), %v9010_v62, %v8978_v4  ;;  %v8994_v9 = vld [vmem:[#allocation2 + $0x128] sm:$0xff] (%p3354_p4)  ;;  %v10709_v27 = vld [vmem:[%s15718_s7] sm:$0xff] (%p3354_p4)  }
 0x645   : >> { %v10343_v25 = vpop.f32.mrf.mxu0  ;;  %8972 = vst.msk [vmem:[#allocation2 + $0x1c8] sm:$0xff] %vm334_vm0, %v8940_v21  ;;  %v8938_v33 = vmax.f32 %v8906_v8, 0.0  ;;  %v8909_v49 = vadd.f32 %v8863_v16, %v6164_v15  ;;  %v8855_v34 = vadd.f32 %v8854_v31, %v8694_v7  ;;  %10508 = vmatprep.subr.bf16.mxu0 (%p3354_p4), %v10707_v53  ;;  %10563 = vmatprep.subr.bf16.mxu1 (%p3354_p4), %v10707_v53  ;;  %v8995_v60 = vld [vmem:[#allocation2 + $0x130] sm:$0xff] (%p3354_p4)  ;;  %v9013_v21 = vld [vmem:[#allocation4 + $0x18] sm:$0xff] (%p3354_p4)  ;;  %v8996_v16 = vld [vmem:[#allocation2 + $0x148] sm:$0xff] (%p3354_p4) }
 0x646   : >> { %v8715_v28 = vadd.f32 %v10342_v10, %v8554_v44  ;;  %v10504_v35 = vpop.f32.mrf.mxu1  ;;  %v9043_v44 = vadd.f32 (%p3354_p4), %v9011_v23, %v8979_v54  ;;  %v9058_v38 = vadd.f32 (%p3354_p4), %v9026_v30, %v8994_v9  ;;  %v9059_v15 = vadd.f32 (%p3354_p4), %v9027_v45, %v8995_v60  ;;  %v8981_v37 = vld [vmem:[#allocation2 + $0x50] sm:$0xff] (%p3354_p4)  ;;  %v9000_v11 = vld [vmem:[#allocation2 + $0x188] sm:$0xff] (%p3354_p4)  ;;  %v9021_v60 = vld [vmem:[#allocation4 + $0x58] sm:$0xff] (%p3354_p4) }
 0x647   : >> { %v10344_v39 = vpop.f32.mrf.mxu0  ;;  %8970 = vst.msk [vmem:[#allocation2 + $0x1a8] sm:$0xff] %vm334_vm0, %v8938_v33  ;;  %v8941_v36 = vmax.f32 %v8909_v49, 0.0  ;;  %v8907_v61 = vadd.f32 %v8855_v34, %v6162_v42  ;;  %10509 = vmatpush3.bf16.msra.mxu0 (%p3354_p4), %v10707_v53  ;;  %10567 = vmatpush3.bf16.msra.mxu1 (%p3354_p4), %v10707_v53  ;;  %v9012_v10 = vld [vmem:[#allocation4 + $0x10] sm:$0xff] (%p3354_p4)  ;;  %v8982_v42 = vld [vmem:[#allocation2 + $0x68] sm:$0xff] (%p3354_p4)  ;;  %v9045_v33 = vadd.f32 (%p3354_p4), %v9013_v21, %v8981_v37 }
 0x648   : >> { %v10345_v57 = vadd.f32 %v10344_v39, %v10343_v25  ;;  %v8876_v22 = vadd.f32 %v10504_v35, %v8715_v28  ;;  %v8867_v46 = vpop.f32.mrf.mxu1  ;;  %10510 = vmatprep.subr.bf16.mxu0 (%p3354_p4), %v10708_v56  ;;  %10564 = vmatprep.subr.bf16.mxu1 (%p3354_p4), %v10708_v56  ;;  %v9074_v8 = vpack.c.bf16 (%p3354_p4), %v9043_v44, %v9042_v12  ;;  %v8997_v7 = vld [vmem:[#allocation2 + $0x150] sm:$0xff] (%p3354_p4)  ;;  %v9014_v39 = vld [vmem:[#allocation4 + $0x20] sm:$0xff] (%p3354_p4)  ;;  %v8988_v23 = vld [vmem:[#allocation2 + $0xc8] sm:$0xff] (%p3354_p4) }
 0x649   : >> { %8973 = vst.msk [vmem:[#allocation2 + $0x1d0] sm:$0xff] %vm334_vm0, %v8941_v36  ;;  %v8939_v40 = vmax.f32 %v8907_v61, 0.0  ;;  %v8868_v32 = vadd.f32 %v8867_v46, %v8707_v6  ;;  %v9028_v25 = vld [vmem:[#allocation4 + $0x90] sm:$0xff] (%p3354_p4)  ;;  %v9082_v51 = vpack.c.bf16 (%p3354_p4), %v9059_v15, %v9058_v38  ;;  %v9044_v28 = vadd.f32 (%p3354_p4), %v9012_v10, %v8980_v24  ;;  %v9031_v36 = vld [vmem:[#allocation4 + $0xa8] sm:$0xff] (%p3354_p4)  ;;  %v9037_v38 = vld [vmem:[#allocation4 + $0xd8] sm:$0xff] (%p3354_p4) }
 0x64a   : >> { %v8718_v55 = vadd.f32 %v10345_v57, %v8557_v5  ;;  %v8912_v63 = vadd.f32 %v8876_v22, %v6167_v13  ;;  %v10505_v19 = vpop.f32.mrf.mxu1  ;;  %v8983_v31 = vld [vmem:[#allocation2 + $0x70] sm:$0xff] (%p3354_p4)  ;;  %10514 = vmatprep.mubr.msk.bf16.mxu0 (%p3354_p4), %vm334_vm0, %v9074_v8  ;;  %v9060_v49 = vadd.f32 (%p3354_p4), %v9028_v25, %v8996_v16  ;;  %v9061_v34 = vadd.f32 (%p3354_p4), %v9029_v26, %v8997_v7  ;;  %v9015_v5 = vld [vmem:[#allocation4 + $0x28] sm:$0xff] (%p3354_p4)  ;;  %v9022_v8 = vld [vmem:[#allocation4 + $0x60] sm:$0xff] (%p3354_p4) }
 0x64b   : >> { %8971 = vst.msk [vmem:[#allocation2 + $0x1b0] sm:$0xff] %vm334_vm0, %v8939_v40  ;;  %v8910_v59 = vadd.f32 %v8868_v32, %v6165_v18  ;;  %v8998_v13 = vld [vmem:[#allocation2 + $0x168] sm:$0xff] (%p3354_p4)  ;;  %10511 = vmatpush3.bf16.msra.mxu0 (%p3354_p4), %v10708_v56  ;;  %10568 = vmatpush3.bf16.msra.mxu1 (%p3354_p4), %v10708_v56  ;;  %v9046_v35 = vadd.f32 (%p3354_p4), %v9014_v39, %v8982_v42  ;;  %v8999_v6 = vld [vmem:[#allocation2 + $0x170] sm:$0xff] (%p3354_p4) }
 0x64c   : >> { %v8944_v29 = vmax.f32 %v8912_v63, 0.0  ;;  %v8879_v3 = vadd.f32 %v10505_v19, %v8718_v55  ;;  %v8870_v14 = vpop.f32.mrf.mxu1  ;;  %v9047_v57 = vadd.f32 (%p3354_p4), %v9015_v5, %v8983_v31  ;;  %10512 = vmatprep.subr.bf16.mxu0 (%p3354_p4), %v10709_v27  ;;  %10565 = vmatprep.subr.bf16.mxu1 (%p3354_p4), %v10709_v27  ;;  %v9062_v61 = vadd.f32 (%p3354_p4), %v9030_v1, %v8998_v13  ;;  %v8984_v18 = vld [vmem:[#allocation2 + $0x88] sm:$0xff] (%p3354_p4)  ;;  %v8985_v46 = vld [vmem:[#allocation2 + $0x90] sm:$0xff] (%p3354_p4)  ;;  %v9033_v19 = vld [vmem:[#allocation4 + $0xb8] sm:$0xff] (%p3354_p4) }
 0x64d   : >> { %v8942_v48 = vmax.f32 %v8910_v59, 0.0  ;;  %v8871_v41 = vadd.f32 %v8870_v14, %v8710_v50  ;;  %v9063_v22 = vadd.f32 (%p3354_p4), %v9031_v36, %v8999_v6  ;;  %v9016_v55 = vld [vmem:[#allocation4 + $0x30] sm:$0xff] (%p3354_p4)  ;;  %10530 = vmatprep.mubr.msk.bf16.mxu1 (%p3354_p4), %vm334_vm0, %v9082_v51  ;;  %v9075_v63 = vpack.c.bf16 (%p3354_p4), %v9045_v33, %v9044_v28  ;;  %v9019_v14 = vld [vmem:[#allocation4 + $0x48] sm:$0xff] (%p3354_p4)  ;;  %v9038_v51 = vld [vmem:[#allocation4 + $0xe0] sm:$0xff] (%p3354_p4) }
 0x64e   : >> { %8976 = vst.msk [vmem:[#allocation2 + $0x208] sm:$0xff] %vm334_vm0, %v8944_v29  ;;  %v8913_v2 = vadd.f32 %v8879_v3, %v6168_v0  ;;  %v9001_v40 = vld [vmem:[#allocation2 + $0x190] sm:$0xff] (%p3354_p4)  ;;  %v9083_v32 = vpack.c.bf16 (%p3354_p4), %v9061_v34, %v9060_v49  ;;  %v8986_v29 = vld [vmem:[#allocation2 + $0xa8] sm:$0xff] (%p3354_p4)  ;;  %v9076_v59 = vpack.c.bf16 (%p3354_p4), %v9047_v57, %v9046_v35  ;;  %v9025_v36 = vld [vmem:[#allocation4 + $0x78] sm:$0xff] (%p3354_p4) }
 0x64f   : >> { %8974 = vst.msk [vmem:[#allocation2 + $0x1e8] sm:$0xff] %vm334_vm0, %v8942_v48  ;;  %v8911_v17 = vadd.f32 %v8871_v41, %v6166_v43  ;;  %3356 = sbr.rel (!%p3354_p4) target bundleno = 619 (0x26b), region = 99  ;;  %v9032_v0 = vld [vmem:[#allocation4 + $0xb0] sm:$0xff] (%p3354_p4)  ;;  %10513 = vmatpush3.bf16.msra.mxu0 (%p3354_p4), %v10709_v27  ;;  %10569 = vmatpush3.bf16.msra.mxu1 (%p3354_p4), %v10709_v27  ;;  %v9084_v3 = vpack.c.bf16 (%p3354_p4), %v9063_v22, %v9062_v61  ;;  %v9018_v43 = vld [vmem:[#allocation4 + $0x40] sm:$0xff] (%p3354_p4)  ;;  %v9002_v48 = vld [vmem:[#allocation2 + $0x1a8] sm:$0xff] (%p3354_p4) }
 0x650   : >> { %v8945_v52 = vmax.f32 %v8913_v2, 0.0  ;;  %v8987_v50 = vld [vmem:[#allocation2 + $0xb0] sm:$0xff] (%p3354_p4)  ;;  %v9034_v41 = vld [vmem:[#allocation4 + $0xc0] sm:$0xff] (%p3354_p4)  ;;  %v9064_v47 = vadd.f32 (%p3354_p4), %v9032_v0, %v9000_v11  ;;  %v9065_v53 = vadd.f32 (%p3354_p4), %v9033_v19, %v9001_v40  ;;  %v9050_v56 = vadd.f32 (%p3354_p4), %v9018_v43, %v8986_v29  ;;  %v9004_v27 = vld [vmem:[#allocation2 + $0x1c8] sm:$0xff] (%p3354_p4) }
 0x651   : >> { %v8943_v20 = vmax.f32 %v8911_v17, 0.0  ;;  %v9049_v17 = vadd.f32 (%p3354_p4), %v9017_v58, %v8985_v46  ;;  %v9051_v4 = vadd.f32 (%p3354_p4), %v9019_v14, %v8987_v50  ;;  %v9066_v54 = vadd.f32 (%p3354_p4), %v9034_v41, %v9002_v48  ;;  %v8989_v12 = vld [vmem:[#allocation2 + $0xd0] sm:$0xff] (%p3354_p4)  ;;  %v8990_v15 = vld [vmem:[#allocation2 + $0xe8] sm:$0xff] (%p3354_p4)  ;;  %v9041_v58 = vld [vmem:[#allocation4 + $0xf8] sm:$0xff] (%p3354_p4) }
 0x652   : >> { %8977 = vst.msk [vmem:[#allocation2 + $0x210] sm:$0xff] %vm334_vm0, %v8945_v52  ;;  %v9003_v2 = vld [vmem:[#allocation2 + $0x1b0] sm:$0xff] (%p3354_p4)  ;;  %v9048_v52 = vadd.f32 (%p3354_p4), %v9016_v55, %v8984_v18  ;;  %10515 = vmatmul.mubr.msk.bf16.vlgmr.msra.gmra.mxu0 (%p3354_p4), %vm334_vm0, %v9075_v63  ;;  %10531 = vmatmul.mubr.msk.bf16.vlgmr.msra.gmra.mxu1 (%p3354_p4), %vm334_vm0, %v9083_v32  ;;  %v9085_v24 = vpack.c.bf16 (%p3354_p4), %v9065_v53, %v9064_v47  ;;  %v9023_v16 = vld [vmem:[#allocation4 + $0x68] sm:$0xff] (%p3354_p4)  ;;  %v15610_v29 = vld [vmem:[%s15719_s8] ss:$0 sm:$0xff] (%p3354_p4) }
 0x653   : >> { %8975 = vst.msk [vmem:[#allocation2 + $0x1f0] sm:$0xff] %vm334_vm0, %v8943_v20  ;;  %v9035_v20 = vld [vmem:[#allocation4 + $0xc8] sm:$0xff] (%p3354_p4)  ;;  %10518 = vmatprep.mubr.msk.bf16.mxu0 (%p3354_p4), %vm334_vm0, %v9076_v59  ;;  %10534 = vmatprep.mubr.msk.bf16.mxu1 (%p3354_p4), %vm334_vm0, %v9084_v3  ;;  %v9020_v9 = vld [vmem:[#allocation4 + $0x50] sm:$0xff] (%p3354_p4)  ;;  %v9078_v10 = vpack.c.bf16 (%p3354_p4), %v9051_v4, %v9050_v56  ;;  %v9053_v31 = vadd.f32 (%p3354_p4), %v9021_v60, %v8989_v12 }
 0x654   : > { %v9067_v62 = vadd.f32 %v9035_v20, %v9003_v2  ;;  %v9005_v44 = vld [vmem:[#allocation2 + $0x1d0] sm:$0xff]  ;;  %v9077_v45 = vpack.c.bf16 %v9049_v17, %v9048_v52  ;;  %v9039_v26 = vld [vmem:[#allocation4 + $0xe8] sm:$0xff]  ;;  %v9052_v42 = vadd.f32 %v9020_v9, %v8988_v23  ;;  %v9054_v49 = vadd.f32 %v9022_v8, %v8990_v15 }
 0x655   : > { %v9036_v30 = vld [vmem:[#allocation4 + $0xd0] sm:$0xff]  ;;  %v9069_v33 = vadd.f32 %v9037_v38, %v9005_v44  ;;  %v8992_v13 = vld [vmem:[#allocation2 + $0x108] sm:$0xff] }
 0x656   : > { %v8991_v37 = vld [vmem:[#allocation2 + $0xf0] sm:$0xff]  ;;  %v9086_v21 = vpack.c.bf16 %v9067_v62, %v9066_v54  ;;  %v9006_v7 = vld [vmem:[#allocation2 + $0x1e8] sm:$0xff]  ;;  %v9068_v28 = vadd.f32 %v9036_v30, %v9004_v27  ;;  %v9079_v57 = vpack.c.bf16 %v9053_v31, %v9052_v42 }
 0x657   : > { %v9055_v34 = vadd.f32 %v9023_v16, %v8991_v37  ;;  %v9070_v39 = vadd.f32 %v9038_v51, %v9006_v7  ;;  %v8993_v35 = vld [vmem:[#allocation2 + $0x110] sm:$0xff]  ;;  %v9008_v61 = vld [vmem:[#allocation2 + $0x208] sm:$0xff] }
 0x658   : > { %v9087_v6 = vpack.c.bf16 %v9069_v33, %v9068_v28  ;;  %v9024_v1 = vld [vmem:[#allocation4 + $0x70] sm:$0xff]  ;;  %v9057_v40 = vadd.f32 %v9025_v36, %v8993_v35 }
 0x659   : > { %v9080_v22 = vpack.c.bf16 %v9055_v34, %v9054_v49  ;;  %v9009_v46 = vld [vmem:[#allocation2 + $0x210] sm:$0xff]  ;;  %v9056_v11 = vadd.f32 %v9024_v1, %v8992_v13 }
 0x65a   : > { %v9007_v25 = vld [vmem:[#allocation2 + $0x1f0] sm:$0xff]  ;;  %10519 = vmatmul.mubr.msk.bf16.gmra.mxu0 %vm334_vm0, %v9077_v45  ;;  %10535 = vmatmul.mubr.msk.bf16.gmra.mxu1 %vm334_vm0, %v9085_v24  ;;  %v9073_v32 = vadd.f32 %v9041_v58, %v9009_v46 }
 0x65b   : > { %10522 = vmatprep.mubr.msk.bf16.mxu0 %vm334_vm0, %v9078_v10  ;;  %10538 = vmatprep.mubr.msk.bf16.mxu1 %vm334_vm0, %v9086_v21  ;;  %v9071_v5 = vadd.f32 %v9039_v26, %v9007_v25  ;;  %v9040_v55 = vld [vmem:[#allocation4 + $0xf0] sm:$0xff]  ;;  %v9081_v0 = vpack.c.bf16 %v9057_v40, %v9056_v11 }
 0x65c   : > { %v9072_v63 = vadd.f32 %v9040_v55, %v9008_v61 }
 0x65d   : > { %v9088_v18 = vpack.c.bf16 %v9071_v5, %v9070_v39 }
 0x65e   : > { %v9089_v19 = vpack.c.bf16 %v9073_v32, %v9072_v63 }
 0x662   : > { %10523 = vmatmul.mubr.msk.bf16.gmra.mxu0 %vm334_vm0, %v9079_v57  ;;  %10539 = vmatmul.mubr.msk.bf16.gmra.mxu1 %vm334_vm0, %v9087_v6 }
 0x663   : > { %10526 = vmatprep.mubr.msk.bf16.mxu0 %vm334_vm0, %v9080_v22  ;;  %10542 = vmatprep.mubr.msk.bf16.mxu1 %vm334_vm0, %v9088_v18 }
 0x66a   : > { %10527 = vmatmul.mubr.msk.bf16.gmra.mxu0 %vm334_vm0, %v9081_v0  ;;  %10543 = vmatmul.mubr.msk.bf16.gmra.mxu1 %vm334_vm0, %v9089_v19 }
 0x712   : > { %v10516_v59 = vpop.f32.mrf.mxu0  ;;  %v10532_v3 = vpop.f32.mrf.mxu1 }
 0x713   : > { %v9220_v50 = vadd.f32 %v10516_v59, %v15610_v29  ;;  %v9284_v43 = vadd.f32 %v10532_v3, %v15610_v29 }
 0x714   : > { %v9211_v14 = vpop.f32.mrf.mxu0  ;;  %v9275_v48 = vpop.f32.mrf.mxu1 }
 0x715   : > { %9341 = vst.msk [vmem:[%s11109_s26 + $0x10] sm:$0xff] %vm9338_vm3, %v9220_v50  ;;  %9357 = vst.msk [vmem:[%s11109_s26 + $0x90] sm:$0xff] %vm9338_vm3, %v9284_v43  ;;  %v9212_v2 = vadd.f32 %v15610_v29, %v9211_v14  ;;  %v9276_v41 = vadd.f32 %v15610_v29, %v9275_v48 }
 0x716   : > { %v10517_v52 = vpop.f32.mrf.mxu0  ;;  %v10533_v17 = vpop.f32.mrf.mxu1 }
 0x717   : > { %9339 = vst.msk [vmem:[%s11109_s26] sm:$0xff] %vm9338_vm3, %v9212_v2  ;;  %9355 = vst.msk [vmem:[%s11109_s26 + $0x80] sm:$0xff] %vm9338_vm3, %v9276_v41  ;;  %v9223_v20 = vadd.f32 %v10517_v52, %v15610_v29  ;;  %v9287_v47 = vadd.f32 %v10533_v17, %v15610_v29 }
 0x718   : > { %v9214_v53 = vpop.f32.mrf.mxu0  ;;  %v9278_v56 = vpop.f32.mrf.mxu1 }
 0x719   : > { %9342 = vst.msk [vmem:[%s11109_s26 + $0x18] sm:$0xff] %vm9338_vm3, %v9223_v20  ;;  %9358 = vst.msk [vmem:[%s11109_s26 + $0x98] sm:$0xff] %vm9338_vm3, %v9287_v47  ;;  %v9215_v4 = vadd.f32 %v15610_v29, %v9214_v53  ;;  %v9279_v54 = vadd.f32 %v15610_v29, %v9278_v56 }
 0x71a   : > { %v10520_v62 = vpop.f32.mrf.mxu0  ;;  %v10536_v23 = vpop.f32.mrf.mxu1 }
 0x71b   : > { %9340 = vst.msk [vmem:[%s11109_s26 + $0x8] sm:$0xff] %vm9338_vm3, %v9215_v4  ;;  %9356 = vst.msk [vmem:[%s11109_s26 + $0x88] sm:$0xff] %vm9338_vm3, %v9279_v54  ;;  %v9236_v12 = vadd.f32 %v10520_v62, %v15610_v29  ;;  %v9300_v9 = vadd.f32 %v10536_v23, %v15610_v29 }
 0x71c   : > { %v9227_v60 = vpop.f32.mrf.mxu0  ;;  %v9291_v27 = vpop.f32.mrf.mxu1 }
 0x71d   : > { %9345 = vst.msk [vmem:[%s11109_s26 + $0x30] sm:$0xff] %vm9338_vm3, %v9236_v12  ;;  %9361 = vst.msk [vmem:[%s11109_s26 + $0xb0] sm:$0xff] %vm9338_vm3, %v9300_v9  ;;  %v9228_v44 = vadd.f32 %v15610_v29, %v9227_v60  ;;  %v9292_v30 = vadd.f32 %v15610_v29, %v9291_v27 }
 0x71e   : > { %v10521_v45 = vpop.f32.mrf.mxu0  ;;  %v10537_v24 = vpop.f32.mrf.mxu1 }
 0x71f   : > { %9343 = vst.msk [vmem:[%s11109_s26 + $0x20] sm:$0xff] %vm9338_vm3, %v9228_v44  ;;  %9359 = vst.msk [vmem:[%s11109_s26 + $0xa0] sm:$0xff] %vm9338_vm3, %v9292_v30  ;;  %v9239_v38 = vadd.f32 %v10521_v45, %v15610_v29  ;;  %v9303_v15 = vadd.f32 %v10537_v24, %v15610_v29 }
 0x720   : > { %v9230_v37 = vpop.f32.mrf.mxu0  ;;  %v9294_v10 = vpop.f32.mrf.mxu1 }
 0x721   : > { %9346 = vst.msk [vmem:[%s11109_s26 + $0x38] sm:$0xff] %vm9338_vm3, %v9239_v38  ;;  %9362 = vst.msk [vmem:[%s11109_s26 + $0xb8] sm:$0xff] %vm9338_vm3, %v9303_v15  ;;  %v9231_v21 = vadd.f32 %v15610_v29, %v9230_v37  ;;  %v9295_v8 = vadd.f32 %v15610_v29, %v9294_v10 }
 0x722   : > { %v10524_v16 = vpop.f32.mrf.mxu0  ;;  %v10540_v7 = vpop.f32.mrf.mxu1 }
 0x723   : > { %9344 = vst.msk [vmem:[%s11109_s26 + $0x28] sm:$0xff] %vm9338_vm3, %v9231_v21  ;;  %9360 = vst.msk [vmem:[%s11109_s26 + $0xa8] sm:$0xff] %vm9338_vm3, %v9295_v8  ;;  %v9252_v25 = vadd.f32 %v10524_v16, %v15610_v29  ;;  %v9316_v51 = vadd.f32 %v10540_v7, %v15610_v29 }
 0x724   : > { %v9243_v26 = vpop.f32.mrf.mxu0  ;;  %v9307_v42 = vpop.f32.mrf.mxu1 }
 0x725   : > { %9349 = vst.msk [vmem:[%s11109_s26 + $0x50] sm:$0xff] %vm9338_vm3, %v9252_v25  ;;  %9365 = vst.msk [vmem:[%s11109_s26 + $0xd0] sm:$0xff] %vm9338_vm3, %v9316_v51  ;;  %v9244_v31 = vadd.f32 %v15610_v29, %v9243_v26  ;;  %v9308_v28 = vadd.f32 %v15610_v29, %v9307_v42 }
 0x726   : > { %v10525_v33 = vpop.f32.mrf.mxu0  ;;  %v10541_v49 = vpop.f32.mrf.mxu1 }
 0x727   : > { %9347 = vst.msk [vmem:[%s11109_s26 + $0x40] sm:$0xff] %vm9338_vm3, %v9244_v31  ;;  %9363 = vst.msk [vmem:[%s11109_s26 + $0xc0] sm:$0xff] %vm9338_vm3, %v9308_v28  ;;  %v9255_v34 = vadd.f32 %v10525_v33, %v15610_v29  ;;  %v9319_v39 = vadd.f32 %v10541_v49, %v15610_v29 }
 0x728   : > { %v9246_v5 = vpop.f32.mrf.mxu0  ;;  %v9310_v13 = vpop.f32.mrf.mxu1 }
 0x729   : > { %9350 = vst.msk [vmem:[%s11109_s26 + $0x58] sm:$0xff] %vm9338_vm3, %v9255_v34  ;;  %9366 = vst.msk [vmem:[%s11109_s26 + $0xd8] sm:$0xff] %vm9338_vm3, %v9319_v39  ;;  %v9247_v35 = vadd.f32 %v15610_v29, %v9246_v5  ;;  %v9311_v57 = vadd.f32 %v15610_v29, %v9310_v13 }
 0x72a   : > { %v10528_v6 = vpop.f32.mrf.mxu0  ;;  %v10544_v1 = vpop.f32.mrf.mxu1 }
 0x72b   : > { %9348 = vst.msk [vmem:[%s11109_s26 + $0x48] sm:$0xff] %vm9338_vm3, %v9247_v35  ;;  %9364 = vst.msk [vmem:[%s11109_s26 + $0xc8] sm:$0xff] %vm9338_vm3, %v9311_v57  ;;  %v9268_v36 = vadd.f32 %v10528_v6, %v15610_v29  ;;  %v9332_v61 = vadd.f32 %v10544_v1, %v15610_v29 }
 0x72c   : > { %v9259_v22 = vpop.f32.mrf.mxu0  ;;  %v9323_v18 = vpop.f32.mrf.mxu1 }
 0x72d   : > { %9353 = vst.msk [vmem:[%s11109_s26 + $0x70] sm:$0xff] %vm9338_vm3, %v9268_v36  ;;  %9369 = vst.msk [vmem:[%s11109_s26 + $0xf0] sm:$0xff] %vm9338_vm3, %v9332_v61  ;;  %v9260_v46 = vadd.f32 %v15610_v29, %v9259_v22  ;;  %v9324_v55 = vadd.f32 %v15610_v29, %v9323_v18 }
 0x72e   : > { %v10529_v58 = vpop.f32.mrf.mxu0  ;;  %v10545_v11 = vpop.f32.mrf.mxu1 }
 0x72f   : > { %9351 = vst.msk [vmem:[%s11109_s26 + $0x60] sm:$0xff] %vm9338_vm3, %v9260_v46  ;;  %9367 = vst.msk [vmem:[%s11109_s26 + $0xe0] sm:$0xff] %vm9338_vm3, %v9324_v55  ;;  %v9271_v40 = vadd.f32 %v10529_v58, %v15610_v29  ;;  %v9335_v63 = vadd.f32 %v10545_v11, %v15610_v29 }
 0x730   : > { %v9262_v32 = vpop.f32.mrf.mxu0  ;;  %v9326_v0 = vpop.f32.mrf.mxu1 }
 0x731   : > { %9354 = vst.msk [vmem:[%s11109_s26 + $0x78] sm:$0xff] %vm9338_vm3, %v9271_v40  ;;  %9370 = vst.msk [vmem:[%s11109_s26 + $0xf8] sm:$0xff] %vm9338_vm3, %v9335_v63  ;;  %v9263_v19 = vadd.f32 %v15610_v29, %v9262_v32  ;;  %v9327_v59 = vadd.f32 %v15610_v29, %v9326_v0 }
 0x733   : > { %9352 = vst.msk [vmem:[%s11109_s26 + $0x68] sm:$0xff] %vm9338_vm3, %v9263_v19  ;;  %9368 = vst.msk [vmem:[%s11109_s26 + $0xe8] sm:$0xff] %vm9338_vm3, %v9327_v59 }
 0x734 PF: > { %s19_s30 = sadd.s32 1, %s10720_s30  }
 0x735   : > { %p16_p5 = scmp.ge.s32.totalorder %s19_s30, 4  }
 0x737   :  { %18 = sbr.rel (!%p16_p5) target bundleno = 1 (0x1), region = 110 }

</bundles_post_ra>
